<compile_context>
chip_gen: v6e
topology: v6e:2x2x1
jax: 0.10.0
libtpu: 0.0.40
codegen_flags: <defaults>
</compile_context>

<pallas_src>
import functools

import jax
import jax.numpy as jnp
from jax.experimental import pallas as pl
from jax.experimental.pallas import tpu as pltpu

_EPS = 1e-5
_VMEM_LIMIT = 48 * 1024 * 1024  # stay well inside v7x's 64 MiB per-core VMEM
_POINT_PARAMS = pltpu.CompilerParams(
    dimension_semantics=("parallel", "arbitrary"),
    vmem_limit_bytes=_VMEM_LIMIT,
)


def _bf16(a):
    return a.astype(jnp.bfloat16)


def _pick_tile(n):
    for t in (512, 256, 128, 64, 32, 16, 8):
        if n % t == 0:
            return t
    return n


# ----------------------------- Pallas kernels ------------------------------

def _first_layer_kernel(x_ref, w_ref, b_ref, y_ref, sum_ref, sq_ref):
    # x: (1, TN, 3) f32 raw points; w: (1, 3, Cout) per-batch rotation-folded
    # weight.  K=3 is computed on the VPU (broadcast FMAs), not the MXU.
    n = pl.program_id(1)

    @pl.when(n == 0)
    def _():
        sum_ref[...] = jnp.zeros_like(sum_ref)
        sq_ref[...] = jnp.zeros_like(sq_ref)

    x = x_ref[...][0]                      # (TN, 3) f32
    w = w_ref[...][0]                      # (3, Cout) f32
    acc = jnp.zeros((x.shape[0], w.shape[1]), jnp.float32)
    for j in range(x.shape[1]):            # static unroll, K = 3
        acc = acc + x[:, j:j + 1] * w[j:j + 1, :]
    y = acc + b_ref[...]                   # pre-BN activation, f32

    y_ref[...] = y[None].astype(y_ref.dtype)
    sum_ref[...] += jnp.sum(y, axis=0, keepdims=True)[None]
    sq_ref[...] += jnp.sum(y * y, axis=0, keepdims=True)[None]


def _mid_layer_kernel(x_ref, w_ref, b_ref, scale_ref, shift_ref,
                      y_ref, sum_ref, sq_ref, *, per_batch_w):
    # x: (1, TN, Cin) pre-BN activation of previous layer.
    # Fuses: previous-layer BN (folded scale/shift) + ReLU, bf16 matmul with
    # f32 accumulation, bias, and this layer's BN-statistics accumulation.
    n = pl.program_id(1)

    @pl.when(n == 0)
    def _():
        sum_ref[...] = jnp.zeros_like(sum_ref)
        sq_ref[...] = jnp.zeros_like(sq_ref)

    xp = x_ref[...][0].astype(jnp.float32)                       # (TN, Cin)
    a = jnp.maximum(xp * scale_ref[...] + shift_ref[...], 0.0)   # prev BN+ReLU
    w = w_ref[...][0] if per_batch_w else w_ref[...]             # bf16 weight
    y = jnp.dot(a.astype(jnp.bfloat16), w,
                preferred_element_type=jnp.float32) + b_ref[...]

    y_ref[...] = y[None].astype(y_ref.dtype)
    sum_ref[...] += jnp.sum(y, axis=0, keepdims=True)[None]
    sq_ref[...] += jnp.sum(y * y, axis=0, keepdims=True)[None]


def _pool_layer_kernel(x_ref, w_ref, b_ref, scale_ref, shift_ref,
                       sum_ref, sq_ref, max_ref, min_ref):
    # Same as the mid layer, but instead of writing the (B, N, Cout) output it
    # keeps running per-channel max/min (+ BN stats).  The global max-pool is
    # finished in JAX after the BN fold — the wide activation never hits HBM.
    n = pl.program_id(1)

    @pl.when(n == 0)
    def _():
        sum_ref[...] = jnp.zeros_like(sum_ref)
        sq_ref[...] = jnp.zeros_like(sq_ref)
        max_ref[...] = jnp.full_like(max_ref, -jnp.inf)
        min_ref[...] = jnp.full_like(min_ref, jnp.inf)

    xp = x_ref[...][0].astype(jnp.float32)
    a = jnp.maximum(xp * scale_ref[...] + shift_ref[...], 0.0)
    y = jnp.dot(a.astype(jnp.bfloat16), w_ref[...],
                preferred_element_type=jnp.float32) + b_ref[...]

    sum_ref[...] += jnp.sum(y, axis=0, keepdims=True)[None]
    sq_ref[...] += jnp.sum(y * y, axis=0, keepdims=True)[None]
    max_ref[...] = jnp.maximum(max_ref[...], jnp.max(y, axis=0, keepdims=True)[None])
    min_ref[...] = jnp.minimum(min_ref[...], jnp.min(y, axis=0, keepdims=True)[None])


def _tnet_head_kernel(p_ref, w1_ref, b1_ref, g1_ref, be1_ref,
                      w2_ref, b2_ref, g2_ref, be2_ref,
                      w3_ref, b3_ref, o_ref):
    # fc_bn1 -> fc_bn2 -> fc3 fused in one kernel; (B,512)/(B,256) stay in VMEM.
    def fc_bn_relu(h, w_ref, b_ref, g_ref, be_ref):
        y = jnp.dot(h.astype(jnp.bfloat16), w_ref[...],
                    preferred_element_type=jnp.float32) + b_ref[...]
        mean = jnp.mean(y, axis=0, keepdims=True)        # BN over the batch dim
        var = jnp.mean((y - mean) ** 2, axis=0, keepdims=True)
        yn = (y - mean) * jax.lax.rsqrt(var + _EPS)
        return jnp.maximum(yn * g_ref[...] + be_ref[...], 0.0)

    h = fc_bn_relu(p_ref[...], w1_ref, b1_ref, g1_ref, be1_ref)   # (B, 512)
    h = fc_bn_relu(h, w2_ref, b2_ref, g2_ref, be2_ref)            # (B, 256)
    o_ref[...] = (jnp.dot(h.astype(jnp.bfloat16), w3_ref[...],
                          preferred_element_type=jnp.float32) + b3_ref[...])


# ----------------------------- kernel wrappers ------------------------------

def first_point_layer(x, w_b, bias):
    # x: (B, N, 3) f32, w_b: (B, 3, Cout) f32 -> pre-BN y (B, N, Cout) bf16
    # plus per-batch per-channel sum / sumsq for the BN statistics.
    B, N, cin = x.shape
    cout = w_b.shape[-1]
    tn = _pick_tile(N)
    return pl.pallas_call(
        _first_layer_kernel,
        out_shape=(jax.ShapeDtypeStruct((B, N, cout), jnp.bfloat16),
                   jax.ShapeDtypeStruct((B, 1, cout), jnp.float32),
                   jax.ShapeDtypeStruct((B, 1, cout), jnp.float32)),
        grid=(B, N // tn),
        in_specs=[pl.BlockSpec((1, tn, cin), lambda b, n: (b, n, 0)),
                  pl.BlockSpec((1, cin, cout), lambda b, n: (b, 0, 0)),
                  pl.BlockSpec((1, cout), lambda b, n: (0, 0))],
        out_specs=(pl.BlockSpec((1, tn, cout), lambda b, n: (b, n, 0)),
                   pl.BlockSpec((1, 1, cout), lambda b, n: (b, 0, 0)),
                   pl.BlockSpec((1, 1, cout), lambda b, n: (b, 0, 0))),
        compiler_params=_POINT_PARAMS,
    )(x, w_b, bias.reshape(1, -1))


def mid_point_layer(y_prev, w, bias, scale, shift, *, per_batch_w=False):
    # y_prev: pre-BN activation of previous layer (B, N, Cin) bf16.
    # w: (Cin, Cout) bf16 shared, or (B, Cin, Cout) bf16 (transform-folded).
    B, N, cin = y_prev.shape
    cout = w.shape[-1]
    tn = _pick_tile(N)
    if per_batch_w:
        w_spec = pl.BlockSpec((1, cin, cout), lambda b, n: (b, 0, 0))
    else:
        w_spec = pl.BlockSpec((cin, cout), lambda b, n: (0, 0))
    kernel = functools.partial(_mid_layer_kernel, per_batch_w=per_batch_w)
    return pl.pallas_call(
        kernel,
        out_shape=(jax.ShapeDtypeStruct((B, N, cout), jnp.bfloat16),
                   jax.ShapeDtypeStruct((B, 1, cout), jnp.float32),
                   jax.ShapeDtypeStruct((B, 1, cout), jnp.float32)),
        grid=(B, N // tn),
        in_specs=[pl.BlockSpec((1, tn, cin), lambda b, n: (b, n, 0)),
                  w_spec,
                  pl.BlockSpec((1, cout), lambda b, n: (0, 0)),
                  pl.BlockSpec((1, cin), lambda b, n: (0, 0)),
                  pl.BlockSpec((1, cin), lambda b, n: (0, 0))],
        out_specs=(pl.BlockSpec((1, tn, cout), lambda b, n: (b, n, 0)),
                   pl.BlockSpec((1, 1, cout), lambda b, n: (b, 0, 0)),
                   pl.BlockSpec((1, 1, cout), lambda b, n: (b, 0, 0))),
        compiler_params=_POINT_PARAMS,
    )(y_prev, w, bias.reshape(1, -1), scale, shift)


def pool_point_layer(y_prev, w, bias, scale, shift):
    # Final wide layer fused with the global max-pool: returns per-batch
    # (sum, sumsq, max, min) of the pre-BN output, each (B, 1, Cout).
    B, N, cin = y_prev.shape
    cout = w.shape[-1]
    tn = _pick_tile(N)
    acc_spec = pl.BlockSpec((1, 1, cout), lambda b, n: (b, 0, 0))
    return pl.pallas_call(
        _pool_layer_kernel,
        out_shape=tuple(jax.ShapeDtypeStruct((B, 1, cout), jnp.float32)
                        for _ in range(4)),
        grid=(B, N // tn),
        in_specs=[pl.BlockSpec((1, tn, cin), lambda b, n: (b, n, 0)),
                  pl.BlockSpec((cin, cout), lambda b, n: (0, 0)),
                  pl.BlockSpec((1, cout), lambda b, n: (0, 0)),
                  pl.BlockSpec((1, cin), lambda b, n: (0, 0)),
                  pl.BlockSpec((1, cin), lambda b, n: (0, 0))],
        out_specs=(acc_spec, acc_spec, acc_spec, acc_spec),
        compiler_params=_POINT_PARAMS,
    )(y_prev, w, bias.reshape(1, -1), scale, shift)


def tnet_head(pooled, t):
    # pooled: (B, 1024) f32 -> (B, 4096) f32 (fc_bn1 -> fc_bn2 -> fc3 fused).
    B = pooled.shape[0]
    return pl.pallas_call(
        _tnet_head_kernel,
        out_shape=jax.ShapeDtypeStruct((B, 64 * 64), jnp.float32),
        compiler_params=pltpu.CompilerParams(vmem_limit_bytes=_VMEM_LIMIT),
    )(pooled,
      _bf16(t["fc_bn1"]["w"]), t["fc_bn1"]["b"].reshape(1, -1),
      t["fc_bn1"]["gamma"].reshape(1, -1), t["fc_bn1"]["beta"].reshape(1, -1),
      _bf16(t["fc_bn2"]["w"]), t["fc_bn2"]["b"].reshape(1, -1),
      t["fc_bn2"]["gamma"].reshape(1, -1), t["fc_bn2"]["beta"].reshape(1, -1),
      _bf16(t["fc3"]["w"]), t["fc3"]["b"].reshape(1, -1))


# --------------------------- BatchNorm stat folding -------------------------

def bn_fold(s, q, count, gamma, beta):
    # Training-mode BN (biased variance) from accumulated sum / sumsq,
    # folded into a per-channel scale/shift.  Stats stay in f32.
    s = jnp.sum(s, axis=0)                       # (1, C)
    q = jnp.sum(q, axis=0)                       # (1, C)
    mean = s / count
    var = jnp.maximum(q / count - mean * mean, 0.0)
    scale = gamma.reshape(1, -1) * jax.lax.rsqrt(var + _EPS)
    shift = beta.reshape(1, -1) - mean * scale
    return scale, shift


def finish_maxpool(s, q, ymax, ymin, count, gamma, beta):
    # max_n relu(scale*y+shift) == relu(scale * (max if scale>=0 else min) + shift)
    scale, shift = bn_fold(s, q, count, gamma, beta)
    sel = jnp.where(scale >= 0, ymax[:, 0, :], ymin[:, 0, :])   # (B, C)
    return jnp.maximum(scale * sel + shift, 0.0)


# ------------------------- shot_canonical_rotation --------------------------
# TODO(synk): torch.linalg.eig (3x3 eigendecomposition) has no Pallas
# equivalent; this tiny per-batch step runs in plain JAX (jnp.linalg.eigh).

def shot_canonical_rotation(x_bcn, k=3):
    n = x_bcn.shape[1]  # torch code uses size(1)==3 as "n"

    def per_batch(fb):  # fb: (3, N)
        centroid = jnp.mean(fb, axis=1, keepdims=True)
        centered = fb - centroid
        bad = jnp.isnan(centered) | jnp.isinf(centered)
        centered = jnp.where(bad, 1e-6, centered)
        distances = jnp.sqrt(jnp.sum(centered * centered, axis=0))
        weights = jnp.maximum(1.0 - distances, 0.0)
        ws = jnp.sum(weights)
        ws_safe = jnp.where(ws > 0, ws, 1.0)
        weights = jnp.where(ws > 0, weights / ws_safe,
                            jnp.ones_like(weights) / n)
        cov = (weights * centered) @ centered.T
        cov = cov + jnp.eye(n, dtype=jnp.float32) * 1e-6
        vals, vecs = jnp.linalg.eigh(cov)
        order = jnp.argsort(-vals)
        V = vecs[:, order]
        rot = V[:, :k]
        signs = jnp.sign(jnp.sum(centered[:, :, None] * rot[:, None, :], axis=0))
        flip = jnp.sum(signs >= 0, axis=0) < jnp.sum(signs < 0, axis=0)
        return jnp.where(flip[None, :], -rot, rot)

    return jax.vmap(per_batch)(x_bcn)


# --------------------------------- model ------------------------------------

def tiny_pointnet_forward(params, x_bcn):
    # x_bcn: (B, 3, N) torch layout; returns (B, 256, 1) like nn.MaxPool1d(N).
    B, _, N = x_bcn.shape
    M = B * N

    R = shot_canonical_rotation(x_bcn, 3)               # (B, 3, 3)
    x = jnp.transpose(x_bcn, (0, 2, 1))                 # (B, N, 3)

    # mlp1 with the input rotation folded into per-batch weights (VPU K=3).
    w1b = jnp.einsum("bij,jk->bik", R, params["mlp1"]["w"])       # (B, 3, 64)
    y1, s1, q1 = first_point_layer(x, w1b, params["mlp1"]["b"])
    sc1, sh1 = bn_fold(s1, q1, M, params["mlp1"]["gamma"], params["mlp1"]["beta"])

    # mlp2
    y2, s2, q2 = mid_point_layer(y1, _bf16(params["mlp2"]["w"]),
                                 params["mlp2"]["b"], sc1, sh1)
    sc2, sh2 = bn_fold(s2, q2, M, params["mlp2"]["gamma"], params["mlp2"]["beta"])

    # ----- T-Net on a2 (a2 = relu(sc2*y2+sh2), never materialized) -----
    t = params["tnet"]
    u1, ts1, tq1 = mid_point_layer(y2, _bf16(t["mlp1"]["w"]),
                                   t["mlp1"]["b"], sc2, sh2)
    tsc1, tsh1 = bn_fold(ts1, tq1, M, t["mlp1"]["gamma"], t["mlp1"]["beta"])

    u2, ts2, tq2 = mid_point_layer(u1, _bf16(t["mlp2"]["w"]),
                                   t["mlp2"]["b"], tsc1, tsh1)
    tsc2, tsh2 = bn_fold(ts2, tq2, M, t["mlp2"]["gamma"], t["mlp2"]["beta"])

    # mlp3 (128->1024) fused with the global max-pool: (B,N,1024) never stored.
    ps, pq, pmax, pmin = pool_point_layer(u2, _bf16(t["mlp3"]["w"]),
                                          t["mlp3"]["b"], tsc2, tsh2)
    pooled = finish_maxpool(ps, pq, pmax, pmin, M,
                            t["mlp3"]["gamma"], t["mlp3"]["beta"])   # (B, 1024)

    mat = tnet_head(pooled, t)                                       # (B, 4096)
    featT = mat.reshape(B, 64, 64) + jnp.eye(64, dtype=jnp.float32)[None]

    # mlp3 of the trunk with the 64x64 feature transform folded into weights.
    w3b = _bf16(jnp.einsum("bij,jk->bik", featT, params["mlp3"]["w"]))  # (B,64,64)
    y3, s3, q3 = mid_point_layer(y2, w3b, params["mlp3"]["b"], sc2, sh2,
                                 per_batch_w=True)
    sc3, sh3 = bn_fold(s3, q3, M, params["mlp3"]["gamma"], params["mlp3"]["beta"])

    # mlp4
    y4, s4, q4 = mid_point_layer(y3, _bf16(params["mlp4"]["w"]),
                                 params["mlp4"]["b"], sc3, sh3)
    sc4, sh4 = bn_fold(s4, q4, M, params["mlp4"]["gamma"], params["mlp4"]["beta"])

    # mlp5 (128->256) fused with the global max-pool.
    s5, q5, y5max, y5min = pool_point_layer(y4, _bf16(params["mlp5"]["w"]),
                                            params["mlp5"]["b"], sc4, sh4)
    gf = finish_maxpool(s5, q5, y5max, y5min, M,
                        params["mlp5"]["gamma"], params["mlp5"]["beta"])  # (B, 256)
    return gf[:, :, None]                                                 # (B,256,1)


# ------------------------------ parameter init -------------------------------

def init_linear(key, cin, cout):
    k1, k2 = jax.random.split(key)
    bound = 1.0 / jnp.sqrt(cin).astype(jnp.float32)
    w = jax.random.uniform(k1, (cin, cout), jnp.float32, -bound, bound)
    b = jax.random.uniform(k2, (cout,), jnp.float32, -bound, bound)
    return w, b


def init_mlp(key, cin, cout):
    w, b = init_linear(key, cin, cout)
    return dict(w=w, b=b,
                gamma=jnp.ones((cout,), jnp.float32),
                beta=jnp.zeros((cout,), jnp.float32))


def init_params(key):
    keys = jax.random.split(key, 11)
    p = {
        "mlp1": init_mlp(keys[0], 3, 64),
        "mlp2": init_mlp(keys[1], 64, 64),
        "mlp3": init_mlp(keys[2], 64, 64),
        "mlp4": init_mlp(keys[3], 64, 128),
        "mlp5": init_mlp(keys[4], 128, 256),
    }
    t = {
        "mlp1": init_mlp(keys[5], 64, 64),
        "mlp2": init_mlp(keys[6], 64, 128),
        "mlp3": init_mlp(keys[7], 128, 1024),
        "fc_bn1": init_mlp(keys[8], 1024, 512),
        "fc_bn2": init_mlp(keys[9], 512, 256),
    }
    w, b = init_linear(keys[10], 256, 64 * 64)
    t["fc3"] = dict(w=w, b=b)
    p["tnet"] = t
    return p


# ---------------------------------- main -------------------------------------

if __name__ == "__main__":
    key = jax.random.PRNGKey(0)
    k_x, k_p = jax.random.split(key)
    # batch=2, 3 input channels (xyz), 64 points
    x = jax.random.normal(k_x, (2, 3, 64), jnp.float32)
    params = init_params(k_p)

    fwd = jax.jit(tiny_pointnet_forward)
    out = fwd(params, x)
    jax.block_until_ready(out)

    assert out.shape == (2, 256, 1), out.shape
    assert bool(jnp.all(jnp.isfinite(out)))
    print("KERNEL_OK")
</pallas_src>

<mosaic_0001>
module attributes {stable_mosaic.version = 11 : i64} {
  func.func @_mid_layer_kernel(%arg0: i32, %arg1: i32, %arg2: memref<1x64x64xbf16, #tpu.memory_space<vmem>>, %arg3: memref<64x64xbf16, #tpu.memory_space<vmem>>, %arg4: memref<1x64xf32, #tpu.memory_space<vmem>>, %arg5: memref<1x64xf32, #tpu.memory_space<vmem>>, %arg6: memref<1x64xf32, #tpu.memory_space<vmem>>, %arg7: memref<1x64x64xbf16, #tpu.memory_space<vmem>>, %arg8: memref<1x1x64xf32, #tpu.memory_space<vmem>>, %arg9: memref<1x1x64xf32, #tpu.memory_space<vmem>>) attributes {dimension_semantics = [#tpu.dimension_semantics<parallel>, #tpu.dimension_semantics<arbitrary>], iteration_bounds = array<i64: 2, 1>, scalar_prefetch = 0 : i64, scratch_operands = 0 : i64, tpu.core_type = #tpu.core_type<tc>, window_params = [{transform_indices = @transform_0, window_bounds = array<i64: 1, 64, 64>}, {pipeline_mode = #tpu.pipeline_mode<synchronous>, transform_indices = @transform_1, window_bounds = array<i64: 64, 64>}, {pipeline_mode = #tpu.pipeline_mode<synchronous>, transform_indices = @transform_2, window_bounds = array<i64: 1, 64>}, {pipeline_mode = #tpu.pipeline_mode<synchronous>, transform_indices = @transform_3, window_bounds = array<i64: 1, 64>}, {pipeline_mode = #tpu.pipeline_mode<synchronous>, transform_indices = @transform_4, window_bounds = array<i64: 1, 64>}, {transform_indices = @transform_5, window_bounds = array<i64: 1, 64, 64>}, {transform_indices = @transform_6, window_bounds = array<i64: 1, 1, 64>}, {transform_indices = @transform_7, window_bounds = array<i64: 1, 1, 64>}]} {
    %c0_i32 = arith.constant 0 : i32
    %0 = arith.cmpi eq, %arg1, %c0_i32 : i32
    %1 = arith.extui %0 : i1 to i32
    %c0_i32_0 = arith.constant 0 : i32
    %2 = arith.cmpi ne, %1, %c0_i32_0 : i32
    scf.if %2 {
      %cst_29 = arith.constant 0.000000e+00 : f32
      %36 = vector.broadcast %cst_29 : f32 to vector<1x1x64xf32>
      %c0_30 = arith.constant 0 : index
      %c0_31 = arith.constant 0 : index
      %c0_32 = arith.constant 0 : index
      %37 = vector.load %arg8[%c0_30, %c0_31, %c0_32] : memref<1x1x64xf32, #tpu.memory_space<vmem>>, vector<1x1x64xf32>
      tpu.vector_store %arg8[%c0_30, %c0_31, %c0_32], %36 {strides = array<i32>} : memref<1x1x64xf32, #tpu.memory_space<vmem>>, vector<1x1x64xf32>,
      %cst_33 = arith.constant 0.000000e+00 : f32
      %38 = vector.broadcast %cst_33 : f32 to vector<1x1x64xf32>
      %c0_34 = arith.constant 0 : index
      %c0_35 = arith.constant 0 : index
      %c0_36 = arith.constant 0 : index
      %39 = vector.load %arg9[%c0_34, %c0_35, %c0_36] : memref<1x1x64xf32, #tpu.memory_space<vmem>>, vector<1x1x64xf32>
      tpu.vector_store %arg9[%c0_34, %c0_35, %c0_36], %38 {strides = array<i32>} : memref<1x1x64xf32, #tpu.memory_space<vmem>>, vector<1x1x64xf32>,
    } else {
    }
    %c0 = arith.constant 0 : index
    %c0_1 = arith.constant 0 : index
    %c0_2 = arith.constant 0 : index
    %3 = vector.load %arg2[%c0, %c0_1, %c0_2] : memref<1x64x64xbf16, #tpu.memory_space<vmem>>, vector<1x64x64xbf16>
    %4 = vector.shape_cast %3 : vector<1x64x64xbf16> to vector<64x64xbf16>
    %5 = arith.extf %4 : vector<64x64xbf16> to vector<64x64xf32>
    %c0_3 = arith.constant 0 : index
    %c0_4 = arith.constant 0 : index
    %6 = vector.load %arg5[%c0_3, %c0_4] : memref<1x64xf32, #tpu.memory_space<vmem>>, vector<1x64xf32>
    %7 = vector.broadcast %6 : vector<1x64xf32> to vector<64x64xf32>
    %8 = arith.mulf %5, %7 : vector<64x64xf32>
    %c0_5 = arith.constant 0 : index
    %c0_6 = arith.constant 0 : index
    %9 = vector.load %arg6[%c0_5, %c0_6] : memref<1x64xf32, #tpu.memory_space<vmem>>, vector<1x64xf32>
    %10 = vector.broadcast %9 : vector<1x64xf32> to vector<64x64xf32>
    %11 = arith.addf %8, %10 : vector<64x64xf32>
    %cst = arith.constant 0.000000e+00 : f32
    %12 = vector.broadcast %cst : f32 to vector<64x64xf32>
    %13 = arith.maximumf %11, %12 : vector<64x64xf32>
    %c0_7 = arith.constant 0 : index
    %c0_8 = arith.constant 0 : index
    %14 = vector.load %arg3[%c0_7, %c0_8] : memref<64x64xbf16, #tpu.memory_space<vmem>>, vector<64x64xbf16>
    %15 = arith.truncf %13 : vector<64x64xf32> to vector<64x64xbf16>
    %cst_9 = arith.constant dense<0.000000e+00> : vector<64x64xf32>
    %16 = tpu.matmul %15, %14, %cst_9 {dimension_numbers = #tpu.dot_dimension_numbers<[1], [0], [0], [1], [0, 0, 1, 1], [], []>} : vector<64x64xbf16>, vector<64x64xbf16>, vector<64x64xf32> -> vector<64x64xf32>
    %c0_10 = arith.constant 0 : index
    %c0_11 = arith.constant 0 : index
    %17 = vector.load %arg4[%c0_10, %c0_11] : memref<1x64xf32, #tpu.memory_space<vmem>>, vector<1x64xf32>
    %18 = vector.broadcast %17 : vector<1x64xf32> to vector<64x64xf32>
    %19 = arith.addf %16, %18 : vector<64x64xf32>
    %20 = vector.shape_cast %19 : vector<64x64xf32> to vector<1x64x64xf32>
    %21 = arith.truncf %20 : vector<1x64x64xf32> to vector<1x64x64xbf16>
    %c0_12 = arith.constant 0 : index
    %c0_13 = arith.constant 0 : index
    %c0_14 = arith.constant 0 : index
    %22 = vector.load %arg7[%c0_12, %c0_13, %c0_14] : memref<1x64x64xbf16, #tpu.memory_space<vmem>>, vector<1x64x64xbf16>
    tpu.vector_store %arg7[%c0_12, %c0_13, %c0_14], %21 {strides = array<i32>} : memref<1x64x64xbf16, #tpu.memory_space<vmem>>, vector<1x64x64xbf16>,
    %c0_15 = arith.constant 0 : index
    %c0_16 = arith.constant 0 : index
    %c0_17 = arith.constant 0 : index
    %23 = vector.load %arg8[%c0_15, %c0_16, %c0_17] : memref<1x1x64xf32, #tpu.memory_space<vmem>>, vector<1x1x64xf32>
    %cst_18 = arith.constant dense<0.000000e+00> : vector<64xf32>
    %24 = vector.multi_reduction <add>, %19, %cst_18 [0] : vector<64x64xf32> to vector<64xf32>
    %25 = vector.shape_cast %24 : vector<64xf32> to vector<1x64xf32>
    %26 = vector.shape_cast %25 : vector<1x64xf32> to vector<1x1x64xf32>
    %27 = arith.addf %23, %26 : vector<1x1x64xf32>
    %c0_19 = arith.constant 0 : index
    %c0_20 = arith.constant 0 : index
    %c0_21 = arith.constant 0 : index
    %28 = vector.load %arg8[%c0_19, %c0_20, %c0_21] : memref<1x1x64xf32, #tpu.memory_space<vmem>>, vector<1x1x64xf32>
    tpu.vector_store %arg8[%c0_19, %c0_20, %c0_21], %27 {strides = array<i32>} : memref<1x1x64xf32, #tpu.memory_space<vmem>>, vector<1x1x64xf32>,
    %c0_22 = arith.constant 0 : index
    %c0_23 = arith.constant 0 : index
    %c0_24 = arith.constant 0 : index
    %29 = vector.load %arg9[%c0_22, %c0_23, %c0_24] : memref<1x1x64xf32, #tpu.memory_space<vmem>>, vector<1x1x64xf32>
    %30 = arith.mulf %19, %19 : vector<64x64xf32>
    %cst_25 = arith.constant dense<0.000000e+00> : vector<64xf32>
    %31 = vector.multi_reduction <add>, %30, %cst_25 [0] : vector<64x64xf32> to vector<64xf32>
    %32 = vector.shape_cast %31 : vector<64xf32> to vector<1x64xf32>
    %33 = vector.shape_cast %32 : vector<1x64xf32> to vector<1x1x64xf32>
    %34 = arith.addf %29, %33 : vector<1x1x64xf32>
    %c0_26 = arith.constant 0 : index
    %c0_27 = arith.constant 0 : index
    %c0_28 = arith.constant 0 : index
    %35 = vector.load %arg9[%c0_26, %c0_27, %c0_28] : memref<1x1x64xf32, #tpu.memory_space<vmem>>, vector<1x1x64xf32>
    tpu.vector_store %arg9[%c0_26, %c0_27, %c0_28], %34 {strides = array<i32>} : memref<1x1x64xf32, #tpu.memory_space<vmem>>, vector<1x1x64xf32>,
    return
  }
  func.func @transform_0(%arg0: i32, %arg1: i32) -> (i32, i32, i32) {
    %c0_i32 = arith.constant 0 : i32
    %c0_i32_0 = arith.constant 0 : i32
    return %arg0, %arg1, %c0_i32 : i32, i32, i32
  }
  func.func @transform_1(%arg0: i32, %arg1: i32) -> (i32, i32) {
    %c0_i32 = arith.constant 0 : i32
    %c0_i32_0 = arith.constant 0 : i32
    %c0_i32_1 = arith.constant 0 : i32
    return %c0_i32, %c0_i32_0 : i32, i32
  }
  func.func @transform_2(%arg0: i32, %arg1: i32) -> (i32, i32) {
    %c0_i32 = arith.constant 0 : i32
    %c0_i32_0 = arith.constant 0 : i32
    %c0_i32_1 = arith.constant 0 : i32
    return %c0_i32, %c0_i32_0 : i32, i32
  }
  func.func @transform_3(%arg0: i32, %arg1: i32) -> (i32, i32) {
    %c0_i32 = arith.constant 0 : i32
    %c0_i32_0 = arith.constant 0 : i32
    %c0_i32_1 = arith.constant 0 : i32
    return %c0_i32, %c0_i32_0 : i32, i32
  }
  func.func @transform_4(%arg0: i32, %arg1: i32) -> (i32, i32) {
    %c0_i32 = arith.constant 0 : i32
    %c0_i32_0 = arith.constant 0 : i32
    %c0_i32_1 = arith.constant 0 : i32
    return %c0_i32, %c0_i32_0 : i32, i32
  }
  func.func @transform_5(%arg0: i32, %arg1: i32) -> (i32, i32, i32) {
    %c0_i32 = arith.constant 0 : i32
    %c0_i32_0 = arith.constant 0 : i32
    return %arg0, %arg1, %c0_i32 : i32, i32, i32
  }
  func.func @transform_6(%arg0: i32, %arg1: i32) -> (i32, i32, i32) {
    %c0_i32 = arith.constant 0 : i32
    %c0_i32_0 = arith.constant 0 : i32
    %c0_i32_1 = arith.constant 0 : i32
    return %arg0, %c0_i32, %c0_i32_0 : i32, i32, i32
  }
  func.func @transform_7(%arg0: i32, %arg1: i32) -> (i32, i32, i32) {
    %c0_i32 = arith.constant 0 : i32
    %c0_i32_0 = arith.constant 0 : i32
    %c0_i32_1 = arith.constant 0 : i32
    return %arg0, %c0_i32, %c0_i32_0 : i32, i32, i32
  }
}

module attributes {stable_mosaic.version = 11 : i64} {
  func.func @_first_layer_kernel(%arg0: i32, %arg1: i32, %arg2: memref<1x64x3xf32, #tpu.memory_space<vmem>>, %arg3: memref<1x3x64xf32, #tpu.memory_space<vmem>>, %arg4: memref<1x64xf32, #tpu.memory_space<vmem>>, %arg5: memref<1x64x64xbf16, #tpu.memory_space<vmem>>, %arg6: memref<1x1x64xf32, #tpu.memory_space<vmem>>, %arg7: memref<1x1x64xf32, #tpu.memory_space<vmem>>) attributes {dimension_semantics = [#tpu.dimension_semantics<parallel>, #tpu.dimension_semantics<arbitrary>], iteration_bounds = array<i64: 2, 1>, scalar_prefetch = 0 : i64, scratch_operands = 0 : i64, tpu.core_type = #tpu.core_type<tc>, window_params = [{transform_indices = @transform_0, window_bounds = array<i64: 1, 64, 3>}, {transform_indices = @transform_1, window_bounds = array<i64: 1, 3, 64>}, {pipeline_mode = #tpu.pipeline_mode<synchronous>, transform_indices = @transform_2, window_bounds = array<i64: 1, 64>}, {transform_indices = @transform_3, window_bounds = array<i64: 1, 64, 64>}, {transform_indices = @transform_4, window_bounds = array<i64: 1, 1, 64>}, {transform_indices = @transform_5, window_bounds = array<i64: 1, 1, 64>}]} {
    %c0_i32 = arith.constant 0 : i32
    %0 = arith.cmpi eq, %arg1, %c0_i32 : i32
    %1 = arith.extui %0 : i1 to i32
    %c0_i32_0 = arith.constant 0 : i32
    %2 = arith.cmpi ne, %1, %c0_i32_0 : i32
    scf.if %2 {
      %cst_25 = arith.constant 0.000000e+00 : f32
      %45 = vector.broadcast %cst_25 : f32 to vector<1x1x64xf32>
      %c0_26 = arith.constant 0 : index
      %c0_27 = arith.constant 0 : index
      %c0_28 = arith.constant 0 : index
      %46 = vector.load %arg6[%c0_26, %c0_27, %c0_28] : memref<1x1x64xf32, #tpu.memory_space<vmem>>, vector<1x1x64xf32>
      tpu.vector_store %arg6[%c0_26, %c0_27, %c0_28], %45 {strides = array<i32>} : memref<1x1x64xf32, #tpu.memory_space<vmem>>, vector<1x1x64xf32>,
      %cst_29 = arith.constant 0.000000e+00 : f32
      %47 = vector.broadcast %cst_29 : f32 to vector<1x1x64xf32>
      %c0_30 = arith.constant 0 : index
      %c0_31 = arith.constant 0 : index
      %c0_32 = arith.constant 0 : index
      %48 = vector.load %arg7[%c0_30, %c0_31, %c0_32] : memref<1x1x64xf32, #tpu.memory_space<vmem>>, vector<1x1x64xf32>
      tpu.vector_store %arg7[%c0_30, %c0_31, %c0_32], %47 {strides = array<i32>} : memref<1x1x64xf32, #tpu.memory_space<vmem>>, vector<1x1x64xf32>,
    } else {
    }
    %c0 = arith.constant 0 : index
    %c0_1 = arith.constant 0 : index
    %c0_2 = arith.constant 0 : index
    %3 = vector.load %arg2[%c0, %c0_1, %c0_2] : memref<1x64x3xf32, #tpu.memory_space<vmem>>, vector<1x64x3xf32>
    %4 = vector.shape_cast %3 : vector<1x64x3xf32> to vector<64x3xf32>
    %c0_3 = arith.constant 0 : index
    %c0_4 = arith.constant 0 : index
    %c0_5 = arith.constant 0 : index
    %5 = vector.load %arg3[%c0_3, %c0_4, %c0_5] : memref<1x3x64xf32, #tpu.memory_space<vmem>>, vector<1x3x64xf32>
    %6 = vector.shape_cast %5 : vector<1x3x64xf32> to vector<3x64xf32>
    %cst = arith.constant 0.000000e+00 : f32
    %7 = vector.broadcast %cst : f32 to vector<64x64xf32>
    %8 = vector.extract_strided_slice %4 {offsets = [0, 0], sizes = [64, 1], strides = [1, 1]} : vector<64x3xf32> to vector<64x1xf32>
    %9 = vector.extract_strided_slice %6 {offsets = [0, 0], sizes = [1, 64], strides = [1, 1]} : vector<3x64xf32> to vector<1x64xf32>
    %10 = vector.broadcast %8 : vector<64x1xf32> to vector<64x64xf32>
    %11 = vector.broadcast %9 : vector<1x64xf32> to vector<64x64xf32>
    %12 = arith.mulf %10, %11 : vector<64x64xf32>
    %13 = arith.addf %7, %12 : vector<64x64xf32>
    %14 = vector.extract_strided_slice %4 {offsets = [0, 1], sizes = [64, 1], strides = [1, 1]} : vector<64x3xf32> to vector<64x1xf32>
    %15 = vector.extract_strided_slice %6 {offsets = [1, 0], sizes = [1, 64], strides = [1, 1]} : vector<3x64xf32> to vector<1x64xf32>
    %16 = vector.broadcast %14 : vector<64x1xf32> to vector<64x64xf32>
    %17 = vector.broadcast %15 : vector<1x64xf32> to vector<64x64xf32>
    %18 = arith.mulf %16, %17 : vector<64x64xf32>
    %19 = arith.addf %13, %18 : vector<64x64xf32>
    %20 = vector.extract_strided_slice %4 {offsets = [0, 2], sizes = [64, 1], strides = [1, 1]} : vector<64x3xf32> to vector<64x1xf32>
    %21 = vector.extract_strided_slice %6 {offsets = [2, 0], sizes = [1, 64], strides = [1, 1]} : vector<3x64xf32> to vector<1x64xf32>
    %22 = vector.broadcast %20 : vector<64x1xf32> to vector<64x64xf32>
    %23 = vector.broadcast %21 : vector<1x64xf32> to vector<64x64xf32>
    %24 = arith.mulf %22, %23 : vector<64x64xf32>
    %25 = arith.addf %19, %24 : vector<64x64xf32>
    %c0_6 = arith.constant 0 : index
    %c0_7 = arith.constant 0 : index
    %26 = vector.load %arg4[%c0_6, %c0_7] : memref<1x64xf32, #tpu.memory_space<vmem>>, vector<1x64xf32>
    %27 = vector.broadcast %26 : vector<1x64xf32> to vector<64x64xf32>
    %28 = arith.addf %25, %27 : vector<64x64xf32>
    %29 = vector.shape_cast %28 : vector<64x64xf32> to vector<1x64x64xf32>
    %30 = arith.truncf %29 : vector<1x64x64xf32> to vector<1x64x64xbf16>
    %c0_8 = arith.constant 0 : index
    %c0_9 = arith.constant 0 : index
    %c0_10 = arith.constant 0 : index
    %31 = vector.load %arg5[%c0_8, %c0_9, %c0_10] : memref<1x64x64xbf16, #tpu.memory_space<vmem>>, vector<1x64x64xbf16>
    tpu.vector_store %arg5[%c0_8, %c0_9, %c0_10], %30 {strides = array<i32>} : memref<1x64x64xbf16, #tpu.memory_space<vmem>>, vector<1x64x64xbf16>,
    %c0_11 = arith.constant 0 : index
    %c0_12 = arith.constant 0 : index
    %c0_13 = arith.constant 0 : index
    %32 = vector.load %arg6[%c0_11, %c0_12, %c0_13] : memref<1x1x64xf32, #tpu.memory_space<vmem>>, vector<1x1x64xf32>
    %cst_14 = arith.constant dense<0.000000e+00> : vector<64xf32>
    %33 = vector.multi_reduction <add>, %28, %cst_14 [0] : vector<64x64xf32> to vector<64xf32>
    %34 = vector.shape_cast %33 : vector<64xf32> to vector<1x64xf32>
    %35 = vector.shape_cast %34 : vector<1x64xf32> to vector<1x1x64xf32>
    %36 = arith.addf %32, %35 : vector<1x1x64xf32>
    %c0_15 = arith.constant 0 : index
    %c0_16 = arith.constant 0 : index
    %c0_17 = arith.constant 0 : index
    %37 = vector.load %arg6[%c0_15, %c0_16, %c0_17] : memref<1x1x64xf32, #tpu.memory_space<vmem>>, vector<1x1x64xf32>
    tpu.vector_store %arg6[%c0_15, %c0_16, %c0_17], %36 {strides = array<i32>} : memref<1x1x64xf32, #tpu.memory_space<vmem>>, vector<1x1x64xf32>,
    %c0_18 = arith.constant 0 : index
    %c0_19 = arith.constant 0 : index
    %c0_20 = arith.constant 0 : index
    %38 = vector.load %arg7[%c0_18, %c0_19, %c0_20] : memref<1x1x64xf32, #tpu.memory_space<vmem>>, vector<1x1x64xf32>
    %39 = arith.mulf %28, %28 : vector<64x64xf32>
    %cst_21 = arith.constant dense<0.000000e+00> : vector<64xf32>
    %40 = vector.multi_reduction <add>, %39, %cst_21 [0] : vector<64x64xf32> to vector<64xf32>
    %41 = vector.shape_cast %40 : vector<64xf32> to vector<1x64xf32>
    %42 = vector.shape_cast %41 : vector<1x64xf32> to vector<1x1x64xf32>
    %43 = arith.addf %38, %42 : vector<1x1x64xf32>
    %c0_22 = arith.constant 0 : index
    %c0_23 = arith.constant 0 : index
    %c0_24 = arith.constant 0 : index
    %44 = vector.load %arg7[%c0_22, %c0_23, %c0_24] : memref<1x1x64xf32, #tpu.memory_space<vmem>>, vector<1x1x64xf32>
    tpu.vector_store %arg7[%c0_22, %c0_23, %c0_24], %43 {strides = array<i32>} : memref<1x1x64xf32, #tpu.memory_space<vmem>>, vector<1x1x64xf32>,
    return
  }
  func.func @transform_0(%arg0: i32, %arg1: i32) -> (i32, i32, i32) {
    %c0_i32 = arith.constant 0 : i32
    %c0_i32_0 = arith.constant 0 : i32
    return %arg0, %arg1, %c0_i32 : i32, i32, i32
  }
  func.func @transform_1(%arg0: i32, %arg1: i32) -> (i32, i32, i32) {
    %c0_i32 = arith.constant 0 : i32
    %c0_i32_0 = arith.constant 0 : i32
    %c0_i32_1 = arith.constant 0 : i32
    return %arg0, %c0_i32, %c0_i32_0 : i32, i32, i32
  }
  func.func @transform_2(%arg0: i32, %arg1: i32) -> (i32, i32) {
    %c0_i32 = arith.constant 0 : i32
    %c0_i32_0 = arith.constant 0 : i32
    %c0_i32_1 = arith.constant 0 : i32
    return %c0_i32, %c0_i32_0 : i32, i32
  }
  func.func @transform_3(%arg0: i32, %arg1: i32) -> (i32, i32, i32) {
    %c0_i32 = arith.constant 0 : i32
    %c0_i32_0 = arith.constant 0 : i32
    return %arg0, %arg1, %c0_i32 : i32, i32, i32
  }
  func.func @transform_4(%arg0: i32, %arg1: i32) -> (i32, i32, i32) {
    %c0_i32 = arith.constant 0 : i32
    %c0_i32_0 = arith.constant 0 : i32
    %c0_i32_1 = arith.constant 0 : i32
    return %arg0, %c0_i32, %c0_i32_0 : i32, i32, i32
  }
  func.func @transform_5(%arg0: i32, %arg1: i32) -> (i32, i32, i32) {
    %c0_i32 = arith.constant 0 : i32
    %c0_i32_0 = arith.constant 0 : i32
    %c0_i32_1 = arith.constant 0 : i32
    return %arg0, %c0_i32, %c0_i32_0 : i32, i32, i32
  }
}

module attributes {stable_mosaic.version = 11 : i64} {
  func.func @_mid_layer_kernel(%arg0: i32, %arg1: i32, %arg2: memref<1x64x64xbf16, #tpu.memory_space<vmem>>, %arg3: memref<64x128xbf16, #tpu.memory_space<vmem>>, %arg4: memref<1x128xf32, #tpu.memory_space<vmem>>, %arg5: memref<1x64xf32, #tpu.memory_space<vmem>>, %arg6: memref<1x64xf32, #tpu.memory_space<vmem>>, %arg7: memref<1x64x128xbf16, #tpu.memory_space<vmem>>, %arg8: memref<1x1x128xf32, #tpu.memory_space<vmem>>, %arg9: memref<1x1x128xf32, #tpu.memory_space<vmem>>) attributes {dimension_semantics = [#tpu.dimension_semantics<parallel>, #tpu.dimension_semantics<arbitrary>], iteration_bounds = array<i64: 2, 1>, scalar_prefetch = 0 : i64, scratch_operands = 0 : i64, tpu.core_type = #tpu.core_type<tc>, window_params = [{transform_indices = @transform_0, window_bounds = array<i64: 1, 64, 64>}, {pipeline_mode = #tpu.pipeline_mode<synchronous>, transform_indices = @transform_1, window_bounds = array<i64: 64, 128>}, {pipeline_mode = #tpu.pipeline_mode<synchronous>, transform_indices = @transform_2, window_bounds = array<i64: 1, 128>}, {pipeline_mode = #tpu.pipeline_mode<synchronous>, transform_indices = @transform_3, window_bounds = array<i64: 1, 64>}, {pipeline_mode = #tpu.pipeline_mode<synchronous>, transform_indices = @transform_4, window_bounds = array<i64: 1, 64>}, {transform_indices = @transform_5, window_bounds = array<i64: 1, 64, 128>}, {transform_indices = @transform_6, window_bounds = array<i64: 1, 1, 128>}, {transform_indices = @transform_7, window_bounds = array<i64: 1, 1, 128>}]} {
    %c0_i32 = arith.constant 0 : i32
    %0 = arith.cmpi eq, %arg1, %c0_i32 : i32
    %1 = arith.extui %0 : i1 to i32
    %c0_i32_0 = arith.constant 0 : i32
    %2 = arith.cmpi ne, %1, %c0_i32_0 : i32
    scf.if %2 {
      %cst_29 = arith.constant 0.000000e+00 : f32
      %36 = vector.broadcast %cst_29 : f32 to vector<1x1x128xf32>
      %c0_30 = arith.constant 0 : index
      %c0_31 = arith.constant 0 : index
      %c0_32 = arith.constant 0 : index
      %37 = vector.load %arg8[%c0_30, %c0_31, %c0_32] : memref<1x1x128xf32, #tpu.memory_space<vmem>>, vector<1x1x128xf32>
      tpu.vector_store %arg8[%c0_30, %c0_31, %c0_32], %36 {strides = array<i32>} : memref<1x1x128xf32, #tpu.memory_space<vmem>>, vector<1x1x128xf32>,
      %cst_33 = arith.constant 0.000000e+00 : f32
      %38 = vector.broadcast %cst_33 : f32 to vector<1x1x128xf32>
      %c0_34 = arith.constant 0 : index
      %c0_35 = arith.constant 0 : index
      %c0_36 = arith.constant 0 : index
      %39 = vector.load %arg9[%c0_34, %c0_35, %c0_36] : memref<1x1x128xf32, #tpu.memory_space<vmem>>, vector<1x1x128xf32>
      tpu.vector_store %arg9[%c0_34, %c0_35, %c0_36], %38 {strides = array<i32>} : memref<1x1x128xf32, #tpu.memory_space<vmem>>, vector<1x1x128xf32>,
    } else {
    }
    %c0 = arith.constant 0 : index
    %c0_1 = arith.constant 0 : index
    %c0_2 = arith.constant 0 : index
    %3 = vector.load %arg2[%c0, %c0_1, %c0_2] : memref<1x64x64xbf16, #tpu.memory_space<vmem>>, vector<1x64x64xbf16>
    %4 = vector.shape_cast %3 : vector<1x64x64xbf16> to vector<64x64xbf16>
    %5 = arith.extf %4 : vector<64x64xbf16> to vector<64x64xf32>
    %c0_3 = arith.constant 0 : index
    %c0_4 = arith.constant 0 : index
    %6 = vector.load %arg5[%c0_3, %c0_4] : memref<1x64xf32, #tpu.memory_space<vmem>>, vector<1x64xf32>
    %7 = vector.broadcast %6 : vector<1x64xf32> to vector<64x64xf32>
    %8 = arith.mulf %5, %7 : vector<64x64xf32>
    %c0_5 = arith.constant 0 : index
    %c0_6 = arith.constant 0 : index
    %9 = vector.load %arg6[%c0_5, %c0_6] : memref<1x64xf32, #tpu.memory_space<vmem>>, vector<1x64xf32>
    %10 = vector.broadcast %9 : vector<1x64xf32> to vector<64x64xf32>
    %11 = arith.addf %8, %10 : vector<64x64xf32>
    %cst = arith.constant 0.000000e+00 : f32
    %12 = vector.broadcast %cst : f32 to vector<64x64xf32>
    %13 = arith.maximumf %11, %12 : vector<64x64xf32>
    %c0_7 = arith.constant 0 : index
    %c0_8 = arith.constant 0 : index
    %14 = vector.load %arg3[%c0_7, %c0_8] : memref<64x128xbf16, #tpu.memory_space<vmem>>, vector<64x128xbf16>
    %15 = arith.truncf %13 : vector<64x64xf32> to vector<64x64xbf16>
    %cst_9 = arith.constant dense<0.000000e+00> : vector<64x128xf32>
    %16 = tpu.matmul %15, %14, %cst_9 {dimension_numbers = #tpu.dot_dimension_numbers<[1], [0], [0], [1], [0, 0, 1, 1], [], []>} : vector<64x64xbf16>, vector<64x128xbf16>, vector<64x128xf32> -> vector<64x128xf32>
    %c0_10 = arith.constant 0 : index
    %c0_11 = arith.constant 0 : index
    %17 = vector.load %arg4[%c0_10, %c0_11] : memref<1x128xf32, #tpu.memory_space<vmem>>, vector<1x128xf32>
    %18 = vector.broadcast %17 : vector<1x128xf32> to vector<64x128xf32>
    %19 = arith.addf %16, %18 : vector<64x128xf32>
    %20 = vector.shape_cast %19 : vector<64x128xf32> to vector<1x64x128xf32>
    %21 = arith.truncf %20 : vector<1x64x128xf32> to vector<1x64x128xbf16>
    %c0_12 = arith.constant 0 : index
    %c0_13 = arith.constant 0 : index
    %c0_14 = arith.constant 0 : index
    %22 = vector.load %arg7[%c0_12, %c0_13, %c0_14] : memref<1x64x128xbf16, #tpu.memory_space<vmem>>, vector<1x64x128xbf16>
    tpu.vector_store %arg7[%c0_12, %c0_13, %c0_14], %21 {strides = array<i32>} : memref<1x64x128xbf16, #tpu.memory_space<vmem>>, vector<1x64x128xbf16>,
    %c0_15 = arith.constant 0 : index
    %c0_16 = arith.constant 0 : index
    %c0_17 = arith.constant 0 : index
    %23 = vector.load %arg8[%c0_15, %c0_16, %c0_17] : memref<1x1x128xf32, #tpu.memory_space<vmem>>, vector<1x1x128xf32>
    %cst_18 = arith.constant dense<0.000000e+00> : vector<128xf32>
    %24 = vector.multi_reduction <add>, %19, %cst_18 [0] : vector<64x128xf32> to vector<128xf32>
    %25 = vector.shape_cast %24 : vector<128xf32> to vector<1x128xf32>
    %26 = vector.shape_cast %25 : vector<1x128xf32> to vector<1x1x128xf32>
    %27 = arith.addf %23, %26 : vector<1x1x128xf32>
    %c0_19 = arith.constant 0 : index
    %c0_20 = arith.constant 0 : index
    %c0_21 = arith.constant 0 : index
    %28 = vector.load %arg8[%c0_19, %c0_20, %c0_21] : memref<1x1x128xf32, #tpu.memory_space<vmem>>, vector<1x1x128xf32>
    tpu.vector_store %arg8[%c0_19, %c0_20, %c0_21], %27 {strides = array<i32>} : memref<1x1x128xf32, #tpu.memory_space<vmem>>, vector<1x1x128xf32>,
    %c0_22 = arith.constant 0 : index
    %c0_23 = arith.constant 0 : index
    %c0_24 = arith.constant 0 : index
    %29 = vector.load %arg9[%c0_22, %c0_23, %c0_24] : memref<1x1x128xf32, #tpu.memory_space<vmem>>, vector<1x1x128xf32>
    %30 = arith.mulf %19, %19 : vector<64x128xf32>
    %cst_25 = arith.constant dense<0.000000e+00> : vector<128xf32>
    %31 = vector.multi_reduction <add>, %30, %cst_25 [0] : vector<64x128xf32> to vector<128xf32>
    %32 = vector.shape_cast %31 : vector<128xf32> to vector<1x128xf32>
    %33 = vector.shape_cast %32 : vector<1x128xf32> to vector<1x1x128xf32>
    %34 = arith.addf %29, %33 : vector<1x1x128xf32>
    %c0_26 = arith.constant 0 : index
    %c0_27 = arith.constant 0 : index
    %c0_28 = arith.constant 0 : index
    %35 = vector.load %arg9[%c0_26, %c0_27, %c0_28] : memref<1x1x128xf32, #tpu.memory_space<vmem>>, vector<1x1x128xf32>
    tpu.vector_store %arg9[%c0_26, %c0_27, %c0_28], %34 {strides = array<i32>} : memref<1x1x128xf32, #tpu.memory_space<vmem>>, vector<1x1x128xf32>,
    return
  }
  func.func @transform_0(%arg0: i32, %arg1: i32) -> (i32, i32, i32) {
    %c0_i32 = arith.constant 0 : i32
    %c0_i32_0 = arith.constant 0 : i32
    return %arg0, %arg1, %c0_i32 : i32, i32, i32
  }
  func.func @transform_1(%arg0: i32, %arg1: i32) -> (i32, i32) {
    %c0_i32 = arith.constant 0 : i32
    %c0_i32_0 = arith.constant 0 : i32
    %c0_i32_1 = arith.constant 0 : i32
    return %c0_i32, %c0_i32_0 : i32, i32
  }
  func.func @transform_2(%arg0: i32, %arg1: i32) -> (i32, i32) {
    %c0_i32 = arith.constant 0 : i32
    %c0_i32_0 = arith.constant 0 : i32
    %c0_i32_1 = arith.constant 0 : i32
    return %c0_i32, %c0_i32_0 : i32, i32
  }
  func.func @transform_3(%arg0: i32, %arg1: i32) -> (i32, i32) {
    %c0_i32 = arith.constant 0 : i32
    %c0_i32_0 = arith.constant 0 : i32
    %c0_i32_1 = arith.constant 0 : i32
    return %c0_i32, %c0_i32_0 : i32, i32
  }
  func.func @transform_4(%arg0: i32, %arg1: i32) -> (i32, i32) {
    %c0_i32 = arith.constant 0 : i32
    %c0_i32_0 = arith.constant 0 : i32
    %c0_i32_1 = arith.constant 0 : i32
    return %c0_i32, %c0_i32_0 : i32, i32
  }
  func.func @transform_5(%arg0: i32, %arg1: i32) -> (i32, i32, i32) {
    %c0_i32 = arith.constant 0 : i32
    %c0_i32_0 = arith.constant 0 : i32
    return %arg0, %arg1, %c0_i32 : i32, i32, i32
  }
  func.func @transform_6(%arg0: i32, %arg1: i32) -> (i32, i32, i32) {
    %c0_i32 = arith.constant 0 : i32
    %c0_i32_0 = arith.constant 0 : i32
    %c0_i32_1 = arith.constant 0 : i32
    return %arg0, %c0_i32, %c0_i32_0 : i32, i32, i32
  }
  func.func @transform_7(%arg0: i32, %arg1: i32) -> (i32, i32, i32) {
    %c0_i32 = arith.constant 0 : i32
    %c0_i32_0 = arith.constant 0 : i32
    %c0_i32_1 = arith.constant 0 : i32
    return %arg0, %c0_i32, %c0_i32_0 : i32, i32, i32
  }
}

module attributes {stable_mosaic.version = 11 : i64} {
  func.func @_pool_layer_kernel(%arg0: i32, %arg1: i32, %arg2: memref<1x64x128xbf16, #tpu.memory_space<vmem>>, %arg3: memref<128x1024xbf16, #tpu.memory_space<vmem>>, %arg4: memref<1x1024xf32, #tpu.memory_space<vmem>>, %arg5: memref<1x128xf32, #tpu.memory_space<vmem>>, %arg6: memref<1x128xf32, #tpu.memory_space<vmem>>, %arg7: memref<1x1x1024xf32, #tpu.memory_space<vmem>>, %arg8: memref<1x1x1024xf32, #tpu.memory_space<vmem>>, %arg9: memref<1x1x1024xf32, #tpu.memory_space<vmem>>, %arg10: memref<1x1x1024xf32, #tpu.memory_space<vmem>>) attributes {dimension_semantics = [#tpu.dimension_semantics<parallel>, #tpu.dimension_semantics<arbitrary>], iteration_bounds = array<i64: 2, 1>, scalar_prefetch = 0 : i64, scratch_operands = 0 : i64, tpu.core_type = #tpu.core_type<tc>, window_params = [{transform_indices = @transform_0, window_bounds = array<i64: 1, 64, 128>}, {pipeline_mode = #tpu.pipeline_mode<synchronous>, transform_indices = @transform_1, window_bounds = array<i64: 128, 1024>}, {pipeline_mode = #tpu.pipeline_mode<synchronous>, transform_indices = @transform_2, window_bounds = array<i64: 1, 1024>}, {pipeline_mode = #tpu.pipeline_mode<synchronous>, transform_indices = @transform_3, window_bounds = array<i64: 1, 128>}, {pipeline_mode = #tpu.pipeline_mode<synchronous>, transform_indices = @transform_4, window_bounds = array<i64: 1, 128>}, {transform_indices = @transform_5, window_bounds = array<i64: 1, 1, 1024>}, {transform_indices = @transform_6, window_bounds = array<i64: 1, 1, 1024>}, {transform_indices = @transform_7, window_bounds = array<i64: 1, 1, 1024>}, {transform_indices = @transform_8, window_bounds = array<i64: 1, 1, 1024>}]} {
    %c0_i32 = arith.constant 0 : i32
    %0 = arith.cmpi eq, %arg1, %c0_i32 : i32
    %1 = arith.extui %0 : i1 to i32
    %c0_i32_0 = arith.constant 0 : i32
    %2 = arith.cmpi ne, %1, %c0_i32_0 : i32
    scf.if %2 {
      %cst_40 = arith.constant 0.000000e+00 : f32
      %45 = vector.broadcast %cst_40 : f32 to vector<1x1x1024xf32>
      %c0_41 = arith.constant 0 : index
      %c0_42 = arith.constant 0 : index
      %c0_43 = arith.constant 0 : index
      %46 = vector.load %arg7[%c0_41, %c0_42, %c0_43] : memref<1x1x1024xf32, #tpu.memory_space<vmem>>, vector<1x1x1024xf32>
      tpu.vector_store %arg7[%c0_41, %c0_42, %c0_43], %45 {strides = array<i32>} : memref<1x1x1024xf32, #tpu.memory_space<vmem>>, vector<1x1x1024xf32>,
      %cst_44 = arith.constant 0.000000e+00 : f32
      %47 = vector.broadcast %cst_44 : f32 to vector<1x1x1024xf32>
      %c0_45 = arith.constant 0 : index
      %c0_46 = arith.constant 0 : index
      %c0_47 = arith.constant 0 : index
      %48 = vector.load %arg8[%c0_45, %c0_46, %c0_47] : memref<1x1x1024xf32, #tpu.memory_space<vmem>>, vector<1x1x1024xf32>
      tpu.vector_store %arg8[%c0_45, %c0_46, %c0_47], %47 {strides = array<i32>} : memref<1x1x1024xf32, #tpu.memory_space<vmem>>, vector<1x1x1024xf32>,
      %cst_48 = arith.constant 0xFF800000 : f32
      %49 = vector.broadcast %cst_48 : f32 to vector<1x1x1024xf32>
      %c0_49 = arith.constant 0 : index
      %c0_50 = arith.constant 0 : index
      %c0_51 = arith.constant 0 : index
      %50 = vector.load %arg9[%c0_49, %c0_50, %c0_51] : memref<1x1x1024xf32, #tpu.memory_space<vmem>>, vector<1x1x1024xf32>
      tpu.vector_store %arg9[%c0_49, %c0_50, %c0_51], %49 {strides = array<i32>} : memref<1x1x1024xf32, #tpu.memory_space<vmem>>, vector<1x1x1024xf32>,
      %cst_52 = arith.constant 0x7F800000 : f32
      %51 = vector.broadcast %cst_52 : f32 to vector<1x1x1024xf32>
      %c0_53 = arith.constant 0 : index
      %c0_54 = arith.constant 0 : index
      %c0_55 = arith.constant 0 : index
      %52 = vector.load %arg10[%c0_53, %c0_54, %c0_55] : memref<1x1x1024xf32, #tpu.memory_space<vmem>>, vector<1x1x1024xf32>
      tpu.vector_store %arg10[%c0_53, %c0_54, %c0_55], %51 {strides = array<i32>} : memref<1x1x1024xf32, #tpu.memory_space<vmem>>, vector<1x1x1024xf32>,
    } else {
    }
    %c0 = arith.constant 0 : index
    %c0_1 = arith.constant 0 : index
    %c0_2 = arith.constant 0 : index
    %3 = vector.load %arg2[%c0, %c0_1, %c0_2] : memref<1x64x128xbf16, #tpu.memory_space<vmem>>, vector<1x64x128xbf16>
    %4 = vector.shape_cast %3 : vector<1x64x128xbf16> to vector<64x128xbf16>
    %5 = arith.extf %4 : vector<64x128xbf16> to vector<64x128xf32>
    %c0_3 = arith.constant 0 : index
    %c0_4 = arith.constant 0 : index
    %6 = vector.load %arg5[%c0_3, %c0_4] : memref<1x128xf32, #tpu.memory_space<vmem>>, vector<1x128xf32>
    %7 = vector.broadcast %6 : vector<1x128xf32> to vector<64x128xf32>
    %8 = arith.mulf %5, %7 : vector<64x128xf32>
    %c0_5 = arith.constant 0 : index
    %c0_6 = arith.constant 0 : index
    %9 = vector.load %arg6[%c0_5, %c0_6] : memref<1x128xf32, #tpu.memory_space<vmem>>, vector<1x128xf32>
    %10 = vector.broadcast %9 : vector<1x128xf32> to vector<64x128xf32>
    %11 = arith.addf %8, %10 : vector<64x128xf32>
    %cst = arith.constant 0.000000e+00 : f32
    %12 = vector.broadcast %cst : f32 to vector<64x128xf32>
    %13 = arith.maximumf %11, %12 : vector<64x128xf32>
    %14 = arith.truncf %13 : vector<64x128xf32> to vector<64x128xbf16>
    %c0_7 = arith.constant 0 : index
    %c0_8 = arith.constant 0 : index
    %15 = vector.load %arg3[%c0_7, %c0_8] : memref<128x1024xbf16, #tpu.memory_space<vmem>>, vector<128x1024xbf16>
    %cst_9 = arith.constant dense<0.000000e+00> : vector<64x1024xf32>
    %16 = tpu.matmul %14, %15, %cst_9 {dimension_numbers = #tpu.dot_dimension_numbers<[1], [0], [0], [1], [0, 0, 1, 1], [], []>} : vector<64x128xbf16>, vector<128x1024xbf16>, vector<64x1024xf32> -> vector<64x1024xf32>
    %c0_10 = arith.constant 0 : index
    %c0_11 = arith.constant 0 : index
    %17 = vector.load %arg4[%c0_10, %c0_11] : memref<1x1024xf32, #tpu.memory_space<vmem>>, vector<1x1024xf32>
    %18 = vector.broadcast %17 : vector<1x1024xf32> to vector<64x1024xf32>
    %19 = arith.addf %16, %18 : vector<64x1024xf32>
    %c0_12 = arith.constant 0 : index
    %c0_13 = arith.constant 0 : index
    %c0_14 = arith.constant 0 : index
    %20 = vector.load %arg7[%c0_12, %c0_13, %c0_14] : memref<1x1x1024xf32, #tpu.memory_space<vmem>>, vector<1x1x1024xf32>
    %cst_15 = arith.constant dense<0.000000e+00> : vector<1024xf32>
    %21 = vector.multi_reduction <add>, %19, %cst_15 [0] : vector<64x1024xf32> to vector<1024xf32>
    %22 = vector.shape_cast %21 : vector<1024xf32> to vector<1x1024xf32>
    %23 = vector.shape_cast %22 : vector<1x1024xf32> to vector<1x1x1024xf32>
    %24 = arith.addf %20, %23 : vector<1x1x1024xf32>
    %c0_16 = arith.constant 0 : index
    %c0_17 = arith.constant 0 : index
    %c0_18 = arith.constant 0 : index
    %25 = vector.load %arg7[%c0_16, %c0_17, %c0_18] : memref<1x1x1024xf32, #tpu.memory_space<vmem>>, vector<1x1x1024xf32>
    tpu.vector_store %arg7[%c0_16, %c0_17, %c0_18], %24 {strides = array<i32>} : memref<1x1x1024xf32, #tpu.memory_space<vmem>>, vector<1x1x1024xf32>,
    %c0_19 = arith.constant 0 : index
    %c0_20 = arith.constant 0 : index
    %c0_21 = arith.constant 0 : index
    %26 = vector.load %arg8[%c0_19, %c0_20, %c0_21] : memref<1x1x1024xf32, #tpu.memory_space<vmem>>, vector<1x1x1024xf32>
    %27 = arith.mulf %19, %19 : vector<64x1024xf32>
    %cst_22 = arith.constant dense<0.000000e+00> : vector<1024xf32>
    %28 = vector.multi_reduction <add>, %27, %cst_22 [0] : vector<64x1024xf32> to vector<1024xf32>
    %29 = vector.shape_cast %28 : vector<1024xf32> to vector<1x1024xf32>
    %30 = vector.shape_cast %29 : vector<1x1024xf32> to vector<1x1x1024xf32>
    %31 = arith.addf %26, %30 : vector<1x1x1024xf32>
    %c0_23 = arith.constant 0 : index
    %c0_24 = arith.constant 0 : index
    %c0_25 = arith.constant 0 : index
    %32 = vector.load %arg8[%c0_23, %c0_24, %c0_25] : memref<1x1x1024xf32, #tpu.memory_space<vmem>>, vector<1x1x1024xf32>
    tpu.vector_store %arg8[%c0_23, %c0_24, %c0_25], %31 {strides = array<i32>} : memref<1x1x1024xf32, #tpu.memory_space<vmem>>, vector<1x1x1024xf32>,
    %c0_26 = arith.constant 0 : index
    %c0_27 = arith.constant 0 : index
    %c0_28 = arith.constant 0 : index
    %33 = vector.load %arg9[%c0_26, %c0_27, %c0_28] : memref<1x1x1024xf32, #tpu.memory_space<vmem>>, vector<1x1x1024xf32>
    %cst_29 = arith.constant dense<0xFF800000> : vector<1024xf32>
    %34 = vector.multi_reduction <maximumf>, %19, %cst_29 [0] : vector<64x1024xf32> to vector<1024xf32>
    %35 = vector.shape_cast %34 : vector<1024xf32> to vector<1x1024xf32>
    %36 = vector.shape_cast %35 : vector<1x1024xf32> to vector<1x1x1024xf32>
    %37 = arith.maximumf %33, %36 : vector<1x1x1024xf32>
    %c0_30 = arith.constant 0 : index
    %c0_31 = arith.constant 0 : index
    %c0_32 = arith.constant 0 : index
    %38 = vector.load %arg9[%c0_30, %c0_31, %c0_32] : memref<1x1x1024xf32, #tpu.memory_space<vmem>>, vector<1x1x1024xf32>
    tpu.vector_store %arg9[%c0_30, %c0_31, %c0_32], %37 {strides = array<i32>} : memref<1x1x1024xf32, #tpu.memory_space<vmem>>, vector<1x1x1024xf32>,
    %c0_33 = arith.constant 0 : index
    %c0_34 = arith.constant 0 : index
    %c0_35 = arith.constant 0 : index
    %39 = vector.load %arg10[%c0_33, %c0_34, %c0_35] : memref<1x1x1024xf32, #tpu.memory_space<vmem>>, vector<1x1x1024xf32>
    %cst_36 = arith.constant dense<0x7F800000> : vector<1024xf32>
    %40 = vector.multi_reduction <minimumf>, %19, %cst_36 [0] : vector<64x1024xf32> to vector<1024xf32>
    %41 = vector.shape_cast %40 : vector<1024xf32> to vector<1x1024xf32>
    %42 = vector.shape_cast %41 : vector<1x1024xf32> to vector<1x1x1024xf32>
    %43 = arith.minimumf %39, %42 : vector<1x1x1024xf32>
    %c0_37 = arith.constant 0 : index
    %c0_38 = arith.constant 0 : index
    %c0_39 = arith.constant 0 : index
    %44 = vector.load %arg10[%c0_37, %c0_38, %c0_39] : memref<1x1x1024xf32, #tpu.memory_space<vmem>>, vector<1x1x1024xf32>
    tpu.vector_store %arg10[%c0_37, %c0_38, %c0_39], %43 {strides = array<i32>} : memref<1x1x1024xf32, #tpu.memory_space<vmem>>, vector<1x1x1024xf32>,
    return
  }
  func.func @transform_0(%arg0: i32, %arg1: i32) -> (i32, i32, i32) {
    %c0_i32 = arith.constant 0 : i32
    %c0_i32_0 = arith.constant 0 : i32
    return %arg0, %arg1, %c0_i32 : i32, i32, i32
  }
  func.func @transform_1(%arg0: i32, %arg1: i32) -> (i32, i32) {
    %c0_i32 = arith.constant 0 : i32
    %c0_i32_0 = arith.constant 0 : i32
    %c0_i32_1 = arith.constant 0 : i32
    return %c0_i32, %c0_i32_0 : i32, i32
  }
  func.func @transform_2(%arg0: i32, %arg1: i32) -> (i32, i32) {
    %c0_i32 = arith.constant 0 : i32
    %c0_i32_0 = arith.constant 0 : i32
    %c0_i32_1 = arith.constant 0 : i32
    return %c0_i32, %c0_i32_0 : i32, i32
  }
  func.func @transform_3(%arg0: i32, %arg1: i32) -> (i32, i32) {
    %c0_i32 = arith.constant 0 : i32
    %c0_i32_0 = arith.constant 0 : i32
    %c0_i32_1 = arith.constant 0 : i32
    return %c0_i32, %c0_i32_0 : i32, i32
  }
  func.func @transform_4(%arg0: i32, %arg1: i32) -> (i32, i32) {
    %c0_i32 = arith.constant 0 : i32
    %c0_i32_0 = arith.constant 0 : i32
    %c0_i32_1 = arith.constant 0 : i32
    return %c0_i32, %c0_i32_0 : i32, i32
  }
  func.func @transform_5(%arg0: i32, %arg1: i32) -> (i32, i32, i32) {
    %c0_i32 = arith.constant 0 : i32
    %c0_i32_0 = arith.constant 0 : i32
    %c0_i32_1 = arith.constant 0 : i32
    return %arg0, %c0_i32, %c0_i32_0 : i32, i32, i32
  }
  func.func @transform_6(%arg0: i32, %arg1: i32) -> (i32, i32, i32) {
    %c0_i32 = arith.constant 0 : i32
    %c0_i32_0 = arith.constant 0 : i32
    %c0_i32_1 = arith.constant 0 : i32
    return %arg0, %c0_i32, %c0_i32_0 : i32, i32, i32
  }
  func.func @transform_7(%arg0: i32, %arg1: i32) -> (i32, i32, i32) {
    %c0_i32 = arith.constant 0 : i32
    %c0_i32_0 = arith.constant 0 : i32
    %c0_i32_1 = arith.constant 0 : i32
    return %arg0, %c0_i32, %c0_i32_0 : i32, i32, i32
  }
  func.func @transform_8(%arg0: i32, %arg1: i32) -> (i32, i32, i32) {
    %c0_i32 = arith.constant 0 : i32
    %c0_i32_0 = arith.constant 0 : i32
    %c0_i32_1 = arith.constant 0 : i32
    return %arg0, %c0_i32, %c0_i32_0 : i32, i32, i32
  }
}

module attributes {stable_mosaic.version = 11 : i64} {
  func.func @_tnet_head_kernel(%arg0: memref<2x1024xf32, #tpu.memory_space<vmem>>, %arg1: memref<1024x512xbf16, #tpu.memory_space<vmem>>, %arg2: memref<1x512xf32, #tpu.memory_space<vmem>>, %arg3: memref<1x512xf32, #tpu.memory_space<vmem>>, %arg4: memref<1x512xf32, #tpu.memory_space<vmem>>, %arg5: memref<512x256xbf16, #tpu.memory_space<vmem>>, %arg6: memref<1x256xf32, #tpu.memory_space<vmem>>, %arg7: memref<1x256xf32, #tpu.memory_space<vmem>>, %arg8: memref<1x256xf32, #tpu.memory_space<vmem>>, %arg9: memref<256x4096xbf16, #tpu.memory_space<vmem>>, %arg10: memref<1x4096xf32, #tpu.memory_space<vmem>>, %arg11: memref<2x4096xf32, #tpu.memory_space<vmem>>) attributes {dimension_semantics = [], scalar_prefetch = 0 : i64, scratch_operands = 0 : i64, tpu.core_type = #tpu.core_type<tc>} {
    %c0 = arith.constant 0 : index
    %c0_0 = arith.constant 0 : index
    %0 = vector.load %arg0[%c0, %c0_0] : memref<2x1024xf32, #tpu.memory_space<vmem>>, vector<2x1024xf32>
    %1 = arith.truncf %0 : vector<2x1024xf32> to vector<2x1024xbf16>
    %c0_1 = arith.constant 0 : index
    %c0_2 = arith.constant 0 : index
    %2 = vector.load %arg1[%c0_1, %c0_2] : memref<1024x512xbf16, #tpu.memory_space<vmem>>, vector<1024x512xbf16>
    %cst = arith.constant dense<0.000000e+00> : vector<2x512xf32>
    %3 = tpu.matmul %1, %2, %cst {dimension_numbers = #tpu.dot_dimension_numbers<[1], [0], [0], [1], [0, 0, 1, 1], [], []>} : vector<2x1024xbf16>, vector<1024x512xbf16>, vector<2x512xf32> -> vector<2x512xf32>
    %c0_3 = arith.constant 0 : index
    %c0_4 = arith.constant 0 : index
    %4 = vector.load %arg2[%c0_3, %c0_4] : memref<1x512xf32, #tpu.memory_space<vmem>>, vector<1x512xf32>
    %5 = vector.broadcast %4 : vector<1x512xf32> to vector<2x512xf32>
    %6 = arith.addf %3, %5 : vector<2x512xf32>
    %cst_5 = arith.constant dense<0.000000e+00> : vector<512xf32>
    %7 = vector.multi_reduction <add>, %6, %cst_5 [0] : vector<2x512xf32> to vector<512xf32>
    %8 = vector.shape_cast %7 : vector<512xf32> to vector<1x512xf32>
    %cst_6 = arith.constant 2.000000e+00 : f32
    %9 = vector.broadcast %cst_6 : f32 to vector<1x512xf32>
    %10 = arith.divf %8, %9 : vector<1x512xf32>
    %11 = vector.broadcast %10 : vector<1x512xf32> to vector<2x512xf32>
    %12 = arith.subf %6, %11 : vector<2x512xf32>
    %13 = arith.mulf %12, %12 : vector<2x512xf32>
    %cst_7 = arith.constant dense<0.000000e+00> : vector<512xf32>
    %14 = vector.multi_reduction <add>, %13, %cst_7 [0] : vector<2x512xf32> to vector<512xf32>
    %15 = vector.shape_cast %14 : vector<512xf32> to vector<1x512xf32>
    %cst_8 = arith.constant 2.000000e+00 : f32
    %16 = vector.broadcast %cst_8 : f32 to vector<1x512xf32>
    %17 = arith.divf %15, %16 : vector<1x512xf32>
    %18 = vector.broadcast %10 : vector<1x512xf32> to vector<2x512xf32>
    %19 = arith.subf %6, %18 : vector<2x512xf32>
    %cst_9 = arith.constant 9.99999974E-6 : f32
    %20 = vector.broadcast %cst_9 : f32 to vector<1x512xf32>
    %21 = arith.addf %17, %20 : vector<1x512xf32>
    %22 = math.rsqrt %21 : vector<1x512xf32>
    %23 = vector.broadcast %22 : vector<1x512xf32> to vector<2x512xf32>
    %24 = arith.mulf %19, %23 : vector<2x512xf32>
    %c0_10 = arith.constant 0 : index
    %c0_11 = arith.constant 0 : index
    %25 = vector.load %arg3[%c0_10, %c0_11] : memref<1x512xf32, #tpu.memory_space<vmem>>, vector<1x512xf32>
    %26 = vector.broadcast %25 : vector<1x512xf32> to vector<2x512xf32>
    %27 = arith.mulf %24, %26 : vector<2x512xf32>
    %c0_12 = arith.constant 0 : index
    %c0_13 = arith.constant 0 : index
    %28 = vector.load %arg4[%c0_12, %c0_13] : memref<1x512xf32, #tpu.memory_space<vmem>>, vector<1x512xf32>
    %29 = vector.broadcast %28 : vector<1x512xf32> to vector<2x512xf32>
    %30 = arith.addf %27, %29 : vector<2x512xf32>
    %cst_14 = arith.constant 0.000000e+00 : f32
    %31 = vector.broadcast %cst_14 : f32 to vector<2x512xf32>
    %32 = arith.maximumf %30, %31 : vector<2x512xf32>
    %33 = arith.truncf %32 : vector<2x512xf32> to vector<2x512xbf16>
    %c0_15 = arith.constant 0 : index
    %c0_16 = arith.constant 0 : index
    %34 = vector.load %arg5[%c0_15, %c0_16] : memref<512x256xbf16, #tpu.memory_space<vmem>>, vector<512x256xbf16>
    %cst_17 = arith.constant dense<0.000000e+00> : vector<2x256xf32>
    %35 = tpu.matmul %33, %34, %cst_17 {dimension_numbers = #tpu.dot_dimension_numbers<[1], [0], [0], [1], [0, 0, 1, 1], [], []>} : vector<2x512xbf16>, vector<512x256xbf16>, vector<2x256xf32> -> vector<2x256xf32>
    %c0_18 = arith.constant 0 : index
    %c0_19 = arith.constant 0 : index
    %36 = vector.load %arg6[%c0_18, %c0_19] : memref<1x256xf32, #tpu.memory_space<vmem>>, vector<1x256xf32>
    %37 = vector.broadcast %36 : vector<1x256xf32> to vector<2x256xf32>
    %38 = arith.addf %35, %37 : vector<2x256xf32>
    %cst_20 = arith.constant dense<0.000000e+00> : vector<256xf32>
    %39 = vector.multi_reduction <add>, %38, %cst_20 [0] : vector<2x256xf32> to vector<256xf32>
    %40 = vector.shape_cast %39 : vector<256xf32> to vector<1x256xf32>
    %cst_21 = arith.constant 2.000000e+00 : f32
    %41 = vector.broadcast %cst_21 : f32 to vector<1x256xf32>
    %42 = arith.divf %40, %41 : vector<1x256xf32>
    %43 = vector.broadcast %42 : vector<1x256xf32> to vector<2x256xf32>
    %44 = arith.subf %38, %43 : vector<2x256xf32>
    %45 = arith.mulf %44, %44 : vector<2x256xf32>
    %cst_22 = arith.constant dense<0.000000e+00> : vector<256xf32>
    %46 = vector.multi_reduction <add>, %45, %cst_22 [0] : vector<2x256xf32> to vector<256xf32>
    %47 = vector.shape_cast %46 : vector<256xf32> to vector<1x256xf32>
    %cst_23 = arith.constant 2.000000e+00 : f32
    %48 = vector.broadcast %cst_23 : f32 to vector<1x256xf32>
    %49 = arith.divf %47, %48 : vector<1x256xf32>
    %50 = vector.broadcast %42 : vector<1x256xf32> to vector<2x256xf32>
    %51 = arith.subf %38, %50 : vector<2x256xf32>
    %cst_24 = arith.constant 9.99999974E-6 : f32
    %52 = vector.broadcast %cst_24 : f32 to vector<1x256xf32>
    %53 = arith.addf %49, %52 : vector<1x256xf32>
    %54 = math.rsqrt %53 : vector<1x256xf32>
    %55 = vector.broadcast %54 : vector<1x256xf32> to vector<2x256xf32>
    %56 = arith.mulf %51, %55 : vector<2x256xf32>
    %c0_25 = arith.constant 0 : index
    %c0_26 = arith.constant 0 : index
    %57 = vector.load %arg7[%c0_25, %c0_26] : memref<1x256xf32, #tpu.memory_space<vmem>>, vector<1x256xf32>
    %58 = vector.broadcast %57 : vector<1x256xf32> to vector<2x256xf32>
    %59 = arith.mulf %56, %58 : vector<2x256xf32>
    %c0_27 = arith.constant 0 : index
    %c0_28 = arith.constant 0 : index
    %60 = vector.load %arg8[%c0_27, %c0_28] : memref<1x256xf32, #tpu.memory_space<vmem>>, vector<1x256xf32>
    %61 = vector.broadcast %60 : vector<1x256xf32> to vector<2x256xf32>
    %62 = arith.addf %59, %61 : vector<2x256xf32>
    %cst_29 = arith.constant 0.000000e+00 : f32
    %63 = vector.broadcast %cst_29 : f32 to vector<2x256xf32>
    %64 = arith.maximumf %62, %63 : vector<2x256xf32>
    %65 = arith.truncf %64 : vector<2x256xf32> to vector<2x256xbf16>
    %c0_30 = arith.constant 0 : index
    %c0_31 = arith.constant 0 : index
    %66 = vector.load %arg9[%c0_30, %c0_31] : memref<256x4096xbf16, #tpu.memory_space<vmem>>, vector<256x4096xbf16>
    %cst_32 = arith.constant dense<0.000000e+00> : vector<2x4096xf32>
    %67 = tpu.matmul %65, %66, %cst_32 {dimension_numbers = #tpu.dot_dimension_numbers<[1], [0], [0], [1], [0, 0, 1, 1], [], []>} : vector<2x256xbf16>, vector<256x4096xbf16>, vector<2x4096xf32> -> vector<2x4096xf32>
    %c0_33 = arith.constant 0 : index
    %c0_34 = arith.constant 0 : index
    %68 = vector.load %arg10[%c0_33, %c0_34] : memref<1x4096xf32, #tpu.memory_space<vmem>>, vector<1x4096xf32>
    %69 = vector.broadcast %68 : vector<1x4096xf32> to vector<2x4096xf32>
    %70 = arith.addf %67, %69 : vector<2x4096xf32>
    %c0_35 = arith.constant 0 : index
    %c0_36 = arith.constant 0 : index
    %71 = vector.load %arg11[%c0_35, %c0_36] : memref<2x4096xf32, #tpu.memory_space<vmem>>, vector<2x4096xf32>
    tpu.vector_store %arg11[%c0_35, %c0_36], %70 {strides = array<i32>} : memref<2x4096xf32, #tpu.memory_space<vmem>>, vector<2x4096xf32>,
    return
  }
}

module attributes {stable_mosaic.version = 11 : i64} {
  func.func @_mid_layer_kernel(%arg0: i32, %arg1: i32, %arg2: memref<1x64x64xbf16, #tpu.memory_space<vmem>>, %arg3: memref<1x64x64xbf16, #tpu.memory_space<vmem>>, %arg4: memref<1x64xf32, #tpu.memory_space<vmem>>, %arg5: memref<1x64xf32, #tpu.memory_space<vmem>>, %arg6: memref<1x64xf32, #tpu.memory_space<vmem>>, %arg7: memref<1x64x64xbf16, #tpu.memory_space<vmem>>, %arg8: memref<1x1x64xf32, #tpu.memory_space<vmem>>, %arg9: memref<1x1x64xf32, #tpu.memory_space<vmem>>) attributes {dimension_semantics = [#tpu.dimension_semantics<parallel>, #tpu.dimension_semantics<arbitrary>], iteration_bounds = array<i64: 2, 1>, scalar_prefetch = 0 : i64, scratch_operands = 0 : i64, tpu.core_type = #tpu.core_type<tc>, window_params = [{transform_indices = @transform_0, window_bounds = array<i64: 1, 64, 64>}, {transform_indices = @transform_1, window_bounds = array<i64: 1, 64, 64>}, {pipeline_mode = #tpu.pipeline_mode<synchronous>, transform_indices = @transform_2, window_bounds = array<i64: 1, 64>}, {pipeline_mode = #tpu.pipeline_mode<synchronous>, transform_indices = @transform_3, window_bounds = array<i64: 1, 64>}, {pipeline_mode = #tpu.pipeline_mode<synchronous>, transform_indices = @transform_4, window_bounds = array<i64: 1, 64>}, {transform_indices = @transform_5, window_bounds = array<i64: 1, 64, 64>}, {transform_indices = @transform_6, window_bounds = array<i64: 1, 1, 64>}, {transform_indices = @transform_7, window_bounds = array<i64: 1, 1, 64>}]} {
    %c0_i32 = arith.constant 0 : i32
    %0 = arith.cmpi eq, %arg1, %c0_i32 : i32
    %1 = arith.extui %0 : i1 to i32
    %c0_i32_0 = arith.constant 0 : i32
    %2 = arith.cmpi ne, %1, %c0_i32_0 : i32
    scf.if %2 {
      %cst_30 = arith.constant 0.000000e+00 : f32
      %37 = vector.broadcast %cst_30 : f32 to vector<1x1x64xf32>
      %c0_31 = arith.constant 0 : index
      %c0_32 = arith.constant 0 : index
      %c0_33 = arith.constant 0 : index
      %38 = vector.load %arg8[%c0_31, %c0_32, %c0_33] : memref<1x1x64xf32, #tpu.memory_space<vmem>>, vector<1x1x64xf32>
      tpu.vector_store %arg8[%c0_31, %c0_32, %c0_33], %37 {strides = array<i32>} : memref<1x1x64xf32, #tpu.memory_space<vmem>>, vector<1x1x64xf32>,
      %cst_34 = arith.constant 0.000000e+00 : f32
      %39 = vector.broadcast %cst_34 : f32 to vector<1x1x64xf32>
      %c0_35 = arith.constant 0 : index
      %c0_36 = arith.constant 0 : index
      %c0_37 = arith.constant 0 : index
      %40 = vector.load %arg9[%c0_35, %c0_36, %c0_37] : memref<1x1x64xf32, #tpu.memory_space<vmem>>, vector<1x1x64xf32>
      tpu.vector_store %arg9[%c0_35, %c0_36, %c0_37], %39 {strides = array<i32>} : memref<1x1x64xf32, #tpu.memory_space<vmem>>, vector<1x1x64xf32>,
    } else {
    }
    %c0 = arith.constant 0 : index
    %c0_1 = arith.constant 0 : index
    %c0_2 = arith.constant 0 : index
    %3 = vector.load %arg2[%c0, %c0_1, %c0_2] : memref<1x64x64xbf16, #tpu.memory_space<vmem>>, vector<1x64x64xbf16>
    %4 = vector.shape_cast %3 : vector<1x64x64xbf16> to vector<64x64xbf16>
    %5 = arith.extf %4 : vector<64x64xbf16> to vector<64x64xf32>
    %c0_3 = arith.constant 0 : index
    %c0_4 = arith.constant 0 : index
    %6 = vector.load %arg5[%c0_3, %c0_4] : memref<1x64xf32, #tpu.memory_space<vmem>>, vector<1x64xf32>
    %7 = vector.broadcast %6 : vector<1x64xf32> to vector<64x64xf32>
    %8 = arith.mulf %5, %7 : vector<64x64xf32>
    %c0_5 = arith.constant 0 : index
    %c0_6 = arith.constant 0 : index
    %9 = vector.load %arg6[%c0_5, %c0_6] : memref<1x64xf32, #tpu.memory_space<vmem>>, vector<1x64xf32>
    %10 = vector.broadcast %9 : vector<1x64xf32> to vector<64x64xf32>
    %11 = arith.addf %8, %10 : vector<64x64xf32>
    %cst = arith.constant 0.000000e+00 : f32
    %12 = vector.broadcast %cst : f32 to vector<64x64xf32>
    %13 = arith.maximumf %11, %12 : vector<64x64xf32>
    %c0_7 = arith.constant 0 : index
    %c0_8 = arith.constant 0 : index
    %c0_9 = arith.constant 0 : index
    %14 = vector.load %arg3[%c0_7, %c0_8, %c0_9] : memref<1x64x64xbf16, #tpu.memory_space<vmem>>, vector<1x64x64xbf16>
    %15 = vector.shape_cast %14 : vector<1x64x64xbf16> to vector<64x64xbf16>
    %16 = arith.truncf %13 : vector<64x64xf32> to vector<64x64xbf16>
    %cst_10 = arith.constant dense<0.000000e+00> : vector<64x64xf32>
    %17 = tpu.matmul %16, %15, %cst_10 {dimension_numbers = #tpu.dot_dimension_numbers<[1], [0], [0], [1], [0, 0, 1, 1], [], []>} : vector<64x64xbf16>, vector<64x64xbf16>, vector<64x64xf32> -> vector<64x64xf32>
    %c0_11 = arith.constant 0 : index
    %c0_12 = arith.constant 0 : index
    %18 = vector.load %arg4[%c0_11, %c0_12] : memref<1x64xf32, #tpu.memory_space<vmem>>, vector<1x64xf32>
    %19 = vector.broadcast %18 : vector<1x64xf32> to vector<64x64xf32>
    %20 = arith.addf %17, %19 : vector<64x64xf32>
    %21 = vector.shape_cast %20 : vector<64x64xf32> to vector<1x64x64xf32>
    %22 = arith.truncf %21 : vector<1x64x64xf32> to vector<1x64x64xbf16>
    %c0_13 = arith.constant 0 : index
    %c0_14 = arith.constant 0 : index
    %c0_15 = arith.constant 0 : index
    %23 = vector.load %arg7[%c0_13, %c0_14, %c0_15] : memref<1x64x64xbf16, #tpu.memory_space<vmem>>, vector<1x64x64xbf16>
    tpu.vector_store %arg7[%c0_13, %c0_14, %c0_15], %22 {strides = array<i32>} : memref<1x64x64xbf16, #tpu.memory_space<vmem>>, vector<1x64x64xbf16>,
    %c0_16 = arith.constant 0 : index
    %c0_17 = arith.constant 0 : index
    %c0_18 = arith.constant 0 : index
    %24 = vector.load %arg8[%c0_16, %c0_17, %c0_18] : memref<1x1x64xf32, #tpu.memory_space<vmem>>, vector<1x1x64xf32>
    %cst_19 = arith.constant dense<0.000000e+00> : vector<64xf32>
    %25 = vector.multi_reduction <add>, %20, %cst_19 [0] : vector<64x64xf32> to vector<64xf32>
    %26 = vector.shape_cast %25 : vector<64xf32> to vector<1x64xf32>
    %27 = vector.shape_cast %26 : vector<1x64xf32> to vector<1x1x64xf32>
    %28 = arith.addf %24, %27 : vector<1x1x64xf32>
    %c0_20 = arith.constant 0 : index
    %c0_21 = arith.constant 0 : index
    %c0_22 = arith.constant 0 : index
    %29 = vector.load %arg8[%c0_20, %c0_21, %c0_22] : memref<1x1x64xf32, #tpu.memory_space<vmem>>, vector<1x1x64xf32>
    tpu.vector_store %arg8[%c0_20, %c0_21, %c0_22], %28 {strides = array<i32>} : memref<1x1x64xf32, #tpu.memory_space<vmem>>, vector<1x1x64xf32>,
    %c0_23 = arith.constant 0 : index
    %c0_24 = arith.constant 0 : index
    %c0_25 = arith.constant 0 : index
    %30 = vector.load %arg9[%c0_23, %c0_24, %c0_25] : memref<1x1x64xf32, #tpu.memory_space<vmem>>, vector<1x1x64xf32>
    %31 = arith.mulf %20, %20 : vector<64x64xf32>
    %cst_26 = arith.constant dense<0.000000e+00> : vector<64xf32>
    %32 = vector.multi_reduction <add>, %31, %cst_26 [0] : vector<64x64xf32> to vector<64xf32>
    %33 = vector.shape_cast %32 : vector<64xf32> to vector<1x64xf32>
    %34 = vector.shape_cast %33 : vector<1x64xf32> to vector<1x1x64xf32>
    %35 = arith.addf %30, %34 : vector<1x1x64xf32>
    %c0_27 = arith.constant 0 : index
    %c0_28 = arith.constant 0 : index
    %c0_29 = arith.constant 0 : index
    %36 = vector.load %arg9[%c0_27, %c0_28, %c0_29] : memref<1x1x64xf32, #tpu.memory_space<vmem>>, vector<1x1x64xf32>
    tpu.vector_store %arg9[%c0_27, %c0_28, %c0_29], %35 {strides = array<i32>} : memref<1x1x64xf32, #tpu.memory_space<vmem>>, vector<1x1x64xf32>,
    return
  }
  func.func @transform_0(%arg0: i32, %arg1: i32) -> (i32, i32, i32) {
    %c0_i32 = arith.constant 0 : i32
    %c0_i32_0 = arith.constant 0 : i32
    return %arg0, %arg1, %c0_i32 : i32, i32, i32
  }
  func.func @transform_1(%arg0: i32, %arg1: i32) -> (i32, i32, i32) {
    %c0_i32 = arith.constant 0 : i32
    %c0_i32_0 = arith.constant 0 : i32
    %c0_i32_1 = arith.constant 0 : i32
    return %arg0, %c0_i32, %c0_i32_0 : i32, i32, i32
  }
  func.func @transform_2(%arg0: i32, %arg1: i32) -> (i32, i32) {
    %c0_i32 = arith.constant 0 : i32
    %c0_i32_0 = arith.constant 0 : i32
    %c0_i32_1 = arith.constant 0 : i32
    return %c0_i32, %c0_i32_0 : i32, i32
  }
  func.func @transform_3(%arg0: i32, %arg1: i32) -> (i32, i32) {
    %c0_i32 = arith.constant 0 : i32
    %c0_i32_0 = arith.constant 0 : i32
    %c0_i32_1 = arith.constant 0 : i32
    return %c0_i32, %c0_i32_0 : i32, i32
  }
  func.func @transform_4(%arg0: i32, %arg1: i32) -> (i32, i32) {
    %c0_i32 = arith.constant 0 : i32
    %c0_i32_0 = arith.constant 0 : i32
    %c0_i32_1 = arith.constant 0 : i32
    return %c0_i32, %c0_i32_0 : i32, i32
  }
  func.func @transform_5(%arg0: i32, %arg1: i32) -> (i32, i32, i32) {
    %c0_i32 = arith.constant 0 : i32
    %c0_i32_0 = arith.constant 0 : i32
    return %arg0, %arg1, %c0_i32 : i32, i32, i32
  }
  func.func @transform_6(%arg0: i32, %arg1: i32) -> (i32, i32, i32) {
    %c0_i32 = arith.constant 0 : i32
    %c0_i32_0 = arith.constant 0 : i32
    %c0_i32_1 = arith.constant 0 : i32
    return %arg0, %c0_i32, %c0_i32_0 : i32, i32, i32
  }
  func.func @transform_7(%arg0: i32, %arg1: i32) -> (i32, i32, i32) {
    %c0_i32 = arith.constant 0 : i32
    %c0_i32_0 = arith.constant 0 : i32
    %c0_i32_1 = arith.constant 0 : i32
    return %arg0, %c0_i32, %c0_i32_0 : i32, i32, i32
  }
}

module attributes {stable_mosaic.version = 11 : i64} {
  func.func @_mid_layer_kernel(%arg0: i32, %arg1: i32, %arg2: memref<1x64x64xbf16, #tpu.memory_space<vmem>>, %arg3: memref<64x128xbf16, #tpu.memory_space<vmem>>, %arg4: memref<1x128xf32, #tpu.memory_space<vmem>>, %arg5: memref<1x64xf32, #tpu.memory_space<vmem>>, %arg6: memref<1x64xf32, #tpu.memory_space<vmem>>, %arg7: memref<1x64x128xbf16, #tpu.memory_space<vmem>>, %arg8: memref<1x1x128xf32, #tpu.memory_space<vmem>>, %arg9: memref<1x1x128xf32, #tpu.memory_space<vmem>>) attributes {dimension_semantics = [#tpu.dimension_semantics<parallel>, #tpu.dimension_semantics<arbitrary>], iteration_bounds = array<i64: 2, 1>, scalar_prefetch = 0 : i64, scratch_operands = 0 : i64, tpu.core_type = #tpu.core_type<tc>, window_params = [{transform_indices = @transform_0, window_bounds = array<i64: 1, 64, 64>}, {pipeline_mode = #tpu.pipeline_mode<synchronous>, transform_indices = @transform_1, window_bounds = array<i64: 64, 128>}, {pipeline_mode = #tpu.pipeline_mode<synchronous>, transform_indices = @transform_2, window_bounds = array<i64: 1, 128>}, {pipeline_mode = #tpu.pipeline_mode<synchronous>, transform_indices = @transform_3, window_bounds = array<i64: 1, 64>}, {pipeline_mode = #tpu.pipeline_mode<synchronous>, transform_indices = @transform_4, window_bounds = array<i64: 1, 64>}, {transform_indices = @transform_5, window_bounds = array<i64: 1, 64, 128>}, {transform_indices = @transform_6, window_bounds = array<i64: 1, 1, 128>}, {transform_indices = @transform_7, window_bounds = array<i64: 1, 1, 128>}]} {
    %c0_i32 = arith.constant 0 : i32
    %0 = arith.cmpi eq, %arg1, %c0_i32 : i32
    %1 = arith.extui %0 : i1 to i32
    %c0_i32_0 = arith.constant 0 : i32
    %2 = arith.cmpi ne, %1, %c0_i32_0 : i32
    scf.if %2 {
      %cst_29 = arith.constant 0.000000e+00 : f32
      %36 = vector.broadcast %cst_29 : f32 to vector<1x1x128xf32>
      %c0_30 = arith.constant 0 : index
      %c0_31 = arith.constant 0 : index
      %c0_32 = arith.constant 0 : index
      %37 = vector.load %arg8[%c0_30, %c0_31, %c0_32] : memref<1x1x128xf32, #tpu.memory_space<vmem>>, vector<1x1x128xf32>
      tpu.vector_store %arg8[%c0_30, %c0_31, %c0_32], %36 {strides = array<i32>} : memref<1x1x128xf32, #tpu.memory_space<vmem>>, vector<1x1x128xf32>,
      %cst_33 = arith.constant 0.000000e+00 : f32
      %38 = vector.broadcast %cst_33 : f32 to vector<1x1x128xf32>
      %c0_34 = arith.constant 0 : index
      %c0_35 = arith.constant 0 : index
      %c0_36 = arith.constant 0 : index
      %39 = vector.load %arg9[%c0_34, %c0_35, %c0_36] : memref<1x1x128xf32, #tpu.memory_space<vmem>>, vector<1x1x128xf32>
      tpu.vector_store %arg9[%c0_34, %c0_35, %c0_36], %38 {strides = array<i32>} : memref<1x1x128xf32, #tpu.memory_space<vmem>>, vector<1x1x128xf32>,
    } else {
    }
    %c0 = arith.constant 0 : index
    %c0_1 = arith.constant 0 : index
    %c0_2 = arith.constant 0 : index
    %3 = vector.load %arg2[%c0, %c0_1, %c0_2] : memref<1x64x64xbf16, #tpu.memory_space<vmem>>, vector<1x64x64xbf16>
    %4 = vector.shape_cast %3 : vector<1x64x64xbf16> to vector<64x64xbf16>
    %5 = arith.extf %4 : vector<64x64xbf16> to vector<64x64xf32>
    %c0_3 = arith.constant 0 : index
    %c0_4 = arith.constant 0 : index
    %6 = vector.load %arg5[%c0_3, %c0_4] : memref<1x64xf32, #tpu.memory_space<vmem>>, vector<1x64xf32>
    %7 = vector.broadcast %6 : vector<1x64xf32> to vector<64x64xf32>
    %8 = arith.mulf %5, %7 : vector<64x64xf32>
    %c0_5 = arith.constant 0 : index
    %c0_6 = arith.constant 0 : index
    %9 = vector.load %arg6[%c0_5, %c0_6] : memref<1x64xf32, #tpu.memory_space<vmem>>, vector<1x64xf32>
    %10 = vector.broadcast %9 : vector<1x64xf32> to vector<64x64xf32>
    %11 = arith.addf %8, %10 : vector<64x64xf32>
    %cst = arith.constant 0.000000e+00 : f32
    %12 = vector.broadcast %cst : f32 to vector<64x64xf32>
    %13 = arith.maximumf %11, %12 : vector<64x64xf32>
    %c0_7 = arith.constant 0 : index
    %c0_8 = arith.constant 0 : index
    %14 = vector.load %arg3[%c0_7, %c0_8] : memref<64x128xbf16, #tpu.memory_space<vmem>>, vector<64x128xbf16>
    %15 = arith.truncf %13 : vector<64x64xf32> to vector<64x64xbf16>
    %cst_9 = arith.constant dense<0.000000e+00> : vector<64x128xf32>
    %16 = tpu.matmul %15, %14, %cst_9 {dimension_numbers = #tpu.dot_dimension_numbers<[1], [0], [0], [1], [0, 0, 1, 1], [], []>} : vector<64x64xbf16>, vector<64x128xbf16>, vector<64x128xf32> -> vector<64x128xf32>
    %c0_10 = arith.constant 0 : index
    %c0_11 = arith.constant 0 : index
    %17 = vector.load %arg4[%c0_10, %c0_11] : memref<1x128xf32, #tpu.memory_space<vmem>>, vector<1x128xf32>
    %18 = vector.broadcast %17 : vector<1x128xf32> to vector<64x128xf32>
    %19 = arith.addf %16, %18 : vector<64x128xf32>
    %20 = vector.shape_cast %19 : vector<64x128xf32> to vector<1x64x128xf32>
    %21 = arith.truncf %20 : vector<1x64x128xf32> to vector<1x64x128xbf16>
    %c0_12 = arith.constant 0 : index
    %c0_13 = arith.constant 0 : index
    %c0_14 = arith.constant 0 : index
    %22 = vector.load %arg7[%c0_12, %c0_13, %c0_14] : memref<1x64x128xbf16, #tpu.memory_space<vmem>>, vector<1x64x128xbf16>
    tpu.vector_store %arg7[%c0_12, %c0_13, %c0_14], %21 {strides = array<i32>} : memref<1x64x128xbf16, #tpu.memory_space<vmem>>, vector<1x64x128xbf16>,
    %c0_15 = arith.constant 0 : index
    %c0_16 = arith.constant 0 : index
    %c0_17 = arith.constant 0 : index
    %23 = vector.load %arg8[%c0_15, %c0_16, %c0_17] : memref<1x1x128xf32, #tpu.memory_space<vmem>>, vector<1x1x128xf32>
    %cst_18 = arith.constant dense<0.000000e+00> : vector<128xf32>
    %24 = vector.multi_reduction <add>, %19, %cst_18 [0] : vector<64x128xf32> to vector<128xf32>
    %25 = vector.shape_cast %24 : vector<128xf32> to vector<1x128xf32>
    %26 = vector.shape_cast %25 : vector<1x128xf32> to vector<1x1x128xf32>
    %27 = arith.addf %23, %26 : vector<1x1x128xf32>
    %c0_19 = arith.constant 0 : index
    %c0_20 = arith.constant 0 : index
    %c0_21 = arith.constant 0 : index
    %28 = vector.load %arg8[%c0_19, %c0_20, %c0_21] : memref<1x1x128xf32, #tpu.memory_space<vmem>>, vector<1x1x128xf32>
    tpu.vector_store %arg8[%c0_19, %c0_20, %c0_21], %27 {strides = array<i32>} : memref<1x1x128xf32, #tpu.memory_space<vmem>>, vector<1x1x128xf32>,
    %c0_22 = arith.constant 0 : index
    %c0_23 = arith.constant 0 : index
    %c0_24 = arith.constant 0 : index
    %29 = vector.load %arg9[%c0_22, %c0_23, %c0_24] : memref<1x1x128xf32, #tpu.memory_space<vmem>>, vector<1x1x128xf32>
    %30 = arith.mulf %19, %19 : vector<64x128xf32>
    %cst_25 = arith.constant dense<0.000000e+00> : vector<128xf32>
    %31 = vector.multi_reduction <add>, %30, %cst_25 [0] : vector<64x128xf32> to vector<128xf32>
    %32 = vector.shape_cast %31 : vector<128xf32> to vector<1x128xf32>
    %33 = vector.shape_cast %32 : vector<1x128xf32> to vector<1x1x128xf32>
    %34 = arith.addf %29, %33 : vector<1x1x128xf32>
    %c0_26 = arith.constant 0 : index
    %c0_27 = arith.constant 0 : index
    %c0_28 = arith.constant 0 : index
    %35 = vector.load %arg9[%c0_26, %c0_27, %c0_28] : memref<1x1x128xf32, #tpu.memory_space<vmem>>, vector<1x1x128xf32>
    tpu.vector_store %arg9[%c0_26, %c0_27, %c0_28], %34 {strides = array<i32>} : memref<1x1x128xf32, #tpu.memory_space<vmem>>, vector<1x1x128xf32>,
    return
  }
  func.func @transform_0(%arg0: i32, %arg1: i32) -> (i32, i32, i32) {
    %c0_i32 = arith.constant 0 : i32
    %c0_i32_0 = arith.constant 0 : i32
    return %arg0, %arg1, %c0_i32 : i32, i32, i32
  }
  func.func @transform_1(%arg0: i32, %arg1: i32) -> (i32, i32) {
    %c0_i32 = arith.constant 0 : i32
    %c0_i32_0 = arith.constant 0 : i32
    %c0_i32_1 = arith.constant 0 : i32
    return %c0_i32, %c0_i32_0 : i32, i32
  }
  func.func @transform_2(%arg0: i32, %arg1: i32) -> (i32, i32) {
    %c0_i32 = arith.constant 0 : i32
    %c0_i32_0 = arith.constant 0 : i32
    %c0_i32_1 = arith.constant 0 : i32
    return %c0_i32, %c0_i32_0 : i32, i32
  }
  func.func @transform_3(%arg0: i32, %arg1: i32) -> (i32, i32) {
    %c0_i32 = arith.constant 0 : i32
    %c0_i32_0 = arith.constant 0 : i32
    %c0_i32_1 = arith.constant 0 : i32
    return %c0_i32, %c0_i32_0 : i32, i32
  }
  func.func @transform_4(%arg0: i32, %arg1: i32) -> (i32, i32) {
    %c0_i32 = arith.constant 0 : i32
    %c0_i32_0 = arith.constant 0 : i32
    %c0_i32_1 = arith.constant 0 : i32
    return %c0_i32, %c0_i32_0 : i32, i32
  }
  func.func @transform_5(%arg0: i32, %arg1: i32) -> (i32, i32, i32) {
    %c0_i32 = arith.constant 0 : i32
    %c0_i32_0 = arith.constant 0 : i32
    return %arg0, %arg1, %c0_i32 : i32, i32, i32
  }
  func.func @transform_6(%arg0: i32, %arg1: i32) -> (i32, i32, i32) {
    %c0_i32 = arith.constant 0 : i32
    %c0_i32_0 = arith.constant 0 : i32
    %c0_i32_1 = arith.constant 0 : i32
    return %arg0, %c0_i32, %c0_i32_0 : i32, i32, i32
  }
  func.func @transform_7(%arg0: i32, %arg1: i32) -> (i32, i32, i32) {
    %c0_i32 = arith.constant 0 : i32
    %c0_i32_0 = arith.constant 0 : i32
    %c0_i32_1 = arith.constant 0 : i32
    return %arg0, %c0_i32, %c0_i32_0 : i32, i32, i32
  }
}

module attributes {stable_mosaic.version = 11 : i64} {
  func.func @_pool_layer_kernel(%arg0: i32, %arg1: i32, %arg2: memref<1x64x128xbf16, #tpu.memory_space<vmem>>, %arg3: memref<128x256xbf16, #tpu.memory_space<vmem>>, %arg4: memref<1x256xf32, #tpu.memory_space<vmem>>, %arg5: memref<1x128xf32, #tpu.memory_space<vmem>>, %arg6: memref<1x128xf32, #tpu.memory_space<vmem>>, %arg7: memref<1x1x256xf32, #tpu.memory_space<vmem>>, %arg8: memref<1x1x256xf32, #tpu.memory_space<vmem>>, %arg9: memref<1x1x256xf32, #tpu.memory_space<vmem>>, %arg10: memref<1x1x256xf32, #tpu.memory_space<vmem>>) attributes {dimension_semantics = [#tpu.dimension_semantics<parallel>, #tpu.dimension_semantics<arbitrary>], iteration_bounds = array<i64: 2, 1>, scalar_prefetch = 0 : i64, scratch_operands = 0 : i64, tpu.core_type = #tpu.core_type<tc>, window_params = [{transform_indices = @transform_0, window_bounds = array<i64: 1, 64, 128>}, {pipeline_mode = #tpu.pipeline_mode<synchronous>, transform_indices = @transform_1, window_bounds = array<i64: 128, 256>}, {pipeline_mode = #tpu.pipeline_mode<synchronous>, transform_indices = @transform_2, window_bounds = array<i64: 1, 256>}, {pipeline_mode = #tpu.pipeline_mode<synchronous>, transform_indices = @transform_3, window_bounds = array<i64: 1, 128>}, {pipeline_mode = #tpu.pipeline_mode<synchronous>, transform_indices = @transform_4, window_bounds = array<i64: 1, 128>}, {transform_indices = @transform_5, window_bounds = array<i64: 1, 1, 256>}, {transform_indices = @transform_6, window_bounds = array<i64: 1, 1, 256>}, {transform_indices = @transform_7, window_bounds = array<i64: 1, 1, 256>}, {transform_indices = @transform_8, window_bounds = array<i64: 1, 1, 256>}]} {
    %c0_i32 = arith.constant 0 : i32
    %0 = arith.cmpi eq, %arg1, %c0_i32 : i32
    %1 = arith.extui %0 : i1 to i32
    %c0_i32_0 = arith.constant 0 : i32
    %2 = arith.cmpi ne, %1, %c0_i32_0 : i32
    scf.if %2 {
      %cst_40 = arith.constant 0.000000e+00 : f32
      %45 = vector.broadcast %cst_40 : f32 to vector<1x1x256xf32>
      %c0_41 = arith.constant 0 : index
      %c0_42 = arith.constant 0 : index
      %c0_43 = arith.constant 0 : index
      %46 = vector.load %arg7[%c0_41, %c0_42, %c0_43] : memref<1x1x256xf32, #tpu.memory_space<vmem>>, vector<1x1x256xf32>
      tpu.vector_store %arg7[%c0_41, %c0_42, %c0_43], %45 {strides = array<i32>} : memref<1x1x256xf32, #tpu.memory_space<vmem>>, vector<1x1x256xf32>,
      %cst_44 = arith.constant 0.000000e+00 : f32
      %47 = vector.broadcast %cst_44 : f32 to vector<1x1x256xf32>
      %c0_45 = arith.constant 0 : index
      %c0_46 = arith.constant 0 : index
      %c0_47 = arith.constant 0 : index
      %48 = vector.load %arg8[%c0_45, %c0_46, %c0_47] : memref<1x1x256xf32, #tpu.memory_space<vmem>>, vector<1x1x256xf32>
      tpu.vector_store %arg8[%c0_45, %c0_46, %c0_47], %47 {strides = array<i32>} : memref<1x1x256xf32, #tpu.memory_space<vmem>>, vector<1x1x256xf32>,
      %cst_48 = arith.constant 0xFF800000 : f32
      %49 = vector.broadcast %cst_48 : f32 to vector<1x1x256xf32>
      %c0_49 = arith.constant 0 : index
      %c0_50 = arith.constant 0 : index
      %c0_51 = arith.constant 0 : index
      %50 = vector.load %arg9[%c0_49, %c0_50, %c0_51] : memref<1x1x256xf32, #tpu.memory_space<vmem>>, vector<1x1x256xf32>
      tpu.vector_store %arg9[%c0_49, %c0_50, %c0_51], %49 {strides = array<i32>} : memref<1x1x256xf32, #tpu.memory_space<vmem>>, vector<1x1x256xf32>,
      %cst_52 = arith.constant 0x7F800000 : f32
      %51 = vector.broadcast %cst_52 : f32 to vector<1x1x256xf32>
      %c0_53 = arith.constant 0 : index
      %c0_54 = arith.constant 0 : index
      %c0_55 = arith.constant 0 : index
      %52 = vector.load %arg10[%c0_53, %c0_54, %c0_55] : memref<1x1x256xf32, #tpu.memory_space<vmem>>, vector<1x1x256xf32>
      tpu.vector_store %arg10[%c0_53, %c0_54, %c0_55], %51 {strides = array<i32>} : memref<1x1x256xf32, #tpu.memory_space<vmem>>, vector<1x1x256xf32>,
    } else {
    }
    %c0 = arith.constant 0 : index
    %c0_1 = arith.constant 0 : index
    %c0_2 = arith.constant 0 : index
    %3 = vector.load %arg2[%c0, %c0_1, %c0_2] : memref<1x64x128xbf16, #tpu.memory_space<vmem>>, vector<1x64x128xbf16>
    %4 = vector.shape_cast %3 : vector<1x64x128xbf16> to vector<64x128xbf16>
    %5 = arith.extf %4 : vector<64x128xbf16> to vector<64x128xf32>
    %c0_3 = arith.constant 0 : index
    %c0_4 = arith.constant 0 : index
    %6 = vector.load %arg5[%c0_3, %c0_4] : memref<1x128xf32, #tpu.memory_space<vmem>>, vector<1x128xf32>
    %7 = vector.broadcast %6 : vector<1x128xf32> to vector<64x128xf32>
    %8 = arith.mulf %5, %7 : vector<64x128xf32>
    %c0_5 = arith.constant 0 : index
    %c0_6 = arith.constant 0 : index
    %9 = vector.load %arg6[%c0_5, %c0_6] : memref<1x128xf32, #tpu.memory_space<vmem>>, vector<1x128xf32>
    %10 = vector.broadcast %9 : vector<1x128xf32> to vector<64x128xf32>
    %11 = arith.addf %8, %10 : vector<64x128xf32>
    %cst = arith.constant 0.000000e+00 : f32
    %12 = vector.broadcast %cst : f32 to vector<64x128xf32>
    %13 = arith.maximumf %11, %12 : vector<64x128xf32>
    %14 = arith.truncf %13 : vector<64x128xf32> to vector<64x128xbf16>
    %c0_7 = arith.constant 0 : index
    %c0_8 = arith.constant 0 : index
    %15 = vector.load %arg3[%c0_7, %c0_8] : memref<128x256xbf16, #tpu.memory_space<vmem>>, vector<128x256xbf16>
    %cst_9 = arith.constant dense<0.000000e+00> : vector<64x256xf32>
    %16 = tpu.matmul %14, %15, %cst_9 {dimension_numbers = #tpu.dot_dimension_numbers<[1], [0], [0], [1], [0, 0, 1, 1], [], []>} : vector<64x128xbf16>, vector<128x256xbf16>, vector<64x256xf32> -> vector<64x256xf32>
    %c0_10 = arith.constant 0 : index
    %c0_11 = arith.constant 0 : index
    %17 = vector.load %arg4[%c0_10, %c0_11] : memref<1x256xf32, #tpu.memory_space<vmem>>, vector<1x256xf32>
    %18 = vector.broadcast %17 : vector<1x256xf32> to vector<64x256xf32>
    %19 = arith.addf %16, %18 : vector<64x256xf32>
    %c0_12 = arith.constant 0 : index
    %c0_13 = arith.constant 0 : index
    %c0_14 = arith.constant 0 : index
    %20 = vector.load %arg7[%c0_12, %c0_13, %c0_14] : memref<1x1x256xf32, #tpu.memory_space<vmem>>, vector<1x1x256xf32>
    %cst_15 = arith.constant dense<0.000000e+00> : vector<256xf32>
    %21 = vector.multi_reduction <add>, %19, %cst_15 [0] : vector<64x256xf32> to vector<256xf32>
    %22 = vector.shape_cast %21 : vector<256xf32> to vector<1x256xf32>
    %23 = vector.shape_cast %22 : vector<1x256xf32> to vector<1x1x256xf32>
    %24 = arith.addf %20, %23 : vector<1x1x256xf32>
    %c0_16 = arith.constant 0 : index
    %c0_17 = arith.constant 0 : index
    %c0_18 = arith.constant 0 : index
    %25 = vector.load %arg7[%c0_16, %c0_17, %c0_18] : memref<1x1x256xf32, #tpu.memory_space<vmem>>, vector<1x1x256xf32>
    tpu.vector_store %arg7[%c0_16, %c0_17, %c0_18], %24 {strides = array<i32>} : memref<1x1x256xf32, #tpu.memory_space<vmem>>, vector<1x1x256xf32>,
    %c0_19 = arith.constant 0 : index
    %c0_20 = arith.constant 0 : index
    %c0_21 = arith.constant 0 : index
    %26 = vector.load %arg8[%c0_19, %c0_20, %c0_21] : memref<1x1x256xf32, #tpu.memory_space<vmem>>, vector<1x1x256xf32>
    %27 = arith.mulf %19, %19 : vector<64x256xf32>
    %cst_22 = arith.constant dense<0.000000e+00> : vector<256xf32>
    %28 = vector.multi_reduction <add>, %27, %cst_22 [0] : vector<64x256xf32> to vector<256xf32>
    %29 = vector.shape_cast %28 : vector<256xf32> to vector<1x256xf32>
    %30 = vector.shape_cast %29 : vector<1x256xf32> to vector<1x1x256xf32>
    %31 = arith.addf %26, %30 : vector<1x1x256xf32>
    %c0_23 = arith.constant 0 : index
    %c0_24 = arith.constant 0 : index
    %c0_25 = arith.constant 0 : index
    %32 = vector.load %arg8[%c0_23, %c0_24, %c0_25] : memref<1x1x256xf32, #tpu.memory_space<vmem>>, vector<1x1x256xf32>
    tpu.vector_store %arg8[%c0_23, %c0_24, %c0_25], %31 {strides = array<i32>} : memref<1x1x256xf32, #tpu.memory_space<vmem>>, vector<1x1x256xf32>,
    %c0_26 = arith.constant 0 : index
    %c0_27 = arith.constant 0 : index
    %c0_28 = arith.constant 0 : index
    %33 = vector.load %arg9[%c0_26, %c0_27, %c0_28] : memref<1x1x256xf32, #tpu.memory_space<vmem>>, vector<1x1x256xf32>
    %cst_29 = arith.constant dense<0xFF800000> : vector<256xf32>
    %34 = vector.multi_reduction <maximumf>, %19, %cst_29 [0] : vector<64x256xf32> to vector<256xf32>
    %35 = vector.shape_cast %34 : vector<256xf32> to vector<1x256xf32>
    %36 = vector.shape_cast %35 : vector<1x256xf32> to vector<1x1x256xf32>
    %37 = arith.maximumf %33, %36 : vector<1x1x256xf32>
    %c0_30 = arith.constant 0 : index
    %c0_31 = arith.constant 0 : index
    %c0_32 = arith.constant 0 : index
    %38 = vector.load %arg9[%c0_30, %c0_31, %c0_32] : memref<1x1x256xf32, #tpu.memory_space<vmem>>, vector<1x1x256xf32>
    tpu.vector_store %arg9[%c0_30, %c0_31, %c0_32], %37 {strides = array<i32>} : memref<1x1x256xf32, #tpu.memory_space<vmem>>, vector<1x1x256xf32>,
    %c0_33 = arith.constant 0 : index
    %c0_34 = arith.constant 0 : index
    %c0_35 = arith.constant 0 : index
    %39 = vector.load %arg10[%c0_33, %c0_34, %c0_35] : memref<1x1x256xf32, #tpu.memory_space<vmem>>, vector<1x1x256xf32>
    %cst_36 = arith.constant dense<0x7F800000> : vector<256xf32>
    %40 = vector.multi_reduction <minimumf>, %19, %cst_36 [0] : vector<64x256xf32> to vector<256xf32>
    %41 = vector.shape_cast %40 : vector<256xf32> to vector<1x256xf32>
    %42 = vector.shape_cast %41 : vector<1x256xf32> to vector<1x1x256xf32>
    %43 = arith.minimumf %39, %42 : vector<1x1x256xf32>
    %c0_37 = arith.constant 0 : index
    %c0_38 = arith.constant 0 : index
    %c0_39 = arith.constant 0 : index
    %44 = vector.load %arg10[%c0_37, %c0_38, %c0_39] : memref<1x1x256xf32, #tpu.memory_space<vmem>>, vector<1x1x256xf32>
    tpu.vector_store %arg10[%c0_37, %c0_38, %c0_39], %43 {strides = array<i32>} : memref<1x1x256xf32, #tpu.memory_space<vmem>>, vector<1x1x256xf32>,
    return
  }
  func.func @transform_0(%arg0: i32, %arg1: i32) -> (i32, i32, i32) {
    %c0_i32 = arith.constant 0 : i32
    %c0_i32_0 = arith.constant 0 : i32
    return %arg0, %arg1, %c0_i32 : i32, i32, i32
  }
  func.func @transform_1(%arg0: i32, %arg1: i32) -> (i32, i32) {
    %c0_i32 = arith.constant 0 : i32
    %c0_i32_0 = arith.constant 0 : i32
    %c0_i32_1 = arith.constant 0 : i32
    return %c0_i32, %c0_i32_0 : i32, i32
  }
  func.func @transform_2(%arg0: i32, %arg1: i32) -> (i32, i32) {
    %c0_i32 = arith.constant 0 : i32
    %c0_i32_0 = arith.constant 0 : i32
    %c0_i32_1 = arith.constant 0 : i32
    return %c0_i32, %c0_i32_0 : i32, i32
  }
  func.func @transform_3(%arg0: i32, %arg1: i32) -> (i32, i32) {
    %c0_i32 = arith.constant 0 : i32
    %c0_i32_0 = arith.constant 0 : i32
    %c0_i32_1 = arith.constant 0 : i32
    return %c0_i32, %c0_i32_0 : i32, i32
  }
  func.func @transform_4(%arg0: i32, %arg1: i32) -> (i32, i32) {
    %c0_i32 = arith.constant 0 : i32
    %c0_i32_0 = arith.constant 0 : i32
    %c0_i32_1 = arith.constant 0 : i32
    return %c0_i32, %c0_i32_0 : i32, i32
  }
  func.func @transform_5(%arg0: i32, %arg1: i32) -> (i32, i32, i32) {
    %c0_i32 = arith.constant 0 : i32
    %c0_i32_0 = arith.constant 0 : i32
    %c0_i32_1 = arith.constant 0 : i32
    return %arg0, %c0_i32, %c0_i32_0 : i32, i32, i32
  }
  func.func @transform_6(%arg0: i32, %arg1: i32) -> (i32, i32, i32) {
    %c0_i32 = arith.constant 0 : i32
    %c0_i32_0 = arith.constant 0 : i32
    %c0_i32_1 = arith.constant 0 : i32
    return %arg0, %c0_i32, %c0_i32_0 : i32, i32, i32
  }
  func.func @transform_7(%arg0: i32, %arg1: i32) -> (i32, i32, i32) {
    %c0_i32 = arith.constant 0 : i32
    %c0_i32_0 = arith.constant 0 : i32
    %c0_i32_1 = arith.constant 0 : i32
    return %arg0, %c0_i32, %c0_i32_0 : i32, i32, i32
  }
  func.func @transform_8(%arg0: i32, %arg1: i32) -> (i32, i32, i32) {
    %c0_i32 = arith.constant 0 : i32
    %c0_i32_0 = arith.constant 0 : i32
    %c0_i32_1 = arith.constant 0 : i32
    return %arg0, %c0_i32, %c0_i32_0 : i32, i32, i32
  }
}

</mosaic_0001>

<bundles_post_ra>
// kernel: custom-call.2
= control target key start
LH: loop header
LB: loop body
LE: loop exit
PB: predicated region body
PF: predicated region fallthrough
CT: control target
= control target key end

     0   :  { %s1740_s30 = smov 0   ;;  %s1742_s10 = smov 0   ;;  %s2066_s0 = inlined_call_operand.vmem [shape: f32[2,2,2], index: 0, kind: input, shape index: {}]   ;;  %s2067_s1 = inlined_call_operand.vmem [shape: f32[2,2,2], index: 1, kind: input, shape index: {}]   ;;  %s2068_s2 = inlined_call_operand.vmem [shape: f32[2,2,2], index: 2, kind: input, shape index: {}]   ;;  %s2069_s3 = inlined_call_operand.vmem [shape: f32[2,2,2], index: 3, kind: input, shape index: {}]   ;;  %s2070_s4 = inlined_call_operand.vmem [shape: f32[2,2], index: 4, kind: output, shape index: {0}]   ;;  %s2071_s5 = inlined_call_operand.vmem [shape: f32[2,2], index: 5, kind: output, shape index: {1}]   ;;  %s2072_s6 = inlined_call_operand.vmem [shape: f32[2,2,2], index: 6, kind: output, shape index: {2}]   ;;  %s2073_s7 = inlined_call_operand.vmem [shape: f32[2,2,2], index: 7, kind: output, shape index: {3}]   ;;  %s2074_s8 = inlined_call_operand.vmem [shape: f32[2,2,2], index: 8, kind: output, shape index: {4}]   ;;  %s2075_s9 = inlined_call_operand.vmem [shape: f32[2,2,2], index: 9, kind: output, shape index: {5}]  }
   0x1   :  { %s1744_s11 = smov 0  }
   0x2 LB: > { %s1756_s12 = sadd.s32 4294967295, %s1677_s11   ;;  %s1759_s13 = sadd.s32 1, %s1677_s11   ;;  %s1677_s11 = sphi %s1744_s11, %s2094_s11   ;;  %s1673_s10 = sphi %s1742_s10, %s2093_s10   ;;  %s1669_s30 = sphi %s1740_s30, %s2092_s30  }
   0x3   : > { %s20_s14 = sshrl.u32 %s1677_s11, 3  ;;  %s21_s15 = sshrl.u32 %s1759_s13, 3 }
   0x4   : > { %s22_s16 = ssub.s32 %s20_s14, %s21_s15  ;;  %s25_s17 = sadd.s32 1, %s1673_s10 }
   0x5   : > { %p23_p0 = scmp.eq.s32.totalorder %s22_s16, 0  ;;  %p35_p1 = scmp.ne.s32.totalorder %s1673_s10, %s1669_s30 }
   0x6   : > { %p36_p2 = scmp.eq.s32.totalorder %s1756_s12, 1  ;;  %p1538_p4 = scmp.ge.s32.totalorder %s1677_s11, 2 }
   0x7   : > { %s1768_s18 = scalar_select %p23_p0, %s1673_s10, %s25_s17  }
   0x8   : > { %p1770_p3 = por %p36_p2, %p35_p1  ;;  %86 = sbr.rel (%p1538_p4) target bundleno = 18 (0x12), region = 16 }
   0x9   : > { %2076 = sst [smem:[#allocation33_spill]] %s1768_s18  ;;  %s88_s20 = sand.u32 (!%p1538_p4), 1, %s1677_s11  }
   0xa   : > { %s1540_s21 = sshll.u32 (!%p1538_p4), %s1677_s11, 1  ;;  %s1539_s22 = sshll.u32 (!%p1538_p4), %s88_s20, 1 }
   0xb   : > { %s92_s25 = scalar_lea.vmem (!%p1538_p4), %s2066_s0, %s1540_s21  ;;  %s90_s26 = scalar_lea.vmem (!%p1538_p4), [#allocation1], %s1539_s22 }
   0xc   : > { %s131_s29 = scalar_lea.vmem (!%p1538_p4), %s2067_s1, %s1540_s21  ;;  %s170_s16 = scalar_lea.vmem (!%p1538_p4), %s2068_s2, %s1540_s21 }
   0xd   : > { %v109_v0 = vld [vmem:[%s92_s25] sm:$0x3]  ;;  %s129_s17 = scalar_lea.vmem [#allocation3], %s1539_s22  ;;  %s209_s23 = scalar_lea.vmem %s2069_s3, %s1540_s21 }
   0xe   : > { %110 = vst [vmem:[%s90_s26] sm:$0x3] %v109_v0  ;;  %v148_v1 = vld [vmem:[%s131_s29] sm:$0x3]  ;;  %s168_s24 = scalar_lea.vmem [#allocation5], %s1539_s22  ;;  %s207_s25 = scalar_lea.vmem [#allocation7], %s1539_s22 }
   0xf   : > { %149 = vst [vmem:[%s129_s17] sm:$0x3] %v148_v1  ;;  %v187_v2 = vld [vmem:[%s170_s16] sm:$0x3] }
  0x10   : > { %188 = vst [vmem:[%s168_s24] sm:$0x3] %v187_v2  ;;  %v226_v3 = vld [vmem:[%s209_s23] sm:$0x3] }
  0x11   : > { %227 = vst [vmem:[%s207_s25] sm:$0x3] %v226_v3 }
  0x12 PF: > { %p1547_p5 = scmp.ge.s32.totalorder %s1677_s11, 1  ;;  %p244_p6 = scmp.lt.s32.totalorder %s1677_s11, 3 }
  0x14   : > { %p245_p7 = pnand %p1547_p5, %p244_p6 }
  0x16   : > { %248 = sbr.rel (%p245_p7) target bundleno = 994 (0x3e2), region = 140 }
  0x1b   : > { %s267_s26 = sand.u32 1, %s1756_s12   ;;  %s285_s27 = sand.u32 1, %s1669_s30   ;;  %v349_v4 = vlaneseq  ;;  %v1687_v5 = vmov 0.0  }
  0x1c   : > { %s1793_s28 = sshll.u32 %s267_s26, 1  ;;  %s1795_s18 = sshll.u32 %s285_s27, 1  ;;  %344 = vst [vmem:[#allocation12] sm:$0xff] %v1687_v5  ;;  %345 = vst [vmem:[#allocation14] sm:$0xff] %v1687_v5 }
  0x1d   : > { %346 = vst [vmem:[#allocation16] sm:$0xff] %v1687_v5  ;;  %347 = vst [vmem:[#allocation18] sm:$0xff] %v1687_v5  ;;  %v1797_v6 = vand.u32 127, %v349_v4  ;;  %v1799_v7 = vshrl.u32 %v349_v4, 7  ;;  %s269_s11 = scalar_lea.vmem [#allocation1], %s1793_s28  ;;  %s273_s30 = scalar_lea.vmem [#allocation3], %s1793_s28 }
  0x1e   : > { %v313_v8 = vld [vmem:[%s269_s11] sm:$0x3]  ;;  %v318_v9 = vld [vmem:[%s273_s30] sm:$0x3]  ;;  %s277_s21 = scalar_lea.vmem [#allocation5], %s1793_s28  ;;  %s281_s22 = scalar_lea.vmem [#allocation7], %s1793_s28 }
  0x1f   : > { %314 = vst [vmem:[#allocation0] sm:$0x3] %v313_v8  ;;  %319 = vst [vmem:[#allocation2] sm:$0x3] %v318_v9  ;;  %v323_v10 = vld [vmem:[%s277_s21] sm:$0x3]  ;;  %v351_v6 = vmov %v1797_v6  ;;  %v354_v7 = vmov %v1799_v7 }
  0x20   : > { %v328_v11 = vld [vmem:[%s281_s22] sm:$0x3]  ;;  %324 = vst [vmem:[#allocation4] sm:$0x3] %v323_v10  ;;  %v364_v6 = vmov %v1797_v6  ;;  %v367_v7 = vmov %v1799_v7  ;;  %s332_s29 = smov [#allocation20]  ;;  %s335_s14 = smov [#allocation21]  ;;  %vm358_vm0 = vcmp.eq.s32.totalorder %v354_v7, %v351_v6 }
  0x21   : > { %329 = vst [vmem:[#allocation6] sm:$0x3] %v328_v11  ;;  %vm371_vm1 = vcmp.eq.s32.totalorder %v367_v7, %v364_v6  ;;  %s348_s15 = smov [#allocation12]  ;;  %s361_s16 = smov [#allocation18]  ;;  %vm1427_vm2 = vcmp.lt.s32.totalorder %v1797_v6, 2  ;;  %v1419_v6 = vmov %v1797_v6  ;;  %v1422_v7 = vmov %v1799_v7 }
  0x22   : > { %s338_s17 = smov [#allocation22]  ;;  %s341_s20 = smov [#allocation23]  ;;  %vm1432_vm3 = vcmp.eq.s32.totalorder %v1422_v7, %v1419_v6  ;;  %v1470_v6 = vmov %v1797_v6  ;;  %v1439_v7 = vmov %v1799_v7 }
  0x23   : > { %v355_v12 = vld [vmem:[%s348_s15] sm:$0x3]  ;;  %s1423_s30 = smov [#allocation20]  ;;  %s1440_s21 = smov [#allocation21]  ;;  %v1436_v6 = vmov %v1797_v6  ;;  %v1473_v7 = vmov %v1799_v7 }
  0x24   : > { %v368_v13 = vld [vmem:[%s361_s16] sm:$0x3]  ;;  %v359_v16 = vsel %vm358_vm0, 1.0, %v355_v12  ;;  %s1457_s22 = smov [#allocation22]  ;;  %v1453_v6 = vmov %v1797_v6  ;;  %v1456_v7 = vmov %v1799_v7  ;;  %vm1483_vm4 = vcmp.eq.s32.totalorder %v1473_v7, %v1470_v6 }
  0x25   : > { %v372_v17 = vsel %vm371_vm1, 1.0, %v368_v13  ;;  %360 = vst [vmem:[%s348_s15] sm:$0x3] %v359_v16 }
  0x26   : > { %v333_v14 = vld [vmem:[#allocation0] sm:$0xff]  ;;  %v336_v15 = vld [vmem:[#allocation2] sm:$0xff]  ;;  %373 = vst [vmem:[%s361_s16] sm:$0x3] %v372_v17 }
  0x27   : > { %334 = vst [vmem:[%s332_s29] sm:$0xff] %v333_v14  ;;  %337 = vst [vmem:[%s335_s14] sm:$0xff] %v336_v15  ;;  %v339_v18 = vld [vmem:[#allocation4] sm:$0xff]  ;;  %s1474_s29 = smov [#allocation23] }
  0x28   : > { %v342_v19 = vld [vmem:[#allocation6] sm:$0xff]  ;;  %340 = vst [vmem:[%s338_s17] sm:$0xff] %v339_v18 }
  0x29   : > { %343 = vst [vmem:[%s341_s20] sm:$0xff] %v342_v19 }
  0x2e   : > { %v1429_v20 = vld [vmem:[%s1423_s30] sm:$0x3] }
  0x2f   : > { %v1446_v21 = vld [vmem:[%s1440_s21] sm:$0x3]  ;;  %v1430_v22 = vsel %vm1427_vm2, %v1429_v20, 0.0 }
  0x30   : > { %v1447_v23 = vsel %vm1427_vm2, %v1446_v21, 0.0  ;;  %v1463_v24 = vld [vmem:[%s1457_s22] sm:$0x3]  ;;  %v1431_v26 = vmul.f32 %v1430_v22, %v1430_v22 }
  0x31   : > { %v1480_v25 = vld [vmem:[%s1474_s29] sm:$0x3]  ;;  %v1448_v27 = vmul.f32 %v1447_v23, %v1447_v23  ;;  %v1464_v28 = vsel %vm1427_vm2, %v1463_v24, 0.0 }
  0x32   : > { %v1481_v29 = vsel %vm1427_vm2, %v1480_v25, 0.0  ;;  %v1465_v30 = vmul.f32 %v1464_v28, %v1464_v28  ;;  %v1433_v33 = vsel %vm1432_vm3, 0.0, %v1431_v26 }
  0x33   : > { %v1450_v31 = vadd.f32 %v1448_v27, %v1431_v26  ;;  %v1482_v32 = vmul.f32 %v1481_v29, %v1481_v29  ;;  %v1449_v34 = vadd.f32 %v1448_v27, %v1433_v33 }
  0x35   : > { %v1467_v35 = vadd.f32 %v1465_v30, %v1450_v31  ;;  %v1466_v36 = vadd.f32 %v1465_v30, %v1449_v34  ;;  %v1484_v37 = vsel %vm1483_vm4, 0.0, %v1482_v32 }
  0x37   : > { %v1486_v38 = vadd.f32 %v1482_v32, %v1467_v35  ;;  %v1485_v39 = vadd.f32 %v1484_v37, %v1466_v36 }
  0x39   : > { %1487 = vadd.xlane.f32.xlu0 %v1486_v38 }
  0x3d   : > { %1495 = vadd.xlane.f32.xlu0 %v1485_v39 }
  0xc2   : > { %v1488_v40 = vpop.xlane.xlu0 %1487 }
  0xc3   : > { %v1489_v41 = vrot.slane %v1488_v40, 4 }
  0xc5   : > { %v1490_v42 = vadd.f32 %v1489_v41, %v1488_v40 }
  0xc6   : > { %v1496_v43 = vpop.xlane.xlu0 %1495 }
  0xc7   : > { %v1491_v44 = vrot.slane %v1490_v42, 2  ;;  %v1497_v45 = vrot.slane %v1496_v43, 4 }
  0xc9   : > { %v1498_v46 = vadd.f32 %v1497_v45, %v1496_v43  ;;  %v1492_v47 = vadd.f32 %v1491_v44, %v1490_v42 }
  0xcb   : > { %v1499_v48 = vrot.slane %v1498_v46, 2  ;;  %v1493_v50 = vrot.slane %v1492_v47, 1 }
  0xcd   : > { %v1500_v49 = vadd.f32 %v1499_v48, %v1498_v46  ;;  %v1494_v53 = vadd.f32 %v1493_v50, %v1492_v47 }
  0xcf   : > { %v1501_v51 = vrot.slane %v1500_v49, 1 }
  0xd1   : > { %v1502_v52 = vadd.f32 %v1501_v51, %v1500_v49 }
  0xd3   : > { %1588 = vpush %v1502_v52 }
  0xd4   : > { %1590 = vpush %v1494_v53 }
 0x104   : > { %s1589_s14 = spop %1588 }
 0x105   : > { %s1591_s15 = spop %1590 }
 0x106   : > { %s1505_s16 = smul.f32 1e-10, %s1591_s15 }
 0x108   : > { %p1506_p8 = scmp.le.f32.partialorder %s1589_s14, %s1505_s16 }
 0x109   : > { %s1833_s17 = smov (!%p1506_p8), 0  }
 0x10a   : > { %1509 = sbr.rel (%p1506_p8) target bundleno = 948 (0x3b4), region = 467 }
 0x10f LB: >> { %s1838_s20 = smov 0   ;;  %s1681_s17 = sphi %s1833_s17, %s2078_s17  }
 0x110 LB: >>> { %s478_s30 = smov [#allocation20]  ;;  %v482_v6 = vmov %v1797_v6  ;;  %v485_v7 = vmov %v1799_v7  ;;  %s498_s21 = smov [#allocation21]  ;;  %vm801_vm14 = vcmp.eq.s32.totalorder %v1799_v7, 0  ;;  %vm813_vm15 = vcmp.eq.s32.totalorder %v1799_v7, 1  ;;  %s1685_s20 = sphi %s1838_s20, %s477_s20  }
 0x111   : >>> { %v502_v6 = vmov %v1797_v6  ;;  %v505_v7 = vmov %v1799_v7  ;;  %v486_v54 = vld [vmem:[%s478_s30] sm:$0x3]  ;;  %vm489_vm5 = vcmp.eq.s32.totalorder %v485_v7, %v482_v6  ;;  %s518_s22 = smov [#allocation23]  ;;  %s479_s29 = smov [#allocation24] }
 0x112   : >>> { %vm509_vm6 = vcmp.eq.s32.totalorder %v505_v7, %v502_v6  ;;  %v522_v6 = vmov %v1797_v6  ;;  %v525_v7 = vmov %v1799_v7  ;;  %v490_v55 = vsel %vm489_vm5, %v486_v54, 0.0  ;;  %v506_v56 = vld [vmem:[%s498_s21] sm:$0x3]  ;;  %s499_s14 = smov [#allocation25]  ;;  %s519_s15 = smov [#allocation26] }
 0x113   : >>> { %vm529_vm7 = vcmp.eq.s32.totalorder %v525_v7, %v522_v6  ;;  %v491_v57 = vrot.slane %v490_v55, 4  ;;  %v510_v58 = vsel %vm509_vm6, %v506_v56, 0.0  ;;  %v526_v59 = vld [vmem:[%s518_s22] sm:$0x3]  ;;  %s542_s16 = smov [#allocation25]  ;;  %s540_s30 = smov [#allocation24]  ;;  %v591_v6 = vmov %v1797_v6 }
 0x114   : >>> { %v511_v60 = vrot.slane %v510_v58, 4  ;;  %v530_v61 = vsel %vm529_vm7, %v526_v59, 0.0  ;;  %s544_s21 = smov [#allocation26]  ;;  %s579_s22 = smov [#allocation27]  ;;  %v594_v7 = vmov %v1799_v7  ;;  %v606_v6 = vmov %v1797_v6 }
 0x115   : >>> { %v492_v62 = vadd.f32 %v491_v57, %v490_v55  ;;  %v531_v63 = vrot.slane %v530_v61, 4  ;;  %v609_v7 = vmov %v1799_v7  ;;  %vm596_vm12 = vcmp.eq.s32.totalorder %v594_v7, %v591_v6  ;;  %s1857_s24 = smov [#allocation22]  ;;  %s1863_s23 = smov [#allocation14] }
 0x116   : >>> { %v512_v0 = vadd.f32 %v511_v60, %v510_v58  ;;  %vm611_vm13 = vcmp.eq.s32.totalorder %v609_v7, %v606_v6  ;;  %s841_s11 = smov [#allocation31]  ;;  %s1869_s27 = smov [#allocation18]  ;;  %v627_v55 = vld [vmem:[%s1857_s24] sm:$0x3]  ;;  %v704_v6 = vmov %v1797_v6  ;;  %v707_v7 = vmov %v1799_v7 }
 0x117   : >>> { %v493_v1 = vrot.slane %v492_v62, 2  ;;  %v532_v2 = vadd.f32 %v531_v63, %v530_v61  ;;  %v850_v58 = vld [vmem:[%s1863_s23] sm:$0x3]  ;;  %s619_s26 = smov [#allocation32]  ;;  %s843_s25 = smov [#allocation32]  ;;  %v718_v6 = vmov %v1797_v6  ;;  %v721_v7 = vmov %v1799_v7 }
 0x118   : >>> { %v513_v3 = vrot.slane %v512_v0, 2  ;;  %v852_v61 = vld [vmem:[%s1869_s27] sm:$0x3]  ;;  %vm711_vm0 = vcmp.eq.s32.totalorder %v707_v7, %v704_v6  ;;  %v677_v6 = vmov %v1797_v6  ;;  %v680_v7 = vmov %v1799_v7  ;;  %s477_s20 = sadd.s32 1, %s1685_s20  }
 0x119   : >>> { %v494_v4 = vadd.f32 %v493_v1, %v492_v62  ;;  %v533_v5 = vrot.slane %v532_v2, 2  ;;  %v691_v6 = vmov %v1797_v6  ;;  %v694_v7 = vmov %v1799_v7  ;;  %p474_p9 = scmp.ge.s32.totalorder %s477_s20, 3  }
 0x11a   : >>> { %v514_v8 = vadd.f32 %v513_v3, %v512_v0  ;;  %vm726_vm1 = vcmp.eq.s32.totalorder %v721_v7, %v718_v6  ;;  %vm685_vm3 = vcmp.eq.s32.totalorder %v680_v7, %v677_v6  ;;  %vm698_vm4 = vcmp.eq.s32.totalorder %v694_v7, %v691_v6 }
 0x11b   : >>> { %v495_v9 = vrot.slane %v494_v4, 1  ;;  %v534_v10 = vadd.f32 %v533_v5, %v532_v2  ;;  %vm740_vm5 = vcmp.eq.s32.totalorder %v1797_v6, 0  ;;  %vm744_vm6 = vcmp.eq.s32.totalorder %v1797_v6, 1 }
 0x11c   : >>> { %v515_v11 = vrot.slane %v514_v8, 1  ;;  %v378_v6 = vmov (%p474_p9), %v1797_v6  ;;  %v381_v7 = vmov (%p474_p9), %v1799_v7 }
 0x11d   : >>> { %v496_v12 = vadd.f32 %v495_v9, %v494_v4  ;;  %v535_v13 = vrot.slane %v534_v10, 1  ;;  %v431_v6 = vmov (%p474_p9), %v1797_v6  ;;  %vm393_vm7 = vcmp.eq.s32.totalorder (%p474_p9), %v381_v7, %v378_v6 }
 0x11e   : >>> { %v516_v14 = vadd.f32 %v515_v11, %v514_v8  ;;  %v434_v7 = vmov (%p474_p9), %v1799_v7  ;;  %v397_v6 = vmov (%p474_p9), %v1797_v6 }
 0x11f   : >>> { %497 = vst [vmem:[%s479_s29] sm:$0x1] %v496_v12  ;;  %v536_v15 = vadd.f32 %v535_v13, %v534_v10  ;;  %s581_s29 = smov [#allocation28]  ;;  %v400_v7 = vmov (%p474_p9), %v1799_v7  ;;  %v414_v6 = vmov (%p474_p9), %v1797_v6 }
 0x120   : >>> { %517 = vst [vmem:[%s499_s14] sm:$0x1] %v516_v14  ;;  %s538_s14 = smov [#allocation29]  ;;  %v417_v7 = vmov (%p474_p9), %v1799_v7 }
 0x121   : >>> { %537 = vst [vmem:[%s519_s15] sm:$0x1] %v536_v15  ;;  %s539_s15 = smov [#allocation30]  ;;  %s583_s14 = smov %s538_s14 }
 0x122   : >>> { %s585_s15 = smov %s539_s15 }
 0x126   : >>> { %v541_v18 = vld [vmem:[%s540_s30] sm:$0xff]  ;;  %s602_s30 = smov [#allocation30] }
 0x127   : >>> { %v543_v16 = vld [vmem:[%s542_s16] sm:$0xff]  ;;  %v564_v33 = vand.u32 2147483647, %v541_v18  ;;  %s587_s16 = smov [#allocation29] }
 0x128   : >>> { %v547_v17 = vmul.f32 2.0, %v543_v16  ;;  %v545_v19 = vld [vmem:[%s544_s21] sm:$0xff]  ;;  %v565_v36 = vand.u32 2147483647, %v543_v16  ;;  %s600_s21 = smov [#allocation31] }
 0x129   : >>> { %v546_v20 = vsub.f32 %v545_v19, %v541_v18  ;;  %v566_v34 = vand.u32 2147483647, %v545_v19 }
 0x12a   : >>> { %1639 = vrcp.f32 %v547_v17 }
 0x12b   : >>> { %v567_v35 = vmin.f32 %v564_v33, %v566_v34 }
 0x12d   : >>> { %v568_v37 = vmul.f32 1.1920929e-08, %v567_v35 }
 0x12f   : >>> { %vm569_vm11 = vcmp.le.f32.partialorder %v565_v36, %v568_v37 }
 0x137   : >>> { %v1640_v21 = vpop.eup %1639 }
 0x138   : >>> { %v549_v22 = vmul.f32 %v1640_v21, %v546_v20 }
 0x13a   : >>> { %v551_v23 = vmul.f32 %v549_v22, %v549_v22  ;;  %vm550_vm10 = vcmp.ge.f32.partialorder %v549_v22, 0.0 }
 0x13c   : >>> { %v552_v24 = vadd.f32 1.0, %v551_v23 }
 0x13e   : >>> { %1641 = vrsqrt.f32 %v552_v24  ;;  %vm555_vm8 = vcmp.eq.f32.partialorder %v552_v24, inf  ;;  %v558_v26 = vand.u32 2147483648, %v552_v24  ;;  %vm557_vm9 = vcmp.eq.f32.partialorder %v552_v24, 0.0 }
 0x14b   : >>> { %v1642_v25 = vpop.eup %1641 }
 0x14c   : >>> { %v554_v27 = vmul.f32 %v1642_v25, %v552_v24 }
 0x14e   : >>> { %v556_v28 = vsel %vm555_vm8, %v552_v24, %v554_v27  ;;  %vm446_vm8 = vcmp.eq.s32.totalorder (%p474_p9), %v434_v7, %v431_v6 }
 0x14f   : >>> { %v559_v29 = vsel %vm557_vm9, %v558_v26, %v556_v28 }
 0x150   : >>> { %v560_v30 = vxor.u32 2147483648, %v559_v29 }
 0x152   : >>> { %v561_v31 = vsel %vm550_vm10, %v559_v29, %v560_v30 }
 0x153   : >>> { %v562_v32 = vadd.f32 %v561_v31, %v549_v22 }
 0x155   : >>> { %1643 = vrcp.f32 %v562_v32 }
 0x162   : >>> { %v1644_v38 = vpop.eup %1643 }
 0x163   : >>> { %v570_v39 = vsel %vm569_vm11, 0.0, %v1644_v38 }
 0x164   : >>> { %v571_v40 = vmul.f32 %v570_v39, %v570_v39  ;;  %v575_v41 = vmul.f32 %v570_v39, %v543_v16 }
 0x166   : >>> { %v572_v42 = vadd.f32 1.0, %v571_v40  ;;  %v576_v43 = vsub.f32 %v541_v18, %v575_v41  ;;  %v578_v44 = vadd.f32 %v575_v41, %v545_v19 }
 0x168   : >>> { %1645 = vrsqrt.f32 %v572_v42  ;;  %580 = vst [vmem:[%s579_s22] sm:$0xff] %v576_v43  ;;  %582 = vst [vmem:[%s581_s29] sm:$0xff] %v578_v44  ;;  %s617_s22 = smov [#allocation31]  ;;  %s1853_s29 = smov [#allocation20] }
 0x169   : >>> { %v625_v53 = vld [vmem:[%s1853_s29] sm:$0x3] }
 0x175   : >>> { %v1646_v45 = vpop.eup %1645 }
 0x176   : >>> { %584 = vst [vmem:[%s583_s14] sm:$0xff] %v1646_v45  ;;  %v574_v46 = vmul.f32 %v1646_v45, %v570_v39  ;;  %s615_s14 = smov [#allocation32] }
 0x178   : >>> { %586 = vst [vmem:[%s585_s15] sm:$0xff] %v574_v46  ;;  %s1855_s15 = smov [#allocation21] }
 0x179   : >>> { %v626_v54 = vld [vmem:[%s1855_s15] sm:$0x3] }
 0x17d   : >>> { %v588_v47 = vld [vmem:[%s587_s16] ss:$0 sm:$0xff]  ;;  %s1859_s16 = smov [#allocation23] }
 0x17e   : >>> { %v597_v48 = vsel %vm596_vm12, %v588_v47, 0.0  ;;  %v628_v56 = vld [vmem:[%s1859_s16] sm:$0x3] }
 0x17f   : >>> { %598 = vadd.xlane.f32.xlu0 %v597_v48  ;;  %v603_v49 = vld [vmem:[%s602_s30] ss:$0 sm:$0xff]  ;;  %s1861_s30 = smov [#allocation12] }
 0x180   : >>> { %v612_v50 = vsel %vm611_vm13, %v603_v49, 0.0  ;;  %v849_v57 = vld [vmem:[%s1861_s30] sm:$0x3] }
 0x183   : >>> { %613 = vadd.xlane.f32.xlu0 %v612_v50 }
 0x208   : >>> { %v599_v51 = vpop.xlane.xlu0 %598 }
 0x209   : >>> { %601 = vst [vmem:[%s600_s21] sm:$0xff] %v599_v51  ;;  %s1865_s21 = smov [#allocation16] }
 0x20a   : >>> { %v851_v59 = vld [vmem:[%s1865_s21] sm:$0x3] }
 0x20c   : >>> { %v614_v52 = vpop.xlane.xlu0 %613 }
 0x20d   : >>> { %616 = vst [vmem:[%s615_s14] sm:$0xff] %v614_v52  ;;  %s1889_s14 = smov [#allocation23] }
 0x210   : >>> { %v618_v60 = vld [vmem:[%s617_s22] sm:$0xff]  ;;  %s1887_s22 = smov [#allocation22] }
 0x211   : >>> { %v842_v62 = vld [vmem:[%s841_s11] sm:$0xff]  ;;  %v629_v63 = vmul.f32 %v625_v53, %v618_v60  ;;  %v632_v0 = vmul.f32 %v626_v54, %v618_v60  ;;  %v636_v1 = vmul.f32 %v627_v55, %v618_v60  ;;  %v639_v2 = vmul.f32 %v628_v56, %v618_v60  ;;  %s1885_s11 = smov [#allocation12] }
 0x212   : >>> { %v853_v3 = vmul.f32 %v849_v57, %v842_v62  ;;  %v856_v4 = vmul.f32 %v850_v58, %v842_v62  ;;  %v860_v5 = vmul.f32 %v851_v59, %v842_v62  ;;  %v863_v8 = vmul.f32 %v852_v61, %v842_v62 }
 0x214   : >>> { %v620_v9 = vld [vmem:[%s619_s26] sm:$0xff]  ;;  %s647_s26 = smov [#allocation30] }
 0x215   : >>> { %v844_v10 = vld [vmem:[%s843_s25] sm:$0xff]  ;;  %v630_v11 = vmul.f32 %v627_v55, %v620_v9  ;;  %v633_v12 = vmul.f32 %v628_v56, %v620_v9  ;;  %v635_v13 = vmul.f32 %v625_v53, %v620_v9  ;;  %v638_v14 = vmul.f32 %v626_v54, %v620_v9  ;;  %s645_s25 = smov [#allocation29] }
 0x216   : >>> { %v854_v15 = vmul.f32 %v851_v59, %v844_v10  ;;  %v857_v16 = vmul.f32 %v852_v61, %v844_v10  ;;  %v859_v17 = vmul.f32 %v849_v57, %v844_v10  ;;  %v862_v18 = vmul.f32 %v850_v58, %v844_v10  ;;  %v646_v27 = vld [vmem:[%s645_s25] ss:$0 sm:$0xff]  ;;  %s674_s25 = smov [#allocation27] }
 0x217   : >>> { %v631_v19 = vsub.f32 %v629_v63, %v630_v11  ;;  %v634_v20 = vsub.f32 %v632_v0, %v633_v12  ;;  %v637_v21 = vadd.f32 %v636_v1, %v635_v13  ;;  %v640_v22 = vadd.f32 %v639_v2, %v638_v14  ;;  %v648_v28 = vld [vmem:[%s647_s26] ss:$0 sm:$0xff]  ;;  %s673_s26 = smov [#allocation20] }
 0x218   : >>> { %v855_v23 = vsub.f32 %v853_v3, %v854_v15  ;;  %v858_v24 = vsub.f32 %v856_v4, %v857_v16  ;;  %v861_v25 = vadd.f32 %v860_v5, %v859_v17  ;;  %v864_v26 = vadd.f32 %v863_v8, %v862_v18  ;;  %v681_v63 = vld [vmem:[%s674_s25] ss:$0 sm:$0xff]  ;;  %s917_s25 = sadd.s32 (%p474_p9), 1, %s1681_s17  }
 0x219   : >>> { %642 = vst [vmem:[%s1855_s15] sm:$0x3] %v634_v20  ;;  %644 = vst [vmem:[%s1859_s16] sm:$0x3] %v640_v22  ;;  %s1891_s15 = smov [#allocation20]  ;;  %s715_s16 = smov [#allocation28] }
 0x21a   : >>> { %641 = vst [vmem:[%s1853_s29] sm:$0x3] %v631_v19  ;;  %643 = vst [vmem:[%s1857_s24] sm:$0x3] %v637_v21  ;;  %s1893_s24 = smov [#allocation16]  ;;  %s1901_s29 = smov [#allocation21]  ;;  %v722_v59 = vld [vmem:[%s715_s16] ss:$0 sm:$0xff] }
 0x21b   : >>> { %865 = vst [vmem:[%s1861_s30] sm:$0x3] %v855_v23  ;;  %866 = vst [vmem:[%s1863_s23] sm:$0x3] %v858_v24  ;;  %s1895_s23 = smov [#allocation14]  ;;  %s701_s30 = smov [#allocation22] }
 0x21c   : >>> { %867 = vst [vmem:[%s1865_s21] sm:$0x3] %v861_v25  ;;  %868 = vst [vmem:[%s1869_s27] sm:$0x3] %v864_v26  ;;  %s1899_s27 = smov [#allocation18]  ;;  %s714_s21 = smov [#allocation23] }
 0x21d   : >>> { %s817_s16 = smov [#allocation21]  ;;  %p470_p10 = scmp.ge.s32.totalorder (%p474_p9), %s917_s25, 15 }
 0x21e   : >> { %s2078_s17 = smov (%p474_p9), %s917_s25 }
 0x220   : >>> { %v656_v30 = vld [vmem:[%s1889_s14] sm:$0x3] }
 0x221   : >>> { %v655_v29 = vld [vmem:[%s1887_s22] sm:$0x3]  ;;  %v664_v36 = vmul.f32 %v656_v30, %v648_v28  ;;  %v667_v42 = vmul.f32 %v656_v30, %v646_v27 }
 0x222   : >>> { %v653_v31 = vld [vmem:[%s1891_s15] sm:$0x3]  ;;  %v663_v35 = vmul.f32 %v655_v29, %v646_v27  ;;  %v666_v37 = vmul.f32 %v655_v29, %v648_v28 }
 0x223   : >>> { %v871_v32 = vld [vmem:[%s1885_s11] ss:$0 sm:$0xff]  ;;  %v1567_v34 = vld [vmem:[%s1885_s11 + $0x1] ss:$0 sm:$0xff]  ;;  %v657_v48 = vmul.f32 %v653_v31, %v646_v27  ;;  %v660_v49 = vmul.f32 %v653_v31, %v648_v28 }
 0x224   : >>> { %v1566_v33 = vld [vmem:[%s1885_s11 - $0x1] sm:$0x2]  ;;  %v1569_v40 = vld [vmem:[%s1893_s24 + $0x1] sm:$0x1]  ;;  %v665_v47 = vsub.f32 %v663_v35, %v664_v36  ;;  %v668_v53 = vadd.f32 %v667_v42, %v666_v37 }
 0x225   : >>> { %v878_v38 = vsel %vm801_vm14, %v871_v32, %v1566_v33  ;;  %v882_v39 = vld [vmem:[%s1893_s24] ss:$0 sm:$0xff]  ;;  %v890_v43 = vsel %vm813_vm15, %v1567_v34, %v1569_v40  ;;  %v1571_v45 = vld [vmem:[%s1895_s23 + $0x1] ss:$0 sm:$0xff] }
 0x226   : >>> { %v895_v41 = vld [vmem:[%s1895_s23] ss:$0 sm:$0xff]  ;;  %881 = vst [vmem:[%s1885_s11] sm:$0x3] %v878_v38  ;;  %892 = vst [vmem:[%s1893_s24] sm:$0x3] %v890_v43  ;;  %v1573_v51 = vld [vmem:[%s1899_s27 + $0x1] sm:$0x1] }
 0x227   : >>> { %v1570_v44 = vld [vmem:[%s1895_s23 - $0x1] sm:$0x2]  ;;  %1568 = vst [vmem:[%s1885_s11 + $0x1] sm:$0x1] %v882_v39  ;;  %v914_v54 = vsel %vm813_vm15, %v1571_v45, %v1573_v51  ;;  %671 = vst [vmem:[%s1887_s22] sm:$0x3] %v665_v47  ;;  %s688_s11 = smov [#allocation21] }
 0x228   : >>> { %v906_v46 = vld [vmem:[%s1899_s27] ss:$0 sm:$0xff]  ;;  %v902_v50 = vsel %vm801_vm14, %v895_v41, %v1570_v44  ;;  %672 = vst [vmem:[%s1889_s14] sm:$0x3] %v668_v53  ;;  %s1943_s22 = smov [#allocation22]  ;;  %s1688_s14 = smov 1  }
 0x229   : >>> { %v654_v52 = vld [vmem:[%s1901_s29] sm:$0x3]  ;;  %905 = vst [vmem:[%s1895_s23] sm:$0x3] %v902_v50  ;;  %916 = vst [vmem:[%s1899_s27] sm:$0x3] %v914_v54  ;;  %s730_s24 = smov [#allocation21]  ;;  %s1946_s27 = smov [#allocation23] }
 0x22a   : >>> { %v658_v55 = vmul.f32 %v654_v52, %v648_v28  ;;  %v661_v56 = vmul.f32 %v654_v52, %v646_v27  ;;  %1572 = vst [vmem:[%s1895_s23 + $0x1] sm:$0x1] %v906_v46  ;;  %s1689_s23 = smov 127  }
 0x22c   : >>> { %v659_v57 = vsub.f32 %v657_v48, %v658_v55  ;;  %v662_v58 = vadd.f32 %v661_v56, %v660_v49 }
 0x22e   : >>> { %669 = vst [vmem:[%s1891_s15] sm:$0x3] %v659_v57  ;;  %670 = vst [vmem:[%s1901_s29] sm:$0x3] %v662_v58  ;;  %v708_v60 = vld [vmem:[%s701_s30] sm:$0x3]  ;;  %s729_s15 = smov [#allocation20]  ;;  %s793_s29 = smov [#allocation20] }
 0x22f   : >>> { %v712_v61 = vsel %vm711_vm0, 0.0, %v708_v60  ;;  %v723_v62 = vld [vmem:[%s714_s21] sm:$0x3] }
 0x230   : >>> { %713 = vst [vmem:[%s701_s30] sm:$0x3] %v712_v61  ;;  %v727_v0 = vsel %vm726_vm1, %v722_v59, %v723_v62  ;;  %s794_s30 = smov [#allocation22] }
 0x231   : >>> { %728 = vst [vmem:[%s714_s21] sm:$0x3] %v727_v0  ;;  %s818_s21 = smov [#allocation23] }
 0x235   : >>> { %v682_v1 = vld [vmem:[%s673_s26] sm:$0x3] }
 0x236   : >>> { %v695_v2 = vld [vmem:[%s688_s11] sm:$0x3]  ;;  %v686_v3 = vsel %vm685_vm3, %v681_v63, %v682_v1 }
 0x237   : >>> { %v699_v4 = vsel %vm698_vm4, 0.0, %v695_v2  ;;  %687 = vst [vmem:[%s673_s26] sm:$0x3] %v686_v3  ;;  %v767_v5 = vld [vmem:[%s1943_s22] sm:$0x3]  ;;  %s382_s26 = smov (%p474_p9), [#allocation20] }
 0x238   : >>> { %700 = vst [vmem:[%s688_s11] sm:$0x3] %v699_v4  ;;  %768 = vrot.lane.b32.xlu0 %v767_v5, %s1688_s14  ;;  %v763_v11 = vld [vmem:[%s1946_s27] sm:$0x3]  ;;  %s401_s11 = smov (%p474_p9), [#allocation21] }
 0x239   : >>> { %v784_v12 = vld [vmem:[%s1946_s27] sm:$0x3] }
 0x23a   : >>> { %v766_v30 = vld [vmem:[%s1943_s22] sm:$0x3] }
 0x23e   : >>> { %v735_v8 = vld [vmem:[%s729_s15] sm:$0x3] }
 0x23f   : >>> { %736 = vrot.lane.b32.xlu1 %v735_v8, %s1688_s14  ;;  %v731_v9 = vld [vmem:[%s730_s24] sm:$0x3] }
 0x240   : >>> { %v752_v10 = vld [vmem:[%s730_s24] sm:$0x3] }
 0x241   : >>> { %v734_v18 = vld [vmem:[%s729_s15] sm:$0x3] }
 0x243   : >>> { %732 = vrot.lane.b32.xlu1 %v731_v9, %s1688_s14 }
 0x247   : >>> { %753 = vrot.lane.b32.xlu1 %v752_v10, %s1689_s23 }
 0x24b   : >>> { %764 = vrot.lane.b32.xlu1 %v763_v11, %s1688_s14  ;;  %s435_s14 = smov (%p474_p9), [#allocation23] }
 0x24f   : >>> { %785 = vrot.lane.b32.xlu1 %v784_v12, %s1689_s23 }
 0x2aa   : >>> { %v769_v20 = vpop.permute.xlu0 %768 }
 0x2ab   : >>> { %v773_v22 = vsel %vm740_vm5, %v767_v5, %v769_v20 }
 0x2b1   : >>> { %v737_v13 = vpop.permute.xlu1 %736 }
 0x2b2   : >>> { %v741_v14 = vsel %vm740_vm5, %v735_v8, %v737_v13 }
 0x2b5   : >>> { %v733_v15 = vpop.permute.xlu1 %732 }
 0x2b6   : >>> { %v745_v16 = vsel %vm744_vm6, %v733_v15, %v741_v14 }
 0x2b7   : >>> { %v751_v17 = vsel %vm1427_vm2, %v745_v16, 0.0 }
 0x2b8   : >>> { %759 = vst [vmem:[%s729_s15] sm:$0x3] %v751_v17 }
 0x2b9   : >>> { %v754_v19 = vpop.permute.xlu1 %753 }
 0x2ba   : >>> { %v758_v21 = vsel %vm744_vm6, %v734_v18, %v754_v19 }
 0x2bb   : >>> { %760 = vst [vmem:[%s730_s24] sm:$0x3] %v758_v21 }
 0x2bd   : >>> { %v765_v23 = vpop.permute.xlu1 %764 }
 0x2be   : >>> { %v777_v24 = vsel %vm744_vm6, %v765_v23, %v773_v22 }
 0x2bf   : >>> { %v795_v25 = vld [vmem:[%s793_s29] ss:$0 sm:$0xff]  ;;  %v1559_v27 = vld [vmem:[%s793_s29 + $0x1] ss:$0 sm:$0xff]  ;;  %v783_v29 = vsel %vm1427_vm2, %v777_v24, 0.0 }
 0x2c0   : >>> { %v1558_v26 = vld [vmem:[%s793_s29 - $0x1] sm:$0x2]  ;;  %791 = vst [vmem:[%s1943_s22] sm:$0x3] %v783_v29  ;;  %s418_s22 = smov (%p474_p9), [#allocation22] }
 0x2c1   : >>> { %v802_v28 = vsel %vm801_vm14, %v795_v25, %v1558_v26  ;;  %v786_v31 = vpop.permute.xlu1 %785 }
 0x2c2   : >>> { %805 = vst [vmem:[%s793_s29] sm:$0x3] %v802_v28  ;;  %v819_v32 = vld [vmem:[%s817_s16] ss:$0 sm:$0xff]  ;;  %v1563_v34 = vld [vmem:[%s817_s16 + $0x1] ss:$0 sm:$0xff]  ;;  %v790_v35 = vsel %vm744_vm6, %v766_v30, %v786_v31 }
 0x2c3   : >>> { %v1562_v33 = vld [vmem:[%s817_s16 - $0x1] sm:$0x2]  ;;  %792 = vst [vmem:[%s1946_s27] sm:$0x3] %v790_v35 }
 0x2c4   : >>> { %v826_v36 = vsel %vm801_vm14, %v819_v32, %v1562_v33 }
 0x2c5   : >>> { %829 = vst [vmem:[%s817_s16] sm:$0x3] %v826_v36 }
 0x2c7   : >>> { %v806_v37 = vld [vmem:[%s794_s30] ss:$0 sm:$0xff]  ;;  %v1561_v38 = vld [vmem:[%s794_s30 + $0x1] sm:$0x1] }
 0x2c8   : >>> { %1560 = vst [vmem:[%s793_s29 + $0x1] sm:$0x1] %v806_v37  ;;  %v814_v39 = vsel %vm813_vm15, %v1559_v27, %v1561_v38 }
 0x2c9   : >>> { %816 = vst [vmem:[%s794_s30] sm:$0x3] %v814_v39 }
 0x2ca   : >>> { %v830_v40 = vld [vmem:[%s818_s21] ss:$0 sm:$0xff]  ;;  %v1565_v41 = vld [vmem:[%s818_s21 + $0x1] sm:$0x1] }
 0x2cb   : >>> { %1564 = vst [vmem:[%s817_s16 + $0x1] sm:$0x1] %v830_v40  ;;  %v838_v42 = vsel %vm813_vm15, %v1563_v34, %v1565_v41 }
 0x2cc   : >>> { %840 = vst [vmem:[%s818_s21] sm:$0x3] %v838_v42  ;;  %476 = sbr.rel (!%p474_p9) target bundleno = 272 (0x110), region = 462 }
 0x2cf   : >> { %v388_v43 = vld [vmem:[%s382_s26] sm:$0x3] (%p474_p9) }
 0x2d0   : >> { %v389_v45 = vsel (%p474_p9), %vm1427_vm2, %v388_v43, 0.0  ;;  %v424_v47 = vld [vmem:[%s418_s22] sm:$0x3] (%p474_p9) }
 0x2d1   : >> { %v390_v49 = vmul.f32 %v389_v45, %v389_v45  ;;  %v425_v51 = vsel %vm1427_vm2, %v424_v47, 0.0 }
 0x2d2   : >> { %v407_v44 = vld [vmem:[%s401_s11] sm:$0x3]  ;;  %v426_v53 = vmul.f32 %v425_v51, %v425_v51 }
 0x2d3   : >> { %v408_v46 = vsel %vm1427_vm2, %v407_v44, 0.0  ;;  %v441_v48 = vld [vmem:[%s435_s14] sm:$0x3]  ;;  %v394_v56 = vsel %vm393_vm7, 0.0, %v390_v49 }
 0x2d4   : >> { %v409_v50 = vmul.f32 %v408_v46, %v408_v46  ;;  %v442_v52 = vsel %vm1427_vm2, %v441_v48, 0.0 }
 0x2d5   : >> { %v443_v55 = vmul.f32 %v442_v52, %v442_v52 }
 0x2d6   : >> { %v411_v54 = vadd.f32 %v409_v50, %v390_v49  ;;  %v410_v57 = vadd.f32 %v409_v50, %v394_v56 }
 0x2d7   : >> { %v447_v60 = vsel %vm446_vm8, 0.0, %v443_v55 }
 0x2d8   : >> { %v428_v58 = vadd.f32 %v426_v53, %v411_v54  ;;  %v427_v59 = vadd.f32 %v426_v53, %v410_v57 }
 0x2da   : >> { %v449_v61 = vadd.f32 %v443_v55, %v428_v58  ;;  %v448_v62 = vadd.f32 %v447_v60, %v427_v59 }
 0x2dc   : >> { %450 = vadd.xlane.f32.xlu0 %v449_v61 }
 0x2e0   : >> { %458 = vadd.xlane.f32.xlu0 %v448_v62 }
 0x365   : >> { %v451_v63 = vpop.xlane.xlu0 %450 }
 0x366   : >> { %v452_v0 = vrot.slane %v451_v63, 4 }
 0x368   : >> { %v453_v1 = vadd.f32 %v452_v0, %v451_v63 }
 0x369   : >> { %v459_v2 = vpop.xlane.xlu0 %458 }
 0x36a   : >> { %v454_v3 = vrot.slane %v453_v1, 2  ;;  %v460_v4 = vrot.slane %v459_v2, 4 }
 0x36c   : >> { %v461_v5 = vadd.f32 %v460_v4, %v459_v2  ;;  %v455_v8 = vadd.f32 %v454_v3, %v453_v1 }
 0x36e   : >> { %v462_v9 = vrot.slane %v461_v5, 2  ;;  %v456_v11 = vrot.slane %v455_v8, 1 }
 0x370   : >> { %v463_v10 = vadd.f32 %v462_v9, %v461_v5  ;;  %v457_v14 = vadd.f32 %v456_v11, %v455_v8 }
 0x372   : >> { %v464_v12 = vrot.slane %v463_v10, 1 }
 0x374   : >> { %v465_v13 = vadd.f32 %v464_v12, %v463_v10 }
 0x376   : >> { %1592 = vpush %v465_v13 }
 0x377   : >> { %1594 = vpush %v457_v14 }
 0x3a7   : >> { %s1593_s20 = spop %1592 }
 0x3a8   : >> { %s1595_s15 = spop %1594 }
 0x3a9   : >> { %s468_s24 = smul.f32 1e-10, %s1595_s15 }
 0x3ab   : >> { %p469_p11 = scmp.le.f32.partialorder %s1593_s20, %s468_s24 }
 0x3ad   : >> { %p471_p12 = por %p470_p10, %p469_p11 }
 0x3af   : > { %919 = sbr.rel (!%p471_p12) target bundleno = 271 (0x10f), region = 473 }
 0x3b4 PF: > { %s924_s23 = smov [#allocation20]  ;;  %v928_v6 = vmov %v1797_v6  ;;  %v931_v7 = vmov %v1799_v7  ;;  %v984_v15 = vld [vmem:[#allocation12] sm:$0x3]  ;;  %v992_v16 = vld [vmem:[#allocation14] sm:$0x3]  ;;  %s2079_s17 = scalar_lea.vmem [#allocation13], %s1793_s28 }
 0x3b5   : > { %v948_v6 = vmov %v1797_v6  ;;  %v951_v7 = vmov %v1799_v7  ;;  %v932_v17 = vld [vmem:[%s924_s23] sm:$0x3]  ;;  %vm935_vm9 = vcmp.eq.s32.totalorder %v931_v7, %v928_v6  ;;  %987 = vst [vmem:[%s2079_s17] sm:$0x3] %v984_v15  ;;  %s2080_s27 = scalar_lea.vmem [#allocation15], %s1793_s28  ;;  %s944_s29 = smov [#allocation23] }
 0x3b6   : > { %vm955_vm10 = vcmp.eq.s32.totalorder %v951_v7, %v948_v6  ;;  %995 = vst [vmem:[%s2080_s27] sm:$0x3] %v992_v16  ;;  %v1000_v18 = vld [vmem:[#allocation16] sm:$0x3]  ;;  %v936_v19 = vsel %vm935_vm9, %v932_v17, 0.0  ;;  %s2081_s16 = scalar_lea.vmem [#allocation17], %s1793_s28  ;;  %s2082_s30 = scalar_lea.vmem [#allocation19], %s1793_s28 }
 0x3b7   : > { %1003 = vst [vmem:[%s2081_s16] sm:$0x3] %v1000_v18  ;;  %v1008_v20 = vld [vmem:[#allocation18] sm:$0x3]  ;;  %v937_v21 = vrot.slane %v936_v19, 4  ;;  %v952_v22 = vld [vmem:[%s944_s29] sm:$0x3] }
 0x3b8   : > { %1011 = vst [vmem:[%s2082_s30] sm:$0x3] %v1008_v20  ;;  %v956_v23 = vsel %vm955_vm10, %v952_v22, 0.0  ;;  %s920_s21 = sand.u32 7, %s1756_s12   ;;  %s2083_s11 = scalar_lea.vmem [#allocation9], %s1795_s18 }
 0x3b9   : > { %v938_v24 = vadd.f32 %v937_v21, %v936_v19  ;;  %v957_v25 = vrot.slane %v956_v23, 4  ;;  %s921_s25 = scalar_lea.vmem [#allocation8], %s920_s21  ;;  %s923_s26 = scalar_lea.vmem [#allocation10], %s920_s21 }
 0x3ba   : > { %s925_s25 = smov %s921_s25  ;;  %s945_s26 = smov %s923_s26 }
 0x3bb   : > { %v939_v26 = vrot.slane %v938_v24, 2  ;;  %v958_v6 = vadd.f32 %v957_v25, %v956_v23  ;;  %s2084_s22 = scalar_lea.vmem [#allocation11], %s1795_s18  ;;  %s1039_s14 = sshrl.u32 (%p1770_p3), %s1756_s12, 3 }
 0x3bc   : > { %s2085_s20 = scalar_lea.vmem (%p1770_p3), [#allocation9], %s1795_s18  ;;  %s1580_s15 = sshll.u32 (%p1770_p3), %s1039_s14, 1 }
 0x3bd   : > { %v940_v7 = vadd.f32 %v939_v26, %v938_v24  ;;  %v959_v27 = vrot.slane %v958_v6, 2  ;;  %s1041_s17 = scalar_lea.vmem (%p1770_p3), %s2070_s4, %s1580_s15 }
 0x3bf   : > { %v941_v28 = vrot.slane %v940_v7, 1  ;;  %v960_v29 = vadd.f32 %v959_v27, %v958_v6 }
 0x3c1   : > { %v942_v30 = vadd.f32 %v941_v28, %v940_v7  ;;  %v961_v31 = vrot.slane %v960_v29, 1 }
 0x3c3   : > { %943 = vst [vmem:[%s925_s25] sm:$0x1] %v942_v30  ;;  %v962_v32 = vadd.f32 %v961_v31, %v960_v29 }
 0x3c5   : > { %963 = vst [vmem:[%s945_s26] sm:$0x1] %v962_v32 }
 0x3c9   : > { %1038 = sbr.rel (!%p1770_p3) target bundleno = 980 (0x3d4), region = 158 }
 0x3ca   : > { %v968_v33 = vld [vmem:[#allocation8] sm:$0x3] }
 0x3cb   : > { %971 = vst [vmem:[%s2083_s11] sm:$0x3] %v968_v33 }
 0x3cc   : > { %v976_v34 = vld [vmem:[#allocation10] sm:$0x3] }
 0x3cd   : > { %979 = vst [vmem:[%s2084_s22] sm:$0x3] %v976_v34 }
 0x3d2   : > { %v1058_v35 = vld [vmem:[%s2085_s20] sm:$0x3] }
 0x3d3   : > { %1059 = vst [vmem:[%s1041_s17] sm:$0x3] %v1058_v35 }
 0x3d4 PF: > { %1077 = sbr.rel (!%p1770_p3) target bundleno = 988 (0x3dc), region = 192  ;;  %s1078_s27 = sshrl.u32 (%p1770_p3), %s1756_s12, 3 }
 0x3d5   : > { %s2086_s29 = scalar_lea.vmem (%p1770_p3), [#allocation11], %s1795_s18  ;;  %s1581_s16 = sshll.u32 (%p1770_p3), %s1078_s27, 1 }
 0x3d6   : > { %s1080_s25 = scalar_lea.vmem (%p1770_p3), %s2071_s5, %s1581_s16 }
 0x3da   : > { %v1097_v36 = vld [vmem:[%s2086_s29] sm:$0x3] }
 0x3db   : > { %1098 = vst [vmem:[%s1080_s25] sm:$0x3] %v1097_v36 }
 0x3dc PF: > { %s1582_s26 = sshll.u32 %s1756_s12, 1  ;;  %s2087_s19 = scalar_lea.vmem [#allocation13], %s1793_s28 }
 0x3dd   : > { %v1132_v37 = vld [vmem:[%s2087_s19] sm:$0x3]  ;;  %s2088_s11 = scalar_lea.vmem [#allocation15], %s1793_s28  ;;  %s1115_s14 = scalar_lea.vmem %s2072_s6, %s1582_s26 }
 0x3de   : > { %v1167_v38 = vld [vmem:[%s2088_s11] sm:$0x3]  ;;  %s1150_s24 = scalar_lea.vmem %s2073_s7, %s1582_s26  ;;  %s2089_s23 = scalar_lea.vmem [#allocation17], %s1793_s28  ;;  %1133 = vst [vmem:[%s1115_s14] sm:$0x3] %v1132_v37 }
 0x3df   : > { %v1202_v39 = vld [vmem:[%s2089_s23] sm:$0x3]  ;;  %s2090_s17 = scalar_lea.vmem [#allocation19], %s1793_s28  ;;  %1168 = vst [vmem:[%s1150_s24] sm:$0x3] %v1167_v38  ;;  %s1185_s29 = scalar_lea.vmem %s2074_s8, %s1582_s26 }
 0x3e0   : > { %v1237_v40 = vld [vmem:[%s2090_s17] sm:$0x3]  ;;  %s1220_s21 = scalar_lea.vmem %s2075_s9, %s1582_s26  ;;  %1203 = vst [vmem:[%s1185_s29] sm:$0x3] %v1202_v39 }
 0x3e1   : > { %1238 = vst [vmem:[%s1220_s21] sm:$0x3] %v1237_v40 }
 0x3e2 PF: > { %s2091_s25 = sld [smem:[#allocation33_spill]]  ;;  %p13_p13 = scmp.ge.s32.totalorder %s1759_s13, 4  }
 0x3e3   : > { %s2092_s30 = smov %s1673_s10  ;;  %s2094_s11 = smov %s1759_s13 }
 0x3e4   :  { %15 = sbr.rel (!%p13_p13) target bundleno = 2 (0x2), region = 484 }
 0x3e8   : > { %s2093_s10 = smov %s2091_s25 }

// kernel: neg.2
= control target key start
LH: loop header
LB: loop body
LE: loop exit
PB: predicated region body
PF: predicated region fallthrough
CT: control target
= control target key end

     0   :  { %s24_s0 = inlined_call_operand.vmem [shape: f32[2,3], index: 0, kind: input, shape index: {}]   ;;  %s25_s1 = inlined_call_operand.vmem [shape: f32[2,3], index: 1, kind: output, shape index: {}]  }
   0x1   :  { %v2_v0 = vld [vmem:[%s24_s0] sm:$0x3] }
   0x2   :  { %v5_v1 = vxor.u32 2147483648, %v2_v0 }
   0x4   :  { %7 = vst [vmem:[%s25_s1] sm:$0x3] %v5_v1 }

// kernel: lt.6
= control target key start
LH: loop header
LB: loop body
LE: loop exit
PB: predicated region body
PF: predicated region fallthrough
CT: control target
= control target key end

     0   :  { %v16_v2 = vmov 0   ;;  %s41_s0 = inlined_call_operand.vmem [shape: s32[2,3], index: 0, kind: input, shape index: {}]   ;;  %s42_s1 = inlined_call_operand.vmem [shape: s32[2,3], index: 1, kind: input, shape index: {}]   ;;  %s43_s2 = inlined_call_operand.vmem [shape: pred[2,3], index: 2, kind: output, shape index: {}]  }
   0x1   :  { %v3_v0 = vld [vmem:[%s41_s0] sm:$0x7] }
   0x2   :  { %v4_v1 = vld [vmem:[%s42_s1] sm:$0x7] }
   0x3   :  { %vm7_vm0 = vcmp.lt.s32.totalorder %v3_v0, %v4_v1 }
   0x4   :  { %v8_v3 = vsel %vm7_vm0, 1, %v16_v2 }
   0x5   :  { %v10_v4 = vpack.c.b16 %v16_v2, %v8_v3 }
   0x7   :  { %v11_v5 = vpack.c.b8 %v16_v2, %v10_v4 }
   0x9   :  { %14 = vst [vmem:[%s43_s2] sm:$0x1] %v11_v5 }

// kernel: tiny_pointnet_forward.9
= control target key start
LH: loop header
LB: loop body
LE: loop exit
PB: predicated region body
PF: predicated region fallthrough
CT: control target
= control target key end

     0   :  { %11 = vsyncpa [#allocation3], 0  ;;  %s943_s18 = smov 0   ;;  %s945_s19 = smov 0   ;;  %s1123_s0 = inlined_call_operand.vmem [shape: f32[2,64,3], index: 0, kind: input, shape index: {}]   ;;  %s1124_s1 = inlined_call_operand.vmem [shape: f32[2,3,64], index: 1, kind: input, shape index: {}]   ;;  %s1125_s2 = inlined_call_operand.hbm [shape: f32[1,64], index: 2, kind: input, shape index: {}]   ;;  %s1126_s3 = inlined_call_operand.vmem [shape: bf16[2,64,64], index: 3, kind: output, shape index: {0}]   ;;  %s1127_s4 = inlined_call_operand.vmem [shape: f32[2,1,64], index: 4, kind: output, shape index: {1}]   ;;  %s1128_s5 = inlined_call_operand.vmem [shape: f32[2,1,64], index: 5, kind: output, shape index: {2}]  }
   0x1   :  { %s947_s20 = smov 0  }
   0x2 LB: > { %s766_s21 = sadd.s32 4294967295, %s906_s20   ;;  %s29_s22 = sadd.s32 1, %s902_s19  ;;  %s906_s20 = sphi %s947_s20, %s17_s20   ;;  %s902_s19 = sphi %s945_s19, %s1132_s19   ;;  %s898_s18 = sphi %s943_s18, %s1131_s18  }
   0x3   : > { %p31_p0 = scmp.ge.s32.totalorder %s29_s22, 2  ;;  %p768_p1 = scmp.ge.s32.totalorder %s906_s20, 1 }
   0x4   : > { %p189_p2 = scmp.lt.s32.totalorder %s906_s20, 3  ;;  %p968_p4 = scmp.eq.s32.totalorder %s766_s21, 0 }
   0x5   : > { %s1134_s22 = smov (%p31_p0, %s29_s22), 0  ;;  %s908_s25 = smov [#allocation2]  }
   0x6   : > { %p964_p3 = pnand %p768_p1, %p189_p2  ;;  %s202_s26 = sshll.u32 %s908_s25, 4  ;;  %s203_s26 = int_to_ptr.vmem [resolvable:$true] %s202_s26 }
   0x7   : > { %s865_s27 = scalar_lea.vmem %s203_s26, 16  ;;  %s872_s28 = scalar_lea.vmem %s203_s26, 32 }
   0x8   : > { %p803_p5 = pneg %p964_p3  ;;  %p866_p8 = scmp.ne.s32.totalorder %s203_s26, %s865_s27 }
   0x9   : > { %p873_p11 = scmp.lt.s32.totalorder %s203_s26, %s203_s26  ;;  %p874_p12 = scmp.lt.s32.totalorder %s872_s28, %s865_s27 }
   0xa   : > { %p804_p6 = pnand %p968_p4, %p803_p5 }
   0xb   : > { %p875_p13 = por %p874_p12, %p873_p11 }
   0xc   : > { %p856_p7 = pneg %p804_p6 }
   0xe   : > { %p868_p9 = pnand %p866_p8, %p856_p7 }
  0x10   : > { %p869_p10 = pneg %p868_p9 }
  0x12   : > { %p876_p0 = pnand %p875_p13, %p869_p10 }
  0x14   : > { %879 = shalt.err (!%p876_p0)
}
  0x15   : > { %806 = dma.hbm_to_vmem [thread:$0]  (!%p804_p6), %s1125_s2, 16, %s203_s26, [#allocation3]  }
  0x16   : > { %235 = sbr.rel (%p964_p3) target bundleno = 247 (0xf7), region = 32 }
  0x1b   : > { %893 = dma.done.wait (%p968_p4), [#allocation3], 16  }
  0x1c   : > { %895 = vsyncadd (%p968_p4), [#allocation3], 4294967280  ;;  %p282_p1 = scmp.lt.s32.totalorder %s898_s18, 1  ;;  %v909_v0 = vmov 2   ;;  %v910_v1 = vmov 1   ;;  %v911_v7 = vmov 0   ;;  %v367_v12 = vlaneseq }
  0x1d   : > { %839 = vset.pattern.permute.xlu0 %v909_v0  ;;  %838 = vset.pattern.permute.xlu1 %v910_v1  ;;  %vm315_vm0 = vcmask 516096   ;;  %v912_v11 = vmov 0.0   ;;  %v1032_v33 = vld [vmem:[#allocation2] ss:$0 sm:$0xff]  ;;  %vm538_vm1 = vcmask 519168   ;;  %vm548_vm2 = vcmask 523264  }
  0x1e   : > { %s1136_s18 = smov (!%p282_p1, %s898_s18), 1  ;;  %v368_v15 = vshrl.u32 %v367_v12, 7 }
  0x1f   : > { %s789_s6 = sshll.u32 %s1136_s18, 6  ;;  %s1007_s12 = scalar_lea.vmem %s1127_s4, %s1136_s18 }
  0x20   : > { %s993_s9 = scalar_lea.vmem %s1123_s0, %s789_s6  ;;  %s1013_s15 = scalar_lea.vmem %s1128_s5, %s1136_s18  ;;  %316 = vst.msk [vmem:[%s1007_s12] sm:$0x1] %vm315_vm0, %v912_v11  ;;  %v421_v18 = vsub.s32 1, %v368_v15  ;;  %v369_v19 = vsub.s32 0, %v368_v15  ;;  %v473_v22 = vsub.s32 2, %v368_v15 }
  0x21   : > { %v318_v2 = vld [vmem:[%s993_s9] sm:$0xff]  ;;  %v319_v3 = vld [vmem:[%s993_s9 + $0x8] sm:$0xff]  ;;  %v321_v4 = vld [vmem:[%s993_s9 + $0x18] sm:$0xff]  ;;  %317 = vst.msk [vmem:[%s1013_s15] sm:$0x1] %vm315_vm0, %v912_v11  ;;  %s775_s16 = sshll.u32 %s1136_s18, 2 }
  0x22   : > { %440 = vperm.xlu0 %839, %v318_v2   ;;  %388 = vperm.xlu1 %838, %v318_v2   ;;  %v320_v5 = vld [vmem:[%s993_s9 + $0x10] sm:$0xff]  ;;  %v322_v6 = vld [vmem:[%s993_s9 + $0x20] sm:$0xff]  ;;  %v323_v8 = vld [vmem:[%s993_s9 + $0x28] sm:$0xff]  ;;  %s294_s23 = scalar_lea.vmem %s1124_s1, %s775_s16  ;;  %s790_s24 = sshll.u32 %s1136_s18, 5 }
  0x23   : > { %v324_v9 = vld [vmem:[%s993_s9 + $0x30] sm:$0xff]  ;;  %v325_v10 = vld [vmem:[%s993_s9 + $0x38] sm:$0xff]  ;;  %v326_v20 = vld [vmem:[%s294_s23] sm:$0x7]  ;;  %s1044_s27 = scalar_lea.vmem %s1126_s3, %s790_s24 }
  0x24   : > { %v1023_v24 = vrot.slane %v326_v20, %v421_v18  ;;  %v1025_v25 = vrot.slane %v326_v20, %v369_v19  ;;  %v1027_v26 = vrot.slane %v326_v20, %v473_v22 }
  0x26   : > { %842 = vset.pattern.permute.xlu0 %v910_v1  ;;  %392 = vperm.xlu1 %838, %v319_v3  }
  0x27   : > { %400 = vperm.xlu0 %842, %v321_v4  }
  0x2a   : > { %396 = vperm.xlu1 %838, %v320_v5  }
  0x2b   : > { %404 = vperm.xlu0 %842, %v322_v6  }
  0x2e   : > { %840 = vset.pattern.permute.xlu1 %v909_v0 }
  0x2f   : > { %845 = vset.pattern.permute.xlu0 %v911_v7  ;;  %444 = vperm.xlu1 %840, %v319_v3  }
  0x30   : > { %329 = vperm.xlu0 %845, %v318_v2  }
  0x33   : > { %841 = vset.pattern.permute.xlu1 %v911_v7 }
  0x34   : > { %334 = vperm.xlu0 %845, %v319_v3   ;;  %344 = vperm.xlu1 %841, %v321_v4  }
  0x38   : > { %339 = vperm.xlu0 %845, %v320_v5   ;;  %843 = vset.pattern.permute.xlu1 %v909_v0 }
  0x39   : > { %448 = vperm.xlu1 %843, %v320_v5  }
  0x3c   : > { %354 = vperm.xlu0 %845, %v323_v8  }
  0x3d   : > { %844 = vset.pattern.permute.xlu1 %v911_v7 }
  0x3e   : > { %349 = vperm.xlu1 %844, %v322_v6  }
  0x40   : > { %359 = vperm.xlu0 %845, %v324_v9  }
  0x42   : > { %846 = vset.pattern.permute.xlu1 %v909_v0 }
  0x43   : > { %452 = vperm.xlu1 %846, %v321_v4  }
  0x44   : > { %850 = vset.pattern.permute.xlu0 %v909_v0 }
  0x45   : > { %460 = vperm.xlu0 %850, %v323_v8  }
  0x47   : > { %847 = vset.pattern.permute.xlu1 %v910_v1 }
  0x48   : > { %408 = vperm.xlu1 %847, %v323_v8  }
  0x49   : > { %464 = vperm.xlu0 %850, %v324_v9  }
  0x4c   : > { %848 = vset.pattern.permute.xlu1 %v909_v0 }
  0x4d   : > { %456 = vperm.xlu1 %848, %v322_v6  }
  0x51   : > { %849 = vset.pattern.permute.xlu1 %v910_v1 }
  0x52   : > { %412 = vperm.xlu1 %849, %v324_v9  }
  0x56   : > { %851 = vset.pattern.permute.xlu1 %v911_v7 }
  0x57   : > { %364 = vperm.xlu1 %851, %v325_v10  }
  0x5b   : > { %852 = vset.pattern.permute.xlu1 %v910_v1 }
  0x5c   : > { %416 = vperm.xlu1 %852, %v325_v10  }
  0x60   : > { %853 = vset.pattern.permute.xlu1 %v909_v0 }
  0x61   : > { %468 = vperm.xlu1 %853, %v325_v10  }
  0x9d   : > { %v389_v13 = vpop.permute.xlu1 %388  ;;  %v441_v14 = vpop.permute.xlu0 %440 }
  0x9e   : > { %v423_v29 = vmul.f32 %v1023_v24, %v389_v13  ;;  %v475_v30 = vmul.f32 %v1027_v26, %v441_v14 }
  0xa1   : > { %v393_v16 = vpop.permute.xlu1 %392 }
  0xa2   : > { %v401_v17 = vpop.permute.xlu0 %400  ;;  %v424_v36 = vmul.f32 %v1023_v24, %v393_v16 }
  0xa3   : > { %v426_v55 = vmul.f32 %v1023_v24, %v401_v17 }
  0xa5   : > { %v397_v21 = vpop.permute.xlu1 %396 }
  0xa6   : > { %v405_v23 = vpop.permute.xlu0 %404  ;;  %v425_v46 = vmul.f32 %v1023_v24, %v397_v21 }
  0xa7   : > { %v427_v6 = vmul.f32 %v1023_v24, %v405_v23 }
  0xaa   : > { %v445_v27 = vpop.permute.xlu1 %444 }
  0xab   : > { %v330_v28 = vpop.permute.xlu0 %329  ;;  %v476_v39 = vmul.f32 %v1027_v26, %v445_v27 }
  0xac   : > { %v371_v31 = vmul.f32 %v1025_v25, %v330_v28 }
  0xae   : > { %v431_v32 = vadd.f32 %v423_v29, %v371_v31 }
  0xaf   : > { %v335_v34 = vpop.permute.xlu0 %334  ;;  %v345_v35 = vpop.permute.xlu1 %344 }
  0xb0   : > { %v483_v37 = vadd.f32 %v475_v30, %v431_v32  ;;  %v372_v38 = vmul.f32 %v1025_v25, %v335_v34  ;;  %v374_v56 = vmul.f32 %v1025_v25, %v345_v35 }
  0xb2   : > { %v1039_v40 = vadd.f32 %v1032_v33, %v483_v37  ;;  %v432_v41 = vadd.f32 %v424_v36, %v372_v38  ;;  %v434_v61 = vadd.f32 %v426_v55, %v374_v56 }
  0xb3   : > { %v340_v42 = vpop.permute.xlu0 %339 }
  0xb4   : > { %v791_v43 = vpack.c.bf16 %v1039_v40, %v1039_v40  ;;  %v484_v44 = vadd.f32 %v476_v39, %v432_v41  ;;  %v449_v45 = vpop.permute.xlu1 %448  ;;  %v373_v47 = vmul.f32 %v1025_v25, %v340_v42  ;;  %v574_v31 = vmul.f32 %v1039_v40, %v1039_v40 }
  0xb5   : > { %v477_v48 = vmul.f32 %v1027_v26, %v449_v45  ;;  %v549_v36 = vsel %vm548_vm2, %v1039_v40, 0.0 }
  0xb6   : > { %539 = vst.msk [vmem:[%s1044_s27] sm:$0xf] %vm538_vm1, %v791_v43  ;;  %v499_v49 = vadd.f32 %v1032_v33, %v484_v44  ;;  %v433_v50 = vadd.f32 %v425_v46, %v373_v47  ;;  %v582_v43 = vsel %vm548_vm2, %v574_v31, 0.0 }
  0xb7   : > { %v355_v51 = vpop.permute.xlu0 %354 }
  0xb8   : > { %v792_v52 = vpack.c.bf16 %v499_v49, %v499_v49  ;;  %v485_v53 = vadd.f32 %v477_v48, %v433_v50  ;;  %v376_v3 = vmul.f32 %v1025_v25, %v355_v51  ;;  %v575_v28 = vmul.f32 %v499_v49, %v499_v49 }
  0xb9   : > { %v350_v54 = vpop.permute.xlu1 %349  ;;  %v550_v32 = vsel %vm548_vm2, %v499_v49, 0.0 }
  0xba   : > { %540 = vst.msk [vmem:[%s1044_s27 + $0x4] sm:$0xf] %vm538_vm1, %v792_v52  ;;  %v500_v57 = vadd.f32 %v1032_v33, %v485_v53  ;;  %v375_v7 = vmul.f32 %v1025_v25, %v350_v54  ;;  %v583_v37 = vsel %vm548_vm2, %v575_v28, 0.0  ;;  %v551_v41 = vadd.f32 %v550_v32, %v549_v36 }
  0xbb   : > { %v360_v58 = vpop.permute.xlu0 %359  ;;  %v584_v48 = vadd.f32 %v583_v37, %v582_v43 }
  0xbc   : > { %v793_v59 = vpack.c.bf16 %v500_v57, %v500_v57  ;;  %v435_v12 = vadd.f32 %v427_v6, %v375_v7  ;;  %v377_v20 = vmul.f32 %v1025_v25, %v360_v58  ;;  %v576_v34 = vmul.f32 %v500_v57, %v500_v57 }
  0xbd   : > { %v552_v38 = vsel %vm548_vm2, %v500_v57, 0.0 }
  0xbe   : > { %v453_v60 = vpop.permute.xlu1 %452  ;;  %541 = vst.msk [vmem:[%s1044_s27 + $0x8] sm:$0xf] %vm538_vm1, %v793_v59  ;;  %v585_v44 = vsel %vm548_vm2, %v576_v34, 0.0  ;;  %v553_v49 = vadd.f32 %v552_v38, %v551_v41 }
  0xbf   : > { %v478_v62 = vmul.f32 %v1027_v26, %v453_v60  ;;  %v586_v52 = vadd.f32 %v585_v44, %v584_v48 }
  0xc0   : > { %v461_v0 = vpop.permute.xlu0 %460 }
  0xc1   : > { %v486_v63 = vadd.f32 %v478_v62, %v434_v61  ;;  %v480_v5 = vmul.f32 %v1027_v26, %v461_v0 }
  0xc3   : > { %v501_v1 = vadd.f32 %v1032_v33, %v486_v63  ;;  %v409_v2 = vpop.permute.xlu1 %408 }
  0xc4   : > { %v428_v4 = vmul.f32 %v1023_v24, %v409_v2  ;;  %v465_v16 = vpop.permute.xlu0 %464 }
  0xc5   : > { %v794_v8 = vpack.c.bf16 %v501_v1, %v501_v1  ;;  %v481_v22 = vmul.f32 %v1027_v26, %v465_v16  ;;  %v577_v39 = vmul.f32 %v501_v1, %v501_v1  ;;  %v554_v45 = vsel %vm548_vm2, %v501_v1, 0.0 }
  0xc6   : > { %v436_v9 = vadd.f32 %v428_v4, %v376_v3  ;;  %v555_v53 = vadd.f32 %v554_v45, %v553_v49 }
  0xc7   : > { %542 = vst.msk [vmem:[%s1044_s27 + $0xc] sm:$0xf] %vm538_vm1, %v794_v8  ;;  %v587_v40 = vsel %vm548_vm2, %v577_v39, 0.0 }
  0xc8   : > { %v488_v10 = vadd.f32 %v480_v5, %v436_v9  ;;  %v457_v11 = vpop.permute.xlu1 %456  ;;  %v588_v56 = vadd.f32 %v587_v40, %v586_v52 }
  0xc9   : > { %v479_v13 = vmul.f32 %v1027_v26, %v457_v11 }
  0xca   : > { %v503_v14 = vadd.f32 %v1032_v33, %v488_v10 }
  0xcb   : > { %v487_v15 = vadd.f32 %v479_v13, %v435_v12 }
  0xcc   : > { %v796_v17 = vpack.c.bf16 %v503_v14, %v503_v14  ;;  %v579_v59 = vmul.f32 %v503_v14, %v503_v14  ;;  %v558_v0 = vsel %vm548_vm2, %v503_v14, 0.0 }
  0xcd   : > { %v502_v18 = vadd.f32 %v1032_v33, %v487_v15  ;;  %v413_v19 = vpop.permute.xlu1 %412 }
  0xce   : > { %544 = vst.msk [vmem:[%s1044_s27 + $0x14] sm:$0xf] %vm538_vm1, %v796_v17  ;;  %v429_v21 = vmul.f32 %v1023_v24, %v413_v19  ;;  %v591_v3 = vsel %vm548_vm2, %v579_v59, 0.0 }
  0xcf   : > { %v795_v23 = vpack.c.bf16 %v502_v18, %v502_v18  ;;  %v578_v46 = vmul.f32 %v502_v18, %v502_v18  ;;  %v556_v50 = vsel %vm548_vm2, %v502_v18, 0.0 }
  0xd0   : > { %v437_v27 = vadd.f32 %v429_v21, %v377_v20  ;;  %v557_v57 = vadd.f32 %v556_v50, %v555_v53  ;;  %v547_v21 = vld [vmem:[%s1007_s12] sm:$0x1] }
  0xd1   : > { %543 = vst.msk [vmem:[%s1044_s27 + $0x10] sm:$0xf] %vm538_vm1, %v795_v23  ;;  %v589_v54 = vsel %vm548_vm2, %v578_v46, 0.0 }
  0xd2   : > { %v489_v29 = vadd.f32 %v481_v22, %v437_v27  ;;  %v365_v30 = vpop.permute.xlu1 %364  ;;  %v590_v63 = vadd.f32 %v589_v54, %v588_v56  ;;  %v559_v2 = vadd.f32 %v558_v0, %v557_v57  ;;  %v573_v27 = vld [vmem:[%s1013_s15] sm:$0x1] }
  0xd3   : > { %v378_v55 = vmul.f32 %v1025_v25, %v365_v30 }
  0xd4   : > { %v504_v35 = vadd.f32 %v1032_v33, %v489_v29  ;;  %v592_v6 = vadd.f32 %v591_v3, %v590_v63 }
  0xd6   : > { %v797_v42 = vpack.c.bf16 %v504_v35, %v504_v35  ;;  %v580_v60 = vmul.f32 %v504_v35, %v504_v35 }
  0xd7   : > { %v417_v47 = vpop.permute.xlu1 %416 }
  0xd8   : > { %545 = vst.msk [vmem:[%s1044_s27 + $0x18] sm:$0xf] %vm538_vm1, %v797_v42  ;;  %v430_v51 = vmul.f32 %v1023_v24, %v417_v47  ;;  %v560_v24 = vsel %vm548_vm2, %v504_v35, 0.0  ;;  %v593_v25 = vsel %vm548_vm2, %v580_v60, 0.0 }
  0xd9   : > { %v561_v5 = vadd.f32 %v560_v24, %v559_v2  ;;  %v594_v9 = vadd.f32 %v593_v25, %v592_v6 }
  0xda   : > { %v438_v61 = vadd.f32 %v430_v51, %v378_v55 }
  0xdc   : > { %v469_v58 = vpop.permute.xlu1 %468 }
  0xdd   : > { %v482_v62 = vmul.f32 %v1027_v26, %v469_v58 }
  0xdf   : > { %v490_v1 = vadd.f32 %v482_v62, %v438_v61 }
  0xe1   : > { %v505_v4 = vadd.f32 %v1032_v33, %v490_v1 }
  0xe3   : > { %v798_v7 = vpack.c.bf16 %v505_v4, %v505_v4  ;;  %v562_v8 = vsel %vm548_vm2, %v505_v4, 0.0  ;;  %v581_v26 = vmul.f32 %v505_v4, %v505_v4 }
  0xe4   : > { %v563_v10 = vadd.f32 %v562_v8, %v561_v5 }
  0xe5   : > { %546 = vst.msk [vmem:[%s1044_s27 + $0x1c] sm:$0xf] %vm538_vm1, %v798_v7  ;;  %v595_v11 = vsel %vm548_vm2, %v581_v26, 0.0 }
  0xe6   : > { %v564_v12 = vrot.slane %v563_v10, 4  ;;  %v596_v13 = vadd.f32 %v595_v11, %v594_v9 }
  0xe8   : > { %v565_v14 = vadd.f32 %v564_v12, %v563_v10  ;;  %v597_v33 = vrot.slane %v596_v13, 4 }
  0xea   : > { %v566_v15 = vrot.slane %v565_v14, 2  ;;  %v598_v16 = vadd.f32 %v597_v33, %v596_v13 }
  0xec   : > { %v567_v17 = vadd.f32 %v566_v15, %v565_v14  ;;  %v599_v18 = vrot.slane %v598_v16, 2 }
  0xee   : > { %v568_v19 = vrot.slane %v567_v17, 1  ;;  %v600_v20 = vadd.f32 %v599_v18, %v598_v16 }
  0xf0   : > { %v569_v22 = vadd.f32 %v568_v19, %v567_v17  ;;  %v601_v23 = vrot.slane %v600_v20, 1 }
  0xf2   : > { %v570_v28 = vadd.f32 %v569_v22, %v547_v21  ;;  %v602_v29 = vadd.f32 %v601_v23, %v600_v20 }
  0xf4   : > { %572 = vst.msk [vmem:[%s1007_s12] sm:$0x1] %vm315_vm0, %v570_v28  ;;  %v603_v30 = vadd.f32 %v602_v29, %v573_v27 }
  0xf6   : > { %604 = vst.msk [vmem:[%s1013_s15] sm:$0x1] %vm315_vm0, %v603_v30 }
  0xf7 PF: > { %s17_s20 = sadd.s32 1, %s906_s20   ;;  %s1131_s18 = smov %s902_s19 }
  0xf8   : > { %p14_p2 = scmp.ge.s32.totalorder %s17_s20, 4   ;;  %s1132_s19 = smov %s1134_s22 }
  0xfa   :  { %16 = sbr.rel (!%p14_p2) target bundleno = 2 (0x2), region = 98 }
  0xff   :  { %659 = vsyncpa [#allocation3], 1 }
 0x100   :  { %661 = vsyncpa [#allocation3 + $0x1], 1 }

// kernel: tiny_pointnet_forward.10
= control target key start
LH: loop header
LB: loop body
LE: loop exit
PB: predicated region body
PF: predicated region fallthrough
CT: control target
= control target key end

     0   :  { %13 = vsyncpa [#allocation3], 0  ;;  %s1007_s24 = smov 0   ;;  %s1009_s25 = smov 0   ;;  %s1153_s0 = inlined_call_operand.vmem [shape: bf16[2,64,64], index: 0, kind: input, shape index: {}]   ;;  %s1154_s1 = inlined_call_operand.vmem [shape: bf16[64,64], index: 1, kind: input, shape index: {}]   ;;  %s1155_s2 = inlined_call_operand.hbm [shape: f32[1,64], index: 2, kind: input, shape index: {}]   ;;  %s1156_s3 = inlined_call_operand.vmem [shape: f32[1,64], index: 3, kind: input, shape index: {}]   ;;  %s1157_s4 = inlined_call_operand.vmem [shape: f32[1,64], index: 4, kind: input, shape index: {}]   ;;  %s1158_s5 = inlined_call_operand.vmem [shape: bf16[2,64,64], index: 5, kind: output, shape index: {0}]   ;;  %s1159_s6 = inlined_call_operand.vmem [shape: f32[2,1,64], index: 6, kind: output, shape index: {1}]   ;;  %s1160_s7 = inlined_call_operand.vmem [shape: f32[2,1,64], index: 7, kind: output, shape index: {2}]  }
   0x1   :  { %s1011_s26 = smov 0  }
   0x2 LB: > { %s778_s27 = sadd.s32 4294967295, %s963_s26   ;;  %s31_s28 = sadd.s32 1, %s959_s25  ;;  %s963_s26 = sphi %s1011_s26, %s19_s26   ;;  %s959_s25 = sphi %s1009_s25, %s1164_s25   ;;  %s955_s24 = sphi %s1007_s24, %s1163_s24  }
   0x3   : > { %p33_p0 = scmp.ge.s32.totalorder %s31_s28, 2  ;;  %p780_p1 = scmp.ge.s32.totalorder %s963_s26, 1 }
   0x4   : > { %p228_p2 = scmp.lt.s32.totalorder %s963_s26, 3  ;;  %p1032_p4 = scmp.eq.s32.totalorder %s778_s27, 0 }
   0x5   : > { %s1166_s28 = smov (%p33_p0, %s31_s28), 0  ;;  %s965_s8 = smov [#allocation2]  }
   0x6   : > { %p1028_p3 = pnand %p780_p1, %p228_p2  ;;  %s244_s9 = sshll.u32 %s965_s8, 4  ;;  %s245_s9 = int_to_ptr.vmem [resolvable:$true] %s244_s9 }
   0x7   : > { %s922_s10 = scalar_lea.vmem %s245_s9, 16  ;;  %s929_s11 = scalar_lea.vmem %s245_s9, 32 }
   0x8   : > { %p875_p5 = pneg %p1028_p3  ;;  %p923_p8 = scmp.ne.s32.totalorder %s245_s9, %s922_s10 }
   0x9   : > { %p930_p11 = scmp.lt.s32.totalorder %s245_s9, %s245_s9  ;;  %p931_p12 = scmp.lt.s32.totalorder %s929_s11, %s922_s10 }
   0xa   : > { %p876_p6 = pnand %p1032_p4, %p875_p5 }
   0xb   : > { %p932_p13 = por %p931_p12, %p930_p11 }
   0xc   : > { %p913_p7 = pneg %p876_p6 }
   0xe   : > { %p925_p9 = pnand %p923_p8, %p913_p7 }
  0x10   : > { %p926_p10 = pneg %p925_p9 }
  0x12   : > { %p933_p0 = pnand %p932_p13, %p926_p10 }
  0x14   : > { %936 = shalt.err (!%p933_p0)
}
  0x15   : > { %878 = dma.hbm_to_vmem [thread:$0]  (!%p876_p6), %s1155_s2, 16, %s245_s9, [#allocation3]  }
  0x16   : > { %276 = sbr.rel (%p1028_p3) target bundleno = 278 (0x116), region = 40 }
  0x1b   : > { %950 = dma.done.wait (%p1032_p4), [#allocation3], 16  }
  0x1c   : > { %952 = vsyncadd (%p1032_p4), [#allocation3], 4294967280  ;;  %p323_p1 = scmp.lt.s32.totalorder %s955_s24, 1  ;;  %vm353_vm0 = vcmask 516096   ;;  %v966_v0 = vmov 0.0   ;;  %v907_v1 = vld [vmem:[%s1154_s1 + $0x18] sm:$0xff]  }
  0x1d   : > { %v908_v2 = vld [vmem:[%s1154_s1 + $0x10] sm:$0xff]   ;;  %847 = vmatprep.subr.bf16.mxu0 %v907_v1  ;;  %863 = vmatprep.subr.bf16.mxu1 %v907_v1  ;;  %v909_v3 = vld [vmem:[%s1154_s1 + $0x8] sm:$0xff]   ;;  %v789_v5 = vld [vmem:[%s1156_s3] ss:$0 sm:$0xff]  ;;  %vm453_vm1 = vcmask 523264   ;;  %vm563_vm2 = vcmask 519168  }
  0x1e   : > { %s1168_s24 = smov (!%p323_p1, %s955_s24), 1  ;;  %848 = vmatpush3.bf16.msra.mxu0 %v907_v1  ;;  %867 = vmatpush3.bf16.msra.mxu1 %v907_v1  ;;  %v790_v11 = vld [vmem:[%s1157_s4] ss:$0 sm:$0xff] }
  0x1f   : > { %s1057_s16 = scalar_lea.vmem %s1160_s7, %s1168_s24  ;;  %s810_s17 = sshll.u32 %s1168_s24, 5  ;;  %849 = vmatprep.subr.bf16.mxu0 %v908_v2  ;;  %864 = vmatprep.subr.bf16.mxu1 %v908_v2  ;;  %v910_v20 = vld [vmem:[%s1154_s1] sm:$0xff]  }
  0x20   : > { %355 = vst.msk [vmem:[%s1057_s16] sm:$0x1] %vm353_vm0, %v966_v0  ;;  %s330_s27 = scalar_lea.vmem %s1153_s0, %s810_s17  ;;  %s1094_s18 = scalar_lea.vmem %s1159_s6, %s1168_s24  ;;  %v791_v47 = vld [vmem:[#allocation2] ss:$0 sm:$0xff] }
  0x21   : > { %v821_v4 = vld [vmem:[%s330_s27] sm:$0xff]   ;;  %v836_v8 = vld [vmem:[%s330_s27 + $0x8] sm:$0xff]   ;;  %v837_v9 = vld [vmem:[%s330_s27 + $0x10] sm:$0xff]   ;;  %354 = vst.msk [vmem:[%s1094_s18] sm:$0x1] %vm353_vm0, %v966_v0  ;;  %s1104_s21 = scalar_lea.vmem %s1158_s5, %s810_s17 }
  0x22   : > { %v822_v6 = vunpack.c.l.bf16 %v821_v4  ;;  %v823_v7 = vunpack.c.h.bf16 %v821_v4  ;;  %v838_v10 = vld [vmem:[%s330_s27 + $0x18] sm:$0xff]   ;;  %v826_v12 = vunpack.c.l.bf16 %v836_v8  ;;  %v827_v13 = vunpack.c.h.bf16 %v836_v8  ;;  %850 = vmatpush3.bf16.msra.mxu0 %v908_v2  ;;  %868 = vmatpush3.bf16.msra.mxu1 %v908_v2 }
  0x23   : > { %v830_v14 = vunpack.c.l.bf16 %v837_v9  ;;  %v831_v15 = vunpack.c.h.bf16 %v837_v9  ;;  %v834_v18 = vunpack.c.l.bf16 %v838_v10  ;;  %v835_v19 = vunpack.c.h.bf16 %v838_v10  ;;  %851 = vmatprep.subr.bf16.mxu0 %v909_v3  ;;  %865 = vmatprep.subr.bf16.mxu1 %v909_v3 }
  0x24   : > { %v379_v16 = vmul.f32 %v822_v6, %v789_v5  ;;  %v380_v17 = vmul.f32 %v823_v7, %v789_v5  ;;  %v381_v21 = vmul.f32 %v826_v12, %v789_v5  ;;  %v382_v22 = vmul.f32 %v827_v13, %v789_v5 }
  0x25   : > { %v383_v23 = vmul.f32 %v830_v14, %v789_v5  ;;  %v384_v26 = vmul.f32 %v831_v15, %v789_v5  ;;  %v385_v27 = vmul.f32 %v834_v18, %v789_v5  ;;  %v386_v31 = vmul.f32 %v835_v19, %v789_v5 }
  0x26   : > { %v394_v24 = vadd.f32 %v790_v11, %v379_v16  ;;  %v395_v25 = vadd.f32 %v790_v11, %v380_v17  ;;  %v396_v28 = vadd.f32 %v790_v11, %v381_v21  ;;  %v397_v29 = vadd.f32 %v790_v11, %v382_v22  ;;  %852 = vmatpush3.bf16.msra.mxu0 %v909_v3 }
  0x27   : > { %v398_v30 = vadd.f32 %v790_v11, %v383_v23  ;;  %869 = vmatpush3.bf16.msra.mxu1 %v909_v3  ;;  %v399_v34 = vadd.f32 %v790_v11, %v384_v26  ;;  %v400_v35 = vadd.f32 %v790_v11, %v385_v27  ;;  %853 = vmatprep.subr.bf16.mxu0 %v910_v20 }
  0x28   : > { %v402_v32 = vmax.f32 %v394_v24, 0.0  ;;  %v403_v33 = vmax.f32 %v395_v25, 0.0  ;;  %866 = vmatprep.subr.bf16.mxu1 %v910_v20  ;;  %v404_v36 = vmax.f32 %v396_v28, 0.0  ;;  %v405_v37 = vmax.f32 %v397_v29, 0.0 }
  0x29   : > { %v406_v38 = vmax.f32 %v398_v30, 0.0  ;;  %v401_v39 = vadd.f32 %v790_v11, %v386_v31  ;;  %v407_v41 = vmax.f32 %v399_v34, 0.0  ;;  %v408_v42 = vmax.f32 %v400_v35, 0.0 }
  0x2a   : > { %v418_v40 = vpack.c.bf16 %v403_v33, %v402_v32  ;;  %v419_v43 = vpack.c.bf16 %v405_v37, %v404_v36  ;;  %854 = vmatpush3.bf16.msra.mxu0 %v910_v20 }
  0x2b   : > { %v409_v44 = vmax.f32 %v401_v39, 0.0  ;;  %870 = vmatpush3.bf16.msra.mxu1 %v910_v20  ;;  %v420_v45 = vpack.c.bf16 %v407_v41, %v406_v38 }
  0x2c   : > { %855 = vmatprep.mubr.msk.bf16.mxu0 %vm453_vm1, %v418_v40 }
  0x2d   : > { %v421_v46 = vpack.c.bf16 %v409_v44, %v408_v42  ;;  %859 = vmatprep.mubr.msk.bf16.mxu1 %vm453_vm1, %v420_v45  ;;  %856 = vmatmul.mubr.msk.bf16.vlgmr.msra.gmra.mxu0 %vm453_vm1, %v419_v43 }
  0x2f   : > { %860 = vmatmul.mubr.msk.bf16.vlgmr.msra.gmra.mxu1 %vm453_vm1, %v421_v46 }
  0xed   : > { %v857_v48 = vpop.f32.mrf.mxu0 }
  0xee   : > { %v509_v50 = vadd.f32 %v857_v48, %v791_v47 }
  0xef   : > { %v861_v49 = vpop.f32.mrf.mxu1  ;;  %v500_v52 = vpop.f32.mrf.mxu0 }
  0xf0   : > { %v525_v51 = vadd.f32 %v861_v49, %v791_v47  ;;  %v814_v54 = vpack.c.bf16 %v509_v50, %v509_v50  ;;  %v501_v55 = vadd.f32 %v791_v47, %v500_v52  ;;  %v600_v4 = vmul.f32 %v509_v50, %v509_v50 }
  0xf1   : > { %v516_v53 = vpop.f32.mrf.mxu1  ;;  %v858_v57 = vpop.f32.mrf.mxu0  ;;  %v576_v11 = vsel %vm453_vm1, %v509_v50, 0.0 }
  0xf2   : > { %v818_v56 = vpack.c.bf16 %v525_v51, %v525_v51  ;;  %v517_v58 = vadd.f32 %v791_v47, %v516_v53  ;;  %566 = vst.msk [vmem:[%s1104_s21 + $0x8] sm:$0xf] %vm563_vm2, %v814_v54  ;;  %v812_v60 = vpack.c.bf16 %v501_v55, %v501_v55  ;;  %v512_v61 = vadd.f32 %v858_v57, %v791_v47 }
  0xf3   : > { %v862_v59 = vpop.f32.mrf.mxu1  ;;  %v503_v63 = vpop.f32.mrf.mxu0  ;;  %v598_v1 = vmul.f32 %v501_v55, %v501_v55  ;;  %v573_v7 = vsel %vm453_vm1, %v501_v55, 0.0  ;;  %v609_v20 = vsel %vm453_vm1, %v600_v4, 0.0  ;;  %v604_v30 = vmul.f32 %v525_v51, %v525_v51  ;;  %v572_v55 = vld [vmem:[%s1094_s18] sm:$0x1] }
  0xf4   : > { %570 = vst.msk [vmem:[%s1104_s21 + $0x18] sm:$0xf] %vm563_vm2, %v818_v56  ;;  %v816_v62 = vpack.c.bf16 %v517_v58, %v517_v58  ;;  %564 = vst.msk [vmem:[%s1104_s21] sm:$0xf] %vm563_vm2, %v812_v60  ;;  %v504_v2 = vadd.f32 %v791_v47, %v503_v63  ;;  %v528_v3 = vadd.f32 %v862_v59, %v791_v47  ;;  %v578_v21 = vsel %vm453_vm1, %v512_v61, 0.0 }
  0xf5   : > { %v519_v0 = vpop.f32.mrf.mxu1  ;;  %v815_v5 = vpack.c.bf16 %v512_v61, %v512_v61  ;;  %v606_v14 = vsel %vm453_vm1, %v598_v1, 0.0  ;;  %v601_v15 = vmul.f32 %v512_v61, %v512_v61  ;;  %v602_v22 = vmul.f32 %v517_v58, %v517_v58 }
  0xf6   : > { %568 = vst.msk [vmem:[%s1104_s21 + $0x10] sm:$0xf] %vm563_vm2, %v816_v62  ;;  %v520_v6 = vadd.f32 %v791_v47, %v519_v0  ;;  %v813_v8 = vpack.c.bf16 %v504_v2, %v504_v2  ;;  %v574_v9 = vsel %vm453_vm1, %v504_v2, 0.0  ;;  %v599_v10 = vmul.f32 %v504_v2, %v504_v2 }
  0xf7   : > { %567 = vst.msk [vmem:[%s1104_s21 + $0xc] sm:$0xf] %vm563_vm2, %v815_v5  ;;  %v575_v12 = vadd.f32 %v574_v9, %v573_v7  ;;  %v819_v13 = vpack.c.bf16 %v528_v3, %v528_v3  ;;  %v611_v25 = vsel %vm453_vm1, %v601_v15, 0.0  ;;  %v580_v26 = vsel %vm453_vm1, %v517_v58, 0.0  ;;  %v597_v58 = vld [vmem:[%s1057_s16] sm:$0x1] }
  0xf8   : > { %565 = vst.msk [vmem:[%s1104_s21 + $0x4] sm:$0xf] %vm563_vm2, %v813_v8  ;;  %v607_v16 = vsel %vm453_vm1, %v599_v10, 0.0  ;;  %v817_v17 = vpack.c.bf16 %v520_v6, %v520_v6  ;;  %v603_v27 = vmul.f32 %v520_v6, %v520_v6  ;;  %v613_v31 = vsel %vm453_vm1, %v602_v22, 0.0 }
  0xf9   : > { %v577_v18 = vadd.f32 %v576_v11, %v575_v12  ;;  %v608_v19 = vadd.f32 %v607_v16, %v606_v14  ;;  %571 = vst.msk [vmem:[%s1104_s21 + $0x1c] sm:$0xf] %vm563_vm2, %v819_v13  ;;  %v582_v32 = vsel %vm453_vm1, %v520_v6, 0.0  ;;  %v584_v35 = vsel %vm453_vm1, %v525_v51, 0.0 }
  0xfa   : > { %569 = vst.msk [vmem:[%s1104_s21 + $0x14] sm:$0xf] %vm563_vm2, %v817_v17  ;;  %v605_v36 = vmul.f32 %v528_v3, %v528_v3  ;;  %v615_v37 = vsel %vm453_vm1, %v603_v27, 0.0  ;;  %v617_v40 = vsel %vm453_vm1, %v604_v30, 0.0  ;;  %v586_v41 = vsel %vm453_vm1, %v528_v3, 0.0 }
  0xfb   : > { %v610_v23 = vadd.f32 %v609_v20, %v608_v19  ;;  %v579_v24 = vadd.f32 %v578_v21, %v577_v18 }
  0xfc   : > { %v619_v44 = vsel %vm453_vm1, %v605_v36, 0.0 }
  0xfd   : > { %v581_v28 = vadd.f32 %v580_v26, %v579_v24  ;;  %v612_v29 = vadd.f32 %v611_v25, %v610_v23 }
  0xff   : > { %v583_v33 = vadd.f32 %v582_v32, %v581_v28  ;;  %v614_v34 = vadd.f32 %v613_v31, %v612_v29 }
 0x101   : > { %v585_v38 = vadd.f32 %v584_v35, %v583_v33  ;;  %v616_v39 = vadd.f32 %v615_v37, %v614_v34 }
 0x103   : > { %v587_v42 = vadd.f32 %v586_v41, %v585_v38  ;;  %v618_v43 = vadd.f32 %v617_v40, %v616_v39 }
 0x105   : > { %v588_v45 = vrot.slane %v587_v42, 4  ;;  %v620_v46 = vadd.f32 %v619_v44, %v618_v43 }
 0x107   : > { %v589_v47 = vadd.f32 %v588_v45, %v587_v42  ;;  %v621_v48 = vrot.slane %v620_v46, 4 }
 0x109   : > { %v590_v49 = vrot.slane %v589_v47, 2  ;;  %v622_v50 = vadd.f32 %v621_v48, %v620_v46 }
 0x10b   : > { %v591_v51 = vadd.f32 %v590_v49, %v589_v47  ;;  %v623_v52 = vrot.slane %v622_v50, 2 }
 0x10d   : > { %v592_v53 = vrot.slane %v591_v51, 1  ;;  %v624_v54 = vadd.f32 %v623_v52, %v622_v50 }
 0x10f   : > { %v593_v56 = vadd.f32 %v592_v53, %v591_v51  ;;  %v625_v57 = vrot.slane %v624_v54, 1 }
 0x111   : > { %v594_v59 = vadd.f32 %v593_v56, %v572_v55  ;;  %v626_v60 = vadd.f32 %v625_v57, %v624_v54 }
 0x113   : > { %596 = vst.msk [vmem:[%s1094_s18] sm:$0x1] %vm353_vm0, %v594_v59  ;;  %v627_v61 = vadd.f32 %v626_v60, %v597_v58 }
 0x115   : > { %628 = vst.msk [vmem:[%s1057_s16] sm:$0x1] %vm353_vm0, %v627_v61 }
 0x116 PF: > { %s19_s26 = sadd.s32 1, %s963_s26   ;;  %s1163_s24 = smov %s959_s25 }
 0x117   : > { %p16_p2 = scmp.ge.s32.totalorder %s19_s26, 4   ;;  %s1164_s25 = smov %s1166_s28 }
 0x119   :  { %18 = sbr.rel (!%p16_p2) target bundleno = 2 (0x2), region = 103 }
 0x11e   :  { %683 = vsyncpa [#allocation3], 1 }
 0x11f   :  { %685 = vsyncpa [#allocation3 + $0x1], 1 }

// kernel: tiny_pointnet_forward.12
= control target key start
LH: loop header
LB: loop body
LE: loop exit
PB: predicated region body
PF: predicated region fallthrough
CT: control target
= control target key end

     0   :  { %13 = vsyncpa [#allocation3], 0  ;;  %s1011_s24 = smov 0   ;;  %s1013_s25 = smov 0   ;;  %s1113_s0 = inlined_call_operand.vmem [shape: bf16[2,64,64], index: 0, kind: input, shape index: {}]   ;;  %s1114_s1 = inlined_call_operand.vmem [shape: bf16[64,128], index: 1, kind: input, shape index: {}]   ;;  %s1115_s2 = inlined_call_operand.hbm [shape: f32[1,128], index: 2, kind: input, shape index: {}]   ;;  %s1116_s3 = inlined_call_operand.vmem [shape: f32[1,64], index: 3, kind: input, shape index: {}]   ;;  %s1117_s4 = inlined_call_operand.vmem [shape: f32[1,64], index: 4, kind: input, shape index: {}]   ;;  %s1118_s5 = inlined_call_operand.vmem [shape: bf16[2,64,128], index: 5, kind: output, shape index: {0}]   ;;  %s1119_s6 = inlined_call_operand.vmem [shape: f32[2,1,128], index: 6, kind: output, shape index: {1}]   ;;  %s1120_s7 = inlined_call_operand.vmem [shape: f32[2,1,128], index: 7, kind: output, shape index: {2}]  }
   0x1   :  { %s1015_s26 = smov 0  }
   0x2 LB: > { %s759_s27 = sadd.s32 4294967295, %s967_s26   ;;  %s31_s28 = sadd.s32 1, %s963_s25  ;;  %s967_s26 = sphi %s1015_s26, %s19_s26   ;;  %s963_s25 = sphi %s1013_s25, %s1124_s25   ;;  %s959_s24 = sphi %s1011_s24, %s1123_s24  }
   0x3   : > { %p33_p0 = scmp.ge.s32.totalorder %s31_s28, 2  ;;  %p761_p1 = scmp.ge.s32.totalorder %s967_s26, 1 }
   0x4   : > { %p228_p2 = scmp.lt.s32.totalorder %s967_s26, 3  ;;  %p1036_p4 = scmp.eq.s32.totalorder %s759_s27, 0 }
   0x5   : > { %s1126_s28 = smov (%p33_p0, %s31_s28), 0  ;;  %s969_s8 = smov [#allocation2]  }
   0x6   : > { %p1032_p3 = pnand %p761_p1, %p228_p2  ;;  %s244_s9 = sshll.u32 %s969_s8, 4  ;;  %s245_s9 = int_to_ptr.vmem [resolvable:$true] %s244_s9 }
   0x7   : > { %s926_s10 = scalar_lea.vmem %s245_s9, 16  ;;  %s933_s11 = scalar_lea.vmem %s245_s9, 32 }
   0x8   : > { %p879_p5 = pneg %p1032_p3  ;;  %p927_p8 = scmp.ne.s32.totalorder %s245_s9, %s926_s10 }
   0x9   : > { %p934_p11 = scmp.lt.s32.totalorder %s245_s9, %s245_s9  ;;  %p935_p12 = scmp.lt.s32.totalorder %s933_s11, %s926_s10 }
   0xa   : > { %p880_p6 = pnand %p1036_p4, %p879_p5 }
   0xb   : > { %p936_p13 = por %p935_p12, %p934_p11 }
   0xc   : > { %p917_p7 = pneg %p880_p6 }
   0xe   : > { %p929_p9 = pnand %p927_p8, %p917_p7 }
  0x10   : > { %p930_p10 = pneg %p929_p9 }
  0x12   : > { %p937_p0 = pnand %p936_p13, %p930_p10 }
  0x14   : > { %940 = shalt.err (!%p937_p0)
}
  0x15   : > { %882 = dma.hbm_to_vmem [thread:$0]  (!%p880_p6), %s1115_s2, 16, %s245_s9, [#allocation3]  }
  0x16   : > { %276 = sbr.rel (%p1032_p3) target bundleno = 278 (0x116), region = 40 }
  0x1b   : > { %954 = dma.done.wait (%p1036_p4), [#allocation3], 16  }
  0x1c   : > { %956 = vsyncadd (%p1036_p4), [#allocation3], 4294967280  ;;  %p323_p1 = scmp.lt.s32.totalorder %s959_s24, 1  ;;  %v911_v0 = vld [vmem:[%s1114_s1 + $0x18] sm:$0xff]   ;;  %v912_v1 = vld [vmem:[%s1114_s1 + $0x10] sm:$0xff]   ;;  %vm452_vm0 = vcmask 523264  }
  0x1d   : > { %851 = vmatprep.subr.bf16.mxu0 %v911_v0  ;;  %867 = vmatprep.subr.bf16.mxu1 %v911_v0  ;;  %v913_v2 = vld [vmem:[%s1114_s1 + $0x8] sm:$0xff]   ;;  %v770_v4 = vld [vmem:[%s1116_s3] ss:$0 sm:$0xff]  ;;  %v970_v46 = vmov 0.0  }
  0x1e   : > { %s1128_s24 = smov (!%p323_p1, %s959_s24), 1  ;;  %852 = vmatpush3.bf16.msra.mxu0 %v911_v0  ;;  %871 = vmatpush3.bf16.msra.mxu1 %v911_v0  ;;  %v771_v10 = vld [vmem:[%s1117_s4] ss:$0 sm:$0xff] }
  0x1f   : > { %s791_s14 = sshll.u32 %s1128_s24, 5  ;;  %853 = vmatprep.subr.bf16.mxu0 %v912_v1  ;;  %868 = vmatprep.subr.bf16.mxu1 %v912_v1  ;;  %v914_v19 = vld [vmem:[%s1114_s1] sm:$0xff]   ;;  %s1085_s13 = scalar_lea.vmem %s1119_s6, %s1128_s24 }
  0x20   : > { %s330_s21 = scalar_lea.vmem %s1113_s0, %s791_s14  ;;  %s1091_s17 = scalar_lea.vmem %s1120_s7, %s1128_s24  ;;  %353 = vst [vmem:[%s1085_s13] sm:$0x1] %v970_v46  ;;  %v772_v49 = vld [vmem:[#allocation2] ss:$0 sm:$0xff] }
  0x21   : > { %v802_v3 = vld [vmem:[%s330_s21] sm:$0xff]   ;;  %v837_v7 = vld [vmem:[%s330_s21 + $0x8] sm:$0xff]   ;;  %v838_v8 = vld [vmem:[%s330_s21 + $0x10] sm:$0xff]   ;;  %354 = vst [vmem:[%s1091_s17] sm:$0x1] %v970_v46  ;;  %s340_s20 = scalar_lea.vmem %s1118_s5, %s791_s14 }
  0x22   : > { %v803_v5 = vunpack.c.l.bf16 %v802_v3  ;;  %v804_v6 = vunpack.c.h.bf16 %v802_v3  ;;  %v839_v9 = vld [vmem:[%s330_s21 + $0x18] sm:$0xff]   ;;  %v807_v11 = vunpack.c.l.bf16 %v837_v7  ;;  %v808_v12 = vunpack.c.h.bf16 %v837_v7  ;;  %854 = vmatpush3.bf16.msra.mxu0 %v912_v1  ;;  %872 = vmatpush3.bf16.msra.mxu1 %v912_v1 }
  0x23   : > { %v811_v13 = vunpack.c.l.bf16 %v838_v8  ;;  %v812_v14 = vunpack.c.h.bf16 %v838_v8  ;;  %v815_v17 = vunpack.c.l.bf16 %v839_v9  ;;  %v816_v18 = vunpack.c.h.bf16 %v839_v9  ;;  %855 = vmatprep.subr.bf16.mxu0 %v913_v2  ;;  %869 = vmatprep.subr.bf16.mxu1 %v913_v2 }
  0x24   : > { %v378_v15 = vmul.f32 %v803_v5, %v770_v4  ;;  %v379_v16 = vmul.f32 %v804_v6, %v770_v4  ;;  %v380_v20 = vmul.f32 %v807_v11, %v770_v4  ;;  %v381_v21 = vmul.f32 %v808_v12, %v770_v4 }
  0x25   : > { %v382_v22 = vmul.f32 %v811_v13, %v770_v4  ;;  %v383_v25 = vmul.f32 %v812_v14, %v770_v4  ;;  %v384_v26 = vmul.f32 %v815_v17, %v770_v4  ;;  %v385_v30 = vmul.f32 %v816_v18, %v770_v4 }
  0x26   : > { %v393_v23 = vadd.f32 %v771_v10, %v378_v15  ;;  %v394_v24 = vadd.f32 %v771_v10, %v379_v16  ;;  %v395_v27 = vadd.f32 %v771_v10, %v380_v20  ;;  %v396_v28 = vadd.f32 %v771_v10, %v381_v21  ;;  %856 = vmatpush3.bf16.msra.mxu0 %v913_v2 }
  0x27   : > { %v397_v29 = vadd.f32 %v771_v10, %v382_v22  ;;  %873 = vmatpush3.bf16.msra.mxu1 %v913_v2  ;;  %v398_v33 = vadd.f32 %v771_v10, %v383_v25  ;;  %v399_v34 = vadd.f32 %v771_v10, %v384_v26  ;;  %857 = vmatprep.subr.bf16.mxu0 %v914_v19 }
  0x28   : > { %v401_v31 = vmax.f32 %v393_v23, 0.0  ;;  %v402_v32 = vmax.f32 %v394_v24, 0.0  ;;  %870 = vmatprep.subr.bf16.mxu1 %v914_v19  ;;  %v403_v35 = vmax.f32 %v395_v27, 0.0  ;;  %v404_v36 = vmax.f32 %v396_v28, 0.0 }
  0x29   : > { %v405_v37 = vmax.f32 %v397_v29, 0.0  ;;  %v400_v38 = vadd.f32 %v771_v10, %v385_v30  ;;  %v406_v40 = vmax.f32 %v398_v33, 0.0  ;;  %v407_v41 = vmax.f32 %v399_v34, 0.0 }
  0x2a   : > { %v417_v39 = vpack.c.bf16 %v402_v32, %v401_v31  ;;  %v418_v42 = vpack.c.bf16 %v404_v36, %v403_v35  ;;  %858 = vmatpush3.bf16.msra.mxu0 %v914_v19  ;;  %v570_v35 = vld [vmem:[%s1085_s13] sm:$0x1] }
  0x2b   : > { %v408_v43 = vmax.f32 %v400_v38, 0.0  ;;  %874 = vmatpush3.bf16.msra.mxu1 %v914_v19  ;;  %v419_v44 = vpack.c.bf16 %v406_v40, %v405_v37  ;;  %v586_v38 = vld [vmem:[%s1091_s17] sm:$0x1] }
  0x2c   : > { %859 = vmatprep.mubr.msk.bf16.mxu0 %vm452_vm0, %v417_v39 }
  0x2d   : > { %v420_v45 = vpack.c.bf16 %v408_v43, %v407_v41  ;;  %863 = vmatprep.mubr.msk.bf16.mxu1 %vm452_vm0, %v419_v44  ;;  %860 = vmatmul.mubr.msk.bf16.vlgmr.msra.gmra.mxu0 %vm452_vm0, %v418_v42 }
  0x2f   : > { %864 = vmatmul.mubr.msk.bf16.vlgmr.msra.gmra.mxu1 %vm452_vm0, %v420_v45 }
  0xed   : > { %v861_v47 = vpop.f32.mrf.mxu0 }
  0xee   : > { %v508_v55 = vadd.f32 %v861_v47, %v772_v49 }
  0xef   : > { %v865_v48 = vpop.f32.mrf.mxu1  ;;  %v499_v50 = vpop.f32.mrf.mxu0 }
  0xf0   : > { %v524_v52 = vadd.f32 %v865_v48, %v772_v49  ;;  %v500_v56 = vadd.f32 %v772_v49, %v499_v50  ;;  %v589_v7 = vmul.f32 %v508_v55, %v508_v55 }
  0xf1   : > { %v515_v51 = vpop.f32.mrf.mxu1  ;;  %v862_v53 = vpop.f32.mrf.mxu0 }
  0xf2   : > { %v511_v57 = vadd.f32 %v862_v53, %v772_v49  ;;  %v516_v59 = vadd.f32 %v772_v49, %v515_v51  ;;  %v587_v2 = vmul.f32 %v500_v56, %v500_v56  ;;  %v593_v19 = vmul.f32 %v524_v52, %v524_v52 }
  0xf3   : > { %v866_v54 = vpop.f32.mrf.mxu1  ;;  %v502_v60 = vpop.f32.mrf.mxu0 }
  0xf4   : > { %v527_v58 = vadd.f32 %v866_v54, %v772_v49  ;;  %v825_v62 = vpack.c.bf16 %v511_v57, %v508_v55  ;;  %v503_v63 = vadd.f32 %v772_v49, %v502_v60  ;;  %v590_v10 = vmul.f32 %v511_v57, %v511_v57 }
  0xf5   : > { %v518_v61 = vpop.f32.mrf.mxu1  ;;  %v591_v13 = vmul.f32 %v516_v59, %v516_v59 }
  0xf6   : > { %v835_v0 = vpack.c.bf16 %v527_v58, %v524_v52  ;;  %v519_v1 = vadd.f32 %v772_v49, %v518_v61  ;;  %840 = vst [vmem:[%s340_s20 + $0x8] sm:$0xff] %v825_v62   ;;  %v820_v3 = vpack.c.bf16 %v503_v63, %v500_v56  ;;  %v571_v4 = vadd.f32 %v503_v63, %v500_v56 }
  0xf7   : > { %v588_v5 = vmul.f32 %v503_v63, %v503_v63  ;;  %v594_v22 = vmul.f32 %v527_v58, %v527_v58 }
  0xf8   : > { %842 = vst [vmem:[%s340_s20 + $0x18] sm:$0xff] %v835_v0   ;;  %v830_v6 = vpack.c.bf16 %v519_v1, %v516_v59  ;;  %821 = vst [vmem:[%s340_s20] sm:$0xff] %v820_v3   ;;  %v572_v8 = vadd.f32 %v571_v4, %v508_v55  ;;  %v592_v17 = vmul.f32 %v519_v1, %v519_v1 }
  0xf9   : > { %v595_v9 = vadd.f32 %v588_v5, %v587_v2 }
  0xfa   : > { %841 = vst [vmem:[%s340_s20 + $0x10] sm:$0xff] %v830_v6   ;;  %v573_v12 = vadd.f32 %v572_v8, %v511_v57 }
  0xfb   : > { %v596_v11 = vadd.f32 %v595_v9, %v589_v7 }
  0xfc   : > { %v574_v14 = vadd.f32 %v573_v12, %v516_v59 }
  0xfd   : > { %v597_v15 = vadd.f32 %v596_v11, %v590_v10 }
  0xfe   : > { %v575_v16 = vadd.f32 %v574_v14, %v519_v1 }
  0xff   : > { %v598_v18 = vadd.f32 %v597_v15, %v591_v13 }
 0x100   : > { %v576_v20 = vadd.f32 %v575_v16, %v524_v52 }
 0x101   : > { %v599_v21 = vadd.f32 %v598_v18, %v592_v17 }
 0x102   : > { %v577_v23 = vadd.f32 %v576_v20, %v527_v58 }
 0x103   : > { %v600_v24 = vadd.f32 %v599_v21, %v593_v19 }
 0x104   : > { %v578_v25 = vrot.slane %v577_v23, 4 }
 0x105   : > { %v601_v26 = vadd.f32 %v600_v24, %v594_v22 }
 0x106   : > { %v579_v27 = vadd.f32 %v578_v25, %v577_v23 }
 0x107   : > { %v602_v28 = vrot.slane %v601_v26, 4 }
 0x108   : > { %v580_v29 = vrot.slane %v579_v27, 2 }
 0x109   : > { %v603_v30 = vadd.f32 %v602_v28, %v601_v26 }
 0x10a   : > { %v581_v31 = vadd.f32 %v580_v29, %v579_v27 }
 0x10b   : > { %v604_v32 = vrot.slane %v603_v30, 2 }
 0x10c   : > { %v582_v33 = vrot.slane %v581_v31, 1 }
 0x10d   : > { %v605_v34 = vadd.f32 %v604_v32, %v603_v30 }
 0x10e   : > { %v583_v36 = vadd.f32 %v582_v33, %v581_v31 }
 0x10f   : > { %v606_v37 = vrot.slane %v605_v34, 1 }
 0x110   : > { %v584_v39 = vadd.f32 %v583_v36, %v570_v35 }
 0x111   : > { %v607_v40 = vadd.f32 %v606_v37, %v605_v34 }
 0x112   : > { %585 = vst [vmem:[%s1085_s13] sm:$0x1] %v584_v39 }
 0x113   : > { %v608_v41 = vadd.f32 %v607_v40, %v586_v38 }
 0x115   : > { %609 = vst [vmem:[%s1091_s17] sm:$0x1] %v608_v41 }
 0x116 PF: > { %s19_s26 = sadd.s32 1, %s967_s26   ;;  %s1123_s24 = smov %s963_s25 }
 0x117   : > { %p16_p2 = scmp.ge.s32.totalorder %s19_s26, 4   ;;  %s1124_s25 = smov %s1126_s28 }
 0x119   :  { %18 = sbr.rel (!%p16_p2) target bundleno = 2 (0x2), region = 103 }
 0x11e   :  { %664 = vsyncpa [#allocation3], 1 }
 0x11f   :  { %666 = vsyncpa [#allocation3 + $0x1], 1 }

// kernel: tiny_pointnet_forward.13
= control target key start
LH: loop header
LB: loop body
LE: loop exit
PB: predicated region body
PF: predicated region fallthrough
CT: control target
= control target key end

     0   :  { %14 = vsyncpa [#allocation3], 0  ;;  %s2301_s27 = smov 0   ;;  %s2303_s28 = smov 0   ;;  %s2955_s0 = inlined_call_operand.vmem [shape: bf16[2,64,128], index: 0, kind: input, shape index: {}]   ;;  %s2956_s1 = inlined_call_operand.vmem [shape: bf16[128,1024], index: 1, kind: input, shape index: {}]   ;;  %s2957_s2 = inlined_call_operand.hbm [shape: f32[1,1024], index: 2, kind: input, shape index: {}]   ;;  %s2958_s3 = inlined_call_operand.vmem [shape: f32[1,128], index: 3, kind: input, shape index: {}]   ;;  %s2959_s4 = inlined_call_operand.vmem [shape: f32[1,128], index: 4, kind: input, shape index: {}]   ;;  %s2960_s5 = inlined_call_operand.vmem [shape: f32[2,1,1024], index: 5, kind: output, shape index: {0}]   ;;  %s2961_s6 = inlined_call_operand.vmem [shape: f32[2,1,1024], index: 6, kind: output, shape index: {1}]   ;;  %s2962_s7 = inlined_call_operand.vmem [shape: f32[2,1,1024], index: 7, kind: output, shape index: {2}]   ;;  %s2963_s8 = inlined_call_operand.vmem [shape: f32[2,1,1024], index: 8, kind: output, shape index: {3}]  }
   0x1   :  { %s2305_s29 = smov 0  }
   0x2 LB: > { %s2058_s30 = sadd.s32 4294967295, %s2251_s29   ;;  %s32_s9 = sadd.s32 1, %s2247_s28  ;;  %s2251_s29 = sphi %s2305_s29, %s20_s29   ;;  %s2247_s28 = sphi %s2303_s28, %s2967_s28   ;;  %s2243_s27 = sphi %s2301_s27, %s2966_s27  }
   0x3   : > { %p34_p0 = scmp.ge.s32.totalorder %s32_s9, 2  ;;  %p2060_p1 = scmp.ge.s32.totalorder %s2251_s29, 1 }
   0x4   : > { %p253_p2 = scmp.lt.s32.totalorder %s2251_s29, 3  ;;  %p2326_p4 = scmp.eq.s32.totalorder %s2058_s30, 0 }
   0x5   : > { %s2969_s9 = smov (%p34_p0, %s32_s9), 0  ;;  %s2253_s12 = smov [#allocation2]  }
   0x6   : > { %p2322_p3 = pnand %p2060_p1, %p253_p2  ;;  %s269_s13 = sshll.u32 %s2253_s12, 4  ;;  %s270_s13 = int_to_ptr.vmem [resolvable:$true] %s269_s13 }
   0x7   : > { %s2210_s14 = scalar_lea.vmem %s270_s13, 128  ;;  %p2218_p11 = scmp.lt.s32.totalorder %s270_s13, %s270_s13 }
   0x8   : > { %p2163_p5 = pneg %p2322_p3  ;;  %p2211_p8 = scmp.ne.s32.totalorder %s270_s13, %s2210_s14 }
   0x9   : > { %p2219_p12 = scmp.lt.s32.totalorder %s2210_s14, %s2210_s14 }
   0xa   : > { %p2164_p6 = pnand %p2326_p4, %p2163_p5 }
   0xb   : > { %p2220_p13 = por %p2219_p12, %p2218_p11 }
   0xc   : > { %p2201_p7 = pneg %p2164_p6 }
   0xe   : > { %p2213_p9 = pnand %p2211_p8, %p2201_p7 }
  0x10   : > { %p2214_p10 = pneg %p2213_p9 }
  0x12   : > { %p2221_p0 = pnand %p2220_p13, %p2214_p10 }
  0x14   : > { %2224 = shalt.err (!%p2221_p0)
}
  0x15   : > { %2166 = dma.hbm_to_vmem [thread:$0]  (!%p2164_p6), %s2957_s2, 128, %s270_s13, [#allocation3]  }
  0x16   : > { %301 = sbr.rel (%p2322_p3) target bundleno = 415 (0x19f), region = 40 }
  0x1b   : > { %2238 = dma.done.wait (%p2326_p4), [#allocation3], 128  }
  0x1c   : > { %2240 = vsyncadd (%p2326_p4), [#allocation3], 4294967168  ;;  %v2254_v0 = vmov 0   ;;  %p351_p1 = scmp.lt.s32.totalorder %s2243_s27, 1  ;;  %v499_v1 = vld [vmem:[%s2956_s1 + $0x1c0] sm:$0xff]  ;;  %v500_v3 = vld [vmem:[%s2956_s1 + $0x1c8] sm:$0xff] }
  0x1d   : > { %901 = vmatprep.mubr.bf16.mxu0 %v2254_v0  ;;  %974 = vmatprep.mubr.bf16.mxu1 %v2254_v0  ;;  %v503_v2 = vld [vmem:[%s2956_s1 + $0x1e0] sm:$0xff]  ;;  %v504_v5 = vld [vmem:[%s2956_s1 + $0x1e8] sm:$0xff] }
  0x1e   : > { %v2130_v4 = vcombine.high %v499_v1, %v503_v2  ;;  %v2129_v6 = vcombine.low %v499_v1, %v503_v2  ;;  %v491_v7 = vld [vmem:[%s2956_s1 + $0x180] sm:$0xff]  ;;  %s2971_s27 = smov (!%p351_p1, %s2243_s27), 1  ;;  %v2132_v9 = vcombine.high %v500_v3, %v504_v5  ;;  %v2131_v10 = vcombine.low %v500_v3, %v504_v5  ;;  %v492_v12 = vld [vmem:[%s2956_s1 + $0x188] sm:$0xff] }
  0x1f   : > { %v495_v8 = vld [vmem:[%s2956_s1 + $0x1a0] sm:$0xff]  ;;  %v496_v13 = vld [vmem:[%s2956_s1 + $0x1a8] sm:$0xff]  ;;  %s2139_s23 = sshll.u32 %s2971_s27, 5 }
  0x20   : > { %v2122_v11 = vcombine.high %v491_v7, %v495_v8  ;;  %v483_v14 = vld [vmem:[%s2956_s1 + $0x140] sm:$0xff]  ;;  %869 = vmatprep.subr.bf16.mxu0 %v2130_v4  ;;  %v2124_v15 = vcombine.high %v492_v12, %v496_v13  ;;  %v484_v17 = vld [vmem:[%s2956_s1 + $0x148] sm:$0xff]  ;;  %942 = vmatprep.subr.bf16.mxu1 %v2132_v9  ;;  %v2121_v19 = vcombine.low %v491_v7, %v495_v8  ;;  %s2401_s16 = scalar_lea.vmem %s2955_s0, %s2139_s23 }
  0x21   : > { %v487_v16 = vld [vmem:[%s2956_s1 + $0x160] sm:$0xff]  ;;  %v488_v18 = vld [vmem:[%s2956_s1 + $0x168] sm:$0xff]  ;;  %870 = vmatpush1.bf16.msra.mxu0 %v2129_v6  ;;  %943 = vmatpush1.bf16.msra.mxu1 %v2131_v10  ;;  %v2123_v20 = vcombine.low %v492_v12, %v496_v13 }
  0x22   : > { %871 = vmatprep.subr.bf16.mxu0 %v2122_v11  ;;  %v2114_v21 = vcombine.high %v483_v14, %v487_v16  ;;  %944 = vmatprep.subr.bf16.mxu1 %v2124_v15  ;;  %v2116_v22 = vcombine.high %v484_v17, %v488_v18  ;;  %v475_v23 = vld [vmem:[%s2956_s1 + $0x100] sm:$0xff]  ;;  %v476_v25 = vld [vmem:[%s2956_s1 + $0x108] sm:$0xff]  ;;  %v2113_v27 = vcombine.low %v483_v14, %v487_v16  ;;  %v501_v14 = vld [vmem:[%s2956_s1 + $0x1d0] sm:$0xff] }
  0x23   : > { %v479_v24 = vld [vmem:[%s2956_s1 + $0x120] sm:$0xff]  ;;  %v480_v26 = vld [vmem:[%s2956_s1 + $0x128] sm:$0xff]  ;;  %v2115_v28 = vcombine.low %v484_v17, %v488_v18  ;;  %v505_v15 = vld [vmem:[%s2956_s1 + $0x1f0] sm:$0xff] }
  0x24   : > { %v2106_v29 = vcombine.high %v475_v23, %v479_v24  ;;  %v2108_v30 = vcombine.high %v476_v25, %v480_v26  ;;  %v467_v31 = vld [vmem:[%s2956_s1 + $0xc0] sm:$0xff]  ;;  %v468_v33 = vld [vmem:[%s2956_s1 + $0xc8] sm:$0xff]  ;;  %v2105_v36 = vcombine.low %v475_v23, %v479_v24  ;;  %v2107_v37 = vcombine.low %v476_v25, %v480_v26  ;;  %v502_v16 = vld [vmem:[%s2956_s1 + $0x1d8] sm:$0xff] }
  0x25   : > { %872 = vmatpush1.bf16.msra.mxu0 %v2121_v19  ;;  %945 = vmatpush1.bf16.msra.mxu1 %v2123_v20  ;;  %v471_v32 = vld [vmem:[%s2956_s1 + $0xe0] sm:$0xff]  ;;  %v472_v34 = vld [vmem:[%s2956_s1 + $0xe8] sm:$0xff]  ;;  %v506_v17 = vld [vmem:[%s2956_s1 + $0x1f8] sm:$0xff]  ;;  %v2134_v23 = vcombine.high %v501_v14, %v505_v15 }
  0x26   : > { %873 = vmatprep.subr.bf16.mxu0 %v2114_v21  ;;  %946 = vmatprep.subr.bf16.mxu1 %v2116_v22  ;;  %v2141_v35 = vld [vmem:[%s2401_s16] sm:$0xff]   ;;  %v2098_v38 = vcombine.high %v467_v31, %v471_v32  ;;  %v2100_v39 = vcombine.high %v468_v33, %v472_v34  ;;  %v460_v44 = vld [vmem:[%s2956_s1 + $0x88] sm:$0xff]  ;;  %v2097_v47 = vcombine.low %v467_v31, %v471_v32  ;;  %v2157_v21 = vld [vmem:[%s2401_s16 + $0x10] sm:$0xff]  }
  0x27   : > { %v459_v40 = vld [vmem:[%s2956_s1 + $0x80] sm:$0xff]  ;;  %v2142_v42 = vunpack.c.l.bf16 %v2141_v35  ;;  %v2143_v43 = vunpack.c.h.bf16 %v2141_v35  ;;  %v464_v45 = vld [vmem:[%s2956_s1 + $0xa8] sm:$0xff]  ;;  %v2099_v48 = vcombine.low %v468_v33, %v472_v34  ;;  %v2136_v25 = vcombine.high %v502_v16, %v506_v17  ;;  %v493_v26 = vld [vmem:[%s2956_s1 + $0x190] sm:$0xff] }
  0x28   : > { %v463_v41 = vld [vmem:[%s2956_s1 + $0xa0] sm:$0xff]  ;;  %v2092_v50 = vcombine.high %v460_v44, %v464_v45  ;;  %v452_v55 = vld [vmem:[%s2956_s1 + $0x48] sm:$0xff]  ;;  %v2091_v60 = vcombine.low %v460_v44, %v464_v45  ;;  %v2150_v32 = vunpack.c.l.bf16 %v2157_v21  ;;  %v2151_v33 = vunpack.c.h.bf16 %v2157_v21 }
  0x29   : > { %874 = vmatpush1.bf16.msra.mxu0 %v2113_v27  ;;  %947 = vmatpush1.bf16.msra.mxu1 %v2115_v28  ;;  %v2431_v46 = vld [vmem:[%s2958_s3] ss:$0 sm:$0xff]  ;;  %v2090_v49 = vcombine.high %v459_v40, %v463_v41  ;;  %v456_v56 = vld [vmem:[%s2956_s1 + $0x68] sm:$0xff]  ;;  %v2089_v58 = vcombine.low %v459_v40, %v463_v41  ;;  %v497_v27 = vld [vmem:[%s2956_s1 + $0x1b0] sm:$0xff]  ;;  %v2133_v34 = vcombine.low %v501_v14, %v505_v15 }
  0x2a   : > { %875 = vmatprep.subr.bf16.mxu0 %v2106_v29  ;;  %948 = vmatprep.subr.bf16.mxu1 %v2108_v30  ;;  %v451_v51 = vld [vmem:[%s2956_s1 + $0x40] sm:$0xff]  ;;  %v408_v53 = vmul.f32 %v2142_v42, %v2431_v46  ;;  %v409_v54 = vmul.f32 %v2143_v43, %v2431_v46  ;;  %v2156_v59 = vld [vmem:[%s2401_s16 + $0x8] sm:$0xff]   ;;  %v2084_v62 = vcombine.high %v452_v55, %v456_v56  ;;  %v494_v28 = vld [vmem:[%s2956_s1 + $0x198] sm:$0xff] }
  0x2b   : > { %v455_v52 = vld [vmem:[%s2956_s1 + $0x60] sm:$0xff]  ;;  %v444_v4 = vld [vmem:[%s2956_s1 + $0x8] sm:$0xff]  ;;  %v2146_v6 = vunpack.c.l.bf16 %v2156_v59  ;;  %v2147_v7 = vunpack.c.h.bf16 %v2156_v59  ;;  %v2083_v9 = vcombine.low %v452_v55, %v456_v56  ;;  %v498_v29 = vld [vmem:[%s2956_s1 + $0x1b8] sm:$0xff]  ;;  %v2135_v35 = vcombine.low %v502_v16, %v506_v17 }
  0x2c   : > { %v2450_v57 = vld [vmem:[%s2959_s4] ss:$0 sm:$0xff]  ;;  %v2082_v61 = vcombine.high %v451_v51, %v455_v52  ;;  %v448_v5 = vld [vmem:[%s2956_s1 + $0x28] sm:$0xff]  ;;  %v2081_v8 = vcombine.low %v451_v51, %v455_v52  ;;  %v486_v42 = vld [vmem:[%s2956_s1 + $0x158] sm:$0xff]  ;;  %v412_v44 = vmul.f32 %v2150_v32, %v2431_v46  ;;  %v413_v45 = vmul.f32 %v2151_v33, %v2431_v46 }
  0x2d   : > { %876 = vmatpush1.bf16.msra.mxu0 %v2105_v36  ;;  %949 = vmatpush1.bf16.msra.mxu1 %v2107_v37  ;;  %v443_v63 = vld [vmem:[%s2956_s1] sm:$0xff]  ;;  %v423_v2 = vadd.f32 %v2450_v57, %v408_v53  ;;  %v424_v3 = vadd.f32 %v2450_v57, %v409_v54  ;;  %v2076_v11 = vcombine.high %v444_v4, %v448_v5  ;;  %v490_v43 = vld [vmem:[%s2956_s1 + $0x178] sm:$0xff]  ;;  %v477_v52 = vld [vmem:[%s2956_s1 + $0x110] sm:$0xff] }
  0x2e   : > { %877 = vmatprep.subr.bf16.mxu0 %v2098_v38  ;;  %950 = vmatprep.subr.bf16.mxu1 %v2100_v39  ;;  %v447_v1 = vld [vmem:[%s2956_s1 + $0x20] sm:$0xff]  ;;  %v410_v18 = vmul.f32 %v2146_v6, %v2431_v46  ;;  %v411_v19 = vmul.f32 %v2147_v7, %v2431_v46  ;;  %v2075_v22 = vcombine.low %v444_v4, %v448_v5  ;;  %v485_v38 = vld [vmem:[%s2956_s1 + $0x150] sm:$0xff]  ;;  %v478_v56 = vld [vmem:[%s2956_s1 + $0x118] sm:$0xff] }
  0x2f   : > { %v2074_v10 = vcombine.high %v443_v63, %v447_v1  ;;  %v431_v12 = vmax.f32 %v423_v2, 0.0  ;;  %v432_v13 = vmax.f32 %v424_v3, 0.0  ;;  %v2073_v20 = vcombine.low %v443_v63, %v447_v1  ;;  %v489_v39 = vld [vmem:[%s2956_s1 + $0x170] sm:$0xff]  ;;  %v470_v7 = vld [vmem:[%s2956_s1 + $0xd8] sm:$0xff] }
  0x30   : > { %v425_v30 = vadd.f32 %v2450_v57, %v410_v18  ;;  %v426_v31 = vadd.f32 %v2450_v57, %v411_v19  ;;  %v2126_v36 = vcombine.high %v493_v26, %v497_v27  ;;  %v2128_v37 = vcombine.high %v494_v28, %v498_v29  ;;  %v481_v53 = vld [vmem:[%s2956_s1 + $0x130] sm:$0xff]  ;;  %v462_v17 = vld [vmem:[%s2956_s1 + $0x98] sm:$0xff] }
  0x31   : > { %878 = vmatpush1.bf16.msra.mxu0 %v2097_v47  ;;  %951 = vmatpush1.bf16.msra.mxu1 %v2099_v48  ;;  %v2482_v24 = vpack.c.bf16 %v432_v13, %v431_v12  ;;  %v2158_v47 = vld [vmem:[%s2401_s16 + $0x18] sm:$0xff]   ;;  %v2125_v48 = vcombine.low %v493_v26, %v497_v27  ;;  %v2120_v51 = vcombine.high %v486_v42, %v490_v43  ;;  %v469_v3 = vld [vmem:[%s2956_s1 + $0xd0] sm:$0xff]  ;;  %s2067_s16 = sshll.u32 %s2971_s27, 3 }
  0x32   : > { %879 = vmatprep.subr.bf16.mxu0 %v2090_v49  ;;  %952 = vmatprep.subr.bf16.mxu1 %v2092_v50  ;;  %v433_v40 = vmax.f32 %v425_v30, 0.0  ;;  %v434_v41 = vmax.f32 %v426_v31, 0.0  ;;  %v2127_v49 = vcombine.low %v494_v28, %v498_v29  ;;  %v2118_v50 = vcombine.high %v485_v38, %v489_v39  ;;  %v473_v4 = vld [vmem:[%s2956_s1 + $0xf0] sm:$0xff]  ;;  %v466_v18 = vld [vmem:[%s2956_s1 + $0xb8] sm:$0xff]  ;;  %s363_s13 = scalar_lea.vmem %s2960_s5, %s2067_s16  ;;  %s371_s17 = scalar_lea.vmem %s2962_s7, %s2067_s16 }
  0x33   : > { %v2154_v54 = vunpack.c.l.bf16 %v2158_v47  ;;  %v427_v59 = vadd.f32 %v2450_v57, %v412_v44  ;;  %v2119_v63 = vcombine.low %v486_v42, %v490_v43  ;;  %v2110_v1 = vcombine.high %v477_v52, %v481_v53  ;;  %v461_v15 = vld [vmem:[%s2956_s1 + $0x90] sm:$0xff]  ;;  %v454_v29 = vld [vmem:[%s2956_s1 + $0x58] sm:$0xff]  ;;  %s375_s20 = scalar_lea.vmem %s2963_s8, %s2067_s16  ;;  %s367_s23 = scalar_lea.vmem %s2961_s6, %s2067_s16 }
  0x34   : > { %v2523_v55 = vpack.c.bf16 %v434_v41, %v433_v40  ;;  %v2102_v13 = vcombine.high %v469_v3, %v473_v4  ;;  %v2101_v21 = vcombine.low %v469_v3, %v473_v4  ;;  %v453_v26 = vld [vmem:[%s2956_s1 + $0x50] sm:$0xff]  ;;  %v458_v30 = vld [vmem:[%s2956_s1 + $0x78] sm:$0xff]  ;;  %v2095_v32 = vcombine.low %v462_v17, %v466_v18 }
  0x35   : > { %880 = vmatpush1.bf16.msra.mxu0 %v2089_v58  ;;  %953 = vmatpush1.bf16.msra.mxu1 %v2091_v60  ;;  %v482_v58 = vld [vmem:[%s2956_s1 + $0x138] sm:$0xff]  ;;  %v428_v60 = vadd.f32 %v2450_v57, %v413_v45  ;;  %v435_v5 = vmax.f32 %v427_v59, 0.0  ;;  %v457_v27 = vld [vmem:[%s2956_s1 + $0x70] sm:$0xff]  ;;  %v2087_v41 = vcombine.low %v454_v29, %v458_v30 }
  0x36   : > { %881 = vmatprep.subr.bf16.mxu0 %v2082_v61  ;;  %954 = vmatprep.subr.bf16.mxu1 %v2084_v62  ;;  %v2155_v61 = vunpack.c.h.bf16 %v2158_v47  ;;  %v2117_v62 = vcombine.low %v485_v38, %v489_v39  ;;  %v2112_v2 = vcombine.high %v478_v56, %v482_v58  ;;  %v2111_v12 = vcombine.low %v478_v56, %v482_v58  ;;  %v446_v38 = vld [vmem:[%s2956_s1 + $0x18] sm:$0xff] }
  0x37   : > { %v436_v6 = vmax.f32 %v428_v60, 0.0  ;;  %v2086_v33 = vcombine.high %v453_v26, %v457_v27  ;;  %v450_v39 = vld [vmem:[%s2956_s1 + $0x38] sm:$0xff]  ;;  %v2085_v40 = vcombine.low %v453_v26, %v457_v27 }
  0x38   : > { %v2080_v43 = vcombine.high %v446_v38, %v450_v39  ;;  %v2079_v45 = vcombine.low %v446_v38, %v450_v39 }
  0x39   : > { %882 = vmatpush1.bf16.msra.mxu0 %v2081_v8  ;;  %955 = vmatpush1.bf16.msra.mxu1 %v2083_v9  ;;  %v474_v8 = vld [vmem:[%s2956_s1 + $0xf8] sm:$0xff]  ;;  %v414_v9 = vmul.f32 %v2154_v54, %v2431_v46  ;;  %v2557_v16 = vpack.c.bf16 %v436_v6, %v435_v5 }
  0x3a   : > { %883 = vmatprep.subr.bf16.mxu0 %v2074_v10  ;;  %956 = vmatprep.subr.bf16.mxu1 %v2076_v11  ;;  %v415_v10 = vmul.f32 %v2155_v61, %v2431_v46  ;;  %v2109_v11 = vcombine.low %v477_v52, %v481_v53  ;;  %v2104_v14 = vcombine.high %v470_v7, %v474_v8  ;;  %v465_v46 = vld [vmem:[%s2956_s1 + $0xb0] sm:$0xff]  ;;  %v2255_v53 = vmov 1966171168  }
  0x3b   : > { %v429_v19 = vadd.f32 %v2450_v57, %v414_v9  ;;  %v2093_v31 = vcombine.low %v461_v15, %v465_v46  ;;  %v1279_v54 = vunpack.c.l.s4 %v2255_v53 }
  0x3d   : > { %884 = vmatpush1.bf16.msra.mxu0 %v2073_v20  ;;  %957 = vmatpush1.bf16.msra.mxu1 %v2075_v22  ;;  %v430_v20 = vadd.f32 %v2450_v57, %v415_v10  ;;  %v2103_v22 = vcombine.low %v470_v7, %v474_v8  ;;  %v437_v28 = vmax.f32 %v429_v19, 0.0  ;;  %v1280_v61 = vunpack.c.0.s8 %v1279_v54 }
  0x3e   : > { %1015 = vmatprep.subr.bf16.mxu0 %v2134_v23  ;;  %1088 = vmatprep.subr.bf16.mxu1 %v2136_v25  ;;  %v2094_v23 = vcombine.high %v461_v15, %v465_v46  ;;  %v2096_v25 = vcombine.high %v462_v17, %v466_v18 }
  0x3f   : > { %v438_v57 = vmax.f32 %v430_v20, 0.0 }
  0x40   : > { %902 = vmatmul.mubr.bf16.vlgmr.msra.gmra.mxu0 %v2482_v24  ;;  %975 = vmatmul.mubr.bf16.vlgmr.msra.gmra.mxu1 %v2482_v24 }
  0x41   : > { %1016 = vmatpush1.bf16.msra.mxu0 %v2133_v34  ;;  %1089 = vmatpush1.bf16.msra.mxu1 %v2135_v35  ;;  %v2088_v34 = vcombine.high %v454_v29, %v458_v30  ;;  %v445_v35 = vld [vmem:[%s2956_s1 + $0x10] sm:$0xff] }
  0x42   : > { %1017 = vmatprep.subr.bf16.mxu0 %v2126_v36  ;;  %1090 = vmatprep.subr.bf16.mxu1 %v2128_v37  ;;  %v449_v36 = vld [vmem:[%s2956_s1 + $0x30] sm:$0xff]  ;;  %v442_v37 = vpack.c.bf16 %v438_v57, %v437_v28 }
  0x43   : > { %911 = vmatprep.mubr.bf16.mxu0 %v2254_v0  ;;  %984 = vmatprep.mubr.bf16.mxu1 %v2254_v0  ;;  %v2078_v42 = vcombine.high %v445_v35, %v449_v36  ;;  %v2077_v44 = vcombine.low %v445_v35, %v449_v36 }
  0x45   : > { %1018 = vmatpush1.bf16.msra.mxu0 %v2125_v48  ;;  %1091 = vmatpush1.bf16.msra.mxu1 %v2127_v49 }
  0x46   : > { %1019 = vmatprep.subr.bf16.mxu0 %v2118_v50  ;;  %1092 = vmatprep.subr.bf16.mxu1 %v2120_v51  ;;  %v2614_v51 = vld [vmem:[#allocation2] sm:$0xff] }
  0x48   : > { %912 = vmatmul.mubr.bf16.gmra.mxu0 %v2523_v55  ;;  %985 = vmatmul.mubr.bf16.gmra.mxu1 %v2523_v55 }
  0x49   : > { %1020 = vmatpush1.bf16.msra.mxu0 %v2117_v62  ;;  %1093 = vmatpush1.bf16.msra.mxu1 %v2119_v63 }
  0x4a   : > { %1021 = vmatprep.subr.bf16.mxu0 %v2110_v1  ;;  %1094 = vmatprep.subr.bf16.mxu1 %v2112_v2 }
  0x4b   : > { %921 = vmatprep.mubr.bf16.mxu0 %v2254_v0  ;;  %994 = vmatprep.mubr.bf16.mxu1 %v2254_v0 }
  0x4d   : > { %1022 = vmatpush1.bf16.msra.mxu0 %v2109_v11  ;;  %1095 = vmatpush1.bf16.msra.mxu1 %v2111_v12 }
  0x4e   : > { %1023 = vmatprep.subr.bf16.mxu0 %v2102_v13  ;;  %1096 = vmatprep.subr.bf16.mxu1 %v2104_v14 }
  0x50   : > { %922 = vmatmul.mubr.bf16.gmra.mxu0 %v2557_v16  ;;  %995 = vmatmul.mubr.bf16.gmra.mxu1 %v2557_v16 }
  0x51   : > { %1024 = vmatpush1.bf16.msra.mxu0 %v2101_v21  ;;  %1097 = vmatpush1.bf16.msra.mxu1 %v2103_v22 }
  0x52   : > { %1025 = vmatprep.subr.bf16.mxu0 %v2094_v23  ;;  %1098 = vmatprep.subr.bf16.mxu1 %v2096_v25 }
  0x53   : > { %931 = vmatprep.mubr.bf16.mxu0 %v2254_v0  ;;  %1004 = vmatprep.mubr.bf16.mxu1 %v2254_v0 }
  0x55   : > { %1026 = vmatpush1.bf16.msra.mxu0 %v2093_v31  ;;  %1099 = vmatpush1.bf16.msra.mxu1 %v2095_v32 }
  0x56   : > { %1027 = vmatprep.subr.bf16.mxu0 %v2086_v33  ;;  %1100 = vmatprep.subr.bf16.mxu1 %v2088_v34 }
  0x58   : > { %932 = vmatmul.mubr.bf16.gmra.mxu0 %v442_v37  ;;  %1005 = vmatmul.mubr.bf16.gmra.mxu1 %v442_v37 }
  0x59   : > { %1028 = vmatpush1.bf16.msra.mxu0 %v2085_v40  ;;  %1101 = vmatpush1.bf16.msra.mxu1 %v2087_v41 }
  0x5a   : > { %1029 = vmatprep.subr.bf16.mxu0 %v2078_v42  ;;  %1102 = vmatprep.subr.bf16.mxu1 %v2080_v43 }
  0x5b   : > { %1047 = vmatprep.mubr.bf16.mxu0 %v2254_v0  ;;  %1120 = vmatprep.mubr.bf16.mxu1 %v2254_v0 }
  0x5d   : > { %1030 = vmatpush1.bf16.msra.mxu0 %v2077_v44  ;;  %1103 = vmatpush1.bf16.msra.mxu1 %v2079_v45 }
  0x60   : > { %1048 = vmatmul.mubr.bf16.vlgmr.msra.gmra.mxu0 %v2482_v24  ;;  %1121 = vmatmul.mubr.bf16.vlgmr.msra.gmra.mxu1 %v2482_v24  ;;  %v509_v24 = vlaneseq }
  0x61   : > { %1057 = vmatprep.mubr.bf16.mxu0 %v2254_v0  ;;  %1130 = vmatprep.mubr.bf16.mxu1 %v2254_v0 }
  0x62   : > { %v2609_v47 = vshrl.u32 %v509_v24, 7 }
  0x64   : > { %v511_v48 = vsub.s32 0, %v2609_v47  ;;  %v519_v49 = vsub.s32 2, %v2609_v47  ;;  %v515_v50 = vsub.s32 1, %v2609_v47  ;;  %v523_v52 = vsub.s32 3, %v2609_v47 }
  0x65   : > { %v527_v62 = vsub.s32 4, %v2609_v47  ;;  %v535_v1 = vsub.s32 6, %v2609_v47  ;;  %v531_v2 = vsub.s32 5, %v2609_v47  ;;  %v2644_v11 = vsub.s32 %v1280_v61, %v2609_v47 }
  0x66   : > { %v2624_v56 = vrot.slane %v2614_v51, %v515_v50  ;;  %v2627_v59 = vrot.slane %v2614_v51, %v523_v52 }
  0x67   : > { %v2647_v12 = vrot.slane %v2614_v51, %v527_v62  ;;  %v2651_v15 = vrot.slane %v2614_v51, %v535_v1  ;;  %v2654_v46 = vrot.slane %v2614_v51, %v531_v2 }
  0x68   : > { %1058 = vmatmul.mubr.bf16.gmra.mxu0 %v2523_v55  ;;  %1131 = vmatmul.mubr.bf16.gmra.mxu1 %v2523_v55  ;;  %v2618_v55 = vrot.slane %v2614_v51, %v511_v48 }
  0x69   : > { %1067 = vmatprep.mubr.bf16.mxu0 %v2254_v0  ;;  %1140 = vmatprep.mubr.bf16.mxu1 %v2254_v0 }
  0x70   : > { %1068 = vmatmul.mubr.bf16.gmra.mxu0 %v2557_v16  ;;  %1141 = vmatmul.mubr.bf16.gmra.mxu1 %v2557_v16  ;;  %v539_v16 = vsub.s32 7, %v2609_v47 }
  0x71   : > { %1077 = vmatprep.mubr.bf16.mxu0 %v2254_v0  ;;  %1150 = vmatprep.mubr.bf16.mxu1 %v2254_v0  ;;  %v2621_v0 = vrot.slane %v2614_v51, %v519_v49 }
  0x78   : > { %1078 = vmatmul.mubr.bf16.gmra.mxu0 %v442_v37  ;;  %1151 = vmatmul.mubr.bf16.gmra.mxu1 %v442_v37 }
 0x100   : > { %v903_v58 = vpop.f32.mrf.mxu0  ;;  %v976_v60 = vpop.f32.mrf.mxu1 }
 0x101   : > { %v904_v3 = vadd.f32 %v903_v58, %v2618_v55  ;;  %v2634_v4 = vadd.f32 %v976_v60, %v2621_v0 }
 0x102   : > { %v905_v63 = vpop.f32.mrf.mxu0  ;;  %v978_v6 = vpop.f32.mrf.mxu1 }
 0x103   : > { %v2637_v5 = vadd.f32 %v905_v63, %v2624_v56  ;;  %v2640_v7 = vadd.f32 %v978_v6, %v2627_v59  ;;  %v1327_v17 = vmul.f32 %v904_v3, %v904_v3  ;;  %v1329_v18 = vmul.f32 %v2634_v4, %v2634_v4 }
 0x104   : > { %v907_v8 = vpop.f32.mrf.mxu0  ;;  %v980_v10 = vpop.f32.mrf.mxu1 }
 0x105   : > { %v908_v9 = vadd.f32 %v907_v8, %v2618_v55  ;;  %v981_v13 = vadd.f32 %v980_v10, %v2621_v0  ;;  %v1328_v19 = vmul.f32 %v2637_v5, %v2637_v5  ;;  %v1330_v22 = vmul.f32 %v2640_v7, %v2640_v7 }
 0x106   : > { %v909_v14 = vpop.f32.mrf.mxu0  ;;  %v982_v21 = vpop.f32.mrf.mxu1 }
 0x107   : > { %v1335_v20 = vmul.f32 %v908_v9, %v908_v9  ;;  %v1162_v23 = vadd.f32 %v908_v9, %v904_v3  ;;  %v1556_v25 = vmax.f32 %v904_v3, %v908_v9  ;;  %v1337_v26 = vmul.f32 %v981_v13, %v981_v13 }
 0x108   : > { %v913_v27 = vpop.f32.mrf.mxu0  ;;  %v1721_v28 = vmin.f32 %v904_v3, %v908_v9  ;;  %v910_v57 = vadd.f32 %v909_v14, %v2624_v56  ;;  %v983_v29 = vadd.f32 %v982_v21, %v2627_v59  ;;  %v986_v31 = vpop.f32.mrf.mxu1  ;;  %v1188_v32 = vadd.f32 %v981_v13, %v2634_v4 }
 0x109   : > { %v914_v30 = vadd.f32 %v913_v27, %v2618_v55  ;;  %v1582_v33 = vmax.f32 %v2634_v4, %v981_v13  ;;  %v1747_v34 = vmin.f32 %v2634_v4, %v981_v13  ;;  %v987_v35 = vadd.f32 %v986_v31, %v2621_v0 }
 0x10a   : > { %v915_v36 = vpop.f32.mrf.mxu0  ;;  %v1391_v37 = vadd.f32 %v1335_v20, %v1327_v17  ;;  %v1417_v38 = vadd.f32 %v1337_v26, %v1329_v18  ;;  %v1175_v39 = vadd.f32 %v910_v57, %v2637_v5  ;;  %v1336_v40 = vmul.f32 %v910_v57, %v910_v57  ;;  %v988_v41 = vpop.f32.mrf.mxu1 }
 0x10b   : > { %v1569_v42 = vmax.f32 %v2637_v5, %v910_v57  ;;  %v1734_v43 = vmin.f32 %v2637_v5, %v910_v57  ;;  %v1201_v44 = vadd.f32 %v983_v29, %v2640_v7  ;;  %v1338_v45 = vmul.f32 %v983_v29, %v983_v29 }
 0x10c   : > { %v917_v24 = vpop.f32.mrf.mxu0  ;;  %v1404_v48 = vadd.f32 %v1336_v40, %v1328_v19  ;;  %v1595_v49 = vmax.f32 %v2640_v7, %v983_v29  ;;  %v1760_v50 = vmin.f32 %v2640_v7, %v983_v29  ;;  %v1343_v52 = vmul.f32 %v914_v30, %v914_v30  ;;  %v990_v53 = vpop.f32.mrf.mxu1 }
 0x10d   : > { %v1430_v54 = vadd.f32 %v1338_v45, %v1330_v22  ;;  %v1163_v58 = vadd.f32 %v1162_v23, %v914_v30  ;;  %v1557_v60 = vmax.f32 %v1556_v25, %v914_v30  ;;  %v1345_v61 = vmul.f32 %v987_v35, %v987_v35 }
 0x10e   : > { %v919_v62 = vpop.f32.mrf.mxu0  ;;  %v1392_v63 = vadd.f32 %v1391_v37, %v1343_v52  ;;  %v1722_v1 = vmin.f32 %v1721_v28, %v914_v30  ;;  %v1189_v2 = vadd.f32 %v1188_v32, %v987_v35  ;;  %v916_v3 = vadd.f32 %v915_v36, %v2624_v56  ;;  %v992_v4 = vpop.f32.mrf.mxu1 }
 0x10f   : > { %v1583_v5 = vmax.f32 %v1582_v33, %v987_v35  ;;  %v989_v6 = vadd.f32 %v988_v41, %v2627_v59  ;;  %v918_v8 = vadd.f32 %v917_v24, %v2618_v55  ;;  %v991_v7 = vadd.f32 %v990_v53, %v2621_v0 }
 0x110   : > { %v923_v9 = vpop.f32.mrf.mxu0  ;;  %v1418_v10 = vadd.f32 %v1417_v38, %v1345_v61  ;;  %v1748_v13 = vmin.f32 %v1747_v34, %v987_v35  ;;  %v1176_v14 = vadd.f32 %v1175_v39, %v916_v3  ;;  %v1344_v17 = vmul.f32 %v916_v3, %v916_v3  ;;  %v996_v18 = vpop.f32.mrf.mxu1 }
 0x111   : > { %v1570_v19 = vmax.f32 %v1569_v42, %v916_v3  ;;  %v1735_v20 = vmin.f32 %v1734_v43, %v916_v3  ;;  %v1202_v21 = vadd.f32 %v1201_v44, %v989_v6  ;;  %v1346_v22 = vmul.f32 %v989_v6, %v989_v6 }
 0x112   : > { %v925_v23 = vpop.f32.mrf.mxu0  ;;  %v1405_v25 = vadd.f32 %v1404_v48, %v1344_v17  ;;  %v1596_v26 = vmax.f32 %v1595_v49, %v989_v6  ;;  %v1761_v27 = vmin.f32 %v1760_v50, %v989_v6  ;;  %v1351_v28 = vmul.f32 %v918_v8, %v918_v8  ;;  %v998_v57 = vpop.f32.mrf.mxu1 }
 0x113   : > { %v1431_v29 = vadd.f32 %v1430_v54, %v1346_v22  ;;  %v1164_v30 = vadd.f32 %v1163_v58, %v918_v8  ;;  %v1558_v31 = vmax.f32 %v1557_v60, %v918_v8  ;;  %v1353_v32 = vmul.f32 %v991_v7, %v991_v7 }
 0x114   : > { %v1393_v33 = vadd.f32 %v1392_v63, %v1351_v28  ;;  %v1723_v36 = vmin.f32 %v1722_v1, %v918_v8  ;;  %v1190_v34 = vadd.f32 %v1189_v2, %v991_v7  ;;  %v920_v35 = vadd.f32 %v919_v62, %v2624_v56  ;;  %v927_v37 = vpop.f32.mrf.mxu0  ;;  %v1000_v38 = vpop.f32.mrf.mxu1 }
 0x115   : > { %v1584_v39 = vmax.f32 %v1583_v5, %v991_v7  ;;  %v993_v40 = vadd.f32 %v992_v4, %v2627_v59  ;;  %v924_v41 = vadd.f32 %v923_v9, %v2618_v55  ;;  %v997_v42 = vadd.f32 %v996_v18, %v2621_v0 }
 0x116   : > { %v1419_v43 = vadd.f32 %v1418_v10, %v1353_v32  ;;  %v1749_v44 = vmin.f32 %v1748_v13, %v991_v7  ;;  %v1177_v45 = vadd.f32 %v1176_v14, %v920_v35  ;;  %v1352_v24 = vmul.f32 %v920_v35, %v920_v35  ;;  %v929_v61 = vpop.f32.mrf.mxu0  ;;  %v1002_v62 = vpop.f32.mrf.mxu1 }
 0x117   : > { %v1571_v48 = vmax.f32 %v1570_v19, %v920_v35  ;;  %v1736_v49 = vmin.f32 %v1735_v20, %v920_v35  ;;  %v1203_v50 = vadd.f32 %v1202_v21, %v993_v40  ;;  %v1354_v52 = vmul.f32 %v993_v40, %v993_v40 }
 0x118   : > { %v1406_v53 = vadd.f32 %v1405_v25, %v1352_v24  ;;  %v1597_v54 = vmax.f32 %v1596_v26, %v993_v40  ;;  %v1762_v58 = vmin.f32 %v1761_v27, %v993_v40  ;;  %v1359_v60 = vmul.f32 %v924_v41, %v924_v41  ;;  %v933_v20 = vpop.f32.mrf.mxu0  ;;  %v1006_v21 = vpop.f32.mrf.mxu1 }
 0x119   : > { %v1432_v63 = vadd.f32 %v1431_v29, %v1354_v52  ;;  %v1165_v1 = vadd.f32 %v1164_v30, %v924_v41  ;;  %v1559_v2 = vmax.f32 %v1558_v31, %v924_v41  ;;  %v1361_v3 = vmul.f32 %v997_v42, %v997_v42 }
 0x11a   : > { %v1394_v4 = vadd.f32 %v1393_v33, %v1359_v60  ;;  %v1724_v5 = vmin.f32 %v1723_v36, %v924_v41  ;;  %v1191_v6 = vadd.f32 %v1190_v34, %v997_v42  ;;  %v926_v8 = vadd.f32 %v925_v23, %v2624_v56 }
 0x11b   : > { %v1585_v7 = vmax.f32 %v1584_v39, %v997_v42  ;;  %v999_v9 = vadd.f32 %v998_v57, %v2627_v59  ;;  %v928_v10 = vadd.f32 %v927_v37, %v2618_v55  ;;  %v1001_v13 = vadd.f32 %v1000_v38, %v2621_v0  ;;  %v935_v38 = vpop.f32.mrf.mxu0  ;;  %v1008_v39 = vpop.f32.mrf.mxu1 }
 0x11c   : > { %v1420_v14 = vadd.f32 %v1419_v43, %v1361_v3  ;;  %v1750_v17 = vmin.f32 %v1749_v44, %v997_v42  ;;  %v1178_v18 = vadd.f32 %v1177_v45, %v926_v8  ;;  %v1360_v19 = vmul.f32 %v926_v8, %v926_v8 }
 0x11d   : > { %v1572_v22 = vmax.f32 %v1571_v48, %v926_v8  ;;  %v1737_v25 = vmin.f32 %v1736_v49, %v926_v8  ;;  %v1204_v26 = vadd.f32 %v1203_v50, %v999_v9  ;;  %v1362_v27 = vmul.f32 %v999_v9, %v999_v9 }
 0x11e   : > { %v1407_v28 = vadd.f32 %v1406_v53, %v1360_v19  ;;  %v1598_v29 = vmax.f32 %v1597_v54, %v999_v9  ;;  %v1763_v23 = vmin.f32 %v1762_v58, %v999_v9  ;;  %v1367_v30 = vmul.f32 %v928_v10, %v928_v10 }
 0x11f   : > { %v1433_v31 = vadd.f32 %v1432_v63, %v1362_v27  ;;  %v1166_v57 = vadd.f32 %v1165_v1, %v928_v10  ;;  %v1560_v32 = vmax.f32 %v1559_v2, %v928_v10  ;;  %v1369_v33 = vmul.f32 %v1001_v13, %v1001_v13  ;;  %v937_v63 = vpop.f32.mrf.mxu0  ;;  %v1010_v1 = vpop.f32.mrf.mxu1 }
 0x120   : > { %v1395_v36 = vadd.f32 %v1394_v4, %v1367_v30  ;;  %v1725_v34 = vmin.f32 %v1724_v5, %v928_v10  ;;  %v1192_v35 = vadd.f32 %v1191_v6, %v1001_v13  ;;  %v930_v37 = vadd.f32 %v929_v61, %v2624_v56 }
 0x121   : > { %v1586_v40 = vmax.f32 %v1585_v7, %v1001_v13  ;;  %v1003_v41 = vadd.f32 %v1002_v62, %v2627_v59  ;;  %v934_v42 = vadd.f32 %v933_v20, %v2618_v55  ;;  %v1007_v43 = vadd.f32 %v1006_v21, %v2621_v0 }
 0x122   : > { %v1421_v44 = vadd.f32 %v1420_v14, %v1369_v33  ;;  %v1751_v45 = vmin.f32 %v1750_v17, %v1001_v13  ;;  %v1179_v24 = vadd.f32 %v1178_v18, %v930_v37  ;;  %v1368_v48 = vmul.f32 %v930_v37, %v930_v37 }
 0x123   : > { %v1573_v49 = vmax.f32 %v1572_v22, %v930_v37  ;;  %v1738_v50 = vmin.f32 %v1737_v25, %v930_v37  ;;  %v1205_v52 = vadd.f32 %v1204_v26, %v1003_v41  ;;  %v1370_v53 = vmul.f32 %v1003_v41, %v1003_v41 }
 0x124   : > { %v2692_v54 = vadd.f32 %v1407_v28, %v1368_v48  ;;  %v1599_v58 = vmax.f32 %v1598_v29, %v1003_v41  ;;  %v1764_v60 = vmin.f32 %v1763_v23, %v1003_v41  ;;  %v1375_v61 = vmul.f32 %v934_v42, %v934_v42 }
 0x125   : > { %v2694_v62 = vadd.f32 %v1433_v31, %v1370_v53  ;;  %v1167_v2 = vadd.f32 %v1166_v57, %v934_v42  ;;  %v1561_v3 = vmax.f32 %v1560_v32, %v934_v42  ;;  %v1377_v4 = vmul.f32 %v1007_v43, %v1007_v43 }
 0x126   : > { %v1396_v5 = vadd.f32 %v1395_v36, %v1375_v61  ;;  %v1726_v6 = vmin.f32 %v1725_v34, %v934_v42  ;;  %v1193_v8 = vadd.f32 %v1192_v35, %v1007_v43  ;;  %v936_v7 = vadd.f32 %v935_v38, %v2624_v56 }
 0x127   : > { %v1587_v9 = vmax.f32 %v1586_v40, %v1007_v43  ;;  %v1009_v10 = vadd.f32 %v1008_v39, %v2627_v59  ;;  %v938_v13 = vadd.f32 %v937_v63, %v2618_v55  ;;  %v1011_v14 = vadd.f32 %v1010_v1, %v2621_v0 }
 0x128   : > { %v1422_v17 = vadd.f32 %v1421_v44, %v1377_v4  ;;  %v1752_v18 = vmin.f32 %v1751_v45, %v1007_v43  ;;  %v2700_v19 = vadd.f32 %v1179_v24, %v936_v7  ;;  %v1376_v20 = vmul.f32 %v936_v7, %v936_v7  ;;  %v939_v4 = vpop.f32.mrf.mxu0 }
 0x129   : > { %v2702_v21 = vmax.f32 %v1573_v49, %v936_v7  ;;  %v2704_v22 = vmin.f32 %v1738_v50, %v936_v7  ;;  %v2706_v25 = vadd.f32 %v1205_v52, %v1009_v10  ;;  %v1378_v26 = vmul.f32 %v1009_v10, %v1009_v10 }
 0x12a   : > { %v2708_v27 = vmax.f32 %v1599_v58, %v1009_v10  ;;  %v1168_v28 = vadd.f32 %v1167_v2, %v938_v13  ;;  %v1383_v29 = vmul.f32 %v938_v13, %v938_v13  ;;  %v1562_v23 = vmax.f32 %v1561_v3, %v938_v13 }
 0x12b   : > { %v2710_v55 = vmin.f32 %v1764_v60, %v1009_v10  ;;  %v1727_v0 = vmin.f32 %v1726_v6, %v938_v13  ;;  %v1194_v30 = vadd.f32 %v1193_v8, %v1011_v14  ;;  %v1385_v31 = vmul.f32 %v1011_v14, %v1011_v14 }
 0x12c   : > { %v1169_v57 = vrot.slane %v1168_v28, 4  ;;  %v1397_v32 = vadd.f32 %v1396_v5, %v1383_v29  ;;  %v1563_v33 = vrot.slane %v1562_v23, 4  ;;  %v1588_v36 = vmax.f32 %v1587_v9, %v1011_v14  ;;  %v1012_v5 = vpop.f32.mrf.mxu1 }
 0x12d   : > { %v1728_v34 = vrot.slane %v1727_v0, 4  ;;  %v1195_v35 = vrot.slane %v1194_v30, 4  ;;  %v1423_v37 = vadd.f32 %v1422_v17, %v1385_v31  ;;  %v1753_v38 = vmin.f32 %v1752_v18, %v1011_v14 }
 0x12e   : > { %v1170_v39 = vadd.f32 %v1169_v57, %v1168_v28  ;;  %v1398_v40 = vrot.slane %v1397_v32, 4  ;;  %v1564_v41 = vmax.f32 %v1562_v23, %v1563_v33  ;;  %v1589_v42 = vrot.slane %v1588_v36, 4  ;;  %v2716_v33 = vpop.f32.mrf.mxu1 }
 0x12f   : > { %v1729_v43 = vmin.f32 %v1727_v0, %v1728_v34  ;;  %v1196_v44 = vadd.f32 %v1195_v35, %v1194_v30  ;;  %v1424_v45 = vrot.slane %v1423_v37, 4  ;;  %v1754_v24 = vrot.slane %v1753_v38, 4 }
 0x130   : > { %v1171_v48 = vrot.slane %v1170_v39, 2  ;;  %v1399_v49 = vadd.f32 %v1398_v40, %v1397_v32  ;;  %v1565_v50 = vrot.slane %v1564_v41, 2  ;;  %v1590_v52 = vmax.f32 %v1588_v36, %v1589_v42  ;;  %v2714_v32 = vpop.f32.mrf.mxu0 }
 0x131   : > { %v1730_v53 = vrot.slane %v1729_v43, 2  ;;  %v1197_v58 = vrot.slane %v1196_v44, 2  ;;  %v1425_v60 = vadd.f32 %v1424_v45, %v1423_v37  ;;  %v1755_v61 = vmin.f32 %v1753_v38, %v1754_v24 }
 0x132   : > { %v1172_v63 = vadd.f32 %v1171_v48, %v1170_v39  ;;  %v1400_v1 = vrot.slane %v1399_v49, 2  ;;  %v1566_v2 = vmax.f32 %v1564_v41, %v1565_v50  ;;  %v1591_v3 = vrot.slane %v1590_v52, 2  ;;  %v2739_v24 = vpop.f32.mrf.mxu0 }
 0x133   : > { %v1731_v6 = vmin.f32 %v1729_v43, %v1730_v53  ;;  %v1198_v8 = vadd.f32 %v1197_v58, %v1196_v44  ;;  %v1426_v7 = vrot.slane %v1425_v60, 2  ;;  %v1756_v9 = vrot.slane %v1755_v61, 2 }
 0x134   : > { %v1173_v10 = vrot.slane %v1172_v63, 1  ;;  %v1401_v13 = vadd.f32 %v1400_v1, %v1399_v49  ;;  %v1567_v14 = vrot.slane %v1566_v2, 1  ;;  %v1592_v17 = vmax.f32 %v1590_v52, %v1591_v3 }
 0x135   : > { %v1732_v18 = vrot.slane %v1731_v6, 1  ;;  %v1199_v28 = vrot.slane %v1198_v8, 1  ;;  %v1427_v29 = vadd.f32 %v1426_v7, %v1425_v60  ;;  %v1757_v23 = vmin.f32 %v1755_v61, %v1756_v9 }
 0x136   : > { %v1409_v0 = vadd.f32 %v2692_v54, %v1376_v20  ;;  %v1435_v30 = vadd.f32 %v2694_v62, %v1378_v26  ;;  %v1402_v31 = vrot.slane %v1401_v13, 1  ;;  %v1593_v57 = vrot.slane %v1592_v17, 1 }
 0x137   : > { %v2718_v36 = vadd.f32 %v1173_v10, %v1172_v63  ;;  %v2720_v34 = vmax.f32 %v1566_v2, %v1567_v14  ;;  %v1428_v35 = vrot.slane %v1427_v29, 1  ;;  %v1758_v37 = vrot.slane %v1757_v23, 1 }
 0x138   : > { %v2722_v38 = vmin.f32 %v1731_v6, %v1732_v18  ;;  %v2724_v39 = vadd.f32 %v1199_v28, %v1198_v8  ;;  %v940_v54 = vadd.f32 %v939_v4, %v2624_v56  ;;  %v1013_v62 = vadd.f32 %v1012_v5, %v2627_v59  ;;  %v2741_v56 = vpop.f32.mrf.mxu1  ;;  %v2746_v4 = vpop.f32.mrf.mxu0 }
 0x139   : > { %v2728_v20 = vadd.f32 %v1402_v31, %v1401_v13  ;;  %v2730_v26 = vadd.f32 %v1428_v35, %v1427_v29  ;;  %v2732_v40 = vmax.f32 %v1592_v17, %v1593_v57  ;;  %v2734_v41 = vmin.f32 %v1757_v23, %v1758_v37 }
 0x13a   : > { %v1181_v42 = vadd.f32 %v2700_v19, %v940_v54  ;;  %v1384_v43 = vmul.f32 %v940_v54, %v940_v54  ;;  %v1575_v44 = vmax.f32 %v2702_v21, %v940_v54  ;;  %v1740_v45 = vmin.f32 %v2704_v22, %v940_v54 }
 0x13b   : > { %v1207_v59 = vadd.f32 %v2706_v25, %v1013_v62  ;;  %v1386_v48 = vmul.f32 %v1013_v62, %v1013_v62  ;;  %v1601_v49 = vmax.f32 %v2708_v27, %v1013_v62  ;;  %v1766_v50 = vmin.f32 %v2710_v55, %v1013_v62  ;;  %v2748_v25 = vpop.f32.mrf.mxu1 }
 0x13c   : > { %v1182_v52 = vrot.slane %v1181_v42, 4  ;;  %v1410_v53 = vadd.f32 %v1409_v0, %v1384_v43  ;;  %v1576_v58 = vrot.slane %v1575_v44, 4  ;;  %v1741_v19 = vrot.slane %v1740_v45, 4 }
 0x13d   : > { %v1208_v60 = vrot.slane %v1207_v59, 4  ;;  %v1436_v61 = vadd.f32 %v1435_v30, %v1386_v48  ;;  %v1602_v21 = vrot.slane %v1601_v49, 4  ;;  %v1767_v63 = vrot.slane %v1766_v50, 4  ;;  %v2750_v30 = vpop.f32.mrf.mxu0  ;;  %v2752_v31 = vpop.f32.mrf.mxu1 }
 0x13e   : > { %v1183_v22 = vadd.f32 %v1182_v52, %v1181_v42  ;;  %v1411_v1 = vrot.slane %v1410_v53, 4  ;;  %v1577_v2 = vmax.f32 %v1575_v44, %v1576_v58  ;;  %v1742_v3 = vmin.f32 %v1740_v45, %v1741_v19 }
 0x13f   : > { %v1209_v5 = vadd.f32 %v1208_v60, %v1207_v59  ;;  %v1437_v27 = vrot.slane %v1436_v61, 4  ;;  %v1603_v6 = vmax.f32 %v1601_v49, %v1602_v21  ;;  %v1768_v55 = vmin.f32 %v1766_v50, %v1767_v63  ;;  %v1059_v19 = vpop.f32.mrf.mxu0  ;;  %v1132_v60 = vpop.f32.mrf.mxu1 }
 0x140   : > { %v1184_v8 = vrot.slane %v1183_v22, 2  ;;  %v1412_v7 = vadd.f32 %v1411_v1, %v1410_v53  ;;  %v1578_v9 = vrot.slane %v1577_v2, 2  ;;  %v1743_v10 = vrot.slane %v1742_v3, 2 }
 0x141   : > { %v1210_v13 = vrot.slane %v1209_v5, 2  ;;  %v1438_v14 = vadd.f32 %v1437_v27, %v1436_v61  ;;  %v1604_v17 = vrot.slane %v1603_v6, 2  ;;  %v1769_v18 = vrot.slane %v1768_v55, 2 }
 0x142   : > { %v1185_v28 = vadd.f32 %v1184_v8, %v1183_v22  ;;  %v1413_v29 = vrot.slane %v1412_v7, 2  ;;  %v1579_v23 = vmax.f32 %v1577_v2, %v1578_v9  ;;  %v1744_v0 = vmin.f32 %v1742_v3, %v1743_v10 }
 0x143   : > { %v1211_v57 = vadd.f32 %v1210_v13, %v1209_v5  ;;  %v1439_v35 = vrot.slane %v1438_v14, 2  ;;  %v1605_v37 = vmax.f32 %v1603_v6, %v1604_v17  ;;  %v1770_v54 = vmin.f32 %v1768_v55, %v1769_v18 }
 0x144   : > { %v1186_v62 = vrot.slane %v1185_v28, 1  ;;  %v1414_v42 = vadd.f32 %v1413_v29, %v1412_v7  ;;  %v1580_v43 = vrot.slane %v1579_v23, 1  ;;  %v1745_v44 = vrot.slane %v1744_v0, 1 }
 0x145   : > { %v1212_v45 = vrot.slane %v1211_v57, 1  ;;  %v1440_v59 = vadd.f32 %v1439_v35, %v1438_v14  ;;  %v1606_v48 = vrot.slane %v1605_v37, 1  ;;  %v1771_v49 = vrot.slane %v1770_v54, 1 }
 0x146   : > { %v1187_v50 = vadd.f32 %v1186_v62, %v1185_v28  ;;  %v1415_v52 = vrot.slane %v1414_v42, 1  ;;  %v1581_v53 = vmax.f32 %v1579_v23, %v1580_v43  ;;  %v1746_v58 = vmin.f32 %v1744_v0, %v1745_v44 }
 0x147   : > { %v1213_v61 = vadd.f32 %v1212_v45, %v1211_v57  ;;  %v1441_v21 = vrot.slane %v1440_v59, 1  ;;  %v1607_v63 = vmax.f32 %v1605_v37, %v1606_v48  ;;  %v1772_v22 = vmin.f32 %v1770_v54, %v1771_v49 }
 0x148   : > { %v1274_v1 = vcombine.low %v2718_v36, %v1187_v50  ;;  %v1416_v2 = vadd.f32 %v1415_v52, %v1414_v42  ;;  %v1668_v3 = vcombine.low %v2720_v34, %v1581_v53  ;;  %v1833_v5 = vcombine.low %v2722_v38, %v1746_v58  ;;  %v1061_v38 = vpop.f32.mrf.mxu0 }
 0x149   : > { %v1275_v27 = vcombine.low %v2724_v39, %v1213_v61  ;;  %v1442_v6 = vadd.f32 %v1441_v21, %v1440_v59  ;;  %v1669_v55 = vcombine.low %v2732_v40, %v1607_v63  ;;  %v1834_v8 = vcombine.low %v2734_v41, %v1772_v22  ;;  %v1134_v39 = vpop.f32.mrf.mxu1 }
 0x14a   : > { %v1503_v7 = vcombine.low %v2728_v20, %v1416_v2  ;;  %v1050_v9 = vadd.f32 %v2714_v32, %v2647_v12  ;;  %v2765_v36 = vadd.f32 %v2716_v33, %v2651_v15  ;;  %v2770_v34 = vrot.slane %v2614_v51, %v539_v16  ;;  %v1063_v17 = vpop.f32.mrf.mxu0 }
 0x14b   : > { %v2773_v40 = vrot.slane %v1274_v1, %v2644_v11  ;;  %v2776_v41 = vrot.slane %v1668_v3, %v2644_v11  ;;  %v2779_v20 = vrot.slane %v1275_v27, %v2644_v11  ;;  %v1504_v32 = vcombine.low %v2730_v26, %v1442_v6  ;;  %v1136_v18 = vpop.f32.mrf.mxu1 }
 0x14c   : > { %v2783_v33 = vrot.slane %v1833_v5, %v2644_v11  ;;  %v2786_v47 = vrot.slane %v1669_v55, %v2644_v11  ;;  %v2789_v51 = vrot.slane %v1834_v8, %v2644_v11  ;;  %v2793_v16 = vadd.f32 %v2739_v24, %v2654_v46  ;;  %v1065_v45 = vpop.f32.mrf.mxu0 }
 0x14d   : > { %v2796_v10 = vrot.slane %v1503_v7, %v2644_v11  ;;  %v2800_v13 = vadd.f32 %v2741_v56, %v2770_v34  ;;  %v1054_v26 = vadd.f32 %v2746_v4, %v2647_v12  ;;  %v1127_v14 = vadd.f32 %v2748_v25, %v2651_v15  ;;  %v1138_v59 = vpop.f32.mrf.mxu1 }
 0x14e   : > { %v1306_v28 = vcombine.low %v2773_v40, %v2779_v20  ;;  %v2809_v24 = vrot.slane %v1504_v32, %v2644_v11  ;;  %v1331_v29 = vmul.f32 %v1050_v9, %v1050_v9  ;;  %v1333_v23 = vmul.f32 %v2765_v36, %v2765_v36 }
 0x14f   : > { %v1700_v56 = vcombine.low %v2776_v41, %v2786_v47  ;;  %v1865_v4 = vcombine.low %v2783_v33, %v2789_v51  ;;  %v1332_v25 = vmul.f32 %v2793_v16, %v2793_v16  ;;  %v1339_v0 = vmul.f32 %v1054_v26, %v1054_v26  ;;  %v1142_v5 = vpop.f32.mrf.mxu1 }
 0x150   : > { %v1334_v57 = vmul.f32 %v2800_v13, %v2800_v13  ;;  %v1214_v35 = vadd.f32 %v1054_v26, %v1050_v9  ;;  %v1608_v37 = vmax.f32 %v1050_v9, %v1054_v26  ;;  %v1341_v54 = vmul.f32 %v1127_v14, %v1127_v14 }
 0x151   : > { %v1443_v62 = vadd.f32 %v1339_v0, %v1331_v29  ;;  %v1773_v42 = vmin.f32 %v1050_v9, %v1054_v26  ;;  %v1240_v43 = vadd.f32 %v1127_v14, %v2765_v36  ;;  %v1056_v44 = vadd.f32 %v2750_v30, %v2654_v46 }
 0x152   : > { %v1634_v48 = vmax.f32 %v2765_v36, %v1127_v14  ;;  %v1129_v49 = vadd.f32 %v2752_v31, %v2770_v34  ;;  %v1060_v50 = vadd.f32 %v1059_v19, %v2647_v12  ;;  %v1133_v52 = vadd.f32 %v1132_v60, %v2651_v15  ;;  %v1069_v60 = vpop.f32.mrf.mxu0 }
 0x153   : > { %v1469_v53 = vadd.f32 %v1341_v54, %v1333_v23  ;;  %v1799_v58 = vmin.f32 %v2765_v36, %v1127_v14  ;;  %v1227_v61 = vadd.f32 %v1056_v44, %v2793_v16  ;;  %v1340_v21 = vmul.f32 %v1056_v44, %v1056_v44 }
 0x154   : > { %v1621_v63 = vmax.f32 %v2793_v16, %v1056_v44  ;;  %v1786_v30 = vmin.f32 %v2793_v16, %v1056_v44  ;;  %v1253_v22 = vadd.f32 %v1129_v49, %v2800_v13  ;;  %v1342_v1 = vmul.f32 %v1129_v49, %v1129_v49 }
 0x155   : > { %v1456_v2 = vadd.f32 %v1340_v21, %v1332_v25  ;;  %v1647_v31 = vmax.f32 %v2800_v13, %v1129_v49  ;;  %v1812_v19 = vmin.f32 %v2800_v13, %v1129_v49  ;;  %v1347_v3 = vmul.f32 %v1060_v50, %v1060_v50 }
 0x156   : > { %v1482_v27 = vadd.f32 %v1342_v1, %v1334_v57  ;;  %v1215_v6 = vadd.f32 %v1214_v35, %v1060_v50  ;;  %v1609_v55 = vmax.f32 %v1608_v37, %v1060_v50  ;;  %v1349_v8 = vmul.f32 %v1133_v52, %v1133_v52  ;;  %v1071_v57 = vpop.f32.mrf.mxu0  ;;  %v1144_v35 = vpop.f32.mrf.mxu1 }
 0x157   : > { %v1444_v7 = vadd.f32 %v1443_v62, %v1347_v3  ;;  %v1774_v9 = vmin.f32 %v1773_v42, %v1060_v50  ;;  %v1241_v36 = vadd.f32 %v1240_v43, %v1133_v52  ;;  %v1062_v32 = vadd.f32 %v1061_v38, %v2654_v46 }
 0x158   : > { %v1635_v16 = vmax.f32 %v1634_v48, %v1133_v52  ;;  %v1135_v26 = vadd.f32 %v1134_v39, %v2770_v34  ;;  %v1064_v14 = vadd.f32 %v1063_v17, %v2647_v12  ;;  %v1137_v29 = vadd.f32 %v1136_v18, %v2651_v15 }
 0x159   : > { %v1470_v13 = vadd.f32 %v1469_v53, %v1349_v8  ;;  %v1800_v23 = vmin.f32 %v1799_v58, %v1133_v52  ;;  %v1228_v25 = vadd.f32 %v1227_v61, %v1062_v32  ;;  %v1348_v0 = vmul.f32 %v1062_v32, %v1062_v32  ;;  %v1073_v58 = vpop.f32.mrf.mxu0  ;;  %v1146_v61 = vpop.f32.mrf.mxu1 }
 0x15a   : > { %v1622_v37 = vmax.f32 %v1621_v63, %v1062_v32  ;;  %v1787_v54 = vmin.f32 %v1786_v30, %v1062_v32  ;;  %v1254_v62 = vadd.f32 %v1253_v22, %v1135_v26  ;;  %v1350_v42 = vmul.f32 %v1135_v26, %v1135_v26 }
 0x15b   : > { %v1457_v43 = vadd.f32 %v1456_v2, %v1348_v0  ;;  %v1648_v44 = vmax.f32 %v1647_v31, %v1135_v26  ;;  %v1813_v38 = vmin.f32 %v1812_v19, %v1135_v26  ;;  %v1355_v48 = vmul.f32 %v1064_v14, %v1064_v14  ;;  %v1075_v32 = vpop.f32.mrf.mxu0 }
 0x15c   : > { %v1483_v49 = vadd.f32 %v1482_v27, %v1350_v42  ;;  %v1216_v39 = vadd.f32 %v1215_v6, %v1064_v14  ;;  %v1610_v50 = vmax.f32 %v1609_v55, %v1064_v14  ;;  %v1357_v17 = vmul.f32 %v1137_v29, %v1137_v29 }
 0x15d   : > { %v1445_v21 = vadd.f32 %v1444_v7, %v1355_v48  ;;  %v1775_v18 = vmin.f32 %v1774_v9, %v1064_v14  ;;  %v1242_v53 = vadd.f32 %v1241_v36, %v1137_v29  ;;  %v1066_v52 = vadd.f32 %v1065_v45, %v2654_v46 }
 0x15e   : > { %v1636_v1 = vmax.f32 %v1635_v16, %v1137_v29  ;;  %v1139_v63 = vadd.f32 %v1138_v59, %v2770_v34  ;;  %v1070_v30 = vadd.f32 %v1069_v60, %v2647_v12  ;;  %v1143_v22 = vadd.f32 %v1142_v5, %v2651_v15  ;;  %v1148_v16 = vpop.f32.mrf.mxu1 }
 0x15f   : > { %v1471_v2 = vadd.f32 %v1470_v13, %v1357_v17  ;;  %v1801_v31 = vmin.f32 %v1800_v23, %v1137_v29  ;;  %v1229_v19 = vadd.f32 %v1228_v25, %v1066_v52  ;;  %v1356_v3 = vmul.f32 %v1066_v52, %v1066_v52 }
 0x160   : > { %v1623_v27 = vmax.f32 %v1622_v37, %v1066_v52  ;;  %v1788_v6 = vmin.f32 %v1787_v54, %v1066_v52  ;;  %v1255_v55 = vadd.f32 %v1254_v62, %v1139_v63  ;;  %v1358_v8 = vmul.f32 %v1139_v63, %v1139_v63  ;;  %v1152_v48 = vpop.f32.mrf.mxu1 }
 0x161   : > { %v1458_v7 = vadd.f32 %v1457_v43, %v1356_v3  ;;  %v1649_v9 = vmax.f32 %v1648_v44, %v1139_v63  ;;  %v1814_v45 = vmin.f32 %v1813_v38, %v1139_v63  ;;  %v1363_v36 = vmul.f32 %v1070_v30, %v1070_v30  ;;  %v1079_v38 = vpop.f32.mrf.mxu0 }
 0x162   : > { %v1484_v26 = vadd.f32 %v1483_v49, %v1358_v8  ;;  %v1217_v59 = vadd.f32 %v1216_v39, %v1070_v30  ;;  %v1611_v14 = vmax.f32 %v1610_v50, %v1070_v30  ;;  %v1365_v60 = vmul.f32 %v1143_v22, %v1143_v22 }
 0x163   : > { %v1446_v0 = vadd.f32 %v1445_v21, %v1363_v36  ;;  %v1776_v5 = vmin.f32 %v1775_v18, %v1070_v30  ;;  %v1243_v13 = vadd.f32 %v1242_v53, %v1143_v22  ;;  %v1072_v29 = vadd.f32 %v1071_v57, %v2654_v46 }
 0x164   : > { %v1637_v23 = vmax.f32 %v1636_v1, %v1143_v22  ;;  %v1145_v25 = vadd.f32 %v1144_v35, %v2770_v34  ;;  %v1074_v37 = vadd.f32 %v1073_v58, %v2647_v12  ;;  %v1147_v54 = vadd.f32 %v1146_v61, %v2651_v15 }
 0x165   : > { %v1472_v62 = vadd.f32 %v1471_v2, %v1365_v60  ;;  %v1802_v42 = vmin.f32 %v1801_v31, %v1143_v22  ;;  %v1230_v43 = vadd.f32 %v1229_v19, %v1072_v29  ;;  %v1364_v44 = vmul.f32 %v1072_v29, %v1072_v29  ;;  %v1081_v2 = vpop.f32.mrf.mxu0  ;;  %v1154_v31 = vpop.f32.mrf.mxu1 }
 0x166   : > { %v1624_v49 = vmax.f32 %v1623_v27, %v1072_v29  ;;  %v1789_v39 = vmin.f32 %v1788_v6, %v1072_v29  ;;  %v1256_v50 = vadd.f32 %v1255_v55, %v1145_v25  ;;  %v1366_v17 = vmul.f32 %v1145_v25, %v1145_v25 }
 0x167   : > { %v1459_v21 = vadd.f32 %v1458_v7, %v1364_v44  ;;  %v1650_v18 = vmax.f32 %v1649_v9, %v1145_v25  ;;  %v1815_v57 = vmin.f32 %v1814_v45, %v1145_v25  ;;  %v1371_v53 = vmul.f32 %v1074_v37, %v1074_v37 }
 0x168   : > { %v1485_v52 = vadd.f32 %v1484_v26, %v1366_v17  ;;  %v1218_v35 = vadd.f32 %v1217_v59, %v1074_v37  ;;  %v1612_v1 = vmax.f32 %v1611_v14, %v1074_v37  ;;  %v1373_v58 = vmul.f32 %v1147_v54, %v1147_v54 }
 0x169   : > { %v1447_v63 = vadd.f32 %v1446_v0, %v1371_v53  ;;  %v1777_v61 = vmin.f32 %v1776_v5, %v1074_v37  ;;  %v1244_v30 = vadd.f32 %v1243_v13, %v1147_v54  ;;  %v1076_v22 = vadd.f32 %v1075_v32, %v2654_v46  ;;  %v1083_v5 = vpop.f32.mrf.mxu0  ;;  %v1156_v13 = vpop.f32.mrf.mxu1 }
 0x16a   : > { %v1638_v19 = vmax.f32 %v1637_v23, %v1147_v54  ;;  %v1149_v3 = vadd.f32 %v1148_v16, %v2770_v34  ;;  %v1080_v27 = vadd.f32 %v1079_v38, %v2647_v12  ;;  %v1153_v6 = vadd.f32 %v1152_v48, %v2651_v15 }
 0x16b   : > { %v1473_v55 = vadd.f32 %v1472_v62, %v1373_v58  ;;  %v1803_v8 = vmin.f32 %v1802_v42, %v1147_v54  ;;  %v1231_v7 = vadd.f32 %v1230_v43, %v1076_v22  ;;  %v1372_v9 = vmul.f32 %v1076_v22, %v1076_v22 }
 0x16c   : > { %v1625_v45 = vmax.f32 %v1624_v49, %v1076_v22  ;;  %v1790_v36 = vmin.f32 %v1789_v39, %v1076_v22  ;;  %v1257_v26 = vadd.f32 %v1256_v50, %v1149_v3  ;;  %v1374_v59 = vmul.f32 %v1149_v3, %v1149_v3 }
 0x16d   : > { %v2852_v14 = vadd.f32 %v1459_v21, %v1372_v9  ;;  %v1651_v32 = vmax.f32 %v1650_v18, %v1149_v3  ;;  %v1816_v60 = vmin.f32 %v1815_v57, %v1149_v3  ;;  %v1379_v0 = vmul.f32 %v1080_v27, %v1080_v27 }
 0x16e   : > { %v2854_v16 = vadd.f32 %v1485_v52, %v1374_v59  ;;  %v1219_v29 = vadd.f32 %v1218_v35, %v1080_v27  ;;  %v1613_v23 = vmax.f32 %v1612_v1, %v1080_v27  ;;  %v1381_v25 = vmul.f32 %v1153_v6, %v1153_v6 }
 0x16f   : > { %v1448_v37 = vadd.f32 %v1447_v63, %v1379_v0  ;;  %v1778_v54 = vmin.f32 %v1777_v61, %v1080_v27  ;;  %v1245_v62 = vadd.f32 %v1244_v30, %v1153_v6  ;;  %v1082_v42 = vadd.f32 %v1081_v2, %v2654_v46 }
 0x170   : > { %v1639_v43 = vmax.f32 %v1638_v19, %v1153_v6  ;;  %v1155_v44 = vadd.f32 %v1154_v31, %v2770_v34  ;;  %v1084_v38 = vadd.f32 %v1083_v5, %v2647_v12  ;;  %v1157_v48 = vadd.f32 %v1156_v13, %v2651_v15 }
 0x171   : > { %v1474_v49 = vadd.f32 %v1473_v55, %v1381_v25  ;;  %v1804_v39 = vmin.f32 %v1803_v8, %v1153_v6  ;;  %v2860_v50 = vadd.f32 %v1231_v7, %v1082_v42  ;;  %v1380_v17 = vmul.f32 %v1082_v42, %v1082_v42 }
 0x172   : > { %v2862_v21 = vmax.f32 %v1625_v45, %v1082_v42  ;;  %v2864_v18 = vmin.f32 %v1790_v36, %v1082_v42  ;;  %v2866_v57 = vadd.f32 %v1257_v26, %v1155_v44  ;;  %v1382_v53 = vmul.f32 %v1155_v44, %v1155_v44 }
 0x173   : > { %v2868_v52 = vmax.f32 %v1651_v32, %v1155_v44  ;;  %v1220_v35 = vadd.f32 %v1219_v29, %v1084_v38  ;;  %v1387_v1 = vmul.f32 %v1084_v38, %v1084_v38  ;;  %v1614_v58 = vmax.f32 %v1613_v23, %v1084_v38 }
 0x174   : > { %v2870_v12 = vmin.f32 %v1816_v60, %v1155_v44  ;;  %v1779_v15 = vmin.f32 %v1778_v54, %v1084_v38  ;;  %v1246_v63 = vadd.f32 %v1245_v62, %v1157_v48  ;;  %v1389_v61 = vmul.f32 %v1157_v48, %v1157_v48 }
 0x175   : > { %v1221_v30 = vrot.slane %v1220_v35, 4  ;;  %v1449_v22 = vadd.f32 %v1448_v37, %v1387_v1  ;;  %v1615_v2 = vrot.slane %v1614_v58, 4  ;;  %v1640_v31 = vmax.f32 %v1639_v43, %v1157_v48 }
 0x176   : > { %v1780_v19 = vrot.slane %v1779_v15, 4  ;;  %v1247_v3 = vrot.slane %v1246_v63, 4  ;;  %v1475_v27 = vadd.f32 %v1474_v49, %v1389_v61  ;;  %v1805_v6 = vmin.f32 %v1804_v39, %v1157_v48 }
 0x177   : > { %v1222_v55 = vadd.f32 %v1221_v30, %v1220_v35  ;;  %v1450_v8 = vrot.slane %v1449_v22, 4  ;;  %v1616_v7 = vmax.f32 %v1614_v58, %v1615_v2  ;;  %v1641_v9 = vrot.slane %v1640_v31, 4  ;;  %v1085_v30 = vpop.f32.mrf.mxu0 }
 0x178   : > { %v1781_v45 = vmin.f32 %v1779_v15, %v1780_v19  ;;  %v1248_v36 = vadd.f32 %v1247_v3, %v1246_v63  ;;  %v1476_v26 = vrot.slane %v1475_v27, 4  ;;  %v1806_v59 = vrot.slane %v1805_v6, 4 }
 0x179   : > { %v1223_v32 = vrot.slane %v1222_v55, 2  ;;  %v1451_v60 = vadd.f32 %v1450_v8, %v1449_v22  ;;  %v1617_v0 = vrot.slane %v1616_v7, 2  ;;  %v1642_v5 = vmax.f32 %v1640_v31, %v1641_v9  ;;  %v1158_v22 = vpop.f32.mrf.mxu1 }
 0x17a   : > { %v1782_v13 = vrot.slane %v1781_v45, 2  ;;  %v1249_v29 = vrot.slane %v1248_v36, 2  ;;  %v1477_v23 = vadd.f32 %v1476_v26, %v1475_v27  ;;  %v1807_v25 = vmin.f32 %v1805_v6, %v1806_v59 }
 0x17b   : > { %v1224_v37 = vadd.f32 %v1223_v32, %v1222_v55  ;;  %v1452_v54 = vrot.slane %v1451_v60, 2  ;;  %v1618_v62 = vmax.f32 %v1616_v7, %v1617_v0  ;;  %v1643_v42 = vrot.slane %v1642_v5, 2 }
 0x17c   : > { %v1783_v43 = vmin.f32 %v1781_v45, %v1782_v13  ;;  %v1250_v44 = vadd.f32 %v1249_v29, %v1248_v36  ;;  %v1478_v38 = vrot.slane %v1477_v23, 2  ;;  %v1808_v48 = vrot.slane %v1807_v25, 2 }
 0x17d   : > { %v1225_v49 = vrot.slane %v1224_v37, 1  ;;  %v1453_v39 = vadd.f32 %v1452_v54, %v1451_v60  ;;  %v1619_v35 = vrot.slane %v1618_v62, 1  ;;  %v1644_v1 = vmax.f32 %v1642_v5, %v1643_v42 }
 0x17e   : > { %v1784_v58 = vrot.slane %v1783_v43, 1  ;;  %v1251_v15 = vrot.slane %v1250_v44, 1  ;;  %v1479_v63 = vadd.f32 %v1478_v38, %v1477_v23  ;;  %v1809_v61 = vmin.f32 %v1807_v25, %v1808_v48 }
 0x17f   : > { %v1461_v2 = vadd.f32 %v2852_v14, %v1380_v17  ;;  %v1487_v31 = vadd.f32 %v2854_v16, %v1382_v53  ;;  %v1454_v19 = vrot.slane %v1453_v39, 1  ;;  %v1645_v3 = vrot.slane %v1644_v1, 1 }
 0x180   : > { %v2874_v27 = vadd.f32 %v1225_v49, %v1224_v37  ;;  %v2876_v6 = vmax.f32 %v1618_v62, %v1619_v35  ;;  %v1480_v55 = vrot.slane %v1479_v63, 1  ;;  %v1810_v8 = vrot.slane %v1809_v61, 1 }
 0x181   : > { %v2878_v7 = vmin.f32 %v1783_v43, %v1784_v58  ;;  %v2880_v9 = vadd.f32 %v1251_v15, %v1250_v44  ;;  %v1086_v45 = vadd.f32 %v1085_v30, %v2654_v46  ;;  %v1159_v36 = vadd.f32 %v1158_v22, %v2770_v34 }
 0x182   : > { %v2884_v26 = vadd.f32 %v1454_v19, %v1453_v39  ;;  %v2886_v14 = vadd.f32 %v1480_v55, %v1479_v63  ;;  %v2888_v16 = vmax.f32 %v1644_v1, %v1645_v3  ;;  %v2890_v17 = vmin.f32 %v1809_v61, %v1810_v8 }
 0x183   : > { %v1233_v53 = vadd.f32 %v2860_v50, %v1086_v45  ;;  %v1388_v59 = vmul.f32 %v1086_v45, %v1086_v45  ;;  %v1627_v32 = vmax.f32 %v2862_v21, %v1086_v45  ;;  %v1792_v60 = vmin.f32 %v2864_v18, %v1086_v45 }
 0x184   : > { %v1259_v0 = vadd.f32 %v2866_v57, %v1159_v36  ;;  %v1390_v46 = vmul.f32 %v1159_v36, %v1159_v36  ;;  %v1653_v34 = vmax.f32 %v2868_v52, %v1159_v36  ;;  %v1818_v5 = vmin.f32 %v2870_v12, %v1159_v36 }
 0x185   : > { %v1234_v13 = vrot.slane %v1233_v53, 4  ;;  %v1462_v29 = vadd.f32 %v1461_v2, %v1388_v59  ;;  %v1628_v23 = vrot.slane %v1627_v32, 4  ;;  %v1793_v25 = vrot.slane %v1792_v60, 4 }
 0x186   : > { %v1260_v37 = vrot.slane %v1259_v0, 4  ;;  %v1488_v54 = vadd.f32 %v1487_v31, %v1390_v46  ;;  %v1654_v62 = vrot.slane %v1653_v34, 4  ;;  %v1819_v50 = vrot.slane %v1818_v5, 4 }
 0x187   : > { %v1235_v42 = vadd.f32 %v1234_v13, %v1233_v53  ;;  %v1463_v43 = vrot.slane %v1462_v29, 4  ;;  %v1629_v21 = vmax.f32 %v1627_v32, %v1628_v23  ;;  %v1794_v44 = vmin.f32 %v1792_v60, %v1793_v25 }
 0x188   : > { %v1261_v18 = vadd.f32 %v1260_v37, %v1259_v0  ;;  %v1489_v38 = vrot.slane %v1488_v54, 4  ;;  %v1655_v57 = vmax.f32 %v1653_v34, %v1654_v62  ;;  %v1820_v48 = vmin.f32 %v1818_v5, %v1819_v50 }
 0x189   : > { %v1236_v49 = vrot.slane %v1235_v42, 2  ;;  %v1464_v52 = vadd.f32 %v1463_v43, %v1462_v29  ;;  %v1630_v39 = vrot.slane %v1629_v21, 2  ;;  %v1795_v12 = vrot.slane %v1794_v44, 2 }
 0x18a   : > { %v1262_v35 = vrot.slane %v1261_v18, 2  ;;  %v1490_v1 = vadd.f32 %v1489_v38, %v1488_v54  ;;  %v1656_v58 = vrot.slane %v1655_v57, 2  ;;  %v1821_v15 = vrot.slane %v1820_v48, 2 }
 0x18b   : > { %v1237_v63 = vadd.f32 %v1236_v49, %v1235_v42  ;;  %v1465_v61 = vrot.slane %v1464_v52, 2  ;;  %v1631_v30 = vmax.f32 %v1629_v21, %v1630_v39  ;;  %v1796_v22 = vmin.f32 %v1794_v44, %v1795_v12 }
 0x18c   : > { %v1263_v2 = vadd.f32 %v1262_v35, %v1261_v18  ;;  %v1491_v31 = vrot.slane %v1490_v1, 2  ;;  %v1657_v19 = vmax.f32 %v1655_v57, %v1656_v58  ;;  %v1822_v3 = vmin.f32 %v1820_v48, %v1821_v15 }
 0x18d   : > { %v1238_v55 = vrot.slane %v1237_v63, 1  ;;  %v1466_v8 = vadd.f32 %v1465_v61, %v1464_v52  ;;  %v1632_v45 = vrot.slane %v1631_v30, 1  ;;  %v1797_v36 = vrot.slane %v1796_v22, 1 }
 0x18e   : > { %v1264_v53 = vrot.slane %v1263_v2, 1  ;;  %v1492_v59 = vadd.f32 %v1491_v31, %v1490_v1  ;;  %v1658_v32 = vrot.slane %v1657_v19, 1  ;;  %v1823_v60 = vrot.slane %v1822_v3, 1 }
 0x18f   : > { %v1239_v0 = vadd.f32 %v1238_v55, %v1237_v63  ;;  %v1467_v46 = vrot.slane %v1466_v8, 1  ;;  %v1633_v34 = vmax.f32 %v1631_v30, %v1632_v45  ;;  %v1798_v5 = vmin.f32 %v1796_v22, %v1797_v36 }
 0x190   : > { %v1265_v13 = vadd.f32 %v1264_v53, %v1263_v2  ;;  %v1493_v29 = vrot.slane %v1492_v59, 1  ;;  %v1659_v23 = vmax.f32 %v1657_v19, %v1658_v32  ;;  %v1824_v25 = vmin.f32 %v1822_v3, %v1823_v60 }
 0x191   : > { %v1276_v37 = vcombine.low %v2874_v27, %v1239_v0  ;;  %v1468_v54 = vadd.f32 %v1467_v46, %v1466_v8  ;;  %v1670_v62 = vcombine.low %v2876_v6, %v1633_v34  ;;  %v1835_v50 = vcombine.low %v2878_v7, %v1798_v5 }
 0x192   : > { %v1277_v42 = vcombine.low %v2880_v9, %v1265_v13  ;;  %v1494_v43 = vadd.f32 %v1493_v29, %v1492_v59  ;;  %v1671_v21 = vcombine.low %v2888_v16, %v1659_v23  ;;  %v1836_v44 = vcombine.low %v2890_v17, %v1824_v25 }
 0x193   : > { %v1298_v18 = vrot.slane %v1276_v37, %v2644_v11  ;;  %v1505_v38 = vcombine.low %v2884_v26, %v1468_v54  ;;  %v1692_v57 = vrot.slane %v1670_v62, %v2644_v11  ;;  %v1857_v27 = vrot.slane %v1835_v50, %v2644_v11 }
 0x194   : > { %v1305_v6 = vrot.slane %v1277_v42, %v2644_v11  ;;  %v1506_v7 = vcombine.low %v2886_v14, %v1494_v43  ;;  %v1699_v9 = vrot.slane %v1671_v21, %v2644_v11  ;;  %v1864_v48 = vrot.slane %v1836_v44, %v2644_v11 }
 0x195   : > { %v1535_v16 = vcombine.low %v2796_v10, %v2809_v24  ;;  %v1527_v17 = vrot.slane %v1505_v38, %v2644_v11  ;;  %v1314_v14 = vrot.slane %v1306_v28, %v2644_v11  ;;  %v1708_v12 = vrot.slane %v1700_v56, %v2644_v11 }
 0x196   : > { %v1307_v49 = vcombine.low %v1298_v18, %v1305_v6  ;;  %v1534_v26 = vrot.slane %v1506_v7, %v2644_v11  ;;  %v1701_v52 = vcombine.low %v1692_v57, %v1699_v9  ;;  %v1866_v39 = vcombine.low %v1857_v27, %v1864_v48 }
 0x197   : > { %v1873_v10 = vrot.slane %v1865_v4, %v2644_v11  ;;  %v1543_v40 = vrot.slane %v1535_v16, %v2644_v11 }
 0x198   : > { %v1321_v24 = vrot.slane %v1307_v49, %v2644_v11  ;;  %v1536_v35 = vcombine.low %v1527_v17, %v1534_v26  ;;  %v1715_v1 = vrot.slane %v1701_v52, %v2644_v11  ;;  %v1880_v58 = vrot.slane %v1866_v39, %v2644_v11 }
 0x19a   : > { %v1322_v41 = vcombine.low %v1314_v14, %v1321_v24  ;;  %v1550_v20 = vrot.slane %v1536_v35, %v2644_v11  ;;  %v1716_v47 = vcombine.low %v1708_v12, %v1715_v1  ;;  %v1881_v28 = vcombine.low %v1873_v10, %v1880_v58 }
 0x19c   : > { %v1551_v33 = vcombine.low %v1543_v40, %v1550_v20  ;;  %1325 = vst [vmem:[%s363_s13] sm:$0xff] %v1322_v41  ;;  %1719 = vst [vmem:[%s371_s17] sm:$0xff] %v1716_v47 }
 0x19d   : > { %1884 = vst [vmem:[%s375_s20] sm:$0xff] %v1881_v28 }
 0x19e   : > { %1554 = vst [vmem:[%s367_s23] sm:$0xff] %v1551_v33 }
 0x19f PF: > { %s20_s29 = sadd.s32 1, %s2251_s29   ;;  %s2966_s27 = smov %s2247_s28 }
 0x1a0   : > { %p17_p2 = scmp.ge.s32.totalorder %s20_s29, 4   ;;  %s2967_s28 = smov %s2969_s9 }
 0x1a2   :  { %19 = sbr.rel (!%p17_p2) target bundleno = 2 (0x2), region = 115 }
 0x1a7   :  { %1946 = vsyncpa [#allocation3], 1 }
 0x1a8   :  { %1948 = vsyncpa [#allocation3 + $0x1], 1 }

// kernel: tiny_pointnet_forward.15
= control target key start
LH: loop header
LB: loop body
LE: loop exit
PB: predicated region body
PF: predicated region fallthrough
CT: control target
= control target key end

     0   :  { %s973_s24 = smov 0   ;;  %s975_s25 = smov 0   ;;  %s1092_s0 = inlined_call_operand.vmem [shape: bf16[2,64,64], index: 0, kind: input, shape index: {}]   ;;  %s1093_s1 = inlined_call_operand.vmem [shape: bf16[2,64,64], index: 1, kind: input, shape index: {}]   ;;  %s1094_s2 = inlined_call_operand.vmem [shape: f32[1,64], index: 2, kind: input, shape index: {}]   ;;  %s1095_s3 = inlined_call_operand.vmem [shape: f32[1,64], index: 3, kind: input, shape index: {}]   ;;  %s1096_s4 = inlined_call_operand.vmem [shape: f32[1,64], index: 4, kind: input, shape index: {}]   ;;  %s1097_s5 = inlined_call_operand.vmem [shape: bf16[2,64,64], index: 5, kind: output, shape index: {0}]   ;;  %s1098_s6 = inlined_call_operand.vmem [shape: f32[2,1,64], index: 6, kind: output, shape index: {1}]   ;;  %s1099_s7 = inlined_call_operand.vmem [shape: f32[2,1,64], index: 7, kind: output, shape index: {2}]  }
   0x1   :  { %s977_s26 = smov 0  }
   0x2 LB: > { %s30_s27 = sadd.s32 1, %s926_s25  ;;  %p789_p0 = scmp.ge.s32.totalorder %s930_s26, 1  ;;  %s930_s26 = sphi %s977_s26, %s18_s26   ;;  %s926_s25 = sphi %s975_s25, %s1101_s25   ;;  %s922_s24 = sphi %s973_s24, %s1100_s24  }
   0x3   : > { %p32_p1 = scmp.ge.s32.totalorder %s30_s27, 2  ;;  %p273_p2 = scmp.lt.s32.totalorder %s930_s26, 3 }
   0x5   : > { %s1103_s27 = smov (%p32_p1, %s30_s27), 0  ;;  %p274_p3 = pnand %p789_p0, %p273_p2 }
   0x6   : > { %p325_p4 = scmp.lt.s32.totalorder (!%p274_p3), %s922_s24, 1 }
   0x7   : > { %277 = sbr.rel (%p274_p3) target bundleno = 265 (0x109), region = 40 }
   0xc   : > { %s1105_s24 = smov (!%p325_p4, %s922_s24), 1  ;;  %v796_v2 = vld [vmem:[%s1095_s3] ss:$0 sm:$0xff]  ;;  %vm460_vm0 = vcmask 523264   ;;  %vm360_vm1 = vcmask 516096   ;;  %v932_v46 = vmov 0.0  }
   0xd   : > { %s994_s28 = sshll.u32 %s1105_s24, 5  ;;  %v797_v12 = vld [vmem:[%s1096_s4] ss:$0 sm:$0xff]  ;;  %s1024_s18 = scalar_lea.vmem %s1098_s6, %s1105_s24  ;;  %vm570_vm2 = vcmask 519168  }
   0xe   : > { %s1000_s8 = scalar_lea.vmem %s1093_s1, %s994_s28  ;;  %s332_s11 = scalar_lea.vmem %s1092_s0, %s994_s28  ;;  %361 = vst.msk [vmem:[%s1024_s18] sm:$0x1] %vm360_vm1, %v932_v46  ;;  %v798_v47 = vld [vmem:[%s1094_s2] ss:$0 sm:$0xff] }
   0xf   : > { %v904_v0 = vld [vmem:[%s1000_s8 + $0x18] sm:$0xff]   ;;  %v905_v1 = vld [vmem:[%s1000_s8 + $0x10] sm:$0xff]   ;;  %v906_v3 = vld [vmem:[%s1000_s8 + $0x8] sm:$0xff]   ;;  %s1030_s21 = scalar_lea.vmem %s1099_s7, %s1105_s24  ;;  %s1043_s24 = scalar_lea.vmem %s1097_s5, %s994_s28 }
  0x10   : > { %855 = vmatprep.subr.bf16.mxu0 %v904_v0  ;;  %871 = vmatprep.subr.bf16.mxu1 %v904_v0  ;;  %v829_v4 = vld [vmem:[%s332_s11] sm:$0xff]   ;;  %v844_v5 = vld [vmem:[%s332_s11 + $0x8] sm:$0xff]   ;;  %v845_v6 = vld [vmem:[%s332_s11 + $0x10] sm:$0xff]   ;;  %362 = vst.msk [vmem:[%s1030_s21] sm:$0x1] %vm360_vm1, %v932_v46 }
  0x11   : > { %856 = vmatpush3.bf16.msra.mxu0 %v904_v0  ;;  %875 = vmatpush3.bf16.msra.mxu1 %v904_v0  ;;  %v830_v7 = vunpack.c.l.bf16 %v829_v4  ;;  %v831_v8 = vunpack.c.h.bf16 %v829_v4  ;;  %v834_v9 = vunpack.c.l.bf16 %v844_v5  ;;  %v835_v10 = vunpack.c.h.bf16 %v844_v5  ;;  %v846_v11 = vld [vmem:[%s332_s11 + $0x18] sm:$0xff]   ;;  %v907_v20 = vld [vmem:[%s1000_s8] sm:$0xff]  }
  0x12   : > { %857 = vmatprep.subr.bf16.mxu0 %v905_v1  ;;  %872 = vmatprep.subr.bf16.mxu1 %v905_v1  ;;  %v838_v13 = vunpack.c.l.bf16 %v845_v6  ;;  %v839_v14 = vunpack.c.h.bf16 %v845_v6  ;;  %v842_v15 = vunpack.c.l.bf16 %v846_v11  ;;  %v843_v16 = vunpack.c.h.bf16 %v846_v11 }
  0x13   : > { %v386_v17 = vmul.f32 %v830_v7, %v796_v2  ;;  %v387_v18 = vmul.f32 %v831_v8, %v796_v2  ;;  %v388_v19 = vmul.f32 %v834_v9, %v796_v2  ;;  %v389_v21 = vmul.f32 %v835_v10, %v796_v2 }
  0x14   : > { %v390_v22 = vmul.f32 %v838_v13, %v796_v2  ;;  %v391_v23 = vmul.f32 %v839_v14, %v796_v2  ;;  %v392_v27 = vmul.f32 %v842_v15, %v796_v2  ;;  %v393_v31 = vmul.f32 %v843_v16, %v796_v2 }
  0x15   : > { %858 = vmatpush3.bf16.msra.mxu0 %v905_v1  ;;  %876 = vmatpush3.bf16.msra.mxu1 %v905_v1  ;;  %v401_v24 = vadd.f32 %v797_v12, %v386_v17  ;;  %v402_v25 = vadd.f32 %v797_v12, %v387_v18  ;;  %v403_v26 = vadd.f32 %v797_v12, %v388_v19 }
  0x16   : > { %859 = vmatprep.subr.bf16.mxu0 %v906_v3  ;;  %873 = vmatprep.subr.bf16.mxu1 %v906_v3  ;;  %v404_v28 = vadd.f32 %v797_v12, %v389_v21  ;;  %v405_v29 = vadd.f32 %v797_v12, %v390_v22  ;;  %v406_v30 = vadd.f32 %v797_v12, %v391_v23 }
  0x17   : > { %v409_v32 = vmax.f32 %v401_v24, 0.0  ;;  %v410_v33 = vmax.f32 %v402_v25, 0.0  ;;  %v411_v34 = vmax.f32 %v403_v26, 0.0  ;;  %v407_v35 = vadd.f32 %v797_v12, %v392_v27 }
  0x18   : > { %v412_v36 = vmax.f32 %v404_v28, 0.0  ;;  %v413_v37 = vmax.f32 %v405_v29, 0.0  ;;  %v414_v38 = vmax.f32 %v406_v30, 0.0  ;;  %v408_v39 = vadd.f32 %v797_v12, %v393_v31 }
  0x19   : > { %860 = vmatpush3.bf16.msra.mxu0 %v906_v3  ;;  %877 = vmatpush3.bf16.msra.mxu1 %v906_v3  ;;  %v425_v40 = vpack.c.bf16 %v410_v33, %v409_v32  ;;  %v415_v41 = vmax.f32 %v407_v35, 0.0 }
  0x1a   : > { %861 = vmatprep.subr.bf16.mxu0 %v907_v20  ;;  %874 = vmatprep.subr.bf16.mxu1 %v907_v20  ;;  %v426_v42 = vpack.c.bf16 %v412_v36, %v411_v34  ;;  %v427_v43 = vpack.c.bf16 %v414_v38, %v413_v37  ;;  %v416_v44 = vmax.f32 %v408_v39, 0.0 }
  0x1b   : > { %863 = vmatprep.mubr.msk.bf16.mxu0 %vm460_vm0, %v425_v40 }
  0x1c   : > { %867 = vmatprep.mubr.msk.bf16.mxu1 %vm460_vm0, %v427_v43  ;;  %v428_v45 = vpack.c.bf16 %v416_v44, %v415_v41 }
  0x1d   : > { %862 = vmatpush3.bf16.msra.mxu0 %v907_v20  ;;  %878 = vmatpush3.bf16.msra.mxu1 %v907_v20 }
  0x20   : > { %864 = vmatmul.mubr.msk.bf16.vlgmr.msra.gmra.mxu0 %vm460_vm0, %v426_v42  ;;  %868 = vmatmul.mubr.msk.bf16.vlgmr.msra.gmra.mxu1 %vm460_vm0, %v428_v45 }
  0xe0   : > { %v865_v48 = vpop.f32.mrf.mxu0  ;;  %v869_v49 = vpop.f32.mrf.mxu1 }
  0xe1   : > { %v516_v50 = vadd.f32 %v865_v48, %v798_v47  ;;  %v532_v51 = vadd.f32 %v869_v49, %v798_v47 }
  0xe2   : > { %v507_v52 = vpop.f32.mrf.mxu0  ;;  %v523_v53 = vpop.f32.mrf.mxu1 }
  0xe3   : > { %v822_v54 = vpack.c.bf16 %v516_v50, %v516_v50  ;;  %v508_v55 = vadd.f32 %v798_v47, %v507_v52  ;;  %v826_v56 = vpack.c.bf16 %v532_v51, %v532_v51  ;;  %v524_v58 = vadd.f32 %v798_v47, %v523_v53 }
  0xe4   : > { %v866_v57 = vpop.f32.mrf.mxu0  ;;  %v870_v59 = vpop.f32.mrf.mxu1  ;;  %v607_v4 = vmul.f32 %v516_v50, %v516_v50  ;;  %v583_v11 = vsel %vm460_vm0, %v516_v50, 0.0  ;;  %v611_v30 = vmul.f32 %v532_v51, %v532_v51  ;;  %v591_v35 = vsel %vm460_vm0, %v532_v51, 0.0 }
  0xe5   : > { %573 = vst.msk [vmem:[%s1043_s24 + $0x8] sm:$0xf] %vm570_vm2, %v822_v54  ;;  %v820_v60 = vpack.c.bf16 %v508_v55, %v508_v55  ;;  %577 = vst.msk [vmem:[%s1043_s24 + $0x18] sm:$0xf] %vm570_vm2, %v826_v56  ;;  %v519_v61 = vadd.f32 %v866_v57, %v798_v47  ;;  %v824_v62 = vpack.c.bf16 %v524_v58, %v524_v58  ;;  %v580_v7 = vsel %vm460_vm0, %v508_v55, 0.0 }
  0xe6   : > { %v510_v63 = vpop.f32.mrf.mxu0  ;;  %v526_v0 = vpop.f32.mrf.mxu1  ;;  %v605_v1 = vmul.f32 %v508_v55, %v508_v55  ;;  %v535_v3 = vadd.f32 %v870_v59, %v798_v47  ;;  %v616_v20 = vsel %vm460_vm0, %v607_v4, 0.0  ;;  %v609_v22 = vmul.f32 %v524_v58, %v524_v58  ;;  %v579_v55 = vld [vmem:[%s1024_s18] sm:$0x1] }
  0xe7   : > { %571 = vst.msk [vmem:[%s1043_s24] sm:$0xf] %vm570_vm2, %v820_v60  ;;  %v511_v2 = vadd.f32 %v798_v47, %v510_v63  ;;  %v823_v5 = vpack.c.bf16 %v519_v61, %v519_v61  ;;  %575 = vst.msk [vmem:[%s1043_s24 + $0x10] sm:$0xf] %vm570_vm2, %v824_v62  ;;  %v527_v6 = vadd.f32 %v798_v47, %v526_v0  ;;  %v585_v21 = vsel %vm460_vm0, %v519_v61, 0.0 }
  0xe8   : > { %v827_v13 = vpack.c.bf16 %v535_v3, %v535_v3  ;;  %v613_v14 = vsel %vm460_vm0, %v605_v1, 0.0  ;;  %v608_v15 = vmul.f32 %v519_v61, %v519_v61  ;;  %v587_v26 = vsel %vm460_vm0, %v524_v58, 0.0  ;;  %v604_v58 = vld [vmem:[%s1030_s21] sm:$0x1] }
  0xe9   : > { %v821_v8 = vpack.c.bf16 %v511_v2, %v511_v2  ;;  %v581_v9 = vsel %vm460_vm0, %v511_v2, 0.0  ;;  %v606_v10 = vmul.f32 %v511_v2, %v511_v2  ;;  %574 = vst.msk [vmem:[%s1043_s24 + $0xc] sm:$0xf] %vm570_vm2, %v823_v5  ;;  %v825_v17 = vpack.c.bf16 %v527_v6, %v527_v6 }
  0xea   : > { %v582_v12 = vadd.f32 %v581_v9, %v580_v7  ;;  %578 = vst.msk [vmem:[%s1043_s24 + $0x1c] sm:$0xf] %vm570_vm2, %v827_v13  ;;  %v618_v25 = vsel %vm460_vm0, %v608_v15, 0.0  ;;  %v610_v27 = vmul.f32 %v527_v6, %v527_v6  ;;  %v620_v31 = vsel %vm460_vm0, %v609_v22, 0.0 }
  0xeb   : > { %572 = vst.msk [vmem:[%s1043_s24 + $0x4] sm:$0xf] %vm570_vm2, %v821_v8  ;;  %v614_v16 = vsel %vm460_vm0, %v606_v10, 0.0  ;;  %576 = vst.msk [vmem:[%s1043_s24 + $0x14] sm:$0xf] %vm570_vm2, %v825_v17  ;;  %v589_v32 = vsel %vm460_vm0, %v527_v6, 0.0  ;;  %v612_v36 = vmul.f32 %v535_v3, %v535_v3 }
  0xec   : > { %v584_v18 = vadd.f32 %v583_v11, %v582_v12  ;;  %v615_v19 = vadd.f32 %v614_v16, %v613_v14  ;;  %v622_v37 = vsel %vm460_vm0, %v610_v27, 0.0  ;;  %v624_v40 = vsel %vm460_vm0, %v611_v30, 0.0 }
  0xed   : > { %v593_v41 = vsel %vm460_vm0, %v535_v3, 0.0  ;;  %v626_v44 = vsel %vm460_vm0, %v612_v36, 0.0 }
  0xee   : > { %v617_v23 = vadd.f32 %v616_v20, %v615_v19  ;;  %v586_v24 = vadd.f32 %v585_v21, %v584_v18 }
  0xf0   : > { %v588_v28 = vadd.f32 %v587_v26, %v586_v24  ;;  %v619_v29 = vadd.f32 %v618_v25, %v617_v23 }
  0xf2   : > { %v590_v33 = vadd.f32 %v589_v32, %v588_v28  ;;  %v621_v34 = vadd.f32 %v620_v31, %v619_v29 }
  0xf4   : > { %v592_v38 = vadd.f32 %v591_v35, %v590_v33  ;;  %v623_v39 = vadd.f32 %v622_v37, %v621_v34 }
  0xf6   : > { %v594_v42 = vadd.f32 %v593_v41, %v592_v38  ;;  %v625_v43 = vadd.f32 %v624_v40, %v623_v39 }
  0xf8   : > { %v595_v45 = vrot.slane %v594_v42, 4  ;;  %v627_v46 = vadd.f32 %v626_v44, %v625_v43 }
  0xfa   : > { %v596_v47 = vadd.f32 %v595_v45, %v594_v42  ;;  %v628_v48 = vrot.slane %v627_v46, 4 }
  0xfc   : > { %v597_v49 = vrot.slane %v596_v47, 2  ;;  %v629_v50 = vadd.f32 %v628_v48, %v627_v46 }
  0xfe   : > { %v598_v51 = vadd.f32 %v597_v49, %v596_v47  ;;  %v630_v52 = vrot.slane %v629_v50, 2 }
 0x100   : > { %v599_v53 = vrot.slane %v598_v51, 1  ;;  %v631_v54 = vadd.f32 %v630_v52, %v629_v50 }
 0x102   : > { %v600_v56 = vadd.f32 %v599_v53, %v598_v51  ;;  %v632_v57 = vrot.slane %v631_v54, 1 }
 0x104   : > { %v601_v59 = vadd.f32 %v600_v56, %v579_v55  ;;  %v633_v60 = vadd.f32 %v632_v57, %v631_v54 }
 0x106   : > { %603 = vst.msk [vmem:[%s1024_s18] sm:$0x1] %vm360_vm1, %v601_v59  ;;  %v634_v61 = vadd.f32 %v633_v60, %v604_v58 }
 0x108   : > { %635 = vst.msk [vmem:[%s1030_s21] sm:$0x1] %vm360_vm1, %v634_v61 }
 0x109 PF: > { %s18_s26 = sadd.s32 1, %s930_s26   ;;  %s1100_s24 = smov %s926_s25 }
 0x10a   : > { %p15_p5 = scmp.ge.s32.totalorder %s18_s26, 4   ;;  %s1101_s25 = smov %s1103_s27 }
 0x10c   :  { %17 = sbr.rel (!%p15_p5) target bundleno = 2 (0x2), region = 101 }

// kernel: tiny_pointnet_forward.16
= control target key start
LH: loop header
LB: loop body
LE: loop exit
PB: predicated region body
PF: predicated region fallthrough
CT: control target
= control target key end

     0   :  { %s942_s24 = smov 0   ;;  %s944_s25 = smov 0   ;;  %s1025_s0 = inlined_call_operand.vmem [shape: bf16[2,64,64], index: 0, kind: input, shape index: {}]   ;;  %s1026_s1 = inlined_call_operand.vmem [shape: bf16[64,128], index: 1, kind: input, shape index: {}]   ;;  %s1027_s2 = inlined_call_operand.vmem [shape: f32[1,128], index: 2, kind: input, shape index: {}]   ;;  %s1028_s3 = inlined_call_operand.vmem [shape: f32[1,64], index: 3, kind: input, shape index: {}]   ;;  %s1029_s4 = inlined_call_operand.vmem [shape: f32[1,64], index: 4, kind: input, shape index: {}]   ;;  %s1030_s5 = inlined_call_operand.vmem [shape: bf16[2,64,128], index: 5, kind: output, shape index: {0}]   ;;  %s1031_s6 = inlined_call_operand.vmem [shape: f32[2,1,128], index: 6, kind: output, shape index: {1}]   ;;  %s1032_s7 = inlined_call_operand.vmem [shape: f32[2,1,128], index: 7, kind: output, shape index: {2}]  }
   0x1   :  { %s946_s26 = smov 0  }
   0x2 LB: > { %s30_s27 = sadd.s32 1, %s895_s25  ;;  %p738_p0 = scmp.ge.s32.totalorder %s899_s26, 1  ;;  %s899_s26 = sphi %s946_s26, %s18_s26   ;;  %s895_s25 = sphi %s944_s25, %s1034_s25   ;;  %s891_s24 = sphi %s942_s24, %s1033_s24  }
   0x3   : > { %p32_p1 = scmp.ge.s32.totalorder %s30_s27, 2  ;;  %p263_p2 = scmp.lt.s32.totalorder %s899_s26, 3 }
   0x5   : > { %s1036_s27 = smov (%p32_p1, %s30_s27), 0  ;;  %p264_p3 = pnand %p738_p0, %p263_p2 }
   0x6   : > { %p310_p4 = scmp.lt.s32.totalorder (!%p264_p3), %s891_s24, 1 }
   0x7   : > { %267 = sbr.rel (%p264_p3) target bundleno = 261 (0x105), region = 40 }
   0xc   : > { %v873_v0 = vld [vmem:[%s1026_s1 + $0x18] sm:$0xff]   ;;  %v874_v1 = vld [vmem:[%s1026_s1 + $0x10] sm:$0xff]   ;;  %s1038_s24 = smov (!%p310_p4, %s891_s24), 1  ;;  %v875_v2 = vld [vmem:[%s1026_s1 + $0x8] sm:$0xff]   ;;  %vm439_vm0 = vcmask 523264   ;;  %v901_v46 = vmov 0.0  }
   0xd   : > { %824 = vmatprep.subr.bf16.mxu0 %v873_v0  ;;  %840 = vmatprep.subr.bf16.mxu1 %v873_v0  ;;  %s764_s11 = sshll.u32 %s1038_s24, 5  ;;  %v743_v3 = vld [vmem:[%s1028_s3] ss:$0 sm:$0xff]  ;;  %s994_s23 = scalar_lea.vmem %s1031_s6, %s1038_s24 }
   0xe   : > { %825 = vmatpush3.bf16.msra.mxu0 %v873_v0  ;;  %844 = vmatpush3.bf16.msra.mxu1 %v873_v0  ;;  %s317_s14 = scalar_lea.vmem %s1025_s0, %s764_s11  ;;  %v876_v12 = vld [vmem:[%s1026_s1] sm:$0xff]   ;;  %s1000_s30 = scalar_lea.vmem %s1032_s7, %s1038_s24  ;;  %340 = vst [vmem:[%s994_s23] sm:$0x1] %v901_v46 }
   0xf   : > { %826 = vmatprep.subr.bf16.mxu0 %v874_v1  ;;  %841 = vmatprep.subr.bf16.mxu1 %v874_v1  ;;  %v775_v4 = vld [vmem:[%s317_s14] sm:$0xff]   ;;  %v810_v5 = vld [vmem:[%s317_s14 + $0x8] sm:$0xff]   ;;  %v811_v6 = vld [vmem:[%s317_s14 + $0x10] sm:$0xff]   ;;  %341 = vst [vmem:[%s1000_s30] sm:$0x1] %v901_v46  ;;  %s327_s13 = scalar_lea.vmem %s1030_s5, %s764_s11 }
  0x10   : > { %v776_v7 = vunpack.c.l.bf16 %v775_v4  ;;  %v777_v8 = vunpack.c.h.bf16 %v775_v4  ;;  %v780_v9 = vunpack.c.l.bf16 %v810_v5  ;;  %v781_v10 = vunpack.c.h.bf16 %v810_v5  ;;  %v812_v11 = vld [vmem:[%s317_s14 + $0x18] sm:$0xff]   ;;  %v744_v13 = vld [vmem:[%s1029_s4] ss:$0 sm:$0xff] }
  0x11   : > { %v784_v14 = vunpack.c.l.bf16 %v811_v6  ;;  %v785_v15 = vunpack.c.h.bf16 %v811_v6  ;;  %v788_v16 = vunpack.c.l.bf16 %v812_v11  ;;  %v789_v17 = vunpack.c.h.bf16 %v812_v11  ;;  %v745_v48 = vld [vmem:[%s1027_s2] ss:$0 sm:$0xff] }
  0x12   : > { %827 = vmatpush3.bf16.msra.mxu0 %v874_v1  ;;  %845 = vmatpush3.bf16.msra.mxu1 %v874_v1  ;;  %v365_v18 = vmul.f32 %v776_v7, %v743_v3  ;;  %v366_v19 = vmul.f32 %v777_v8, %v743_v3  ;;  %v367_v20 = vmul.f32 %v780_v9, %v743_v3 }
  0x13   : > { %828 = vmatprep.subr.bf16.mxu0 %v875_v2  ;;  %842 = vmatprep.subr.bf16.mxu1 %v875_v2  ;;  %v368_v21 = vmul.f32 %v781_v10, %v743_v3  ;;  %v369_v22 = vmul.f32 %v784_v14, %v743_v3  ;;  %v370_v23 = vmul.f32 %v785_v15, %v743_v3 }
  0x14   : > { %v371_v24 = vmul.f32 %v788_v16, %v743_v3  ;;  %v372_v25 = vmul.f32 %v789_v17, %v743_v3  ;;  %v380_v26 = vadd.f32 %v744_v13, %v365_v18  ;;  %v381_v27 = vadd.f32 %v744_v13, %v366_v19 }
  0x15   : > { %v382_v28 = vadd.f32 %v744_v13, %v367_v20  ;;  %v383_v29 = vadd.f32 %v744_v13, %v368_v21  ;;  %v384_v30 = vadd.f32 %v744_v13, %v369_v22  ;;  %v385_v31 = vadd.f32 %v744_v13, %v370_v23 }
  0x16   : > { %829 = vmatpush3.bf16.msra.mxu0 %v875_v2  ;;  %846 = vmatpush3.bf16.msra.mxu1 %v875_v2  ;;  %v388_v32 = vmax.f32 %v380_v26, 0.0  ;;  %v389_v33 = vmax.f32 %v381_v27, 0.0  ;;  %v386_v35 = vadd.f32 %v744_v13, %v371_v24  ;;  %v387_v39 = vadd.f32 %v744_v13, %v372_v25 }
  0x17   : > { %830 = vmatprep.subr.bf16.mxu0 %v876_v12  ;;  %843 = vmatprep.subr.bf16.mxu1 %v876_v12  ;;  %v390_v34 = vmax.f32 %v382_v28, 0.0  ;;  %v391_v36 = vmax.f32 %v383_v29, 0.0  ;;  %v392_v37 = vmax.f32 %v384_v30, 0.0  ;;  %v393_v38 = vmax.f32 %v385_v31, 0.0 }
  0x18   : > { %v404_v40 = vpack.c.bf16 %v389_v33, %v388_v32  ;;  %v394_v41 = vmax.f32 %v386_v35, 0.0  ;;  %v395_v44 = vmax.f32 %v387_v39, 0.0  ;;  %v557_v35 = vld [vmem:[%s994_s23] sm:$0x1] }
  0x19   : > { %v405_v42 = vpack.c.bf16 %v391_v36, %v390_v34  ;;  %v406_v43 = vpack.c.bf16 %v393_v38, %v392_v37  ;;  %v573_v38 = vld [vmem:[%s1000_s30] sm:$0x1] }
  0x1a   : > { %831 = vmatpush3.bf16.msra.mxu0 %v876_v12  ;;  %847 = vmatpush3.bf16.msra.mxu1 %v876_v12  ;;  %v407_v45 = vpack.c.bf16 %v395_v44, %v394_v41 }
  0x1b   : > { %832 = vmatprep.mubr.msk.bf16.mxu0 %vm439_vm0, %v404_v40  ;;  %836 = vmatprep.mubr.msk.bf16.mxu1 %vm439_vm0, %v406_v43 }
  0x1d   : > { %833 = vmatmul.mubr.msk.bf16.vlgmr.msra.gmra.mxu0 %vm439_vm0, %v405_v42  ;;  %837 = vmatmul.mubr.msk.bf16.vlgmr.msra.gmra.mxu1 %vm439_vm0, %v407_v45 }
  0xdd   : > { %v834_v47 = vpop.f32.mrf.mxu0  ;;  %v838_v50 = vpop.f32.mrf.mxu1 }
  0xde   : > { %v495_v54 = vadd.f32 %v834_v47, %v745_v48  ;;  %v511_v56 = vadd.f32 %v838_v50, %v745_v48 }
  0xdf   : > { %v486_v49 = vpop.f32.mrf.mxu0  ;;  %v502_v53 = vpop.f32.mrf.mxu1 }
  0xe0   : > { %v487_v51 = vadd.f32 %v745_v48, %v486_v49  ;;  %v503_v60 = vadd.f32 %v745_v48, %v502_v53  ;;  %v576_v6 = vmul.f32 %v495_v54, %v495_v54  ;;  %v580_v19 = vmul.f32 %v511_v56, %v511_v56 }
  0xe1   : > { %v835_v52 = vpop.f32.mrf.mxu0  ;;  %v839_v58 = vpop.f32.mrf.mxu1 }
  0xe2   : > { %v498_v55 = vadd.f32 %v835_v52, %v745_v48  ;;  %v574_v62 = vmul.f32 %v487_v51, %v487_v51  ;;  %v514_v63 = vadd.f32 %v839_v58, %v745_v48  ;;  %v578_v13 = vmul.f32 %v503_v60, %v503_v60 }
  0xe3   : > { %v489_v57 = vpop.f32.mrf.mxu0  ;;  %v505_v0 = vpop.f32.mrf.mxu1 }
  0xe4   : > { %v798_v59 = vpack.c.bf16 %v498_v55, %v495_v54  ;;  %v490_v61 = vadd.f32 %v745_v48, %v489_v57  ;;  %v506_v4 = vadd.f32 %v745_v48, %v505_v0  ;;  %v808_v5 = vpack.c.bf16 %v514_v63, %v511_v56 }
  0xe5   : > { %v577_v10 = vmul.f32 %v498_v55, %v498_v55  ;;  %v581_v22 = vmul.f32 %v514_v63, %v514_v63 }
  0xe6   : > { %813 = vst [vmem:[%s327_s13 + $0x8] sm:$0xff] %v798_v59   ;;  %v793_v1 = vpack.c.bf16 %v490_v61, %v487_v51  ;;  %v558_v2 = vadd.f32 %v490_v61, %v487_v51  ;;  %v575_v3 = vmul.f32 %v490_v61, %v490_v61  ;;  %v803_v9 = vpack.c.bf16 %v506_v4, %v503_v60 }
  0xe7   : > { %815 = vst [vmem:[%s327_s13 + $0x18] sm:$0xff] %v808_v5   ;;  %v579_v17 = vmul.f32 %v506_v4, %v506_v4 }
  0xe8   : > { %794 = vst [vmem:[%s327_s13] sm:$0xff] %v793_v1   ;;  %v559_v7 = vadd.f32 %v558_v2, %v495_v54  ;;  %v582_v8 = vadd.f32 %v575_v3, %v574_v62  ;;  %814 = vst [vmem:[%s327_s13 + $0x10] sm:$0xff] %v803_v9  }
  0xea   : > { %v583_v11 = vadd.f32 %v582_v8, %v576_v6  ;;  %v560_v12 = vadd.f32 %v559_v7, %v498_v55 }
  0xec   : > { %v561_v14 = vadd.f32 %v560_v12, %v503_v60  ;;  %v584_v15 = vadd.f32 %v583_v11, %v577_v10 }
  0xee   : > { %v562_v16 = vadd.f32 %v561_v14, %v506_v4  ;;  %v585_v18 = vadd.f32 %v584_v15, %v578_v13 }
  0xf0   : > { %v563_v20 = vadd.f32 %v562_v16, %v511_v56  ;;  %v586_v21 = vadd.f32 %v585_v18, %v579_v17 }
  0xf2   : > { %v564_v23 = vadd.f32 %v563_v20, %v514_v63  ;;  %v587_v24 = vadd.f32 %v586_v21, %v580_v19 }
  0xf4   : > { %v565_v25 = vrot.slane %v564_v23, 4  ;;  %v588_v26 = vadd.f32 %v587_v24, %v581_v22 }
  0xf6   : > { %v566_v27 = vadd.f32 %v565_v25, %v564_v23  ;;  %v589_v28 = vrot.slane %v588_v26, 4 }
  0xf8   : > { %v567_v29 = vrot.slane %v566_v27, 2  ;;  %v590_v30 = vadd.f32 %v589_v28, %v588_v26 }
  0xfa   : > { %v568_v31 = vadd.f32 %v567_v29, %v566_v27  ;;  %v591_v32 = vrot.slane %v590_v30, 2 }
  0xfc   : > { %v569_v33 = vrot.slane %v568_v31, 1  ;;  %v592_v34 = vadd.f32 %v591_v32, %v590_v30 }
  0xfe   : > { %v570_v36 = vadd.f32 %v569_v33, %v568_v31  ;;  %v593_v37 = vrot.slane %v592_v34, 1 }
 0x100   : > { %v571_v39 = vadd.f32 %v570_v36, %v557_v35  ;;  %v594_v40 = vadd.f32 %v593_v37, %v592_v34 }
 0x102   : > { %572 = vst [vmem:[%s994_s23] sm:$0x1] %v571_v39  ;;  %v595_v41 = vadd.f32 %v594_v40, %v573_v38 }
 0x104   : > { %596 = vst [vmem:[%s1000_s30] sm:$0x1] %v595_v41 }
 0x105 PF: > { %s18_s26 = sadd.s32 1, %s899_s26   ;;  %s1033_s24 = smov %s895_s25 }
 0x106   : > { %p15_p5 = scmp.ge.s32.totalorder %s18_s26, 4   ;;  %s1034_s25 = smov %s1036_s27 }
 0x108   :  { %17 = sbr.rel (!%p15_p5) target bundleno = 2 (0x2), region = 98 }

// kernel: tiny_pointnet_forward.17
= control target key start
LH: loop header
LB: loop body
LE: loop exit
PB: predicated region body
PF: predicated region fallthrough
CT: control target
= control target key end

     0   :  { %s1177_s27 = smov 0   ;;  %s1179_s28 = smov 0   ;;  %s1377_s0 = inlined_call_operand.vmem [shape: bf16[2,64,128], index: 0, kind: input, shape index: {}]   ;;  %s1378_s1 = inlined_call_operand.vmem [shape: bf16[128,256], index: 1, kind: input, shape index: {}]   ;;  %s1379_s2 = inlined_call_operand.vmem [shape: f32[1,256], index: 2, kind: input, shape index: {}]   ;;  %s1380_s3 = inlined_call_operand.vmem [shape: f32[1,128], index: 3, kind: input, shape index: {}]   ;;  %s1381_s4 = inlined_call_operand.vmem [shape: f32[1,128], index: 4, kind: input, shape index: {}]   ;;  %s1382_s5 = inlined_call_operand.vmem [shape: f32[2,1,256], index: 5, kind: output, shape index: {0}]   ;;  %s1383_s6 = inlined_call_operand.vmem [shape: f32[2,1,256], index: 6, kind: output, shape index: {1}]   ;;  %s1384_s7 = inlined_call_operand.vmem [shape: f32[2,1,256], index: 7, kind: output, shape index: {2}]   ;;  %s1385_s8 = inlined_call_operand.vmem [shape: f32[2,1,256], index: 8, kind: output, shape index: {3}]  }
   0x1   :  { %s1181_s29 = smov 0  }
   0x2 LB: > { %s31_s30 = sadd.s32 1, %s1121_s28  ;;  %p987_p0 = scmp.ge.s32.totalorder %s1125_s29, 1  ;;  %s1125_s29 = sphi %s1181_s29, %s19_s29   ;;  %s1121_s28 = sphi %s1179_s28, %s1389_s28   ;;  %s1117_s27 = sphi %s1177_s27, %s1388_s27  }
   0x3   : > { %p33_p1 = scmp.ge.s32.totalorder %s31_s30, 2  ;;  %p288_p2 = scmp.lt.s32.totalorder %s1125_s29, 3 }
   0x5   : > { %s1391_s30 = smov (%p33_p1, %s31_s30), 0  ;;  %p289_p3 = pnand %p987_p0, %p288_p2 }
   0x6   : > { %p338_p4 = scmp.lt.s32.totalorder (!%p289_p3), %s1117_s27, 1 }
   0x7   : > { %292 = sbr.rel (%p289_p3) target bundleno = 292 (0x124), region = 40 }
   0xc   : > { %v1079_v0 = vld [vmem:[%s1378_s1 + $0x74] ss:$8 sps:$4 sm:$0xff]   ;;  %v1081_v1 = vld [vmem:[%s1378_s1 + $0x70] ss:$8 sps:$4 sm:$0xff]   ;;  %v1127_v2 = vmov 0   ;;  %s1393_s27 = smov (!%p338_p4, %s1117_s27), 1  ;;  %v368_v4 = vlaneseq }
   0xd   : > { %574 = vmatprep.mubr.bf16.mxu0 %v1127_v2  ;;  %594 = vmatprep.mubr.bf16.mxu1 %v1127_v2  ;;  %v1082_v3 = vld [vmem:[%s1378_s1 + $0x64] ss:$8 sps:$4 sm:$0xff]   ;;  %v1084_v5 = vld [vmem:[%s1378_s1 + $0x60] ss:$8 sps:$4 sm:$0xff]   ;;  %v1085_v6 = vld [vmem:[%s1378_s1 + $0x54] ss:$8 sps:$4 sm:$0xff]  }
   0xe   : > { %542 = vmatprep.subr.bf16.mxu0 %v1079_v0  ;;  %1034 = vmatprep.subr.bf16.mxu1 %v1079_v0  ;;  %s1014_s19 = sshll.u32 %s1393_s27, 5  ;;  %s990_s20 = sshll.u32 %s1393_s27, 1  ;;  %vm1213_vm0 = vcmp.lt.s32.totalorder %v368_v4, 256  ;;  %v1128_v8 = vmov 0.0   ;;  %v1087_v9 = vld [vmem:[%s1378_s1 + $0x50] ss:$8 sps:$4 sm:$0xff]  }
   0xf   : > { %543 = vmatpush1.bf16.msra.mxu0 %v1081_v1  ;;  %1042 = vmatpush1.bf16.msra.mxu1 %v1081_v1  ;;  %s1220_s23 = scalar_lea.vmem %s1382_s5, %s990_s20  ;;  %s1225_s26 = scalar_lea.vmem %s1383_s6, %s990_s20  ;;  %v1129_v10 = vmov -inf   ;;  %v1088_v11 = vld [vmem:[%s1378_s1 + $0x44] ss:$8 sps:$4 sm:$0xff]   ;;  %v1130_v12 = vmov inf   ;;  %v1090_v14 = vld [vmem:[%s1378_s1 + $0x40] ss:$8 sps:$4 sm:$0xff]  }
  0x10   : > { %544 = vmatprep.subr.bf16.mxu0 %v1082_v3  ;;  %1035 = vmatprep.subr.bf16.mxu1 %v1082_v3  ;;  %s1230_s27 = scalar_lea.vmem %s1384_s7, %s990_s20  ;;  %372 = vst.msk [vmem:[%s1220_s23] sm:$0x3] %vm1213_vm0, %v1128_v8  ;;  %s1241_s15 = scalar_lea.vmem %s1377_s0, %s1014_s19  ;;  %373 = vst.msk [vmem:[%s1225_s26] sm:$0x3] %vm1213_vm0, %v1128_v8  ;;  %v1091_v16 = vld [vmem:[%s1378_s1 + $0x34] ss:$8 sps:$4 sm:$0xff]  }
  0x11   : > { %s1246_s18 = scalar_lea.vmem %s1385_s8, %s990_s20  ;;  %374 = vst.msk [vmem:[%s1230_s27] sm:$0x3] %vm1213_vm0, %v1129_v10  ;;  %v1016_v13 = vld [vmem:[%s1241_s15] sm:$0xff]   ;;  %v1032_v15 = vld [vmem:[%s1241_s15 + $0x10] sm:$0xff]   ;;  %v1031_v29 = vld [vmem:[%s1241_s15 + $0x8] sm:$0xff]   ;;  %v1300_v0 = vshrl.u32 %v368_v4, 7 }
  0x12   : > { %375 = vst.msk [vmem:[%s1246_s18] sm:$0x3] %vm1213_vm0, %v1130_v12  ;;  %v1017_v17 = vunpack.c.l.bf16 %v1016_v13  ;;  %v1018_v18 = vunpack.c.h.bf16 %v1016_v13  ;;  %v994_v19 = vld [vmem:[%s1380_s3] ss:$0 sm:$0xff]  ;;  %v1025_v20 = vunpack.c.l.bf16 %v1032_v15  ;;  %v1026_v21 = vunpack.c.h.bf16 %v1032_v15  ;;  %v1093_v22 = vld [vmem:[%s1378_s1 + $0x30] ss:$8 sps:$4 sm:$0xff]  }
  0x13   : > { %545 = vmatpush1.bf16.msra.mxu0 %v1084_v5  ;;  %1043 = vmatpush1.bf16.msra.mxu1 %v1084_v5  ;;  %v1094_v23 = vld [vmem:[%s1378_s1 + $0x24] ss:$8 sps:$4 sm:$0xff]   ;;  %v995_v26 = vld [vmem:[%s1381_s4] ss:$0 sm:$0xff]  ;;  %v1033_v31 = vld [vmem:[%s1241_s15 + $0x18] sm:$0xff]   ;;  %v1021_v35 = vunpack.c.l.bf16 %v1031_v29  ;;  %v1022_v36 = vunpack.c.h.bf16 %v1031_v29  ;;  %v454_v1 = vsub.s32 0, %v1300_v0 }
  0x14   : > { %546 = vmatprep.subr.bf16.mxu0 %v1085_v6  ;;  %1036 = vmatprep.subr.bf16.mxu1 %v1085_v6  ;;  %v399_v24 = vmul.f32 %v1017_v17, %v994_v19  ;;  %v400_v25 = vmul.f32 %v1018_v18, %v994_v19  ;;  %v403_v27 = vmul.f32 %v1025_v20, %v994_v19  ;;  %v1096_v30 = vld [vmem:[%s1378_s1 + $0x20] ss:$8 sps:$4 sm:$0xff]   ;;  %v1097_v32 = vld [vmem:[%s1378_s1 + $0x14] ss:$8 sps:$4 sm:$0xff]   ;;  %v1029_v39 = vunpack.c.l.bf16 %v1033_v31  ;;  %v1099_v41 = vld [vmem:[%s1378_s1 + $0x10] ss:$8 sps:$4 sm:$0xff]  }
  0x15   : > { %v404_v28 = vmul.f32 %v1026_v21, %v994_v19  ;;  %v1030_v40 = vunpack.c.h.bf16 %v1033_v31  ;;  %v1100_v42 = vld [vmem:[%s1378_s1 + $0x4] ss:$8 sps:$4 sm:$0xff]   ;;  %v401_v45 = vmul.f32 %v1021_v35, %v994_v19  ;;  %v402_v46 = vmul.f32 %v1022_v36, %v994_v19  ;;  %v1102_v51 = vld [vmem:[%s1378_s1] ss:$8 sps:$4 sm:$0xff]  }
  0x16   : > { %v414_v33 = vadd.f32 %v995_v26, %v399_v24  ;;  %v415_v34 = vadd.f32 %v995_v26, %v400_v25  ;;  %v418_v37 = vadd.f32 %v995_v26, %v403_v27  ;;  %v405_v49 = vmul.f32 %v1029_v39, %v994_v19  ;;  %v450_v3 = vld [vmem:[%s1379_s2] sm:$0x3] }
  0x17   : > { %547 = vmatpush1.bf16.msra.mxu0 %v1087_v9  ;;  %1044 = vmatpush1.bf16.msra.mxu1 %v1087_v9  ;;  %v419_v38 = vadd.f32 %v995_v26, %v404_v28  ;;  %v406_v50 = vmul.f32 %v1030_v40, %v994_v19  ;;  %v416_v52 = vadd.f32 %v995_v26, %v401_v45  ;;  %v458_v5 = vsub.s32 1, %v1300_v0 }
  0x18   : > { %548 = vmatprep.subr.bf16.mxu0 %v1088_v11  ;;  %1037 = vmatprep.subr.bf16.mxu1 %v1088_v11  ;;  %v422_v43 = vmax.f32 %v414_v33, 0.0  ;;  %v423_v44 = vmax.f32 %v415_v34, 0.0  ;;  %v426_v47 = vmax.f32 %v418_v37, 0.0  ;;  %v417_v53 = vadd.f32 %v995_v26, %v402_v46 }
  0x19   : > { %v427_v48 = vmax.f32 %v419_v38, 0.0  ;;  %v420_v56 = vadd.f32 %v995_v26, %v405_v49  ;;  %v421_v57 = vadd.f32 %v995_v26, %v406_v50  ;;  %v424_v58 = vmax.f32 %v416_v52, 0.0 }
  0x1a   : > { %v430_v54 = vpack.c.bf16 %v423_v44, %v422_v43  ;;  %v425_v59 = vmax.f32 %v417_v53, 0.0  ;;  %v455_v6 = vrot.slane %v450_v3, %v454_v1  ;;  %v1307_v9 = vrot.slane %v450_v3, %v458_v5 }
  0x1b   : > { %549 = vmatpush1.bf16.msra.mxu0 %v1090_v14  ;;  %1045 = vmatpush1.bf16.msra.mxu1 %v1090_v14  ;;  %v432_v55 = vpack.c.bf16 %v427_v48, %v426_v47  ;;  %v428_v60 = vmax.f32 %v420_v56, 0.0  ;;  %v429_v61 = vmax.f32 %v421_v57, 0.0 }
  0x1c   : > { %550 = vmatprep.subr.bf16.mxu0 %v1091_v16  ;;  %1038 = vmatprep.subr.bf16.mxu1 %v1091_v16  ;;  %v431_v62 = vpack.c.bf16 %v425_v59, %v424_v58 }
  0x1d   : > { %v433_v63 = vpack.c.bf16 %v429_v61, %v428_v60 }
  0x1f   : > { %551 = vmatpush1.bf16.msra.mxu0 %v1093_v22  ;;  %1046 = vmatpush1.bf16.msra.mxu1 %v1093_v22 }
  0x20   : > { %552 = vmatprep.subr.bf16.mxu0 %v1094_v23  ;;  %1039 = vmatprep.subr.bf16.mxu1 %v1094_v23 }
  0x23   : > { %553 = vmatpush1.bf16.msra.mxu0 %v1096_v30  ;;  %1047 = vmatpush1.bf16.msra.mxu1 %v1096_v30 }
  0x24   : > { %554 = vmatprep.subr.bf16.mxu0 %v1097_v32  ;;  %1040 = vmatprep.subr.bf16.mxu1 %v1097_v32 }
  0x27   : > { %555 = vmatpush1.bf16.msra.mxu0 %v1099_v41  ;;  %1048 = vmatpush1.bf16.msra.mxu1 %v1099_v41 }
  0x28   : > { %556 = vmatprep.subr.bf16.mxu0 %v1100_v42  ;;  %1041 = vmatprep.subr.bf16.mxu1 %v1100_v42 }
  0x2b   : > { %557 = vmatpush1.bf16.msra.mxu0 %v1102_v51  ;;  %1049 = vmatpush1.bf16.msra.mxu1 %v1102_v51 }
  0x2e   : > { %575 = vmatmul.mubr.bf16.vlgmr.msra.gmra.mxu0 %v430_v54  ;;  %595 = vmatmul.mubr.bf16.vlgmr.msra.gmra.mxu1 %v432_v55 }
  0x2f   : > { %584 = vmatprep.mubr.bf16.mxu0 %v1127_v2  ;;  %604 = vmatprep.mubr.bf16.mxu1 %v1127_v2 }
  0x36   : > { %585 = vmatmul.mubr.bf16.gmra.mxu0 %v431_v62  ;;  %605 = vmatmul.mubr.bf16.gmra.mxu1 %v433_v63 }
  0xee   : > { %v576_v8 = vpop.f32.mrf.mxu0  ;;  %v596_v2 = vpop.f32.mrf.mxu1 }
  0xef   : > { %v577_v12 = vadd.f32 %v576_v8, %v455_v6  ;;  %v597_v4 = vadd.f32 %v596_v2, %v455_v6 }
  0xf0   : > { %v578_v10 = vpop.f32.mrf.mxu0  ;;  %v598_v11 = vpop.f32.mrf.mxu1 }
  0xf1   : > { %v579_v13 = vadd.f32 %v578_v10, %v1307_v9  ;;  %v1311_v15 = vadd.f32 %v598_v11, %v1307_v9  ;;  %v667_v21 = vmul.f32 %v577_v12, %v577_v12  ;;  %v675_v25 = vmul.f32 %v597_v4, %v597_v4 }
  0xf2   : > { %v580_v14 = vpop.f32.mrf.mxu0  ;;  %v600_v16 = vpop.f32.mrf.mxu1 }
  0xf3   : > { %v581_v17 = vadd.f32 %v580_v14, %v455_v6  ;;  %v601_v18 = vadd.f32 %v600_v16, %v455_v6  ;;  %v668_v24 = vmul.f32 %v579_v13, %v579_v13  ;;  %v1318_v26 = vmul.f32 %v1311_v15, %v1311_v15 }
  0xf4   : > { %v582_v19 = vpop.f32.mrf.mxu0  ;;  %v602_v20 = vpop.f32.mrf.mxu1 }
  0xf5   : > { %v669_v22 = vmul.f32 %v581_v17, %v581_v17  ;;  %v1314_v23 = vadd.f32 %v582_v19, %v1307_v9  ;;  %v1321_v28 = vadd.f32 %v602_v20, %v1307_v9  ;;  %v616_v30 = vadd.f32 %v581_v17, %v577_v12 }
  0xf6   : > { %v586_v27 = vpop.f32.mrf.mxu0  ;;  %v606_v29 = vpop.f32.mrf.mxu1  ;;  %v677_v32 = vmul.f32 %v601_v18, %v601_v18 }
  0xf7   : > { %v670_v31 = vmul.f32 %v1314_v23, %v1314_v23  ;;  %v587_v33 = vadd.f32 %v586_v27, %v455_v6  ;;  %v683_v34 = vadd.f32 %v669_v22, %v667_v21  ;;  %v629_v35 = vadd.f32 %v1314_v23, %v579_v13 }
  0xf8   : > { %v1328_v36 = vmul.f32 %v1321_v28, %v1321_v28  ;;  %v588_v37 = vpop.f32.mrf.mxu0  ;;  %v607_v38 = vadd.f32 %v606_v29, %v455_v6  ;;  %v608_v39 = vpop.f32.mrf.mxu1 }
  0xf9   : > { %v696_v40 = vadd.f32 %v670_v31, %v668_v24  ;;  %v617_v41 = vadd.f32 %v616_v30, %v587_v33  ;;  %v671_v42 = vmul.f32 %v587_v33, %v587_v33  ;;  %v730_v43 = vmax.f32 %v577_v12, %v587_v33 }
  0xfa   : > { %v777_v44 = vmin.f32 %v577_v12, %v587_v33  ;;  %v589_v45 = vadd.f32 %v588_v37, %v1307_v9  ;;  %v679_v46 = vmul.f32 %v607_v38, %v607_v38  ;;  %v590_v47 = vpop.f32.mrf.mxu0  ;;  %v1332_v48 = vadd.f32 %v608_v39, %v1307_v9  ;;  %v610_v49 = vpop.f32.mrf.mxu1 }
  0xfb   : > { %v684_v50 = vadd.f32 %v683_v34, %v671_v42  ;;  %v732_v51 = vmax.f32 %v730_v43, %v597_v4  ;;  %v591_v52 = vadd.f32 %v590_v47, %v455_v6  ;;  %v611_v53 = vadd.f32 %v610_v49, %v455_v6 }
  0xfc   : > { %v630_v54 = vadd.f32 %v629_v35, %v589_v45  ;;  %v672_v55 = vmul.f32 %v589_v45, %v589_v45  ;;  %v743_v56 = vmax.f32 %v579_v13, %v589_v45  ;;  %v790_v57 = vmin.f32 %v579_v13, %v589_v45  ;;  %v592_v62 = vpop.f32.mrf.mxu0 }
  0xfd   : > { %v734_v58 = vmax.f32 %v732_v51, %v607_v38  ;;  %v779_v59 = vmin.f32 %v777_v44, %v597_v4  ;;  %v618_v60 = vadd.f32 %v617_v41, %v591_v52  ;;  %v673_v61 = vmul.f32 %v591_v52, %v591_v52 }
  0xfe   : > { %v697_v63 = vadd.f32 %v696_v40, %v672_v55  ;;  %v731_v1 = vmax.f32 %v581_v17, %v591_v52  ;;  %v778_v3 = vmin.f32 %v581_v17, %v591_v52  ;;  %v680_v5 = vmul.f32 %v1332_v48, %v1332_v48  ;;  %v612_v17 = vpop.f32.mrf.mxu1 }
  0xff   : > { %v781_v8 = vmin.f32 %v779_v59, %v607_v38  ;;  %v619_v2 = vadd.f32 %v618_v60, %v597_v4  ;;  %v685_v10 = vadd.f32 %v684_v50, %v673_v61  ;;  %v745_v6 = vmax.f32 %v743_v56, %v1311_v15 }
 0x100   : > { %v792_v11 = vmin.f32 %v790_v57, %v1311_v15  ;;  %v593_v12 = vadd.f32 %v592_v62, %v1307_v9  ;;  %v681_v13 = vmul.f32 %v611_v53, %v611_v53  ;;  %v733_v14 = vmax.f32 %v731_v1, %v601_v18 }
 0x101   : > { %v686_v16 = vadd.f32 %v685_v10, %v675_v25  ;;  %v747_v19 = vmax.f32 %v745_v6, %v1332_v48  ;;  %v620_v20 = vadd.f32 %v619_v2, %v601_v18  ;;  %v780_v21 = vmin.f32 %v778_v3, %v601_v18 }
 0x102   : > { %v794_v22 = vmin.f32 %v792_v11, %v1332_v48  ;;  %v631_v24 = vadd.f32 %v630_v54, %v593_v12  ;;  %v674_v27 = vmul.f32 %v593_v12, %v593_v12  ;;  %v744_v4 = vmax.f32 %v1314_v23, %v593_v12 }
 0x103   : > { %v791_v29 = vmin.f32 %v1314_v23, %v593_v12  ;;  %v621_v30 = vadd.f32 %v620_v20, %v607_v38  ;;  %v687_v31 = vadd.f32 %v686_v16, %v677_v32  ;;  %v735_v33 = vmax.f32 %v733_v14, %v611_v53 }
 0x104   : > { %v632_v34 = vadd.f32 %v631_v24, %v1311_v15  ;;  %v698_v35 = vadd.f32 %v697_v63, %v674_v27  ;;  %v782_v25 = vmin.f32 %v780_v21, %v611_v53  ;;  %v613_v37 = vadd.f32 %v612_v17, %v1307_v9 }
 0x105   : > { %v622_v39 = vadd.f32 %v621_v30, %v611_v53  ;;  %v688_v18 = vadd.f32 %v687_v31, %v679_v46  ;;  %v736_v40 = vmax.f32 %v734_v58, %v735_v33  ;;  %v746_v41 = vmax.f32 %v744_v4, %v1321_v28 }
 0x106   : > { %v699_v42 = vadd.f32 %v698_v35, %v1318_v26  ;;  %v783_v43 = vmin.f32 %v781_v8, %v782_v25  ;;  %v633_v44 = vadd.f32 %v632_v34, %v1321_v28  ;;  %v682_v23 = vmul.f32 %v613_v37, %v613_v37 }
 0x107   : > { %v623_v38 = vrot.slane %v622_v39, 4  ;;  %v689_v32 = vadd.f32 %v688_v18, %v681_v13  ;;  %v737_v45 = vrot.slane %v736_v40, 4  ;;  %v748_v47 = vmax.f32 %v746_v41, %v613_v37 }
 0x108   : > { %v784_v15 = vrot.slane %v783_v43, 4  ;;  %v634_v49 = vadd.f32 %v633_v44, %v1332_v48  ;;  %v700_v9 = vadd.f32 %v699_v42, %v1328_v36  ;;  %v793_v46 = vmin.f32 %v791_v29, %v1321_v28 }
 0x109   : > { %v624_v50 = vadd.f32 %v623_v38, %v622_v39  ;;  %v690_v51 = vrot.slane %v689_v32, 4  ;;  %v738_v52 = vmax.f32 %v736_v40, %v737_v45  ;;  %v749_v53 = vmax.f32 %v747_v19, %v748_v47 }
 0x10a   : > { %v785_v26 = vmin.f32 %v783_v43, %v784_v15  ;;  %v635_v54 = vadd.f32 %v634_v49, %v613_v37  ;;  %v701_v55 = vadd.f32 %v700_v9, %v680_v5  ;;  %v795_v56 = vmin.f32 %v793_v46, %v613_v37  ;;  %v729_v49 = vld [vmem:[%s1230_s27] sm:$0x3] }
 0x10b   : > { %v625_v57 = vrot.slane %v624_v50, 2  ;;  %v691_v58 = vadd.f32 %v690_v51, %v689_v32  ;;  %v739_v59 = vrot.slane %v738_v52, 2  ;;  %v750_v60 = vrot.slane %v749_v53, 4  ;;  %v615_v46 = vld [vmem:[%s1220_s23] sm:$0x3] }
 0x10c   : > { %v786_v61 = vrot.slane %v785_v26, 2  ;;  %v636_v62 = vrot.slane %v635_v54, 4  ;;  %v702_v63 = vadd.f32 %v701_v55, %v682_v23  ;;  %v796_v48 = vmin.f32 %v794_v22, %v795_v56  ;;  %v776_v55 = vld [vmem:[%s1246_s18] sm:$0x3] }
 0x10d   : > { %v1131_v1 = vmov 1966171168   ;;  %v692_v3 = vrot.slane %v691_v58, 2  ;;  %v740_v28 = vmax.f32 %v738_v52, %v739_v59  ;;  %v751_v8 = vmax.f32 %v749_v53, %v750_v60 }
 0x10e   : > { %v646_v36 = vunpack.c.l.s4 %v1131_v1  ;;  %v626_v2 = vadd.f32 %v625_v57, %v624_v50  ;;  %v637_v10 = vadd.f32 %v636_v62, %v635_v54  ;;  %v703_v6 = vrot.slane %v702_v63, 4 }
 0x10f   : > { %v797_v11 = vrot.slane %v796_v48, 4  ;;  %v787_v12 = vmin.f32 %v785_v26, %v786_v61  ;;  %v752_v5 = vrot.slane %v751_v8, 2  ;;  %v693_v13 = vadd.f32 %v692_v3, %v691_v58  ;;  %v666_v26 = vld [vmem:[%s1225_s26] sm:$0x3] }
 0x110   : > { %v638_v14 = vrot.slane %v637_v10, 2  ;;  %v704_v16 = vadd.f32 %v703_v6, %v702_v63  ;;  %v647_v20 = vunpack.c.0.s8 %v646_v36  ;;  %v741_v21 = vrot.slane %v740_v28, 1 }
 0x111   : > { %v798_v19 = vmin.f32 %v796_v48, %v797_v11  ;;  %v753_v17 = vmax.f32 %v751_v8, %v752_v5  ;;  %v627_v24 = vrot.slane %v626_v2, 1  ;;  %v788_v29 = vrot.slane %v787_v12, 1 }
 0x112   : > { %v639_v22 = vadd.f32 %v638_v14, %v637_v10  ;;  %v705_v27 = vrot.slane %v704_v16, 2  ;;  %v694_v31 = vrot.slane %v693_v13, 1  ;;  %v650_v25 = vsub.s32 %v647_v20, %v1300_v0 }
 0x113   : > { %v799_v4 = vrot.slane %v798_v19, 2  ;;  %v754_v30 = vrot.slane %v753_v17, 1  ;;  %v742_v37 = vmax.f32 %v740_v28, %v741_v21  ;;  %v628_v18 = vadd.f32 %v627_v24, %v626_v2 }
 0x114   : > { %v640_v33 = vrot.slane %v639_v22, 1  ;;  %v706_v34 = vadd.f32 %v705_v27, %v704_v16  ;;  %v789_v43 = vmin.f32 %v787_v12, %v788_v29  ;;  %v695_v23 = vadd.f32 %v694_v31, %v693_v13 }
 0x115   : > { %v800_v35 = vmin.f32 %v798_v19, %v799_v4  ;;  %v755_v39 = vmax.f32 %v753_v17, %v754_v30 }
 0x116   : > { %v641_v40 = vadd.f32 %v640_v33, %v639_v22  ;;  %v707_v41 = vrot.slane %v706_v34, 1 }
 0x117   : > { %v801_v42 = vrot.slane %v800_v35, 1  ;;  %v758_v44 = vcombine.low %v742_v37, %v755_v39 }
 0x118   : > { %v644_v38 = vcombine.low %v628_v18, %v641_v40  ;;  %v708_v32 = vadd.f32 %v707_v41, %v706_v34 }
 0x119   : > { %v802_v45 = vmin.f32 %v800_v35, %v801_v42  ;;  %v765_v47 = vrot.slane %v758_v44, %v650_v25 }
 0x11a   : > { %v651_v15 = vrot.slane %v644_v38, %v650_v25  ;;  %v711_v0 = vcombine.low %v695_v23, %v708_v32 }
 0x11b   : > { %v805_v9 = vcombine.low %v789_v43, %v802_v45  ;;  %v772_v50 = vrot.slane %v765_v47, %v650_v25 }
 0x11c   : > { %v658_v51 = vrot.slane %v651_v15, %v650_v25  ;;  %v718_v52 = vrot.slane %v711_v0, %v650_v25 }
 0x11d   : > { %v812_v53 = vrot.slane %v805_v9, %v650_v25  ;;  %v774_v54 = vmax.f32 %v729_v49, %v772_v50 }
 0x11e   : > { %v660_v56 = vadd.f32 %v658_v51, %v615_v46  ;;  %v725_v57 = vrot.slane %v718_v52, %v650_v25 }
 0x11f   : > { %v819_v58 = vrot.slane %v812_v53, %v650_v25  ;;  %775 = vst.msk [vmem:[%s1230_s27] sm:$0x3] %vm1213_vm0, %v774_v54 }
 0x120   : > { %665 = vst.msk [vmem:[%s1220_s23] sm:$0x3] %vm1213_vm0, %v660_v56  ;;  %v727_v59 = vadd.f32 %v725_v57, %v666_v26 }
 0x121   : > { %v821_v60 = vmin.f32 %v776_v55, %v819_v58 }
 0x122   : > { %728 = vst.msk [vmem:[%s1225_s26] sm:$0x3] %vm1213_vm0, %v727_v59 }
 0x123   : > { %822 = vst.msk [vmem:[%s1246_s18] sm:$0x3] %vm1213_vm0, %v821_v60 }
 0x124 PF: > { %s19_s29 = sadd.s32 1, %s1125_s29   ;;  %s1388_s27 = smov %s1121_s28 }
 0x125   : > { %p16_p5 = scmp.ge.s32.totalorder %s19_s29, 4   ;;  %s1389_s28 = smov %s1391_s30 }
 0x127   :  { %18 = sbr.rel (!%p16_p5) target bundleno = 2 (0x2), region = 110 }

// kernel: tiny_pointnet_forward.14
= control target key start
LH: loop header
LB: loop body
LE: loop exit
PB: predicated region body
PF: predicated region fallthrough
CT: control target
= control target key end

     0   :  { %v8087_v36 = vmov 1983009808   ;;  %v46_v38 = vlaneseq  ;;  %vm1978_vm0 = vcmask 1041408   ;;  %s10983_s1 = inlined_call_operand.vmem [shape: bf16[1024,512], index: 1, kind: input, shape index: {}]   ;;  %s10984_s0 = inlined_call_operand.vmem [shape: f32[2,1024], index: 0, kind: input, shape index: {}]   ;;  %s10985_s5 = inlined_call_operand.vmem [shape: bf16[512,256], index: 5, kind: input, shape index: {}]   ;;  %s10986_s2 = inlined_call_operand.vmem [shape: f32[1,512], index: 2, kind: input, shape index: {}]   ;;  %s10987_s3 = inlined_call_operand.vmem [shape: f32[1,512], index: 3, kind: input, shape index: {}]   ;;  %s10988_s4 = inlined_call_operand.vmem [shape: f32[1,512], index: 4, kind: input, shape index: {}]   ;;  %s10989_s9 = inlined_call_operand.vmem [shape: bf16[256,4096], index: 9, kind: input, shape index: {}]   ;;  %s10990_s6 = inlined_call_operand.vmem [shape: f32[1,256], index: 6, kind: input, shape index: {}]   ;;  %s10991_s7 = inlined_call_operand.vmem [shape: f32[1,256], index: 7, kind: input, shape index: {}]   ;;  %s10992_s8 = inlined_call_operand.vmem [shape: f32[1,256], index: 8, kind: input, shape index: {}]   ;;  %s10993_s10 = inlined_call_operand.vmem [shape: f32[1,4096], index: 10, kind: input, shape index: {}]   ;;  %s10994_s11 = inlined_call_operand.vmem [shape: f32[2,4096], index: 11, kind: output, shape index: {}]  }
   0x1   :  { %v7593_v0 = vld [vmem:[%s10983_s1 + $0xe4] ss:$16 sps:$4 sm:$0xff]   ;;  %v7597_v2 = vld [vmem:[%s10983_s1 + $0xe0] ss:$16 sps:$4 sm:$0xff]   ;;  %v44_v37 = vunpack.c.l.s4 %v8087_v36 }
   0x2   :  { %v7595_v1 = vld [vmem:[%s10983_s1 + $0x2e4] ss:$16 sps:$4 sm:$0xff]   ;;  %1650 = vmatprep.subr.bf16.mxu0 %v7593_v0  ;;  %v7598_v3 = vld [vmem:[%s10983_s1 + $0x2e0] ss:$16 sps:$4 sm:$0xff]   ;;  %v8265_v43 = vshrl.u32 %v46_v38, 7 }
   0x3   :  { %1691 = vmatprep.subr.bf16.mxu1 %v7595_v1  ;;  %v7599_v4 = vld [vmem:[%s10983_s1 + $0xc4] ss:$16 sps:$4 sm:$0xff]   ;;  %1651 = vmatpush1.bf16.msra.mxu0 %v7597_v2  ;;  %v7603_v6 = vld [vmem:[%s10983_s1 + $0xc0] ss:$16 sps:$4 sm:$0xff]   ;;  %v45_v42 = vunpack.c.0.s8 %v44_v37 }
   0x4   :  { %1692 = vmatpush1.bf16.msra.mxu1 %v7598_v3  ;;  %v7601_v5 = vld [vmem:[%s10983_s1 + $0x2c4] ss:$16 sps:$4 sm:$0xff]   ;;  %1652 = vmatprep.subr.bf16.mxu0 %v7599_v4  ;;  %v7604_v7 = vld [vmem:[%s10983_s1 + $0x2c0] ss:$16 sps:$4 sm:$0xff]   ;;  %v39_v4 = vld [vmem:[%s10984_s0 + $0x8] sm:$0xff] }
   0x5   :  { %1693 = vmatprep.subr.bf16.mxu1 %v7601_v5  ;;  %v7605_v8 = vld [vmem:[%s10983_s1 + $0xa4] ss:$16 sps:$4 sm:$0xff]   ;;  %v7609_v10 = vld [vmem:[%s10983_s1 + $0xa0] ss:$16 sps:$4 sm:$0xff]   ;;  %v8283_v49 = vsub.s32 %v45_v42, %v8265_v43 }
   0x6   :  { %v7607_v9 = vld [vmem:[%s10983_s1 + $0x2a4] ss:$16 sps:$4 sm:$0xff]   ;;  %v7610_v11 = vld [vmem:[%s10983_s1 + $0x2a0] ss:$16 sps:$4 sm:$0xff]  }
   0x7   :  { %1653 = vmatpush1.bf16.msra.mxu0 %v7603_v6  ;;  %v7611_v12 = vld [vmem:[%s10983_s1 + $0x84] ss:$16 sps:$4 sm:$0xff]   ;;  %v7615_v14 = vld [vmem:[%s10983_s1 + $0x80] ss:$16 sps:$4 sm:$0xff]  }
   0x8   :  { %1694 = vmatpush1.bf16.msra.mxu1 %v7604_v7  ;;  %1654 = vmatprep.subr.bf16.mxu0 %v7605_v8  ;;  %v7613_v13 = vld [vmem:[%s10983_s1 + $0x284] ss:$16 sps:$4 sm:$0xff]   ;;  %v7616_v15 = vld [vmem:[%s10983_s1 + $0x280] ss:$16 sps:$4 sm:$0xff]  }
   0x9   :  { %1695 = vmatprep.subr.bf16.mxu1 %v7607_v9  ;;  %v7617_v16 = vld [vmem:[%s10983_s1 + $0x64] ss:$16 sps:$4 sm:$0xff]   ;;  %v7621_v18 = vld [vmem:[%s10983_s1 + $0x60] ss:$16 sps:$4 sm:$0xff]   ;;  %v59_v9 = vcombine.high %v39_v4, %v39_v4 }
   0xa   :  { %v7619_v17 = vld [vmem:[%s10983_s1 + $0x264] ss:$16 sps:$4 sm:$0xff]   ;;  %v7622_v19 = vld [vmem:[%s10983_s1 + $0x260] ss:$16 sps:$4 sm:$0xff]  }
   0xb   :  { %1655 = vmatpush1.bf16.msra.mxu0 %v7609_v10  ;;  %v7623_v20 = vld [vmem:[%s10983_s1 + $0x44] ss:$16 sps:$4 sm:$0xff]   ;;  %v7627_v22 = vld [vmem:[%s10983_s1 + $0x40] ss:$16 sps:$4 sm:$0xff]  }
   0xc   :  { %1696 = vmatpush1.bf16.msra.mxu1 %v7610_v11  ;;  %1656 = vmatprep.subr.bf16.mxu0 %v7611_v12  ;;  %v7625_v21 = vld [vmem:[%s10983_s1 + $0x244] ss:$16 sps:$4 sm:$0xff]   ;;  %v7628_v23 = vld [vmem:[%s10983_s1 + $0x240] ss:$16 sps:$4 sm:$0xff]  }
   0xd   :  { %1697 = vmatprep.subr.bf16.mxu1 %v7613_v13  ;;  %v7629_v24 = vld [vmem:[%s10983_s1 + $0x24] ss:$16 sps:$4 sm:$0xff]   ;;  %v7633_v26 = vld [vmem:[%s10983_s1 + $0x20] ss:$16 sps:$4 sm:$0xff]  }
   0xe   :  { %v7631_v25 = vld [vmem:[%s10983_s1 + $0x224] ss:$16 sps:$4 sm:$0xff]   ;;  %v7634_v27 = vld [vmem:[%s10983_s1 + $0x220] ss:$16 sps:$4 sm:$0xff]  }
   0xf   :  { %1657 = vmatpush1.bf16.msra.mxu0 %v7615_v14  ;;  %v7635_v28 = vld [vmem:[%s10983_s1 + $0x4] ss:$16 sps:$4 sm:$0xff]   ;;  %v7639_v30 = vld [vmem:[%s10983_s1] ss:$16 sps:$4 sm:$0xff]   ;;  %v8354_v14 = vrot.slane %v39_v4, %v8283_v49 }
  0x10   :  { %1698 = vmatpush1.bf16.msra.mxu1 %v7616_v15  ;;  %1658 = vmatprep.subr.bf16.mxu0 %v7617_v16  ;;  %v7637_v29 = vld [vmem:[%s10983_s1 + $0x204] ss:$16 sps:$4 sm:$0xff]   ;;  %v7640_v31 = vld [vmem:[%s10983_s1 + $0x200] ss:$16 sps:$4 sm:$0xff]   ;;  %v8357_v15 = vrot.slane %v59_v9, %v8283_v49 }
  0x11   :  { %1699 = vmatprep.subr.bf16.mxu1 %v7619_v17  ;;  %v7641_v32 = vld [vmem:[%s10983_s1 + $0x1e4] ss:$16 sps:$4 sm:$0xff]   ;;  %v7645_v34 = vld [vmem:[%s10983_s1 + $0x1e0] ss:$16 sps:$4 sm:$0xff]  }
  0x12   :  { %v7643_v33 = vld [vmem:[%s10983_s1 + $0x3e4] ss:$16 sps:$4 sm:$0xff]   ;;  %v7646_v35 = vld [vmem:[%s10983_s1 + $0x3e0] ss:$16 sps:$4 sm:$0xff]  }
  0x13   :  { %1659 = vmatpush1.bf16.msra.mxu0 %v7621_v18  ;;  %v7647_v39 = vld [vmem:[%s10983_s1 + $0x1c4] ss:$16 sps:$4 sm:$0xff]   ;;  %v7651_v41 = vld [vmem:[%s10983_s1 + $0x1c0] ss:$16 sps:$4 sm:$0xff]  }
  0x14   :  { %1700 = vmatpush1.bf16.msra.mxu1 %v7622_v19  ;;  %1660 = vmatprep.subr.bf16.mxu0 %v7623_v20  ;;  %v7649_v40 = vld [vmem:[%s10983_s1 + $0x3c4] ss:$16 sps:$4 sm:$0xff]   ;;  %v7652_v44 = vld [vmem:[%s10983_s1 + $0x3c0] ss:$16 sps:$4 sm:$0xff]   ;;  %v74_v20 = vcombine.high %v8354_v14, %v8354_v14 }
  0x15   :  { %1701 = vmatprep.subr.bf16.mxu1 %v7625_v21  ;;  %v7653_v45 = vld [vmem:[%s10983_s1 + $0x1a4] ss:$16 sps:$4 sm:$0xff]   ;;  %v7657_v47 = vld [vmem:[%s10983_s1 + $0x1a0] ss:$16 sps:$4 sm:$0xff]   ;;  %v75_v21 = vcombine.high %v8357_v15, %v8357_v15 }
  0x16   :  { %v7655_v46 = vld [vmem:[%s10983_s1 + $0x3a4] ss:$16 sps:$4 sm:$0xff]   ;;  %v7658_v48 = vld [vmem:[%s10983_s1 + $0x3a0] ss:$16 sps:$4 sm:$0xff]  }
  0x17   :  { %1661 = vmatpush1.bf16.msra.mxu0 %v7627_v22  ;;  %v7659_v50 = vld [vmem:[%s10983_s1 + $0x184] ss:$16 sps:$4 sm:$0xff]   ;;  %v7663_v55 = vld [vmem:[%s10983_s1 + $0x180] ss:$16 sps:$4 sm:$0xff]  }
  0x18   :  { %1702 = vmatpush1.bf16.msra.mxu1 %v7628_v23  ;;  %1662 = vmatprep.subr.bf16.mxu0 %v7629_v24  ;;  %v7661_v51 = vld [vmem:[%s10983_s1 + $0x384] ss:$16 sps:$4 sm:$0xff]   ;;  %v7664_v56 = vld [vmem:[%s10983_s1 + $0x380] ss:$16 sps:$4 sm:$0xff]  }
  0x19   :  { %1703 = vmatprep.subr.bf16.mxu1 %v7631_v25  ;;  %v38_v52 = vld [vmem:[%s10984_s0] sm:$0xff] }
  0x1a   :  { %v49_v53 = vrot.slane %v38_v52, %v8283_v49  ;;  %v42_v54 = vcombine.high %v38_v52, %v38_v52  ;;  %v7665_v57 = vld [vmem:[%s10983_s1 + $0x164] ss:$16 sps:$4 sm:$0xff]   ;;  %v7669_v63 = vld [vmem:[%s10983_s1 + $0x160] ss:$16 sps:$4 sm:$0xff]  }
  0x1b   :  { %1663 = vmatpush1.bf16.msra.mxu0 %v7633_v26  ;;  %v7667_v58 = vld [vmem:[%s10983_s1 + $0x364] ss:$16 sps:$4 sm:$0xff]   ;;  %v7670_v0 = vld [vmem:[%s10983_s1 + $0x360] ss:$16 sps:$4 sm:$0xff]  }
  0x1c   :  { %1704 = vmatpush1.bf16.msra.mxu1 %v7634_v27  ;;  %1664 = vmatprep.subr.bf16.mxu0 %v7635_v28  ;;  %v57_v59 = vcombine.high %v49_v53, %v49_v53  ;;  %v56_v60 = vrot.slane %v42_v54, %v8283_v49  ;;  %v7671_v1 = vld [vmem:[%s10983_s1 + $0x144] ss:$16 sps:$4 sm:$0xff]   ;;  %v7675_v5 = vld [vmem:[%s10983_s1 + $0x140] ss:$16 sps:$4 sm:$0xff]   ;;  %v8375_v22 = vpack.c.bf16 %v49_v53, %v49_v53 }
  0x1d   :  { %1705 = vmatprep.subr.bf16.mxu1 %v7637_v29  ;;  %v7673_v2 = vld [vmem:[%s10983_s1 + $0x344] ss:$16 sps:$4 sm:$0xff]   ;;  %v7676_v6 = vld [vmem:[%s10983_s1 + $0x340] ss:$16 sps:$4 sm:$0xff]   ;;  %v8391_v28 = vpack.c.bf16 %v74_v20, %v74_v20  ;;  %v8393_v29 = vpack.c.bf16 %v75_v21, %v75_v21 }
  0x1e   :  { %v8308_v61 = vpack.c.bf16 %v57_v59, %v57_v59  ;;  %v58_v62 = vcombine.high %v56_v60, %v56_v60  ;;  %v7677_v7 = vld [vmem:[%s10983_s1 + $0x124] ss:$16 sps:$4 sm:$0xff]   ;;  %v7681_v10 = vld [vmem:[%s10983_s1 + $0x120] ss:$16 sps:$4 sm:$0xff]   ;;  %v8377_v23 = vpack.c.bf16 %v56_v60, %v56_v60 }
  0x1f   :  { %1665 = vmatpush1.bf16.msra.mxu0 %v7639_v30  ;;  %v7679_v8 = vld [vmem:[%s10983_s1 + $0x324] ss:$16 sps:$4 sm:$0xff]   ;;  %v7682_v11 = vld [vmem:[%s10983_s1 + $0x320] ss:$16 sps:$4 sm:$0xff]  }
  0x20   :  { %1706 = vmatpush1.bf16.msra.mxu1 %v7640_v31  ;;  %1666 = vmatprep.subr.bf16.mxu0 %v7641_v32  ;;  %v8322_v3 = vpack.c.bf16 %v58_v62, %v58_v62  ;;  %v7683_v12 = vld [vmem:[%s10983_s1 + $0x104] ss:$16 sps:$4 sm:$0xff]   ;;  %v7687_v16 = vld [vmem:[%s10983_s1 + $0x100] ss:$16 sps:$4 sm:$0xff]  }
  0x21   :  { %1707 = vmatprep.subr.bf16.mxu1 %v7643_v33  ;;  %1682 = vmatprep.mubr.bf16.mxu0 %v8308_v61  ;;  %v7685_v13 = vld [vmem:[%s10983_s1 + $0x304] ss:$16 sps:$4 sm:$0xff]   ;;  %v7688_v17 = vld [vmem:[%s10983_s1 + $0x300] ss:$16 sps:$4 sm:$0xff]  }
  0x22   :  { %1723 = vmatprep.mubr.bf16.mxu1 %v8322_v3  ;;  %v7693_v18 = vld [vmem:[%s10983_s1 + $0x4e4] ss:$16 sps:$4 sm:$0xff]   ;;  %v7691_v24 = vld [vmem:[%s10983_s1 + $0x4e0] ss:$16 sps:$4 sm:$0xff]  }
  0x23   :  { %1667 = vmatpush2.bf16.msra.mxu0 %v7645_v34  ;;  %v7696_v19 = vld [vmem:[%s10983_s1 + $0x6e4] ss:$16 sps:$4 sm:$0xff]   ;;  %v7694_v25 = vld [vmem:[%s10983_s1 + $0x6e0] ss:$16 sps:$4 sm:$0xff]  }
  0x24   :  { %1708 = vmatpush2.bf16.msra.mxu1 %v7646_v35  ;;  %1668 = vmatprep.subr.bf16.mxu0 %v7647_v39  ;;  %v7699_v26 = vld [vmem:[%s10983_s1 + $0x4c4] ss:$16 sps:$4 sm:$0xff]   ;;  %v7697_v30 = vld [vmem:[%s10983_s1 + $0x4c0] ss:$16 sps:$4 sm:$0xff]  }
  0x25   :  { %1709 = vmatprep.subr.bf16.mxu1 %v7649_v40  ;;  %v7702_v27 = vld [vmem:[%s10983_s1 + $0x6c4] ss:$16 sps:$4 sm:$0xff]   ;;  %v7700_v31 = vld [vmem:[%s10983_s1 + $0x6c0] ss:$16 sps:$4 sm:$0xff]  }
  0x26   :  { %v7705_v32 = vld [vmem:[%s10983_s1 + $0x4a4] ss:$16 sps:$4 sm:$0xff]   ;;  %v7703_v34 = vld [vmem:[%s10983_s1 + $0x4a0] ss:$16 sps:$4 sm:$0xff]  }
  0x27   :  { %1669 = vmatpush2.bf16.msra.mxu0 %v7651_v41  ;;  %v7708_v33 = vld [vmem:[%s10983_s1 + $0x6a4] ss:$16 sps:$4 sm:$0xff]   ;;  %v7706_v35 = vld [vmem:[%s10983_s1 + $0x6a0] ss:$16 sps:$4 sm:$0xff]  }
  0x28   :  { %1710 = vmatpush2.bf16.msra.mxu1 %v7652_v44  ;;  %1670 = vmatprep.subr.bf16.mxu0 %v7653_v45  ;;  %v7711_v36 = vld [vmem:[%s10983_s1 + $0x484] ss:$16 sps:$4 sm:$0xff]   ;;  %v7709_v38 = vld [vmem:[%s10983_s1 + $0x480] ss:$16 sps:$4 sm:$0xff]  }
  0x29   :  { %1711 = vmatprep.subr.bf16.mxu1 %v7655_v46  ;;  %v7714_v37 = vld [vmem:[%s10983_s1 + $0x684] ss:$16 sps:$4 sm:$0xff]   ;;  %v7712_v39 = vld [vmem:[%s10983_s1 + $0x680] ss:$16 sps:$4 sm:$0xff]  }
  0x2a   :  { %v7717_v40 = vld [vmem:[%s10983_s1 + $0x464] ss:$16 sps:$4 sm:$0xff]   ;;  %v7715_v42 = vld [vmem:[%s10983_s1 + $0x460] ss:$16 sps:$4 sm:$0xff]  }
  0x2b   :  { %1671 = vmatpush2.bf16.msra.mxu0 %v7657_v47  ;;  %v7720_v41 = vld [vmem:[%s10983_s1 + $0x664] ss:$16 sps:$4 sm:$0xff]   ;;  %v7718_v44 = vld [vmem:[%s10983_s1 + $0x660] ss:$16 sps:$4 sm:$0xff]  }
  0x2c   :  { %1712 = vmatpush2.bf16.msra.mxu1 %v7658_v48  ;;  %1672 = vmatprep.subr.bf16.mxu0 %v7659_v50  ;;  %v7723_v45 = vld [vmem:[%s10983_s1 + $0x444] ss:$16 sps:$4 sm:$0xff]   ;;  %v7721_v47 = vld [vmem:[%s10983_s1 + $0x440] ss:$16 sps:$4 sm:$0xff]  }
  0x2d   :  { %1713 = vmatprep.subr.bf16.mxu1 %v7661_v51  ;;  %v7726_v46 = vld [vmem:[%s10983_s1 + $0x644] ss:$16 sps:$4 sm:$0xff]   ;;  %v7724_v48 = vld [vmem:[%s10983_s1 + $0x640] ss:$16 sps:$4 sm:$0xff]  }
  0x2e   :  { %v7729_v50 = vld [vmem:[%s10983_s1 + $0x424] ss:$16 sps:$4 sm:$0xff]   ;;  %v7727_v52 = vld [vmem:[%s10983_s1 + $0x420] ss:$16 sps:$4 sm:$0xff]  }
  0x2f   :  { %1673 = vmatpush2.bf16.msra.mxu0 %v7663_v55  ;;  %v7732_v51 = vld [vmem:[%s10983_s1 + $0x624] ss:$16 sps:$4 sm:$0xff]   ;;  %v7730_v53 = vld [vmem:[%s10983_s1 + $0x620] ss:$16 sps:$4 sm:$0xff]  }
  0x30   :  { %1714 = vmatpush2.bf16.msra.mxu1 %v7664_v56  ;;  %1674 = vmatprep.subr.bf16.mxu0 %v7665_v57  ;;  %v7735_v54 = vld [vmem:[%s10983_s1 + $0x404] ss:$16 sps:$4 sm:$0xff]   ;;  %v7733_v56 = vld [vmem:[%s10983_s1 + $0x400] ss:$16 sps:$4 sm:$0xff]  }
  0x31   :  { %1715 = vmatprep.subr.bf16.mxu1 %v7667_v58  ;;  %v7738_v55 = vld [vmem:[%s10983_s1 + $0x604] ss:$16 sps:$4 sm:$0xff]   ;;  %v7736_v57 = vld [vmem:[%s10983_s1 + $0x600] ss:$16 sps:$4 sm:$0xff]  }
  0x32   :  { %v7741_v58 = vld [vmem:[%s10983_s1 + $0x5e4] ss:$16 sps:$4 sm:$0xff]   ;;  %v7739_v60 = vld [vmem:[%s10983_s1 + $0x5e0] ss:$16 sps:$4 sm:$0xff]  }
  0x33   :  { %1675 = vmatpush2.bf16.msra.mxu0 %v7669_v63  ;;  %v7744_v59 = vld [vmem:[%s10983_s1 + $0x7e4] ss:$16 sps:$4 sm:$0xff]   ;;  %v7742_v62 = vld [vmem:[%s10983_s1 + $0x7e0] ss:$16 sps:$4 sm:$0xff]  }
  0x34   :  { %1716 = vmatpush2.bf16.msra.mxu1 %v7670_v0  ;;  %1676 = vmatprep.subr.bf16.mxu0 %v7671_v1  ;;  %v7747_v63 = vld [vmem:[%s10983_s1 + $0x5c4] ss:$16 sps:$4 sm:$0xff]   ;;  %v7745_v1 = vld [vmem:[%s10983_s1 + $0x5c0] ss:$16 sps:$4 sm:$0xff]  }
  0x35   :  { %1717 = vmatprep.subr.bf16.mxu1 %v7673_v2  ;;  %v7750_v0 = vld [vmem:[%s10983_s1 + $0x7c4] ss:$16 sps:$4 sm:$0xff]   ;;  %v7748_v2 = vld [vmem:[%s10983_s1 + $0x7c0] ss:$16 sps:$4 sm:$0xff]  }
  0x36   :  { %v7753_v4 = vld [vmem:[%s10983_s1 + $0x5a4] ss:$16 sps:$4 sm:$0xff]   ;;  %v7769_v20 = vld [vmem:[%s10983_s1 + $0x540] ss:$16 sps:$4 sm:$0xff]  }
  0x37   :  { %1677 = vmatpush2.bf16.msra.mxu0 %v7675_v5  ;;  %v7756_v5 = vld [vmem:[%s10983_s1 + $0x7a4] ss:$16 sps:$4 sm:$0xff]   ;;  %v7772_v21 = vld [vmem:[%s10983_s1 + $0x740] ss:$16 sps:$4 sm:$0xff]  }
  0x38   :  { %1718 = vmatpush2.bf16.msra.mxu1 %v7676_v6  ;;  %1678 = vmatprep.subr.bf16.mxu0 %v7677_v7  ;;  %v7751_v6 = vld [vmem:[%s10983_s1 + $0x5a0] ss:$16 sps:$4 sm:$0xff]   ;;  %v7762_v9 = vld [vmem:[%s10983_s1 + $0x784] ss:$16 sps:$4 sm:$0xff]  }
  0x39   :  { %1719 = vmatprep.subr.bf16.mxu1 %v7679_v8  ;;  %v7754_v7 = vld [vmem:[%s10983_s1 + $0x7a0] ss:$16 sps:$4 sm:$0xff]   ;;  %v7759_v8 = vld [vmem:[%s10983_s1 + $0x584] ss:$16 sps:$4 sm:$0xff]  }
  0x3b   :  { %1679 = vmatpush2.bf16.msra.mxu0 %v7681_v10  ;;  %v7757_v10 = vld [vmem:[%s10983_s1 + $0x580] ss:$16 sps:$4 sm:$0xff]  }
  0x3c   :  { %1720 = vmatpush2.bf16.msra.mxu1 %v7682_v11  ;;  %1680 = vmatprep.subr.bf16.mxu0 %v7683_v12  ;;  %v7760_v11 = vld [vmem:[%s10983_s1 + $0x780] ss:$16 sps:$4 sm:$0xff]   ;;  %v7765_v12 = vld [vmem:[%s10983_s1 + $0x564] ss:$16 sps:$4 sm:$0xff]  }
  0x3d   :  { %1721 = vmatprep.subr.bf16.mxu1 %v7685_v13  ;;  %v7768_v13 = vld [vmem:[%s10983_s1 + $0x764] ss:$16 sps:$4 sm:$0xff]  }
  0x3f   :  { %1681 = vmatpush2.bf16.msra.mxu0 %v7687_v16  ;;  %v7763_v16 = vld [vmem:[%s10983_s1 + $0x560] ss:$16 sps:$4 sm:$0xff]  }
  0x40   :  { %1722 = vmatpush2.bf16.msra.mxu1 %v7688_v17  ;;  %1732 = vmatprep.subr.bf16.mxu0 %v7693_v18  ;;  %v7766_v17 = vld [vmem:[%s10983_s1 + $0x760] ss:$16 sps:$4 sm:$0xff]   ;;  %v7771_v18 = vld [vmem:[%s10983_s1 + $0x544] ss:$16 sps:$4 sm:$0xff]  }
  0x41   :  { %1773 = vmatprep.subr.bf16.mxu1 %v7696_v19  ;;  %v7774_v19 = vld [vmem:[%s10983_s1 + $0x744] ss:$16 sps:$4 sm:$0xff]  }
  0x42   :  { %1683 = vmatmul.mubr.bf16.vlgmr.msra.gmra.mxu0 %v8375_v22 }
  0x43   :  { %1724 = vmatmul.mubr.bf16.vlgmr.msra.gmra.mxu1 %v8377_v23  ;;  %1733 = vmatpush1.bf16.msra.mxu0 %v7691_v24  ;;  %v7777_v24 = vld [vmem:[%s10983_s1 + $0x524] ss:$16 sps:$4 sm:$0xff]  }
  0x44   :  { %1774 = vmatpush1.bf16.msra.mxu1 %v7694_v25  ;;  %1734 = vmatprep.subr.bf16.mxu0 %v7699_v26  ;;  %v7780_v25 = vld [vmem:[%s10983_s1 + $0x724] ss:$16 sps:$4 sm:$0xff]   ;;  %v7775_v26 = vld [vmem:[%s10983_s1 + $0x520] ss:$16 sps:$4 sm:$0xff]  }
  0x45   :  { %1775 = vmatprep.subr.bf16.mxu1 %v7702_v27  ;;  %1764 = vmatprep.mubr.bf16.mxu0 %v8391_v28  ;;  %v7778_v27 = vld [vmem:[%s10983_s1 + $0x720] ss:$16 sps:$4 sm:$0xff]  }
  0x46   :  { %1805 = vmatprep.mubr.bf16.mxu1 %v8393_v29 }
  0x47   :  { %1735 = vmatpush1.bf16.msra.mxu0 %v7697_v30  ;;  %v7783_v30 = vld [vmem:[%s10983_s1 + $0x504] ss:$16 sps:$4 sm:$0xff]  }
  0x48   :  { %1776 = vmatpush1.bf16.msra.mxu1 %v7700_v31  ;;  %1736 = vmatprep.subr.bf16.mxu0 %v7705_v32  ;;  %v7786_v31 = vld [vmem:[%s10983_s1 + $0x704] ss:$16 sps:$4 sm:$0xff]   ;;  %v7781_v32 = vld [vmem:[%s10983_s1 + $0x500] ss:$16 sps:$4 sm:$0xff]  }
  0x49   :  { %1777 = vmatprep.subr.bf16.mxu1 %v7708_v33  ;;  %v7784_v33 = vld [vmem:[%s10983_s1 + $0x700] ss:$16 sps:$4 sm:$0xff]  }
  0x4b   :  { %1737 = vmatpush1.bf16.msra.mxu0 %v7703_v34  ;;  %v7789_v34 = vld [vmem:[%s10983_s1 + $0xec] ss:$16 sps:$4 sm:$0xff]  }
  0x4c   :  { %1778 = vmatpush1.bf16.msra.mxu1 %v7706_v35  ;;  %1738 = vmatprep.subr.bf16.mxu0 %v7711_v36  ;;  %v7792_v35 = vld [vmem:[%s10983_s1 + $0x2ec] ss:$16 sps:$4 sm:$0xff]   ;;  %v8581_v36 = vpack.c.bf16 %v8354_v14, %v8354_v14 }
  0x4d   :  { %1779 = vmatprep.subr.bf16.mxu1 %v7714_v37  ;;  %v8585_v37 = vpack.c.bf16 %v8357_v15, %v8357_v15  ;;  %v7795_v14 = vld [vmem:[%s10983_s1 + $0xcc] ss:$16 sps:$4 sm:$0xff]  }
  0x4e   :  { %v7798_v15 = vld [vmem:[%s10983_s1 + $0x2cc] ss:$16 sps:$4 sm:$0xff]  }
  0x4f   :  { %1739 = vmatpush1.bf16.msra.mxu0 %v7709_v38  ;;  %v7787_v38 = vld [vmem:[%s10983_s1 + $0xe8] ss:$16 sps:$4 sm:$0xff]  }
  0x50   :  { %1780 = vmatpush1.bf16.msra.mxu1 %v7712_v39  ;;  %1740 = vmatprep.subr.bf16.mxu0 %v7717_v40  ;;  %v7790_v39 = vld [vmem:[%s10983_s1 + $0x2e8] ss:$16 sps:$4 sm:$0xff]  }
  0x51   :  { %1781 = vmatprep.subr.bf16.mxu1 %v7720_v41  ;;  %v7793_v40 = vld [vmem:[%s10983_s1 + $0xc8] ss:$16 sps:$4 sm:$0xff]  }
  0x52   :  { %v7796_v41 = vld [vmem:[%s10983_s1 + $0x2c8] ss:$16 sps:$4 sm:$0xff]  }
  0x53   :  { %1741 = vmatpush1.bf16.msra.mxu0 %v7715_v42  ;;  %v7801_v42 = vld [vmem:[%s10983_s1 + $0xac] ss:$16 sps:$4 sm:$0xff]  }
  0x54   :  { %1782 = vmatpush1.bf16.msra.mxu1 %v7718_v44  ;;  %1742 = vmatprep.subr.bf16.mxu0 %v7723_v45  ;;  %v7804_v44 = vld [vmem:[%s10983_s1 + $0x2ac] ss:$16 sps:$4 sm:$0xff]   ;;  %v7799_v45 = vld [vmem:[%s10983_s1 + $0xa8] ss:$16 sps:$4 sm:$0xff]  }
  0x55   :  { %1783 = vmatprep.subr.bf16.mxu1 %v7726_v46  ;;  %v7802_v46 = vld [vmem:[%s10983_s1 + $0x2a8] ss:$16 sps:$4 sm:$0xff]  }
  0x57   :  { %1743 = vmatpush1.bf16.msra.mxu0 %v7721_v47  ;;  %v7807_v47 = vld [vmem:[%s10983_s1 + $0x8c] ss:$16 sps:$4 sm:$0xff]  }
  0x58   :  { %1784 = vmatpush1.bf16.msra.mxu1 %v7724_v48  ;;  %1744 = vmatprep.subr.bf16.mxu0 %v7729_v50  ;;  %v7808_v48 = vld [vmem:[%s10983_s1 + $0x288] ss:$16 sps:$4 sm:$0xff]   ;;  %v7813_v50 = vld [vmem:[%s10983_s1 + $0x6c] ss:$16 sps:$4 sm:$0xff]  }
  0x59   :  { %1785 = vmatprep.subr.bf16.mxu1 %v7732_v51  ;;  %v7816_v51 = vld [vmem:[%s10983_s1 + $0x26c] ss:$16 sps:$4 sm:$0xff]  }
  0x5b   :  { %1745 = vmatpush1.bf16.msra.mxu0 %v7727_v52  ;;  %v7811_v52 = vld [vmem:[%s10983_s1 + $0x68] ss:$16 sps:$4 sm:$0xff]  }
  0x5c   :  { %1786 = vmatpush1.bf16.msra.mxu1 %v7730_v53  ;;  %1746 = vmatprep.subr.bf16.mxu0 %v7735_v54  ;;  %v7814_v53 = vld [vmem:[%s10983_s1 + $0x268] ss:$16 sps:$4 sm:$0xff]   ;;  %v7819_v54 = vld [vmem:[%s10983_s1 + $0x4c] ss:$16 sps:$4 sm:$0xff]  }
  0x5d   :  { %1787 = vmatprep.subr.bf16.mxu1 %v7738_v55  ;;  %v7822_v55 = vld [vmem:[%s10983_s1 + $0x24c] ss:$16 sps:$4 sm:$0xff]  }
  0x5f   :  { %1747 = vmatpush1.bf16.msra.mxu0 %v7733_v56  ;;  %v7817_v56 = vld [vmem:[%s10983_s1 + $0x48] ss:$16 sps:$4 sm:$0xff]  }
  0x60   :  { %1788 = vmatpush1.bf16.msra.mxu1 %v7736_v57  ;;  %1748 = vmatprep.subr.bf16.mxu0 %v7741_v58  ;;  %v7820_v57 = vld [vmem:[%s10983_s1 + $0x248] ss:$16 sps:$4 sm:$0xff]   ;;  %v7825_v58 = vld [vmem:[%s10983_s1 + $0x2c] ss:$16 sps:$4 sm:$0xff]  }
  0x61   :  { %1789 = vmatprep.subr.bf16.mxu1 %v7744_v59  ;;  %v7828_v59 = vld [vmem:[%s10983_s1 + $0x22c] ss:$16 sps:$4 sm:$0xff]  }
  0x63   :  { %1749 = vmatpush2.bf16.msra.mxu0 %v7739_v60  ;;  %v7823_v60 = vld [vmem:[%s10983_s1 + $0x28] ss:$16 sps:$4 sm:$0xff]  }
  0x64   :  { %1790 = vmatpush2.bf16.msra.mxu1 %v7742_v62  ;;  %1750 = vmatprep.subr.bf16.mxu0 %v7747_v63  ;;  %v7826_v62 = vld [vmem:[%s10983_s1 + $0x228] ss:$16 sps:$4 sm:$0xff]   ;;  %v7831_v63 = vld [vmem:[%s10983_s1 + $0xc] ss:$16 sps:$4 sm:$0xff]  }
  0x65   :  { %1791 = vmatprep.subr.bf16.mxu1 %v7750_v0  ;;  %v7834_v0 = vld [vmem:[%s10983_s1 + $0x20c] ss:$16 sps:$4 sm:$0xff]  }
  0x67   :  { %1751 = vmatpush2.bf16.msra.mxu0 %v7745_v1  ;;  %v7829_v1 = vld [vmem:[%s10983_s1 + $0x8] ss:$16 sps:$4 sm:$0xff]  }
  0x68   :  { %1792 = vmatpush2.bf16.msra.mxu1 %v7748_v2  ;;  %1752 = vmatprep.subr.bf16.mxu0 %v7753_v4  ;;  %v7832_v2 = vld [vmem:[%s10983_s1 + $0x208] ss:$16 sps:$4 sm:$0xff]   ;;  %v7837_v4 = vld [vmem:[%s10983_s1 + $0x1ec] ss:$16 sps:$4 sm:$0xff]  }
  0x69   :  { %1793 = vmatprep.subr.bf16.mxu1 %v7756_v5  ;;  %v7840_v5 = vld [vmem:[%s10983_s1 + $0x3ec] ss:$16 sps:$4 sm:$0xff]  }
  0x6b   :  { %1753 = vmatpush2.bf16.msra.mxu0 %v7751_v6  ;;  %v7835_v6 = vld [vmem:[%s10983_s1 + $0x1e8] ss:$16 sps:$4 sm:$0xff]  }
  0x6c   :  { %1794 = vmatpush2.bf16.msra.mxu1 %v7754_v7  ;;  %1754 = vmatprep.subr.bf16.mxu0 %v7759_v8  ;;  %v7838_v7 = vld [vmem:[%s10983_s1 + $0x3e8] ss:$16 sps:$4 sm:$0xff]   ;;  %v7843_v8 = vld [vmem:[%s10983_s1 + $0x1cc] ss:$16 sps:$4 sm:$0xff]  }
  0x6d   :  { %1795 = vmatprep.subr.bf16.mxu1 %v7762_v9  ;;  %v7846_v9 = vld [vmem:[%s10983_s1 + $0x3cc] ss:$16 sps:$4 sm:$0xff]  }
  0x6f   :  { %1755 = vmatpush2.bf16.msra.mxu0 %v7757_v10  ;;  %v7841_v10 = vld [vmem:[%s10983_s1 + $0x1c8] ss:$16 sps:$4 sm:$0xff]  }
  0x70   :  { %1796 = vmatpush2.bf16.msra.mxu1 %v7760_v11  ;;  %1756 = vmatprep.subr.bf16.mxu0 %v7765_v12  ;;  %v7844_v11 = vld [vmem:[%s10983_s1 + $0x3c8] ss:$16 sps:$4 sm:$0xff]   ;;  %v7849_v12 = vld [vmem:[%s10983_s1 + $0x1ac] ss:$16 sps:$4 sm:$0xff]  }
  0x71   :  { %1797 = vmatprep.subr.bf16.mxu1 %v7768_v13  ;;  %v7852_v13 = vld [vmem:[%s10983_s1 + $0x3ac] ss:$16 sps:$4 sm:$0xff]  }
  0x73   :  { %1757 = vmatpush2.bf16.msra.mxu0 %v7763_v16  ;;  %v7847_v16 = vld [vmem:[%s10983_s1 + $0x1a8] ss:$16 sps:$4 sm:$0xff]  }
  0x74   :  { %1798 = vmatpush2.bf16.msra.mxu1 %v7766_v17  ;;  %1758 = vmatprep.subr.bf16.mxu0 %v7771_v18  ;;  %v7850_v17 = vld [vmem:[%s10983_s1 + $0x3a8] ss:$16 sps:$4 sm:$0xff]   ;;  %v7855_v18 = vld [vmem:[%s10983_s1 + $0x18c] ss:$16 sps:$4 sm:$0xff]  }
  0x75   :  { %1799 = vmatprep.subr.bf16.mxu1 %v7774_v19  ;;  %v7858_v19 = vld [vmem:[%s10983_s1 + $0x38c] ss:$16 sps:$4 sm:$0xff]  }
  0x77   :  { %1759 = vmatpush2.bf16.msra.mxu0 %v7769_v20  ;;  %v7853_v20 = vld [vmem:[%s10983_s1 + $0x188] ss:$16 sps:$4 sm:$0xff]  }
  0x78   :  { %1800 = vmatpush2.bf16.msra.mxu1 %v7772_v21  ;;  %1760 = vmatprep.subr.bf16.mxu0 %v7777_v24  ;;  %v7856_v21 = vld [vmem:[%s10983_s1 + $0x388] ss:$16 sps:$4 sm:$0xff]   ;;  %v7861_v24 = vld [vmem:[%s10983_s1 + $0x16c] ss:$16 sps:$4 sm:$0xff]  }
  0x79   :  { %1801 = vmatprep.subr.bf16.mxu1 %v7780_v25  ;;  %v7864_v25 = vld [vmem:[%s10983_s1 + $0x36c] ss:$16 sps:$4 sm:$0xff]  }
  0x7b   :  { %1761 = vmatpush2.bf16.msra.mxu0 %v7775_v26  ;;  %v7859_v26 = vld [vmem:[%s10983_s1 + $0x168] ss:$16 sps:$4 sm:$0xff]  }
  0x7c   :  { %1802 = vmatpush2.bf16.msra.mxu1 %v7778_v27  ;;  %1762 = vmatprep.subr.bf16.mxu0 %v7783_v30  ;;  %v7862_v27 = vld [vmem:[%s10983_s1 + $0x368] ss:$16 sps:$4 sm:$0xff]   ;;  %v7867_v30 = vld [vmem:[%s10983_s1 + $0x14c] ss:$16 sps:$4 sm:$0xff]  }
  0x7d   :  { %1803 = vmatprep.subr.bf16.mxu1 %v7786_v31  ;;  %v7870_v31 = vld [vmem:[%s10983_s1 + $0x34c] ss:$16 sps:$4 sm:$0xff]  }
  0x7f   :  { %1763 = vmatpush2.bf16.msra.mxu0 %v7781_v32  ;;  %v7865_v32 = vld [vmem:[%s10983_s1 + $0x148] ss:$16 sps:$4 sm:$0xff]  }
  0x80   :  { %1804 = vmatpush2.bf16.msra.mxu1 %v7784_v33  ;;  %1814 = vmatprep.subr.bf16.mxu0 %v7789_v34  ;;  %v7868_v33 = vld [vmem:[%s10983_s1 + $0x348] ss:$16 sps:$4 sm:$0xff]   ;;  %v7873_v34 = vld [vmem:[%s10983_s1 + $0x12c] ss:$16 sps:$4 sm:$0xff]  }
  0x81   :  { %1855 = vmatprep.subr.bf16.mxu1 %v7792_v35  ;;  %v7876_v35 = vld [vmem:[%s10983_s1 + $0x32c] ss:$16 sps:$4 sm:$0xff]  }
  0x82   :  { %1765 = vmatmul.mubr.bf16.vlgmr.msra.gmra.mxu0 %v8581_v36 }
  0x83   :  { %1806 = vmatmul.mubr.bf16.vlgmr.msra.gmra.mxu1 %v8585_v37  ;;  %1815 = vmatpush1.bf16.msra.mxu0 %v7787_v38  ;;  %v7871_v38 = vld [vmem:[%s10983_s1 + $0x128] ss:$16 sps:$4 sm:$0xff]  }
  0x84   :  { %1856 = vmatpush1.bf16.msra.mxu1 %v7790_v39  ;;  %1816 = vmatprep.subr.bf16.mxu0 %v7795_v14  ;;  %v7874_v39 = vld [vmem:[%s10983_s1 + $0x328] ss:$16 sps:$4 sm:$0xff]   ;;  %v7879_v14 = vld [vmem:[%s10983_s1 + $0x10c] ss:$16 sps:$4 sm:$0xff]  }
  0x85   :  { %1857 = vmatprep.subr.bf16.mxu1 %v7798_v15  ;;  %1846 = vmatprep.mubr.bf16.mxu0 %v8308_v61  ;;  %v7810_v61 = vld [vmem:[%s10983_s1 + $0x28c] ss:$16 sps:$4 sm:$0xff]  }
  0x86   :  { %1887 = vmatprep.mubr.bf16.mxu1 %v8322_v3  ;;  %v7805_v3 = vld [vmem:[%s10983_s1 + $0x88] ss:$16 sps:$4 sm:$0xff]   ;;  %v7882_v15 = vld [vmem:[%s10983_s1 + $0x30c] ss:$16 sps:$4 sm:$0xff]  }
  0x87   :  { %1817 = vmatpush1.bf16.msra.mxu0 %v7793_v40  ;;  %v7877_v40 = vld [vmem:[%s10983_s1 + $0x108] ss:$16 sps:$4 sm:$0xff]  }
  0x88   :  { %1858 = vmatpush1.bf16.msra.mxu1 %v7796_v41  ;;  %1818 = vmatprep.subr.bf16.mxu0 %v7801_v42  ;;  %v7880_v41 = vld [vmem:[%s10983_s1 + $0x308] ss:$16 sps:$4 sm:$0xff]   ;;  %v7885_v42 = vld [vmem:[%s10983_s1 + $0x4ec] ss:$16 sps:$4 sm:$0xff]  }
  0x89   :  { %1859 = vmatprep.subr.bf16.mxu1 %v7804_v44  ;;  %v7888_v44 = vld [vmem:[%s10983_s1 + $0x6ec] ss:$16 sps:$4 sm:$0xff]  }
  0x8b   :  { %1819 = vmatpush1.bf16.msra.mxu0 %v7799_v45  ;;  %v7883_v45 = vld [vmem:[%s10983_s1 + $0x4e8] ss:$16 sps:$4 sm:$0xff]  }
  0x8c   :  { %1860 = vmatpush1.bf16.msra.mxu1 %v7802_v46  ;;  %1820 = vmatprep.subr.bf16.mxu0 %v7807_v47  ;;  %v7886_v46 = vld [vmem:[%s10983_s1 + $0x6e8] ss:$16 sps:$4 sm:$0xff]   ;;  %v7891_v47 = vld [vmem:[%s10983_s1 + $0x4cc] ss:$16 sps:$4 sm:$0xff]  }
  0x8d   :  { %1861 = vmatprep.subr.bf16.mxu1 %v7810_v61  ;;  %v7894_v61 = vld [vmem:[%s10983_s1 + $0x6cc] ss:$16 sps:$4 sm:$0xff]  }
  0x8f   :  { %1821 = vmatpush1.bf16.msra.mxu0 %v7805_v3  ;;  %v7889_v3 = vld [vmem:[%s10983_s1 + $0x4c8] ss:$16 sps:$4 sm:$0xff]  }
  0x90   :  { %1862 = vmatpush1.bf16.msra.mxu1 %v7808_v48  ;;  %1822 = vmatprep.subr.bf16.mxu0 %v7813_v50  ;;  %v7892_v48 = vld [vmem:[%s10983_s1 + $0x6c8] ss:$16 sps:$4 sm:$0xff]   ;;  %v7897_v50 = vld [vmem:[%s10983_s1 + $0x4ac] ss:$16 sps:$4 sm:$0xff]  }
  0x91   :  { %1863 = vmatprep.subr.bf16.mxu1 %v7816_v51  ;;  %v7898_v51 = vld [vmem:[%s10983_s1 + $0x6a8] ss:$16 sps:$4 sm:$0xff]  }
  0x93   :  { %1823 = vmatpush1.bf16.msra.mxu0 %v7811_v52  ;;  %v7903_v52 = vld [vmem:[%s10983_s1 + $0x48c] ss:$16 sps:$4 sm:$0xff]  }
  0x94   :  { %1864 = vmatpush1.bf16.msra.mxu1 %v7814_v53  ;;  %1824 = vmatprep.subr.bf16.mxu0 %v7819_v54  ;;  %v7906_v53 = vld [vmem:[%s10983_s1 + $0x68c] ss:$16 sps:$4 sm:$0xff]   ;;  %v7901_v54 = vld [vmem:[%s10983_s1 + $0x488] ss:$16 sps:$4 sm:$0xff]  }
  0x95   :  { %1865 = vmatprep.subr.bf16.mxu1 %v7822_v55  ;;  %v7912_v55 = vld [vmem:[%s10983_s1 + $0x66c] ss:$16 sps:$4 sm:$0xff]  }
  0x97   :  { %1825 = vmatpush1.bf16.msra.mxu0 %v7817_v56  ;;  %v7907_v56 = vld [vmem:[%s10983_s1 + $0x468] ss:$16 sps:$4 sm:$0xff]  }
  0x98   :  { %1866 = vmatpush1.bf16.msra.mxu1 %v7820_v57  ;;  %1826 = vmatprep.subr.bf16.mxu0 %v7825_v58  ;;  %v7910_v57 = vld [vmem:[%s10983_s1 + $0x668] ss:$16 sps:$4 sm:$0xff]   ;;  %v7915_v58 = vld [vmem:[%s10983_s1 + $0x44c] ss:$16 sps:$4 sm:$0xff]  }
  0x99   :  { %1867 = vmatprep.subr.bf16.mxu1 %v7828_v59  ;;  %v7918_v59 = vld [vmem:[%s10983_s1 + $0x64c] ss:$16 sps:$4 sm:$0xff]  }
  0x9b   :  { %1827 = vmatpush1.bf16.msra.mxu0 %v7823_v60  ;;  %v7913_v60 = vld [vmem:[%s10983_s1 + $0x448] ss:$16 sps:$4 sm:$0xff]  }
  0x9c   :  { %1868 = vmatpush1.bf16.msra.mxu1 %v7826_v62  ;;  %1828 = vmatprep.subr.bf16.mxu0 %v7831_v63  ;;  %v7916_v62 = vld [vmem:[%s10983_s1 + $0x648] ss:$16 sps:$4 sm:$0xff]   ;;  %v7921_v63 = vld [vmem:[%s10983_s1 + $0x42c] ss:$16 sps:$4 sm:$0xff]  }
  0x9d   :  { %1869 = vmatprep.subr.bf16.mxu1 %v7834_v0  ;;  %v7924_v0 = vld [vmem:[%s10983_s1 + $0x62c] ss:$16 sps:$4 sm:$0xff]  }
  0x9f   :  { %1829 = vmatpush1.bf16.msra.mxu0 %v7829_v1  ;;  %v7919_v1 = vld [vmem:[%s10983_s1 + $0x428] ss:$16 sps:$4 sm:$0xff]  }
  0xa0   :  { %1870 = vmatpush1.bf16.msra.mxu1 %v7832_v2  ;;  %1830 = vmatprep.subr.bf16.mxu0 %v7837_v4  ;;  %v7922_v2 = vld [vmem:[%s10983_s1 + $0x628] ss:$16 sps:$4 sm:$0xff]   ;;  %v7927_v4 = vld [vmem:[%s10983_s1 + $0x40c] ss:$16 sps:$4 sm:$0xff]  }
  0xa1   :  { %1871 = vmatprep.subr.bf16.mxu1 %v7840_v5  ;;  %v7930_v5 = vld [vmem:[%s10983_s1 + $0x60c] ss:$16 sps:$4 sm:$0xff]  }
  0xa3   :  { %1831 = vmatpush2.bf16.msra.mxu0 %v7835_v6  ;;  %v7925_v6 = vld [vmem:[%s10983_s1 + $0x408] ss:$16 sps:$4 sm:$0xff]  }
  0xa4   :  { %1872 = vmatpush2.bf16.msra.mxu1 %v7838_v7  ;;  %1832 = vmatprep.subr.bf16.mxu0 %v7843_v8  ;;  %v7928_v7 = vld [vmem:[%s10983_s1 + $0x608] ss:$16 sps:$4 sm:$0xff]   ;;  %v7933_v8 = vld [vmem:[%s10983_s1 + $0x5ec] ss:$16 sps:$4 sm:$0xff]  }
  0xa5   :  { %1873 = vmatprep.subr.bf16.mxu1 %v7846_v9  ;;  %v7936_v9 = vld [vmem:[%s10983_s1 + $0x7ec] ss:$16 sps:$4 sm:$0xff]  }
  0xa7   :  { %1833 = vmatpush2.bf16.msra.mxu0 %v7841_v10  ;;  %v7931_v10 = vld [vmem:[%s10983_s1 + $0x5e8] ss:$16 sps:$4 sm:$0xff]  }
  0xa8   :  { %1874 = vmatpush2.bf16.msra.mxu1 %v7844_v11  ;;  %1834 = vmatprep.subr.bf16.mxu0 %v7849_v12  ;;  %v7934_v11 = vld [vmem:[%s10983_s1 + $0x7e8] ss:$16 sps:$4 sm:$0xff]   ;;  %v7939_v12 = vld [vmem:[%s10983_s1 + $0x5cc] ss:$16 sps:$4 sm:$0xff]  }
  0xa9   :  { %1875 = vmatprep.subr.bf16.mxu1 %v7852_v13  ;;  %v7942_v13 = vld [vmem:[%s10983_s1 + $0x7cc] ss:$16 sps:$4 sm:$0xff]  }
  0xab   :  { %1835 = vmatpush2.bf16.msra.mxu0 %v7847_v16  ;;  %v7937_v16 = vld [vmem:[%s10983_s1 + $0x5c8] ss:$16 sps:$4 sm:$0xff]  }
  0xac   :  { %1876 = vmatpush2.bf16.msra.mxu1 %v7850_v17  ;;  %1836 = vmatprep.subr.bf16.mxu0 %v7855_v18  ;;  %v7940_v17 = vld [vmem:[%s10983_s1 + $0x7c8] ss:$16 sps:$4 sm:$0xff]   ;;  %v7945_v18 = vld [vmem:[%s10983_s1 + $0x5ac] ss:$16 sps:$4 sm:$0xff]  }
  0xad   :  { %1877 = vmatprep.subr.bf16.mxu1 %v7858_v19  ;;  %v7948_v19 = vld [vmem:[%s10983_s1 + $0x7ac] ss:$16 sps:$4 sm:$0xff]  }
  0xaf   :  { %1837 = vmatpush2.bf16.msra.mxu0 %v7853_v20  ;;  %v7943_v20 = vld [vmem:[%s10983_s1 + $0x5a8] ss:$16 sps:$4 sm:$0xff]  }
  0xb0   :  { %1878 = vmatpush2.bf16.msra.mxu1 %v7856_v21  ;;  %1838 = vmatprep.subr.bf16.mxu0 %v7861_v24  ;;  %v7946_v21 = vld [vmem:[%s10983_s1 + $0x7a8] ss:$16 sps:$4 sm:$0xff]   ;;  %v7951_v24 = vld [vmem:[%s10983_s1 + $0x58c] ss:$16 sps:$4 sm:$0xff]  }
  0xb1   :  { %1879 = vmatprep.subr.bf16.mxu1 %v7864_v25  ;;  %v7954_v25 = vld [vmem:[%s10983_s1 + $0x78c] ss:$16 sps:$4 sm:$0xff]  }
  0xb3   :  { %1839 = vmatpush2.bf16.msra.mxu0 %v7859_v26  ;;  %v7949_v26 = vld [vmem:[%s10983_s1 + $0x588] ss:$16 sps:$4 sm:$0xff]  }
  0xb4   :  { %1880 = vmatpush2.bf16.msra.mxu1 %v7862_v27  ;;  %1840 = vmatprep.subr.bf16.mxu0 %v7867_v30  ;;  %v7952_v27 = vld [vmem:[%s10983_s1 + $0x788] ss:$16 sps:$4 sm:$0xff]   ;;  %v7957_v30 = vld [vmem:[%s10983_s1 + $0x56c] ss:$16 sps:$4 sm:$0xff]  }
  0xb5   :  { %1881 = vmatprep.subr.bf16.mxu1 %v7870_v31  ;;  %v7960_v31 = vld [vmem:[%s10983_s1 + $0x76c] ss:$16 sps:$4 sm:$0xff]  }
  0xb7   :  { %1841 = vmatpush2.bf16.msra.mxu0 %v7865_v32  ;;  %v7955_v32 = vld [vmem:[%s10983_s1 + $0x568] ss:$16 sps:$4 sm:$0xff]  }
  0xb8   :  { %1882 = vmatpush2.bf16.msra.mxu1 %v7868_v33  ;;  %1842 = vmatprep.subr.bf16.mxu0 %v7873_v34  ;;  %v7958_v33 = vld [vmem:[%s10983_s1 + $0x768] ss:$16 sps:$4 sm:$0xff]   ;;  %v7963_v34 = vld [vmem:[%s10983_s1 + $0x54c] ss:$16 sps:$4 sm:$0xff]  }
  0xb9   :  { %1883 = vmatprep.subr.bf16.mxu1 %v7876_v35  ;;  %v7966_v35 = vld [vmem:[%s10983_s1 + $0x74c] ss:$16 sps:$4 sm:$0xff]  }
  0xbb   :  { %1843 = vmatpush2.bf16.msra.mxu0 %v7871_v38  ;;  %v7961_v38 = vld [vmem:[%s10983_s1 + $0x548] ss:$16 sps:$4 sm:$0xff]  }
  0xbc   :  { %1884 = vmatpush2.bf16.msra.mxu1 %v7874_v39  ;;  %1844 = vmatprep.subr.bf16.mxu0 %v7879_v14  ;;  %v7964_v39 = vld [vmem:[%s10983_s1 + $0x748] ss:$16 sps:$4 sm:$0xff]   ;;  %v7969_v14 = vld [vmem:[%s10983_s1 + $0x52c] ss:$16 sps:$4 sm:$0xff]  }
  0xbd   :  { %1885 = vmatprep.subr.bf16.mxu1 %v7882_v15  ;;  %v7972_v15 = vld [vmem:[%s10983_s1 + $0x72c] ss:$16 sps:$4 sm:$0xff]  }
  0xbf   :  { %1845 = vmatpush2.bf16.msra.mxu0 %v7877_v40  ;;  %v7967_v40 = vld [vmem:[%s10983_s1 + $0x528] ss:$16 sps:$4 sm:$0xff]  }
  0xc0   :  { %1886 = vmatpush2.bf16.msra.mxu1 %v7880_v41  ;;  %1896 = vmatprep.subr.bf16.mxu0 %v7885_v42  ;;  %v7970_v41 = vld [vmem:[%s10983_s1 + $0x728] ss:$16 sps:$4 sm:$0xff]   ;;  %v7975_v42 = vld [vmem:[%s10983_s1 + $0x50c] ss:$16 sps:$4 sm:$0xff]  }
  0xc1   :  { %1937 = vmatprep.subr.bf16.mxu1 %v7888_v44  ;;  %v7978_v44 = vld [vmem:[%s10983_s1 + $0x70c] ss:$16 sps:$4 sm:$0xff]  }
  0xc2   :  { %1847 = vmatmul.mubr.bf16.vlgmr.msra.gmra.mxu0 %v8375_v22  ;;  %v7900_v22 = vld [vmem:[%s10983_s1 + $0x6ac] ss:$16 sps:$4 sm:$0xff]  }
  0xc3   :  { %1888 = vmatmul.mubr.bf16.vlgmr.msra.gmra.mxu1 %v8377_v23  ;;  %1897 = vmatpush1.bf16.msra.mxu0 %v7883_v45  ;;  %v7895_v23 = vld [vmem:[%s10983_s1 + $0x4a8] ss:$16 sps:$4 sm:$0xff]  }
  0xc4   :  { %1938 = vmatpush1.bf16.msra.mxu1 %v7886_v46  ;;  %1898 = vmatprep.subr.bf16.mxu0 %v7891_v47  ;;  %v7973_v45 = vld [vmem:[%s10983_s1 + $0x508] ss:$16 sps:$4 sm:$0xff]   ;;  %v7981_v47 = vld [vmem:[%s10985_s5 + $0x74] ss:$8 sps:$4 sm:$0xff]  }
  0xc5   :  { %1939 = vmatprep.subr.bf16.mxu1 %v7894_v61  ;;  %1928 = vmatprep.mubr.bf16.mxu0 %v8391_v28  ;;  %v7904_v28 = vld [vmem:[%s10983_s1 + $0x688] ss:$16 sps:$4 sm:$0xff]  }
  0xc6   :  { %1969 = vmatprep.mubr.bf16.mxu1 %v8393_v29  ;;  %v7909_v29 = vld [vmem:[%s10983_s1 + $0x46c] ss:$16 sps:$4 sm:$0xff]   ;;  %v7976_v46 = vld [vmem:[%s10983_s1 + $0x708] ss:$16 sps:$4 sm:$0xff]  }
  0xc7   :  { %1899 = vmatpush1.bf16.msra.mxu0 %v7889_v3  ;;  %v7979_v61 = vld [vmem:[%s10985_s5 + $0x70] ss:$8 sps:$4 sm:$0xff]   ;;  %v7984_v3 = vld [vmem:[%s10985_s5 + $0x64] ss:$8 sps:$4 sm:$0xff]  }
  0xc8   :  { %1940 = vmatpush1.bf16.msra.mxu1 %v7892_v48  ;;  %1900 = vmatprep.subr.bf16.mxu0 %v7897_v50 }
  0xc9   :  { %1941 = vmatprep.subr.bf16.mxu1 %v7900_v22  ;;  %v7982_v22 = vld [vmem:[%s10985_s5 + $0x60] ss:$8 sps:$4 sm:$0xff]  }
  0xcb   :  { %1901 = vmatpush1.bf16.msra.mxu0 %v7895_v23 }
  0xcc   :  { %1942 = vmatpush1.bf16.msra.mxu1 %v7898_v51  ;;  %1902 = vmatprep.subr.bf16.mxu0 %v7903_v52  ;;  %v7987_v52 = vld [vmem:[%s10985_s5 + $0x54] ss:$8 sps:$4 sm:$0xff]  }
  0xcd   :  { %1943 = vmatprep.subr.bf16.mxu1 %v7906_v53 }
  0xcf   :  { %1903 = vmatpush1.bf16.msra.mxu0 %v7901_v54 }
  0xd0   :  { %1944 = vmatpush1.bf16.msra.mxu1 %v7904_v28  ;;  %1904 = vmatprep.subr.bf16.mxu0 %v7909_v29  ;;  %v7990_v29 = vld [vmem:[%s10985_s5 + $0x44] ss:$8 sps:$4 sm:$0xff]  }
  0xd1   :  { %1945 = vmatprep.subr.bf16.mxu1 %v7912_v55  ;;  %v7988_v55 = vld [vmem:[%s10985_s5 + $0x40] ss:$8 sps:$4 sm:$0xff]  }
  0xd3   :  { %1905 = vmatpush1.bf16.msra.mxu0 %v7907_v56  ;;  %v7993_v56 = vld [vmem:[%s10985_s5 + $0x34] ss:$8 sps:$4 sm:$0xff]  }
  0xd4   :  { %1946 = vmatpush1.bf16.msra.mxu1 %v7910_v57  ;;  %1906 = vmatprep.subr.bf16.mxu0 %v7915_v58  ;;  %v7991_v57 = vld [vmem:[%s10985_s5 + $0x30] ss:$8 sps:$4 sm:$0xff]   ;;  %v7996_v58 = vld [vmem:[%s10985_s5 + $0x24] ss:$8 sps:$4 sm:$0xff]  }
  0xd5   :  { %1947 = vmatprep.subr.bf16.mxu1 %v7918_v59  ;;  %v7994_v59 = vld [vmem:[%s10985_s5 + $0x20] ss:$8 sps:$4 sm:$0xff]  }
  0xd7   :  { %1907 = vmatpush1.bf16.msra.mxu0 %v7913_v60  ;;  %v7999_v60 = vld [vmem:[%s10985_s5 + $0x14] ss:$8 sps:$4 sm:$0xff]  }
  0xd8   :  { %1948 = vmatpush1.bf16.msra.mxu1 %v7916_v62  ;;  %1908 = vmatprep.subr.bf16.mxu0 %v7921_v63  ;;  %v7997_v62 = vld [vmem:[%s10985_s5 + $0x10] ss:$8 sps:$4 sm:$0xff]   ;;  %v8002_v63 = vld [vmem:[%s10985_s5 + $0x4] ss:$8 sps:$4 sm:$0xff]  }
  0xd9   :  { %1949 = vmatprep.subr.bf16.mxu1 %v7924_v0  ;;  %v8000_v0 = vld [vmem:[%s10985_s5] ss:$8 sps:$4 sm:$0xff]  }
  0xdb   :  { %1909 = vmatpush1.bf16.msra.mxu0 %v7919_v1  ;;  %v8005_v1 = vld [vmem:[%s10985_s5 + $0xf4] ss:$8 sps:$4 sm:$0xff]  }
  0xdc   :  { %1950 = vmatpush1.bf16.msra.mxu1 %v7922_v2  ;;  %1910 = vmatprep.subr.bf16.mxu0 %v7927_v4  ;;  %v8003_v2 = vld [vmem:[%s10985_s5 + $0xf0] ss:$8 sps:$4 sm:$0xff]   ;;  %v8008_v4 = vld [vmem:[%s10985_s5 + $0xe4] ss:$8 sps:$4 sm:$0xff]  }
  0xdd   :  { %1951 = vmatprep.subr.bf16.mxu1 %v7930_v5  ;;  %v8006_v5 = vld [vmem:[%s10985_s5 + $0xe0] ss:$8 sps:$4 sm:$0xff]  }
  0xdf   :  { %1911 = vmatpush1.bf16.msra.mxu0 %v7925_v6  ;;  %v8011_v6 = vld [vmem:[%s10985_s5 + $0xd4] ss:$8 sps:$4 sm:$0xff]  }
  0xe0   :  { %1952 = vmatpush1.bf16.msra.mxu1 %v7928_v7  ;;  %1912 = vmatprep.subr.bf16.mxu0 %v7933_v8  ;;  %v8009_v7 = vld [vmem:[%s10985_s5 + $0xd0] ss:$8 sps:$4 sm:$0xff]   ;;  %v8014_v8 = vld [vmem:[%s10985_s5 + $0xc4] ss:$8 sps:$4 sm:$0xff]  }
  0xe1   :  { %1953 = vmatprep.subr.bf16.mxu1 %v7936_v9  ;;  %v8012_v9 = vld [vmem:[%s10985_s5 + $0xc0] ss:$8 sps:$4 sm:$0xff]  }
  0xe3   :  { %1913 = vmatpush2.bf16.msra.mxu0 %v7931_v10  ;;  %v8017_v10 = vld [vmem:[%s10985_s5 + $0xb4] ss:$8 sps:$4 sm:$0xff]  }
  0xe4   :  { %1954 = vmatpush2.bf16.msra.mxu1 %v7934_v11  ;;  %1914 = vmatprep.subr.bf16.mxu0 %v7939_v12  ;;  %v8015_v11 = vld [vmem:[%s10985_s5 + $0xb0] ss:$8 sps:$4 sm:$0xff]   ;;  %v8020_v12 = vld [vmem:[%s10985_s5 + $0xa4] ss:$8 sps:$4 sm:$0xff]  }
  0xe5   :  { %1955 = vmatprep.subr.bf16.mxu1 %v7942_v13  ;;  %v8018_v13 = vld [vmem:[%s10985_s5 + $0xa0] ss:$8 sps:$4 sm:$0xff]  }
  0xe7   :  { %1915 = vmatpush2.bf16.msra.mxu0 %v7937_v16  ;;  %v8023_v16 = vld [vmem:[%s10985_s5 + $0x94] ss:$8 sps:$4 sm:$0xff]  }
  0xe8   :  { %1956 = vmatpush2.bf16.msra.mxu1 %v7940_v17  ;;  %1916 = vmatprep.subr.bf16.mxu0 %v7945_v18  ;;  %v9071_v17 = vsub.s32 0, %v8265_v43  ;;  %v9076_v18 = vld [vmem:[%s10986_s2] sm:$0xf] }
  0xe9   :  { %1957 = vmatprep.subr.bf16.mxu1 %v7948_v19  ;;  %v9079_v19 = vsub.s32 1, %v8265_v43 }
  0xeb   :  { %1917 = vmatpush2.bf16.msra.mxu0 %v7943_v20  ;;  %v8021_v20 = vld [vmem:[%s10985_s5 + $0x90] ss:$8 sps:$4 sm:$0xff]  }
  0xec   :  { %1958 = vmatpush2.bf16.msra.mxu1 %v7946_v21  ;;  %1918 = vmatprep.subr.bf16.mxu0 %v7951_v24  ;;  %v8026_v21 = vld [vmem:[%s10985_s5 + $0x84] ss:$8 sps:$4 sm:$0xff]   ;;  %v353_v24 = vrot.slane %v9076_v18, %v9071_v17 }
  0xed   :  { %1959 = vmatprep.subr.bf16.mxu1 %v7954_v25  ;;  %v357_v25 = vrot.slane %v9076_v18, %v9079_v19 }
  0xef   :  { %1919 = vmatpush2.bf16.msra.mxu0 %v7949_v26  ;;  %v8024_v26 = vld [vmem:[%s10985_s5 + $0x80] ss:$8 sps:$4 sm:$0xff]  }
  0xf0   :  { %1960 = vmatpush2.bf16.msra.mxu1 %v7952_v27  ;;  %1920 = vmatprep.subr.bf16.mxu0 %v7957_v30 }
  0xf1   :  { %1961 = vmatprep.subr.bf16.mxu1 %v7960_v31 }
  0xf3   :  { %1921 = vmatpush2.bf16.msra.mxu0 %v7955_v32 }
  0xf4   :  { %1962 = vmatpush2.bf16.msra.mxu1 %v7958_v33  ;;  %1922 = vmatprep.subr.bf16.mxu0 %v7963_v34 }
  0xf5   :  { %1963 = vmatprep.subr.bf16.mxu1 %v7966_v35 }
  0xf7   :  { %1923 = vmatpush2.bf16.msra.mxu0 %v7961_v38 }
  0xf8   :  { %1964 = vmatpush2.bf16.msra.mxu1 %v7964_v39  ;;  %1924 = vmatprep.subr.bf16.mxu0 %v7969_v14  ;;  %v8029_v14 = vld [vmem:[%s10985_s5 + $0x174] ss:$8 sps:$4 sm:$0xff]  }
  0xf9   :  { %1965 = vmatprep.subr.bf16.mxu1 %v7972_v15 }
  0xfb   :  { %1925 = vmatpush2.bf16.msra.mxu0 %v7967_v40 }
  0xfc   :  { %1966 = vmatpush2.bf16.msra.mxu1 %v7970_v41  ;;  %1926 = vmatprep.subr.bf16.mxu0 %v7975_v42  ;;  %v8027_v41 = vld [vmem:[%s10985_s5 + $0x170] ss:$8 sps:$4 sm:$0xff]  }
  0xfd   :  { %1967 = vmatprep.subr.bf16.mxu1 %v7978_v44 }
  0xff   :  { %1927 = vmatpush2.bf16.msra.mxu0 %v7973_v45 }
 0x100   :  { %1968 = vmatpush2.bf16.msra.mxu1 %v7976_v46  ;;  %2520 = vmatprep.subr.bf16.mxu0 %v7981_v47 }
 0x101   :  { %2561 = vmatprep.subr.bf16.mxu1 %v8029_v14 }
 0x102   :  { %v8982_v48 = vpop.f32.mrf.mxu0  ;;  %1929 = vmatmul.mubr.bf16.vlgmr.msra.gmra.mxu0 %v8581_v36  ;;  %v7985_v36 = vld [vmem:[%s10985_s5 + $0x50] ss:$8 sps:$4 sm:$0xff]  }
 0x103   :  { %v8984_v50 = vpop.f32.mrf.mxu1  ;;  %1970 = vmatmul.mubr.bf16.vlgmr.msra.gmra.mxu1 %v8585_v37  ;;  %2521 = vmatpush1.bf16.msra.mxu0 %v7979_v61  ;;  %v1685_v27 = vadd.f32 %v8982_v48, %v353_v24  ;;  %v8032_v48 = vld [vmem:[%s10985_s5 + $0x164] ss:$8 sps:$4 sm:$0xff]  }
 0x104   :  { %v8991_v23 = vpop.f32.mrf.mxu0  ;;  %2522 = vmatprep.subr.bf16.mxu0 %v7984_v3  ;;  %2562 = vmatpush1.bf16.msra.mxu1 %v8027_v41 }
 0x105   :  { %v8993_v51 = vpop.f32.mrf.mxu1  ;;  %v1687_v30 = vadd.f32 %v8991_v23, %v357_v25  ;;  %v1726_v31 = vadd.f32 %v8984_v50, %v1685_v27  ;;  %2563 = vmatprep.subr.bf16.mxu1 %v8032_v48  ;;  %v8050_v25 = vld [vmem:[%s10985_s5 + $0x104] ss:$8 sps:$4 sm:$0xff]   ;;  %v8065_v48 = vld [vmem:[%s10985_s5 + $0x1b4] ss:$8 sps:$4 sm:$0xff]  }
 0x106   :  { %v1688_v53 = vpop.f32.mrf.mxu0 }
 0x107   :  { %v1729_v54 = vpop.f32.mrf.mxu1  ;;  %2523 = vmatpush1.bf16.msra.mxu0 %v7982_v22  ;;  %v1728_v34 = vadd.f32 %v8993_v51, %v1687_v30  ;;  %v8030_v22 = vld [vmem:[%s10985_s5 + $0x160] ss:$8 sps:$4 sm:$0xff]  }
 0x108   :  { %v1689_v37 = vpop.f32.mrf.mxu0  ;;  %2524 = vmatprep.subr.bf16.mxu0 %v7987_v52  ;;  %2564 = vmatpush1.bf16.msra.mxu1 %v8030_v22  ;;  %v8035_v54 = vld [vmem:[%s10985_s5 + $0x154] ss:$8 sps:$4 sm:$0xff]   ;;  %v8048_v30 = vld [vmem:[%s10985_s5 + $0x100] ss:$8 sps:$4 sm:$0xff]  }
 0x109   :  { %v1730_v28 = vpop.f32.mrf.mxu1  ;;  %2565 = vmatprep.subr.bf16.mxu1 %v8035_v54  ;;  %v9196_v22 = vld [vmem:[%s10988_s4] sm:$0xf] }
 0x10b   :  { %2525 = vmatpush1.bf16.msra.mxu0 %v7985_v36  ;;  %v8033_v36 = vld [vmem:[%s10985_s5 + $0x150] ss:$8 sps:$4 sm:$0xff]  }
 0x10c   :  { %2526 = vmatprep.subr.bf16.mxu0 %v7990_v29  ;;  %2566 = vmatpush1.bf16.msra.mxu1 %v8033_v36  ;;  %v2095_v36 = vrot.slane %v9196_v22, %v9071_v17 }
 0x10f   :  { %2527 = vmatpush1.bf16.msra.mxu0 %v7988_v55 }
 0x110   :  { %2528 = vmatprep.subr.bf16.mxu0 %v7993_v56  ;;  %v8038_v56 = vld [vmem:[%s10985_s5 + $0x144] ss:$8 sps:$4 sm:$0xff]  }
 0x111   :  { %2567 = vmatprep.subr.bf16.mxu1 %v8038_v56  ;;  %v2099_v56 = vrot.slane %v9196_v22, %v9079_v19 }
 0x113   :  { %2529 = vmatpush1.bf16.msra.mxu0 %v7991_v57  ;;  %v8036_v57 = vld [vmem:[%s10985_s5 + $0x140] ss:$8 sps:$4 sm:$0xff]  }
 0x114   :  { %2530 = vmatprep.subr.bf16.mxu0 %v7996_v58  ;;  %2568 = vmatpush1.bf16.msra.mxu1 %v8036_v57  ;;  %v8071_v57 = vld [vmem:[%s10985_s5 + $0x194] ss:$8 sps:$4 sm:$0xff]  }
 0x117   :  { %2531 = vmatpush1.bf16.msra.mxu0 %v7994_v59 }
 0x118   :  { %2532 = vmatprep.subr.bf16.mxu0 %v7999_v60 }
 0x11b   :  { %2533 = vmatpush1.bf16.msra.mxu0 %v7997_v62 }
 0x11c   :  { %2534 = vmatprep.subr.bf16.mxu0 %v8002_v63  ;;  %v8041_v63 = vld [vmem:[%s10985_s5 + $0x134] ss:$8 sps:$4 sm:$0xff]  }
 0x11d   :  { %2569 = vmatprep.subr.bf16.mxu1 %v8041_v63 }
 0x11f   :  { %2535 = vmatpush1.bf16.msra.mxu0 %v8000_v0  ;;  %v8039_v0 = vld [vmem:[%s10985_s5 + $0x130] ss:$8 sps:$4 sm:$0xff]  }
 0x120   :  { %2536 = vmatprep.subr.bf16.mxu0 %v8005_v1  ;;  %2570 = vmatpush1.bf16.msra.mxu1 %v8039_v0  ;;  %v8072_v0 = vld [vmem:[%s10985_s5 + $0x180] ss:$8 sps:$4 sm:$0xff]  }
 0x123   :  { %2537 = vmatpush2.bf16.msra.mxu0 %v8003_v2 }
 0x124   :  { %2538 = vmatprep.subr.bf16.mxu0 %v8008_v4 }
 0x127   :  { %2539 = vmatpush2.bf16.msra.mxu0 %v8006_v5 }
 0x128   :  { %2540 = vmatprep.subr.bf16.mxu0 %v8011_v6  ;;  %v8044_v6 = vld [vmem:[%s10985_s5 + $0x124] ss:$8 sps:$4 sm:$0xff]  }
 0x129   :  { %2571 = vmatprep.subr.bf16.mxu1 %v8044_v6 }
 0x12b   :  { %2541 = vmatpush2.bf16.msra.mxu0 %v8009_v7  ;;  %v8042_v7 = vld [vmem:[%s10985_s5 + $0x120] ss:$8 sps:$4 sm:$0xff]  }
 0x12c   :  { %2542 = vmatprep.subr.bf16.mxu0 %v8014_v8  ;;  %2572 = vmatpush1.bf16.msra.mxu1 %v8042_v7 }
 0x12f   :  { %2543 = vmatpush2.bf16.msra.mxu0 %v8012_v9 }
 0x130   :  { %2544 = vmatprep.subr.bf16.mxu0 %v8017_v10 }
 0x133   :  { %2545 = vmatpush2.bf16.msra.mxu0 %v8015_v11 }
 0x134   :  { %2546 = vmatprep.subr.bf16.mxu0 %v8020_v12  ;;  %v8047_v12 = vld [vmem:[%s10985_s5 + $0x114] ss:$8 sps:$4 sm:$0xff]  }
 0x135   :  { %2573 = vmatprep.subr.bf16.mxu1 %v8047_v12 }
 0x137   :  { %2547 = vmatpush2.bf16.msra.mxu0 %v8018_v13 }
 0x138   :  { %2548 = vmatprep.subr.bf16.mxu0 %v8023_v16 }
 0x13b   :  { %2549 = vmatpush2.bf16.msra.mxu0 %v8021_v20  ;;  %v8045_v20 = vld [vmem:[%s10985_s5 + $0x110] ss:$8 sps:$4 sm:$0xff]  }
 0x13c   :  { %2550 = vmatprep.subr.bf16.mxu0 %v8026_v21  ;;  %2574 = vmatpush1.bf16.msra.mxu1 %v8045_v20  ;;  %v9230_v20 = vsub.s32 3, %v8265_v43 }
 0x13d   :  { %2575 = vmatprep.subr.bf16.mxu1 %v8050_v25 }
 0x13f   :  { %2551 = vmatpush2.bf16.msra.mxu0 %v8024_v26 }
 0x140   :  { %2576 = vmatpush1.bf16.msra.mxu1 %v8048_v30 }
 0x142   :  { %v1766_v32 = vpop.f32.mrf.mxu0 }
 0x143   :  { %v1807_v33 = vpop.f32.mrf.mxu1  ;;  %v1767_v35 = vadd.f32 %v1766_v32, %v1726_v31 }
 0x144   :  { %v1768_v38 = vpop.f32.mrf.mxu0 }
 0x145   :  { %v1809_v39 = vpop.f32.mrf.mxu1  ;;  %v1808_v15 = vadd.f32 %v1807_v33, %v1767_v35  ;;  %v1769_v40 = vadd.f32 %v1768_v38, %v1728_v34  ;;  %v8053_v33 = vld [vmem:[%s10985_s5 + $0x1f4] ss:$8 sps:$4 sm:$0xff]   ;;  %v8051_v38 = vld [vmem:[%s10985_s5 + $0x1f0] ss:$8 sps:$4 sm:$0xff]  }
 0x146   :  { %v1770_v42 = vpop.f32.mrf.mxu0  ;;  %2577 = vmatprep.subr.bf16.mxu1 %v8053_v33 }
 0x147   :  { %v1811_v44 = vpop.f32.mrf.mxu1  ;;  %v1979_v45 = vsel %vm1978_vm0, %v1808_v15, 0.0  ;;  %v1810_v46 = vadd.f32 %v1809_v39, %v1769_v40  ;;  %2578 = vmatpush2.bf16.msra.mxu1 %v8051_v38  ;;  %v8054_v42 = vld [vmem:[%s10985_s5 + $0x1e0] ss:$8 sps:$4 sm:$0xff]  }
 0x148   :  { %v1980_v47 = vrot.slane %v1979_v45, 4  ;;  %v1771_v61 = vpop.f32.mrf.mxu0 }
 0x149   :  { %v1812_v3 = vpop.f32.mrf.mxu1  ;;  %v1986_v50 = vsel %vm1978_vm0, %v1810_v46, 0.0  ;;  %v8060_v61 = vld [vmem:[%s10985_s5 + $0x1c0] ss:$8 sps:$4 sm:$0xff]  }
 0x14a   :  { %v1981_v23 = vadd.f32 %v1980_v47, %v1979_v45  ;;  %v1987_v51 = vrot.slane %v1986_v50, 4  ;;  %v8059_v45 = vld [vmem:[%s10985_s5 + $0x1d4] ss:$8 sps:$4 sm:$0xff]   ;;  %v8062_v47 = vld [vmem:[%s10985_s5 + $0x1c4] ss:$8 sps:$4 sm:$0xff]  }
 0x14b   :  { %v9185_v3 = vld [vmem:[%s10987_s3] sm:$0xf] }
 0x14c   :  { %v1982_v52 = vrot.slane %v1981_v23, 2  ;;  %v1988_v53 = vadd.f32 %v1987_v51, %v1986_v50  ;;  %v8063_v50 = vld [vmem:[%s10985_s5 + $0x1b0] ss:$8 sps:$4 sm:$0xff]   ;;  %v2073_v54 = vrot.slane %v9185_v3, %v9079_v19 }
 0x14e   :  { %v1983_v37 = vadd.f32 %v1982_v52, %v1981_v23  ;;  %v1989_v28 = vrot.slane %v1988_v53, 2  ;;  %v2069_v23 = vrot.slane %v9185_v3, %v9071_v17  ;;  %v8068_v52 = vld [vmem:[%s10985_s5 + $0x1a4] ss:$8 sps:$4 sm:$0xff]  }
 0x150   :  { %v1984_v29 = vrot.slane %v1983_v37, 1  ;;  %v1990_v55 = vadd.f32 %v1989_v28, %v1988_v53 }
 0x152   :  { %v1985_v58 = vadd.f32 %v1984_v29, %v1983_v37  ;;  %v1991_v59 = vrot.slane %v1990_v55, 1  ;;  %v8066_v37 = vld [vmem:[%s10985_s5 + $0x1a0] ss:$8 sps:$4 sm:$0xff]  }
 0x154   :  { %v2008_v60 = vmul.f32 0.5, %v1985_v58  ;;  %v1992_v62 = vadd.f32 %v1991_v59, %v1990_v55 }
 0x156   :  { %v9130_v1 = vsub.f32 %v1808_v15, %v2008_v60  ;;  %v2009_v2 = vmul.f32 0.5, %v1992_v62  ;;  %v8056_v15 = vld [vmem:[%s10985_s5 + $0x1e4] ss:$8 sps:$4 sm:$0xff]   ;;  %v8069_v60 = vld [vmem:[%s10985_s5 + $0x190] ss:$8 sps:$4 sm:$0xff]  }
 0x157   :  { %2579 = vmatprep.subr.bf16.mxu1 %v8056_v15  ;;  %v8074_v62 = vld [vmem:[%s10985_s5 + $0x184] ss:$8 sps:$4 sm:$0xff]  }
 0x158   :  { %v2016_v4 = vmul.f32 %v9130_v1, %v9130_v1  ;;  %v9134_v5 = vsub.f32 %v1810_v46, %v2009_v2  ;;  %2580 = vmatpush2.bf16.msra.mxu1 %v8054_v42  ;;  %v8057_v46 = vld [vmem:[%s10985_s5 + $0x1d0] ss:$8 sps:$4 sm:$0xff]  }
 0x159   :  { %2581 = vmatprep.subr.bf16.mxu1 %v8059_v45 }
 0x15a   :  { %v2020_v8 = vsel %vm1978_vm0, %v2016_v4, 0.0  ;;  %v2017_v9 = vmul.f32 %v9134_v5, %v9134_v5 }
 0x15b   :  { %v2021_v10 = vrot.slane %v2020_v8, 4 }
 0x15c   :  { %v2027_v11 = vsel %vm1978_vm0, %v2017_v9, 0.0  ;;  %2582 = vmatpush2.bf16.msra.mxu1 %v8057_v46 }
 0x15d   :  { %v2022_v13 = vadd.f32 %v2021_v10, %v2020_v8  ;;  %v2028_v16 = vrot.slane %v2027_v11, 4  ;;  %2583 = vmatprep.subr.bf16.mxu1 %v8062_v47 }
 0x15f   :  { %v2023_v21 = vrot.slane %v2022_v13, 2  ;;  %v2029_v24 = vadd.f32 %v2028_v16, %v2027_v11  ;;  %v9227_v16 = vsub.s32 2, %v8265_v43 }
 0x160   :  { %2584 = vmatpush2.bf16.msra.mxu1 %v8060_v61 }
 0x161   :  { %v2024_v26 = vadd.f32 %v2023_v21, %v2022_v13  ;;  %v2030_v27 = vrot.slane %v2029_v24, 2  ;;  %2585 = vmatprep.subr.bf16.mxu1 %v8065_v48  ;;  %v361_v21 = vrot.slane %v9076_v18, %v9227_v16 }
 0x163   :  { %v2025_v31 = vrot.slane %v2024_v26, 1  ;;  %v2031_v32 = vadd.f32 %v2030_v27, %v2029_v24  ;;  %v365_v24 = vrot.slane %v9076_v18, %v9230_v20 }
 0x164   :  { %2586 = vmatpush2.bf16.msra.mxu1 %v8063_v50 }
 0x165   :  { %v2026_v34 = vadd.f32 %v2025_v31, %v2024_v26  ;;  %v2032_v35 = vrot.slane %v2031_v32, 1  ;;  %2587 = vmatprep.subr.bf16.mxu1 %v8068_v52 }
 0x167   :  { %v2048_v39 = vmul.f32 0.5, %v2026_v34  ;;  %v2033_v14 = vadd.f32 %v2032_v35, %v2031_v32 }
 0x168   :  { %2588 = vmatpush2.bf16.msra.mxu1 %v8066_v37 }
 0x169   :  { %v2052_v40 = vadd.f32 1e-05, %v2048_v39  ;;  %v2049_v41 = vmul.f32 0.5, %v2033_v14  ;;  %2589 = vmatprep.subr.bf16.mxu1 %v8071_v57 }
 0x16b   :  { %8075 = vrsqrt.f32 %v2052_v40  ;;  %v2053_v44 = vadd.f32 1e-05, %v2049_v41 }
 0x16c   :  { %2590 = vmatpush2.bf16.msra.mxu1 %v8069_v60 }
 0x16d   :  { %8077 = vrsqrt.f32 %v2053_v44  ;;  %2591 = vmatprep.subr.bf16.mxu1 %v8074_v62 }
 0x170   :  { %2592 = vmatpush2.bf16.msra.mxu1 %v8072_v0 }
 0x178   :  { %v8076_v51 = vpop.eup %8075 }
 0x179   :  { %v2060_v53 = vmul.f32 %v8076_v51, %v9130_v1 }
 0x17a   :  { %v8078_v28 = vpop.eup %8077 }
 0x17b   :  { %v2086_v29 = vmul.f32 %v2069_v23, %v2060_v53  ;;  %v2061_v55 = vmul.f32 %v8078_v28, %v9134_v5 }
 0x17d   :  { %v2087_v58 = vmul.f32 %v2073_v54, %v2061_v55  ;;  %v2112_v59 = vadd.f32 %v2095_v36, %v2086_v29 }
 0x17f   :  { %v2113_v63 = vadd.f32 %v2099_v56, %v2087_v58  ;;  %v2116_v1 = vmax.f32 %v2112_v59, 0.0 }
 0x181   :  { %v2117_v2 = vmax.f32 %v2113_v63, 0.0  ;;  %v2120_v9 = vpack.c.bf16 %v2116_v1, %v2116_v1 }
 0x182   :  { %v1848_v4 = vpop.f32.mrf.mxu0 }
 0x183   :  { %v1889_v5 = vpop.f32.mrf.mxu1  ;;  %v2121_v6 = vpack.c.bf16 %v2117_v2, %v2117_v2  ;;  %v1849_v25 = vadd.f32 %v1848_v4, %v361_v21  ;;  %v2077_v21 = vrot.slane %v9185_v3, %v9227_v16 }
 0x184   :  { %v1850_v7 = vpop.f32.mrf.mxu0 }
 0x185   :  { %v1891_v8 = vpop.f32.mrf.mxu1  ;;  %2552 = vmatprep.mubr.bf16.mxu0 %v2121_v6  ;;  %v1851_v26 = vadd.f32 %v1850_v7, %v365_v24  ;;  %v1890_v27 = vadd.f32 %v1889_v5, %v1849_v25 }
 0x186   :  { %v1852_v10 = vpop.f32.mrf.mxu0  ;;  %2553 = vmatmul.mubr.bf16.vlgmr.msra.gmra.mxu0 %v2120_v9 }
 0x187   :  { %v1893_v11 = vpop.f32.mrf.mxu1  ;;  %v1892_v32 = vadd.f32 %v1891_v8, %v1851_v26  ;;  %v2081_v26 = vrot.slane %v9185_v3, %v9230_v20  ;;  %v2900_v3 = vld [vmem:[%s10989_s9 + $0x700] sm:$0xff] }
 0x188   :  { %v1853_v12 = vpop.f32.mrf.mxu0 }
 0x189   :  { %v1894_v13 = vpop.f32.mrf.mxu1 }
 0x1c2   :  { %v1930_v30 = vpop.f32.mrf.mxu0 }
 0x1c3   :  { %v1971_v31 = vpop.f32.mrf.mxu1  ;;  %v1931_v33 = vadd.f32 %v1930_v30, %v1890_v27  ;;  %v2103_v27 = vrot.slane %v9196_v22, %v9227_v16 }
 0x1c4   :  { %v1932_v34 = vpop.f32.mrf.mxu0 }
 0x1c5   :  { %v1973_v35 = vpop.f32.mrf.mxu1  ;;  %v1972_v38 = vadd.f32 %v1971_v31, %v1931_v33  ;;  %v1933_v39 = vadd.f32 %v1932_v34, %v1892_v32  ;;  %v2107_v33 = vrot.slane %v9196_v22, %v9230_v20  ;;  %v2901_v22 = vld [vmem:[%s10989_s9 + $0x708] sm:$0xff] }
 0x1c6   :  { %v1934_v14 = vpop.f32.mrf.mxu0 }
 0x1c7   :  { %v1975_v15 = vpop.f32.mrf.mxu1  ;;  %v1993_v40 = vsel %vm1978_vm0, %v1972_v38, 0.0  ;;  %v1974_v41 = vadd.f32 %v1973_v35, %v1933_v39 }
 0x1c8   :  { %v1994_v42 = vrot.slane %v1993_v40, 4  ;;  %v1935_v44 = vpop.f32.mrf.mxu0 }
 0x1c9   :  { %v1976_v45 = vpop.f32.mrf.mxu1  ;;  %v2000_v18 = vsel %vm1978_vm0, %v1974_v41, 0.0  ;;  %v2917_v44 = vld [vmem:[%s10989_s9 + $0x788] sm:$0xff] }
 0x1ca   :  { %v1995_v46 = vadd.f32 %v1994_v42, %v1993_v40  ;;  %v2001_v47 = vrot.slane %v2000_v18, 4 }
 0x1cc   :  { %v1996_v61 = vrot.slane %v1995_v46, 2  ;;  %v2002_v48 = vadd.f32 %v2001_v47, %v2000_v18  ;;  %v7307_v47 = vcombine.high %v2901_v22, %v2917_v44 }
 0x1ce   :  { %v1997_v50 = vadd.f32 %v1996_v61, %v1995_v46  ;;  %v2003_v23 = vrot.slane %v2002_v48, 2  ;;  %v7306_v46 = vcombine.low %v2901_v22, %v2917_v44  ;;  %5957 = vmatprep.subr.bf16.mxu1 %v7307_v47  ;;  %v2676_v22 = vld [vmem:[%s10989_s9] sm:$0xff]  ;;  %v2677_v44 = vld [vmem:[%s10989_s9 + $0x8] sm:$0xff] }
 0x1d0   :  { %v1998_v51 = vrot.slane %v1997_v50, 1  ;;  %v2004_v52 = vadd.f32 %v2003_v23, %v2002_v48  ;;  %v2868_v48 = vld [vmem:[%s10989_s9 + $0x600] sm:$0xff]  ;;  %v2869_v23 = vld [vmem:[%s10989_s9 + $0x608] sm:$0xff] }
 0x1d2   :  { %v1999_v53 = vadd.f32 %v1998_v51, %v1997_v50  ;;  %v2005_v54 = vrot.slane %v2004_v52, 1  ;;  %v2884_v50 = vld [vmem:[%s10989_s9 + $0x680] sm:$0xff] }
 0x1d3   :  { %v7273_v51 = vcombine.high %v2868_v48, %v2884_v50 }
 0x1d4   :  { %v2010_v36 = vmul.f32 0.5, %v1999_v53  ;;  %v2006_v37 = vadd.f32 %v2005_v54, %v2004_v52  ;;  %v2885_v52 = vld [vmem:[%s10989_s9 + $0x688] sm:$0xff]  ;;  %v7272_v54 = vcombine.low %v2868_v48, %v2884_v50 }
 0x1d6   :  { %v2014_v28 = vsub.f32 %v1972_v38, %v2010_v36  ;;  %v2011_v29 = vmul.f32 0.5, %v2006_v37  ;;  %v7274_v36 = vcombine.low %v2869_v23, %v2885_v52  ;;  %v7275_v37 = vcombine.high %v2869_v23, %v2885_v52  ;;  %v3156_v23 = vld [vmem:[%s10989_s9 + $0xf00] sm:$0xff]  ;;  %v3157_v52 = vld [vmem:[%s10989_s9 + $0xf08] sm:$0xff] }
 0x1d8   :  { %v2018_v55 = vmul.f32 %v2014_v28, %v2014_v28  ;;  %v2015_v56 = vsub.f32 %v1974_v41, %v2011_v29  ;;  %v2916_v41 = vld [vmem:[%s10989_s9 + $0x780] sm:$0xff] }
 0x1d9   :  { %v7305_v42 = vcombine.high %v2900_v3, %v2916_v41  ;;  %v7304_v18 = vcombine.low %v2900_v3, %v2916_v41  ;;  %v2836_v29 = vld [vmem:[%s10989_s9 + $0x500] sm:$0xff] }
 0x1da   :  { %v2034_v57 = vsel %vm1978_vm0, %v2018_v55, 0.0  ;;  %v2019_v58 = vmul.f32 %v2015_v56, %v2015_v56  ;;  %v2852_v55 = vld [vmem:[%s10989_s9 + $0x580] sm:$0xff] }
 0x1db   :  { %v2035_v59 = vrot.slane %v2034_v57, 4  ;;  %5916 = vmatprep.subr.bf16.mxu0 %v7305_v42  ;;  %v2692_v42 = vld [vmem:[%s10989_s9 + $0x80] sm:$0xff] }
 0x1dc   :  { %v2041_v60 = vsel %vm1978_vm0, %v2019_v58, 0.0  ;;  %5917 = vmatpush1.bf16.msra.mxu0 %v7304_v18  ;;  %v2853_v58 = vld [vmem:[%s10989_s9 + $0x588] sm:$0xff]  ;;  %v7081_v18 = vcombine.high %v2676_v22, %v2692_v42  ;;  %v7080_v47 = vcombine.low %v2676_v22, %v2692_v42  ;;  %v2964_v22 = vld [vmem:[%s10989_s9 + $0x900] sm:$0xff] }
 0x1dd   :  { %v2036_v62 = vadd.f32 %v2035_v59, %v2034_v57  ;;  %v2042_v63 = vrot.slane %v2041_v60, 4  ;;  %5918 = vmatprep.subr.bf16.mxu0 %v7273_v51  ;;  %v7241_v57 = vcombine.high %v2836_v29, %v2852_v55  ;;  %v7240_v59 = vcombine.low %v2836_v29, %v2852_v55  ;;  %v3172_v51 = vld [vmem:[%s10989_s9 + $0xf80] sm:$0xff] }
 0x1de   :  { %v3124_v29 = vld [vmem:[%s10989_s9 + $0xe00] sm:$0xff] }
 0x1df   :  { %v2037_v0 = vrot.slane %v2036_v62, 2  ;;  %v2043_v1 = vadd.f32 %v2042_v63, %v2041_v60  ;;  %v2804_v63 = vld [vmem:[%s10989_s9 + $0x400] sm:$0xff] }
 0x1e0   :  { %5919 = vmatpush1.bf16.msra.mxu0 %v7272_v54  ;;  %v3173_v54 = vld [vmem:[%s10989_s9 + $0xf88] sm:$0xff]  ;;  %v3140_v55 = vld [vmem:[%s10989_s9 + $0xe80] sm:$0xff] }
 0x1e1   :  { %v2038_v2 = vadd.f32 %v2037_v0, %v2036_v62  ;;  %v2044_v4 = vrot.slane %v2043_v1, 2  ;;  %5920 = vmatprep.subr.bf16.mxu0 %v7241_v57  ;;  %v2820_v0 = vld [vmem:[%s10989_s9 + $0x480] sm:$0xff]  ;;  %v7529_v57 = vcombine.high %v3124_v29, %v3140_v55 }
 0x1e2   :  { %v2980_v42 = vld [vmem:[%s10989_s9 + $0x980] sm:$0xff] }
 0x1e3   :  { %v2039_v5 = vrot.slane %v2038_v2, 1  ;;  %v2045_v6 = vadd.f32 %v2044_v4, %v2043_v1  ;;  %v2805_v1 = vld [vmem:[%s10989_s9 + $0x408] sm:$0xff] }
 0x1e4   :  { %5921 = vmatpush1.bf16.msra.mxu0 %v7240_v59  ;;  %v2821_v4 = vld [vmem:[%s10989_s9 + $0x488] sm:$0xff]  ;;  %v7528_v59 = vcombine.low %v3124_v29, %v3140_v55  ;;  %v9447_v29 = vld [vmem:[%s10989_s9 + $0x710] sm:$0xff] }
 0x1e5   :  { %v2040_v7 = vadd.f32 %v2039_v5, %v2038_v2  ;;  %v2046_v8 = vrot.slane %v2045_v6, 1  ;;  %v7209_v2 = vcombine.high %v2804_v63, %v2820_v0  ;;  %v7208_v5 = vcombine.low %v2804_v63, %v2820_v0  ;;  %v3092_v63 = vld [vmem:[%s10989_s9 + $0xd00] sm:$0xff]  ;;  %v9452_v55 = vld [vmem:[%s10989_s9 + $0x790] sm:$0xff] }
 0x1e6   :  { %v3108_v0 = vld [vmem:[%s10989_s9 + $0xd80] sm:$0xff] }
 0x1e7   :  { %v2050_v9 = vmul.f32 0.5, %v2040_v7  ;;  %v2047_v10 = vadd.f32 %v2046_v8, %v2045_v6  ;;  %v7210_v6 = vcombine.low %v2805_v1, %v2821_v4  ;;  %v7211_v7 = vcombine.high %v2805_v1, %v2821_v4  ;;  %5922 = vmatprep.subr.bf16.mxu0 %v7209_v2  ;;  %v2772_v8 = vld [vmem:[%s10989_s9 + $0x300] sm:$0xff]  ;;  %v3093_v1 = vld [vmem:[%s10989_s9 + $0xd08] sm:$0xff] }
 0x1e8   :  { %5923 = vmatpush1.bf16.msra.mxu0 %v7208_v5  ;;  %v7497_v2 = vcombine.high %v3092_v63, %v3108_v0  ;;  %v3109_v4 = vld [vmem:[%s10989_s9 + $0xd88] sm:$0xff]  ;;  %v7496_v5 = vcombine.low %v3092_v63, %v3108_v0  ;;  %v2188_v63 = vld [vmem:[%s10990_s6] sm:$0x3] }
 0x1e9   :  { %v2054_v11 = vadd.f32 1e-05, %v2050_v9  ;;  %v2051_v12 = vmul.f32 0.5, %v2047_v10  ;;  %v2788_v9 = vld [vmem:[%s10989_s9 + $0x380] sm:$0xff]  ;;  %v2773_v10 = vld [vmem:[%s10989_s9 + $0x308] sm:$0xff]  ;;  %v2193_v0 = vrot.slane %v2188_v63, %v9071_v17 }
 0x1eb   :  { %8079 = vrsqrt.f32 %v2054_v11  ;;  %v2055_v13 = vadd.f32 1e-05, %v2051_v12  ;;  %v7177_v11 = vcombine.high %v2772_v8, %v2788_v9  ;;  %v2789_v12 = vld [vmem:[%s10989_s9 + $0x388] sm:$0xff] }
 0x1ed   :  { %8081 = vrsqrt.f32 %v2055_v13  ;;  %v7176_v13 = vcombine.low %v2772_v8, %v2788_v9  ;;  %5924 = vmatprep.subr.bf16.mxu0 %v7177_v11  ;;  %v3060_v8 = vld [vmem:[%s10989_s9 + $0xc00] sm:$0xff] }
 0x1ee   :  { %v3076_v9 = vld [vmem:[%s10989_s9 + $0xc80] sm:$0xff] }
 0x1ef   :  { %5925 = vmatpush1.bf16.msra.mxu0 %v7176_v13  ;;  %v7465_v11 = vcombine.high %v3060_v8, %v3076_v9  ;;  %v7464_v13 = vcombine.low %v3060_v8, %v3076_v9 }
 0x1f8   :  { %v8080_v24 = vpop.eup %8079 }
 0x1f9   :  { %v2062_v25 = vmul.f32 %v8080_v24, %v2014_v28  ;;  %v7179_v24 = vcombine.high %v2773_v10, %v2789_v12 }
 0x1fa   :  { %v8082_v30 = vpop.eup %8081 }
 0x1fb   :  { %v2088_v31 = vmul.f32 %v2077_v21, %v2062_v25  ;;  %v2063_v32 = vmul.f32 %v8082_v30, %v2015_v56  ;;  %v2837_v56 = vld [vmem:[%s10989_s9 + $0x508] sm:$0xff]  ;;  %v7178_v21 = vcombine.low %v2773_v10, %v2789_v12  ;;  %v2740_v25 = vld [vmem:[%s10989_s9 + $0x200] sm:$0xff] }
 0x1fc   :  { %v7242_v60 = vcombine.low %v2837_v56, %v2853_v58  ;;  %v7243_v62 = vcombine.high %v2837_v56, %v2853_v58  ;;  %v3125_v56 = vld [vmem:[%s10989_s9 + $0xe08] sm:$0xff] }
 0x1fd   :  { %v2089_v34 = vmul.f32 %v2081_v26, %v2063_v32  ;;  %v2114_v35 = vadd.f32 %v2103_v27, %v2088_v31  ;;  %v2756_v26 = vld [vmem:[%s10989_s9 + $0x280] sm:$0xff]  ;;  %v2741_v27 = vld [vmem:[%s10989_s9 + $0x208] sm:$0xff] }
 0x1fe   :  { %v7145_v30 = vcombine.high %v2740_v25, %v2756_v26  ;;  %v2757_v31 = vld [vmem:[%s10989_s9 + $0x288] sm:$0xff]  ;;  %v7144_v32 = vcombine.low %v2740_v25, %v2756_v26  ;;  %v3028_v25 = vld [vmem:[%s10989_s9 + $0xb00] sm:$0xff] }
 0x1ff   :  { %v2115_v38 = vadd.f32 %v2107_v33, %v2089_v34  ;;  %v2118_v39 = vmax.f32 %v2114_v35, 0.0  ;;  %v7146_v33 = vcombine.low %v2741_v27, %v2757_v31  ;;  %v7147_v34 = vcombine.high %v2741_v27, %v2757_v31  ;;  %v2708_v35 = vld [vmem:[%s10989_s9 + $0x100] sm:$0xff]  ;;  %v3141_v58 = vld [vmem:[%s10989_s9 + $0xe88] sm:$0xff] }
 0x200   :  { %5926 = vmatprep.subr.bf16.mxu0 %v7145_v30  ;;  %v3061_v10 = vld [vmem:[%s10989_s9 + $0xc08] sm:$0xff]  ;;  %v3044_v26 = vld [vmem:[%s10989_s9 + $0xb80] sm:$0xff] }
 0x201   :  { %v2119_v14 = vmax.f32 %v2115_v38, 0.0  ;;  %v2122_v40 = vpack.c.bf16 %v2118_v39, %v2118_v39  ;;  %5927 = vmatpush1.bf16.msra.mxu0 %v7144_v32  ;;  %v2724_v38 = vld [vmem:[%s10989_s9 + $0x180] sm:$0xff]  ;;  %v2709_v39 = vld [vmem:[%s10989_s9 + $0x108] sm:$0xff]  ;;  %v7433_v30 = vcombine.high %v3028_v25, %v3044_v26  ;;  %v7432_v32 = vcombine.low %v3028_v25, %v3044_v26 }
 0x202   :  { %v3077_v12 = vld [vmem:[%s10989_s9 + $0xc88] sm:$0xff] }
 0x203   :  { %v2123_v15 = vpack.c.bf16 %v2119_v14, %v2119_v14  ;;  %v7113_v14 = vcombine.high %v2708_v35, %v2724_v38  ;;  %v3029_v27 = vld [vmem:[%s10989_s9 + $0xb08] sm:$0xff] }
 0x204   :  { %v3045_v31 = vld [vmem:[%s10989_s9 + $0xb88] sm:$0xff] }
 0x205   :  { %2593 = vmatprep.mubr.bf16.mxu1 %v2123_v15  ;;  %v2725_v15 = vld [vmem:[%s10989_s9 + $0x188] sm:$0xff]  ;;  %5928 = vmatprep.subr.bf16.mxu0 %v7113_v14 }
 0x206   :  { %2594 = vmatmul.mubr.bf16.vlgmr.msra.gmra.mxu1 %v2122_v40  ;;  %v7112_v40 = vcombine.low %v2708_v35, %v2724_v38  ;;  %v7114_v3 = vcombine.low %v2709_v39, %v2725_v15  ;;  %v7115_v41 = vcombine.high %v2709_v39, %v2725_v15  ;;  %v2996_v35 = vld [vmem:[%s10989_s9 + $0xa00] sm:$0xff]  ;;  %v2997_v39 = vld [vmem:[%s10989_s9 + $0xa08] sm:$0xff] }
 0x207   :  { %5958 = vmatpush1.bf16.msra.mxu1 %v7306_v46  ;;  %v2693_v46 = vld [vmem:[%s10989_s9 + $0x88] sm:$0xff]  ;;  %v3012_v38 = vld [vmem:[%s10989_s9 + $0xa80] sm:$0xff] }
 0x208   :  { %5959 = vmatprep.subr.bf16.mxu1 %v7275_v37  ;;  %5929 = vmatpush1.bf16.msra.mxu0 %v7112_v40  ;;  %v7082_v48 = vcombine.low %v2677_v44, %v2693_v46  ;;  %v7083_v50 = vcombine.high %v2677_v44, %v2693_v46  ;;  %v7562_v37 = vcombine.low %v3157_v52, %v3173_v54  ;;  %v3013_v15 = vld [vmem:[%s10989_s9 + $0xa88] sm:$0xff] }
 0x209   :  { %5930 = vmatprep.subr.bf16.mxu0 %v7081_v18  ;;  %v7401_v14 = vcombine.high %v2996_v35, %v3012_v38  ;;  %v7400_v40 = vcombine.low %v2996_v35, %v3012_v38  ;;  %v7369_v44 = vcombine.high %v2964_v22, %v2980_v42  ;;  %v2965_v18 = vld [vmem:[%s10989_s9 + $0x908] sm:$0xff] }
 0x20a   :  { %v2981_v46 = vld [vmem:[%s10989_s9 + $0x988] sm:$0xff] }
 0x20b   :  { %5960 = vmatpush1.bf16.msra.mxu1 %v7274_v36  ;;  %v7560_v36 = vcombine.low %v3156_v23, %v3172_v51 }
 0x20c   :  { %5961 = vmatprep.subr.bf16.mxu1 %v7243_v62  ;;  %5931 = vmatpush1.bf16.msra.mxu0 %v7080_v47  ;;  %v7531_v62 = vcombine.high %v3125_v56, %v3141_v58  ;;  %v7368_v47 = vcombine.low %v2964_v22, %v2980_v42 }
 0x20f   :  { %5962 = vmatpush1.bf16.msra.mxu1 %v7242_v60  ;;  %v7530_v60 = vcombine.low %v3125_v56, %v3141_v58  ;;  %v9457_v56 = vld [vmem:[%s10989_s9 + $0x718] sm:$0xff] }
 0x210   :  { %5963 = vmatprep.subr.bf16.mxu1 %v7211_v7  ;;  %v7499_v7 = vcombine.high %v3093_v1, %v3109_v4  ;;  %v9464_v58 = vld [vmem:[%s10989_s9 + $0x798] sm:$0xff] }
 0x213   :  { %5964 = vmatpush1.bf16.msra.mxu1 %v7210_v6  ;;  %v7498_v6 = vcombine.low %v3093_v1, %v3109_v4  ;;  %v2197_v1 = vrot.slane %v2188_v63, %v9079_v19 }
 0x214   :  { %5965 = vmatprep.subr.bf16.mxu1 %v7179_v24  ;;  %v7467_v24 = vcombine.high %v3061_v10, %v3077_v12 }
 0x217   :  { %5966 = vmatpush1.bf16.msra.mxu1 %v7178_v21  ;;  %v7466_v21 = vcombine.low %v3061_v10, %v3077_v12 }
 0x218   :  { %5967 = vmatprep.subr.bf16.mxu1 %v7147_v34  ;;  %v7435_v34 = vcombine.high %v3029_v27, %v3045_v31 }
 0x21b   :  { %5968 = vmatpush1.bf16.msra.mxu1 %v7146_v33  ;;  %v7434_v33 = vcombine.low %v3029_v27, %v3045_v31 }
 0x21c   :  { %5969 = vmatprep.subr.bf16.mxu1 %v7115_v41  ;;  %v7403_v41 = vcombine.high %v2997_v39, %v3013_v15 }
 0x21f   :  { %5970 = vmatpush1.bf16.msra.mxu1 %v7114_v3  ;;  %v7402_v3 = vcombine.low %v2997_v39, %v3013_v15 }
 0x220   :  { %5971 = vmatprep.subr.bf16.mxu1 %v7083_v50  ;;  %v7371_v50 = vcombine.high %v2965_v18, %v2981_v46 }
 0x223   :  { %5972 = vmatpush1.bf16.msra.mxu1 %v7082_v48  ;;  %v7370_v48 = vcombine.low %v2965_v18, %v2981_v46 }
 0x246   :  { %v9260_v45 = vpop.f32.mrf.mxu0 }
 0x248   :  { %v9262_v61 = vpop.f32.mrf.mxu0 }
 0x24a   :  { %v2558_v53 = vpop.f32.mrf.mxu0 }
 0x24b   :  { %v7561_v53 = vcombine.high %v3156_v23, %v3172_v51  ;;  %v2932_v23 = vld [vmem:[%s10989_s9 + $0x800] sm:$0xff] }
 0x24c   :  { %v2559_v28 = vpop.f32.mrf.mxu0  ;;  %v2948_v51 = vld [vmem:[%s10989_s9 + $0x880] sm:$0xff] }
 0x24d   :  { %v7563_v28 = vcombine.high %v3157_v52, %v3173_v54  ;;  %5932 = vmatprep.subr.bf16.mxu0 %v7561_v53  ;;  %v2933_v52 = vld [vmem:[%s10989_s9 + $0x808] sm:$0xff]  ;;  %v7337_v53 = vcombine.high %v2932_v23, %v2948_v51 }
 0x24e   :  { %5933 = vmatpush2.bf16.msra.mxu0 %v7560_v36  ;;  %v2949_v54 = vld [vmem:[%s10989_s9 + $0x888] sm:$0xff]  ;;  %v7336_v36 = vcombine.low %v2932_v23, %v2948_v51 }
 0x24f   :  { %5973 = vmatprep.subr.bf16.mxu1 %v7563_v28  ;;  %5934 = vmatprep.subr.bf16.mxu0 %v7529_v57  ;;  %v7339_v28 = vcombine.high %v2933_v52, %v2949_v54  ;;  %v7309_v57 = vcombine.high %v9447_v29, %v9452_v55 }
 0x250   :  { %5974 = vmatpush2.bf16.msra.mxu1 %v7562_v37  ;;  %v7338_v37 = vcombine.low %v2933_v52, %v2949_v54 }
 0x251   :  { %5975 = vmatprep.subr.bf16.mxu1 %v7531_v62  ;;  %v7311_v62 = vcombine.high %v9457_v56, %v9464_v58 }
 0x252   :  { %5935 = vmatpush2.bf16.msra.mxu0 %v7528_v59  ;;  %v7308_v59 = vcombine.low %v9447_v29, %v9452_v55  ;;  %v2822_v29 = vld [vmem:[%s10989_s9 + $0x490] sm:$0xff]  ;;  %v2807_v55 = vld [vmem:[%s10989_s9 + $0x418] sm:$0xff] }
 0x253   :  { %5936 = vmatprep.subr.bf16.mxu0 %v7497_v2  ;;  %v2555_v2 = vadd.f32 %v9260_v45, %v2193_v0 }
 0x254   :  { %5976 = vmatpush2.bf16.msra.mxu1 %v7530_v60  ;;  %v7310_v60 = vcombine.low %v9457_v56, %v9464_v58  ;;  %v2823_v56 = vld [vmem:[%s10989_s9 + $0x498] sm:$0xff] }
 0x255   :  { %5977 = vmatprep.subr.bf16.mxu1 %v7499_v7 }
 0x256   :  { %5937 = vmatpush2.bf16.msra.mxu0 %v7496_v5  ;;  %v2557_v5 = vadd.f32 %v9262_v61, %v2197_v1 }
 0x257   :  { %5938 = vmatprep.subr.bf16.mxu0 %v7465_v11 }
 0x258   :  { %5978 = vmatpush2.bf16.msra.mxu1 %v7498_v6 }
 0x259   :  { %5979 = vmatprep.subr.bf16.mxu1 %v7467_v24 }
 0x25a   :  { %5939 = vmatpush2.bf16.msra.mxu0 %v7464_v13 }
 0x25b   :  { %5940 = vmatprep.subr.bf16.mxu0 %v7433_v30 }
 0x25c   :  { %5980 = vmatpush2.bf16.msra.mxu1 %v7466_v21 }
 0x25d   :  { %5981 = vmatprep.subr.bf16.mxu1 %v7435_v34 }
 0x25e   :  { %5941 = vmatpush2.bf16.msra.mxu0 %v7432_v32 }
 0x25f   :  { %5942 = vmatprep.subr.bf16.mxu0 %v7401_v14 }
 0x260   :  { %5982 = vmatpush2.bf16.msra.mxu1 %v7434_v33 }
 0x261   :  { %5983 = vmatprep.subr.bf16.mxu1 %v7403_v41 }
 0x262   :  { %5943 = vmatpush2.bf16.msra.mxu0 %v7400_v40 }
 0x263   :  { %5944 = vmatprep.subr.bf16.mxu0 %v7369_v44 }
 0x264   :  { %5984 = vmatpush2.bf16.msra.mxu1 %v7402_v3 }
 0x265   :  { %5985 = vmatprep.subr.bf16.mxu1 %v7371_v50 }
 0x266   :  { %5945 = vmatpush2.bf16.msra.mxu0 %v7368_v47 }
 0x267   :  { %5946 = vmatprep.subr.bf16.mxu0 %v7337_v53 }
 0x268   :  { %5986 = vmatpush2.bf16.msra.mxu1 %v7370_v48 }
 0x269   :  { %5987 = vmatprep.subr.bf16.mxu1 %v7339_v28  ;;  %v2644_v28 = vld [vmem:[%s10991_s7] sm:$0x3] }
 0x26a   :  { %5947 = vmatpush2.bf16.msra.mxu0 %v7336_v36 }
 0x26b   :  { %5998 = vmatprep.subr.bf16.mxu0 %v7309_v57  ;;  %v2658_v57 = vld [vmem:[%s10992_s8] sm:$0x3] }
 0x26c   :  { %5988 = vmatpush2.bf16.msra.mxu1 %v7338_v37  ;;  %v2663_v1 = vrot.slane %v2658_v57, %v9071_v17 }
 0x26d   :  { %6039 = vmatprep.subr.bf16.mxu1 %v7311_v62  ;;  %v2649_v62 = vrot.slane %v2644_v28, %v9071_v17 }
 0x2c6   :  { %v2595_v4 = vpop.f32.mrf.mxu1 }
 0x2c7   :  { %v2596_v6 = vadd.f32 %v2595_v4, %v2555_v2  ;;  %v2653_v2 = vrot.slane %v2644_v28, %v9079_v19  ;;  %v2711_v28 = vld [vmem:[%s10989_s9 + $0x118] sm:$0xff] }
 0x2c8   :  { %v2597_v7 = vpop.f32.mrf.mxu1 }
 0x2c9   :  { %v2602_v8 = vsel %vm1978_vm0, %v2596_v6, 0.0  ;;  %v2598_v9 = vadd.f32 %v2597_v7, %v2557_v5  ;;  %v2667_v7 = vrot.slane %v2658_v57, %v9079_v19  ;;  %v2727_v57 = vld [vmem:[%s10989_s9 + $0x198] sm:$0xff] }
 0x2ca   :  { %v2603_v10 = vrot.slane %v2602_v8, 4  ;;  %v2599_v11 = vpop.f32.mrf.mxu1 }
 0x2cb   :  { %v2609_v12 = vsel %vm1978_vm0, %v2598_v9, 0.0 }
 0x2cc   :  { %v2604_v13 = vadd.f32 %v2603_v10, %v2602_v8  ;;  %v2610_v21 = vrot.slane %v2609_v12, 4  ;;  %v2600_v24 = vpop.f32.mrf.mxu1 }
 0x2cd   :  { %v2871_v24 = vld [vmem:[%s10989_s9 + $0x618] sm:$0xff] }
 0x2ce   :  { %v2605_v25 = vrot.slane %v2604_v13, 2  ;;  %v2611_v26 = vadd.f32 %v2610_v21, %v2609_v12  ;;  %v2886_v21 = vld [vmem:[%s10989_s9 + $0x690] sm:$0xff] }
 0x2d0   :  { %v2606_v27 = vadd.f32 %v2605_v25, %v2604_v13  ;;  %v2612_v30 = vrot.slane %v2611_v26, 2  ;;  %v2870_v13 = vld [vmem:[%s10989_s9 + $0x610] sm:$0xff]  ;;  %v2887_v25 = vld [vmem:[%s10989_s9 + $0x698] sm:$0xff] }
 0x2d2   :  { %v2607_v45 = vrot.slane %v2606_v27, 1  ;;  %v2613_v31 = vadd.f32 %v2612_v30, %v2611_v26  ;;  %v2838_v30 = vld [vmem:[%s10989_s9 + $0x510] sm:$0xff] }
 0x2d4   :  { %v2608_v32 = vadd.f32 %v2607_v45, %v2606_v27  ;;  %v2614_v61 = vrot.slane %v2613_v31, 1  ;;  %v7277_v45 = vcombine.high %v2870_v13, %v2886_v21 }
 0x2d6   :  { %v2616_v33 = vmul.f32 0.5, %v2608_v32  ;;  %v2615_v34 = vadd.f32 %v2614_v61, %v2613_v31  ;;  %v7279_v31 = vcombine.high %v2871_v24, %v2887_v25  ;;  %v2854_v32 = vld [vmem:[%s10989_s9 + $0x590] sm:$0xff]  ;;  %v2839_v61 = vld [vmem:[%s10989_s9 + $0x518] sm:$0xff] }
 0x2d7   :  { %v7244_v58 = vcombine.low %v2838_v30, %v2854_v32 }
 0x2d8   :  { %v2618_v35 = vsub.f32 %v2596_v6, %v2616_v33  ;;  %v2617_v38 = vmul.f32 0.5, %v2615_v34  ;;  %v2855_v33 = vld [vmem:[%s10989_s9 + $0x598] sm:$0xff]  ;;  %v7276_v34 = vcombine.low %v2870_v13, %v2886_v21 }
 0x2d9   :  { %v3159_v13 = vld [vmem:[%s10989_s9 + $0xf18] sm:$0xff] }
 0x2da   :  { %v2620_v39 = vmul.f32 %v2618_v35, %v2618_v35  ;;  %v2619_v14 = vsub.f32 %v2598_v9, %v2617_v38  ;;  %v7245_v38 = vcombine.high %v2838_v30, %v2854_v32  ;;  %v3175_v21 = vld [vmem:[%s10989_s9 + $0xf98] sm:$0xff]  ;;  %v3142_v32 = vld [vmem:[%s10989_s9 + $0xe90] sm:$0xff] }
 0x2dc   :  { %v2622_v15 = vsel %vm1978_vm0, %v2620_v39, 0.0  ;;  %v2621_v40 = vmul.f32 %v2619_v14, %v2619_v14  ;;  %v7247_v39 = vcombine.high %v2839_v61, %v2855_v33 }
 0x2dd   :  { %v2623_v3 = vrot.slane %v2622_v15, 4 }
 0x2de   :  { %v2629_v41 = vsel %vm1978_vm0, %v2621_v40, 0.0  ;;  %v2774_v40 = vld [vmem:[%s10989_s9 + $0x310] sm:$0xff] }
 0x2df   :  { %v2624_v22 = vadd.f32 %v2623_v3, %v2622_v15  ;;  %v2630_v42 = vrot.slane %v2629_v41, 4  ;;  %v7215_v15 = vcombine.high %v2807_v55, %v2823_v56  ;;  %v2790_v3 = vld [vmem:[%s10989_s9 + $0x390] sm:$0xff] }
 0x2e1   :  { %v2625_v44 = vrot.slane %v2624_v22, 2  ;;  %v2631_v18 = vadd.f32 %v2630_v42, %v2629_v41  ;;  %v2775_v41 = vld [vmem:[%s10989_s9 + $0x318] sm:$0xff] }
 0x2e3   :  { %v2626_v46 = vadd.f32 %v2625_v44, %v2624_v22  ;;  %v2632_v47 = vrot.slane %v2631_v18, 2  ;;  %v2791_v22 = vld [vmem:[%s10989_s9 + $0x398] sm:$0xff]  ;;  %v7214_v44 = vcombine.low %v2807_v55, %v2823_v56 }
 0x2e4   :  { %v3095_v55 = vld [vmem:[%s10989_s9 + $0xd18] sm:$0xff] }
 0x2e5   :  { %v2627_v48 = vrot.slane %v2626_v46, 1  ;;  %v2633_v50 = vadd.f32 %v2632_v47, %v2631_v18  ;;  %v7181_v18 = vcombine.high %v2774_v40, %v2790_v3  ;;  %v2742_v47 = vld [vmem:[%s10989_s9 + $0x210] sm:$0xff]  ;;  %v3111_v56 = vld [vmem:[%s10989_s9 + $0xd98] sm:$0xff] }
 0x2e7   :  { %v2628_v23 = vadd.f32 %v2627_v48, %v2626_v46  ;;  %v2634_v51 = vrot.slane %v2633_v50, 1  ;;  %v7183_v46 = vcombine.high %v2775_v41, %v2791_v22  ;;  %v2758_v48 = vld [vmem:[%s10989_s9 + $0x290] sm:$0xff] }
 0x2e9   :  { %v2636_v52 = vmul.f32 0.5, %v2628_v23  ;;  %v2635_v53 = vadd.f32 %v2634_v51, %v2633_v50  ;;  %v2743_v50 = vld [vmem:[%s10989_s9 + $0x218] sm:$0xff]  ;;  %v7180_v51 = vcombine.low %v2774_v40, %v2790_v3  ;;  %v3062_v40 = vld [vmem:[%s10989_s9 + $0xc10] sm:$0xff] }
 0x2ea   :  { %v2759_v23 = vld [vmem:[%s10989_s9 + $0x298] sm:$0xff]  ;;  %v3078_v3 = vld [vmem:[%s10989_s9 + $0xc90] sm:$0xff] }
 0x2eb   :  { %v2638_v54 = vadd.f32 1e-05, %v2636_v52  ;;  %v2637_v36 = vmul.f32 0.5, %v2635_v53  ;;  %v7182_v52 = vcombine.low %v2775_v41, %v2791_v22  ;;  %v7149_v53 = vcombine.high %v2742_v47, %v2758_v48  ;;  %v3063_v41 = vld [vmem:[%s10989_s9 + $0xc18] sm:$0xff] }
 0x2ec   :  { %v3079_v22 = vld [vmem:[%s10989_s9 + $0xc98] sm:$0xff] }
 0x2ed   :  { %8083 = vrsqrt.f32 %v2638_v54  ;;  %v2639_v37 = vadd.f32 1e-05, %v2637_v36  ;;  %v7151_v54 = vcombine.high %v2743_v50, %v2759_v23  ;;  %v2710_v36 = vld [vmem:[%s10989_s9 + $0x110] sm:$0xff] }
 0x2ef   :  { %8085 = vrsqrt.f32 %v2639_v37  ;;  %v2726_v37 = vld [vmem:[%s10989_s9 + $0x190] sm:$0xff] }
 0x2fa   :  { %v8084_v63 = vpop.eup %8083 }
 0x2fb   :  { %v2642_v0 = vmul.f32 %v8084_v63, %v2618_v35  ;;  %v7278_v35 = vcombine.low %v2871_v24, %v2887_v25  ;;  %v7150_v63 = vcombine.low %v2743_v50, %v2759_v23  ;;  %v3031_v50 = vld [vmem:[%s10989_s9 + $0xb18] sm:$0xff] }
 0x2fc   :  { %v8086_v4 = vpop.eup %8085  ;;  %v3047_v23 = vld [vmem:[%s10989_s9 + $0xb98] sm:$0xff] }
 0x2fd   :  { %v2656_v5 = vmul.f32 %v2649_v62, %v2642_v0  ;;  %v2643_v6 = vmul.f32 %v8086_v4, %v2619_v14  ;;  %v2806_v14 = vld [vmem:[%s10989_s9 + $0x410] sm:$0xff]  ;;  %v7148_v62 = vcombine.low %v2742_v47, %v2758_v48  ;;  %v7117_v0 = vcombine.high %v2710_v36, %v2726_v37 }
 0x2fe   :  { %v7212_v42 = vcombine.low %v2806_v14, %v2822_v29  ;;  %v2694_v4 = vld [vmem:[%s10989_s9 + $0x90] sm:$0xff] }
 0x2ff   :  { %v2670_v8 = vadd.f32 %v2663_v1, %v2656_v5  ;;  %v2657_v9 = vmul.f32 %v2653_v2, %v2643_v6  ;;  %v7119_v1 = vcombine.high %v2711_v28, %v2727_v57  ;;  %v2678_v2 = vld [vmem:[%s10989_s9 + $0x10] sm:$0xff]  ;;  %v2679_v5 = vld [vmem:[%s10989_s9 + $0x18] sm:$0xff] }
 0x300   :  { %v2695_v6 = vld [vmem:[%s10989_s9 + $0x98] sm:$0xff]  ;;  %v7084_v24 = vcombine.low %v2678_v2, %v2694_v4  ;;  %v3030_v47 = vld [vmem:[%s10989_s9 + $0xb10] sm:$0xff] }
 0x301   :  { %v2671_v10 = vadd.f32 %v2667_v7, %v2657_v9  ;;  %v2672_v11 = vmax.f32 %v2670_v8, 0.0  ;;  %v7116_v7 = vcombine.low %v2710_v36, %v2726_v37  ;;  %v7118_v8 = vcombine.low %v2711_v28, %v2727_v57  ;;  %v3046_v48 = vld [vmem:[%s10989_s9 + $0xb90] sm:$0xff]  ;;  %v2999_v28 = vld [vmem:[%s10989_s9 + $0xa18] sm:$0xff] }
 0x302   :  { %v7085_v9 = vcombine.high %v2678_v2, %v2694_v4  ;;  %v7086_v25 = vcombine.low %v2679_v5, %v2695_v6  ;;  %v2998_v36 = vld [vmem:[%s10989_s9 + $0xa10] sm:$0xff]  ;;  %v3015_v57 = vld [vmem:[%s10989_s9 + $0xa98] sm:$0xff] }
 0x303   :  { %v2673_v12 = vmax.f32 %v2671_v10, 0.0  ;;  %v9507_v27 = vpack.c.bf16 %v2672_v11, %v2672_v11  ;;  %v7087_v10 = vcombine.high %v2679_v5, %v2695_v6  ;;  %v3158_v11 = vld [vmem:[%s10989_s9 + $0xf10] sm:$0xff]  ;;  %v2967_v5 = vld [vmem:[%s10989_s9 + $0x918] sm:$0xff] }
 0x304   :  { %v3014_v37 = vld [vmem:[%s10989_s9 + $0xa90] sm:$0xff]  ;;  %v2983_v6 = vld [vmem:[%s10989_s9 + $0x998] sm:$0xff] }
 0x305   :  { %v9505_v26 = vpack.c.bf16 %v2673_v12, %v2673_v12  ;;  %v3174_v12 = vld [vmem:[%s10989_s9 + $0xf90] sm:$0xff] }
 0x306   :  { %v7565_v30 = vcombine.high %v3158_v11, %v3174_v12  ;;  %v2966_v2 = vld [vmem:[%s10989_s9 + $0x910] sm:$0xff] }
 0x307   :  { %5948 = vmatprep.mubr.bf16.mxu0 %v9505_v26  ;;  %5989 = vmatprep.mubr.bf16.mxu1 %v9505_v26  ;;  %v2982_v4 = vld [vmem:[%s10989_s9 + $0x990] sm:$0xff] }
 0x308   :  { %5949 = vmatmul.mubr.bf16.vlgmr.msra.gmra.mxu0 %v9507_v27  ;;  %5990 = vmatmul.mubr.bf16.vlgmr.msra.gmra.mxu1 %v9507_v27 }
 0x309   :  { %5999 = vmatpush1.bf16.msra.mxu0 %v7308_v59  ;;  %6040 = vmatpush1.bf16.msra.mxu1 %v7310_v60  ;;  %v7246_v59 = vcombine.low %v2839_v61, %v2855_v33  ;;  %v7213_v60 = vcombine.high %v2806_v14, %v2822_v29  ;;  %v3127_v61 = vld [vmem:[%s10989_s9 + $0xe18] sm:$0xff]  ;;  %v3094_v14 = vld [vmem:[%s10989_s9 + $0xd10] sm:$0xff] }
 0x30a   :  { %6030 = vmatprep.mubr.bf16.mxu0 %v9505_v26  ;;  %6071 = vmatprep.mubr.bf16.mxu1 %v9505_v26  ;;  %v3143_v33 = vld [vmem:[%s10989_s9 + $0xe98] sm:$0xff]  ;;  %v3110_v29 = vld [vmem:[%s10989_s9 + $0xd90] sm:$0xff] }
 0x30b   :  { %6000 = vmatprep.subr.bf16.mxu0 %v7277_v45  ;;  %6041 = vmatprep.subr.bf16.mxu1 %v7279_v31  ;;  %v7567_v45 = vcombine.high %v3159_v13, %v3175_v21  ;;  %v3126_v31 = vld [vmem:[%s10989_s9 + $0xe10] sm:$0xff] }
 0x30d   :  { %6001 = vmatpush1.bf16.msra.mxu0 %v7276_v34  ;;  %6042 = vmatpush1.bf16.msra.mxu1 %v7278_v35  ;;  %v7564_v34 = vcombine.low %v3158_v11, %v3174_v12  ;;  %v7566_v35 = vcombine.low %v3159_v13, %v3175_v21  ;;  %v2934_v11 = vld [vmem:[%s10989_s9 + $0x810] sm:$0xff]  ;;  %v2935_v13 = vld [vmem:[%s10989_s9 + $0x818] sm:$0xff] }
 0x30e   :  { %6002 = vmatprep.subr.bf16.mxu0 %v7245_v38  ;;  %6043 = vmatprep.subr.bf16.mxu1 %v7247_v39  ;;  %v7533_v38 = vcombine.high %v3126_v31, %v3142_v32  ;;  %v7535_v39 = vcombine.high %v3127_v61, %v3143_v33  ;;  %v2950_v12 = vld [vmem:[%s10989_s9 + $0x890] sm:$0xff]  ;;  %v2951_v21 = vld [vmem:[%s10989_s9 + $0x898] sm:$0xff] }
 0x311   :  { %6003 = vmatpush1.bf16.msra.mxu0 %v7244_v58  ;;  %6044 = vmatpush1.bf16.msra.mxu1 %v7246_v59  ;;  %v7532_v58 = vcombine.low %v3126_v31, %v3142_v32  ;;  %v7534_v59 = vcombine.low %v3127_v61, %v3143_v33  ;;  %v2904_v31 = vld [vmem:[%s10989_s9 + $0x720] sm:$0xff]  ;;  %v2905_v61 = vld [vmem:[%s10989_s9 + $0x728] sm:$0xff] }
 0x312   :  { %6004 = vmatprep.subr.bf16.mxu0 %v7213_v60  ;;  %6045 = vmatprep.subr.bf16.mxu1 %v7215_v15  ;;  %v7501_v60 = vcombine.high %v3094_v14, %v3110_v29  ;;  %v7503_v15 = vcombine.high %v3095_v55, %v3111_v56  ;;  %v2920_v32 = vld [vmem:[%s10989_s9 + $0x7a0] sm:$0xff]  ;;  %v2921_v33 = vld [vmem:[%s10989_s9 + $0x7a8] sm:$0xff] }
 0x315   :  { %6005 = vmatpush1.bf16.msra.mxu0 %v7212_v42  ;;  %6046 = vmatpush1.bf16.msra.mxu1 %v7214_v44  ;;  %v7500_v42 = vcombine.low %v3094_v14, %v3110_v29  ;;  %v7502_v44 = vcombine.low %v3095_v55, %v3111_v56  ;;  %v2872_v14 = vld [vmem:[%s10989_s9 + $0x620] sm:$0xff]  ;;  %v2873_v55 = vld [vmem:[%s10989_s9 + $0x628] sm:$0xff] }
 0x316   :  { %6006 = vmatprep.subr.bf16.mxu0 %v7181_v18  ;;  %6047 = vmatprep.subr.bf16.mxu1 %v7183_v46  ;;  %v7469_v18 = vcombine.high %v3062_v40, %v3078_v3  ;;  %v7471_v46 = vcombine.high %v3063_v41, %v3079_v22  ;;  %v2888_v29 = vld [vmem:[%s10989_s9 + $0x6a0] sm:$0xff]  ;;  %v2889_v56 = vld [vmem:[%s10989_s9 + $0x6a8] sm:$0xff] }
 0x319   :  { %6007 = vmatpush1.bf16.msra.mxu0 %v7180_v51  ;;  %6048 = vmatpush1.bf16.msra.mxu1 %v7182_v52  ;;  %v7468_v51 = vcombine.low %v3062_v40, %v3078_v3  ;;  %v7470_v52 = vcombine.low %v3063_v41, %v3079_v22  ;;  %v2840_v40 = vld [vmem:[%s10989_s9 + $0x520] sm:$0xff]  ;;  %v2841_v41 = vld [vmem:[%s10989_s9 + $0x528] sm:$0xff] }
 0x31a   :  { %6008 = vmatprep.subr.bf16.mxu0 %v7149_v53  ;;  %6049 = vmatprep.subr.bf16.mxu1 %v7151_v54  ;;  %v7437_v53 = vcombine.high %v3030_v47, %v3046_v48  ;;  %v7439_v54 = vcombine.high %v3031_v50, %v3047_v23  ;;  %v2856_v3 = vld [vmem:[%s10989_s9 + $0x5a0] sm:$0xff]  ;;  %v2857_v22 = vld [vmem:[%s10989_s9 + $0x5a8] sm:$0xff] }
 0x31d   :  { %6009 = vmatpush1.bf16.msra.mxu0 %v7148_v62  ;;  %6050 = vmatpush1.bf16.msra.mxu1 %v7150_v63  ;;  %v7436_v62 = vcombine.low %v3030_v47, %v3046_v48  ;;  %v7438_v63 = vcombine.low %v3031_v50, %v3047_v23  ;;  %v2808_v47 = vld [vmem:[%s10989_s9 + $0x420] sm:$0xff]  ;;  %v2809_v50 = vld [vmem:[%s10989_s9 + $0x428] sm:$0xff] }
 0x31e   :  { %6010 = vmatprep.subr.bf16.mxu0 %v7117_v0  ;;  %6051 = vmatprep.subr.bf16.mxu1 %v7119_v1  ;;  %v7405_v0 = vcombine.high %v2998_v36, %v3014_v37  ;;  %v7407_v1 = vcombine.high %v2999_v28, %v3015_v57  ;;  %v2824_v48 = vld [vmem:[%s10989_s9 + $0x4a0] sm:$0xff]  ;;  %v2825_v23 = vld [vmem:[%s10989_s9 + $0x4a8] sm:$0xff] }
 0x321   :  { %6011 = vmatpush1.bf16.msra.mxu0 %v7116_v7  ;;  %6052 = vmatpush1.bf16.msra.mxu1 %v7118_v8  ;;  %v7404_v7 = vcombine.low %v2998_v36, %v3014_v37  ;;  %v7406_v8 = vcombine.low %v2999_v28, %v3015_v57  ;;  %v2776_v36 = vld [vmem:[%s10989_s9 + $0x320] sm:$0xff]  ;;  %v2777_v28 = vld [vmem:[%s10989_s9 + $0x328] sm:$0xff] }
 0x322   :  { %6012 = vmatprep.subr.bf16.mxu0 %v7085_v9  ;;  %6053 = vmatprep.subr.bf16.mxu1 %v7087_v10  ;;  %v7373_v9 = vcombine.high %v2966_v2, %v2982_v4  ;;  %v7375_v10 = vcombine.high %v2967_v5, %v2983_v6  ;;  %v2792_v37 = vld [vmem:[%s10989_s9 + $0x3a0] sm:$0xff]  ;;  %v2793_v57 = vld [vmem:[%s10989_s9 + $0x3a8] sm:$0xff] }
 0x325   :  { %6013 = vmatpush1.bf16.msra.mxu0 %v7084_v24  ;;  %6054 = vmatpush1.bf16.msra.mxu1 %v7086_v25  ;;  %v7372_v24 = vcombine.low %v2966_v2, %v2982_v4  ;;  %v7374_v25 = vcombine.low %v2967_v5, %v2983_v6  ;;  %v2744_v2 = vld [vmem:[%s10989_s9 + $0x220] sm:$0xff]  ;;  %v2745_v5 = vld [vmem:[%s10989_s9 + $0x228] sm:$0xff] }
 0x326   :  { %6014 = vmatprep.subr.bf16.mxu0 %v7565_v30  ;;  %6055 = vmatprep.subr.bf16.mxu1 %v7567_v45  ;;  %v7341_v30 = vcombine.high %v2934_v11, %v2950_v12  ;;  %v7343_v45 = vcombine.high %v2935_v13, %v2951_v21  ;;  %v2760_v4 = vld [vmem:[%s10989_s9 + $0x2a0] sm:$0xff]  ;;  %v2761_v6 = vld [vmem:[%s10989_s9 + $0x2a8] sm:$0xff] }
 0x329   :  { %6015 = vmatpush2.bf16.msra.mxu0 %v7564_v34  ;;  %6056 = vmatpush2.bf16.msra.mxu1 %v7566_v35  ;;  %v7340_v34 = vcombine.low %v2934_v11, %v2950_v12  ;;  %v7342_v35 = vcombine.low %v2935_v13, %v2951_v21  ;;  %v2712_v11 = vld [vmem:[%s10989_s9 + $0x120] sm:$0xff]  ;;  %v2713_v13 = vld [vmem:[%s10989_s9 + $0x128] sm:$0xff] }
 0x32a   :  { %6016 = vmatprep.subr.bf16.mxu0 %v7533_v38  ;;  %6057 = vmatprep.subr.bf16.mxu1 %v7535_v39  ;;  %v7313_v38 = vcombine.high %v2904_v31, %v2920_v32  ;;  %v7315_v39 = vcombine.high %v2905_v61, %v2921_v33  ;;  %v2728_v12 = vld [vmem:[%s10989_s9 + $0x1a0] sm:$0xff]  ;;  %v2729_v21 = vld [vmem:[%s10989_s9 + $0x1a8] sm:$0xff] }
 0x32d   :  { %6017 = vmatpush2.bf16.msra.mxu0 %v7532_v58  ;;  %6058 = vmatpush2.bf16.msra.mxu1 %v7534_v59  ;;  %v7312_v58 = vcombine.low %v2904_v31, %v2920_v32  ;;  %v7314_v59 = vcombine.low %v2905_v61, %v2921_v33  ;;  %v2680_v31 = vld [vmem:[%s10989_s9 + $0x20] sm:$0xff]  ;;  %v2681_v61 = vld [vmem:[%s10989_s9 + $0x28] sm:$0xff] }
 0x32e   :  { %6018 = vmatprep.subr.bf16.mxu0 %v7501_v60  ;;  %6059 = vmatprep.subr.bf16.mxu1 %v7503_v15  ;;  %v7281_v60 = vcombine.high %v2872_v14, %v2888_v29  ;;  %v7283_v15 = vcombine.high %v2873_v55, %v2889_v56  ;;  %v2696_v32 = vld [vmem:[%s10989_s9 + $0xa0] sm:$0xff]  ;;  %v2697_v33 = vld [vmem:[%s10989_s9 + $0xa8] sm:$0xff] }
 0x331   :  { %6019 = vmatpush2.bf16.msra.mxu0 %v7500_v42  ;;  %6060 = vmatpush2.bf16.msra.mxu1 %v7502_v44  ;;  %v7280_v42 = vcombine.low %v2872_v14, %v2888_v29  ;;  %v7282_v44 = vcombine.low %v2873_v55, %v2889_v56  ;;  %v3160_v14 = vld [vmem:[%s10989_s9 + $0xf20] sm:$0xff]  ;;  %v3161_v55 = vld [vmem:[%s10989_s9 + $0xf28] sm:$0xff] }
 0x332   :  { %6020 = vmatprep.subr.bf16.mxu0 %v7469_v18  ;;  %6061 = vmatprep.subr.bf16.mxu1 %v7471_v46  ;;  %v7249_v18 = vcombine.high %v2840_v40, %v2856_v3  ;;  %v7251_v46 = vcombine.high %v2841_v41, %v2857_v22  ;;  %v3176_v29 = vld [vmem:[%s10989_s9 + $0xfa0] sm:$0xff]  ;;  %v3177_v56 = vld [vmem:[%s10989_s9 + $0xfa8] sm:$0xff] }
 0x335   :  { %6021 = vmatpush2.bf16.msra.mxu0 %v7468_v51  ;;  %6062 = vmatpush2.bf16.msra.mxu1 %v7470_v52  ;;  %v7248_v51 = vcombine.low %v2840_v40, %v2856_v3  ;;  %v7250_v52 = vcombine.low %v2841_v41, %v2857_v22  ;;  %v3128_v40 = vld [vmem:[%s10989_s9 + $0xe20] sm:$0xff]  ;;  %v3129_v41 = vld [vmem:[%s10989_s9 + $0xe28] sm:$0xff] }
 0x336   :  { %6022 = vmatprep.subr.bf16.mxu0 %v7437_v53  ;;  %6063 = vmatprep.subr.bf16.mxu1 %v7439_v54  ;;  %v7217_v53 = vcombine.high %v2808_v47, %v2824_v48  ;;  %v7219_v54 = vcombine.high %v2809_v50, %v2825_v23  ;;  %v3144_v3 = vld [vmem:[%s10989_s9 + $0xea0] sm:$0xff]  ;;  %v3145_v22 = vld [vmem:[%s10989_s9 + $0xea8] sm:$0xff] }
 0x339   :  { %6023 = vmatpush2.bf16.msra.mxu0 %v7436_v62  ;;  %6064 = vmatpush2.bf16.msra.mxu1 %v7438_v63  ;;  %v7216_v62 = vcombine.low %v2808_v47, %v2824_v48  ;;  %v7218_v63 = vcombine.low %v2809_v50, %v2825_v23  ;;  %v3096_v47 = vld [vmem:[%s10989_s9 + $0xd20] sm:$0xff]  ;;  %v3097_v50 = vld [vmem:[%s10989_s9 + $0xd28] sm:$0xff] }
 0x33a   :  { %6024 = vmatprep.subr.bf16.mxu0 %v7405_v0  ;;  %6065 = vmatprep.subr.bf16.mxu1 %v7407_v1  ;;  %v7185_v0 = vcombine.high %v2776_v36, %v2792_v37  ;;  %v7187_v1 = vcombine.high %v2777_v28, %v2793_v57  ;;  %v3112_v48 = vld [vmem:[%s10989_s9 + $0xda0] sm:$0xff]  ;;  %v3113_v23 = vld [vmem:[%s10989_s9 + $0xda8] sm:$0xff] }
 0x33d   :  { %6025 = vmatpush2.bf16.msra.mxu0 %v7404_v7  ;;  %6066 = vmatpush2.bf16.msra.mxu1 %v7406_v8  ;;  %v7184_v7 = vcombine.low %v2776_v36, %v2792_v37  ;;  %v7186_v8 = vcombine.low %v2777_v28, %v2793_v57  ;;  %v3064_v36 = vld [vmem:[%s10989_s9 + $0xc20] sm:$0xff]  ;;  %v3065_v28 = vld [vmem:[%s10989_s9 + $0xc28] sm:$0xff] }
 0x33e   :  { %6026 = vmatprep.subr.bf16.mxu0 %v7373_v9  ;;  %6067 = vmatprep.subr.bf16.mxu1 %v7375_v10  ;;  %v7153_v9 = vcombine.high %v2744_v2, %v2760_v4  ;;  %v7155_v10 = vcombine.high %v2745_v5, %v2761_v6  ;;  %v3080_v37 = vld [vmem:[%s10989_s9 + $0xca0] sm:$0xff]  ;;  %v3081_v57 = vld [vmem:[%s10989_s9 + $0xca8] sm:$0xff] }
 0x341   :  { %6027 = vmatpush2.bf16.msra.mxu0 %v7372_v24  ;;  %6068 = vmatpush2.bf16.msra.mxu1 %v7374_v25  ;;  %v7152_v24 = vcombine.low %v2744_v2, %v2760_v4  ;;  %v7154_v25 = vcombine.low %v2745_v5, %v2761_v6  ;;  %v3032_v2 = vld [vmem:[%s10989_s9 + $0xb20] sm:$0xff]  ;;  %v3033_v5 = vld [vmem:[%s10989_s9 + $0xb28] sm:$0xff] }
 0x342   :  { %6028 = vmatprep.subr.bf16.mxu0 %v7341_v30  ;;  %6069 = vmatprep.subr.bf16.mxu1 %v7343_v45  ;;  %v7121_v30 = vcombine.high %v2712_v11, %v2728_v12  ;;  %v7123_v45 = vcombine.high %v2713_v13, %v2729_v21  ;;  %v3048_v4 = vld [vmem:[%s10989_s9 + $0xba0] sm:$0xff]  ;;  %v3049_v6 = vld [vmem:[%s10989_s9 + $0xba8] sm:$0xff] }
 0x345   :  { %6029 = vmatpush2.bf16.msra.mxu0 %v7340_v34  ;;  %6070 = vmatpush2.bf16.msra.mxu1 %v7342_v35  ;;  %v7120_v34 = vcombine.low %v2712_v11, %v2728_v12  ;;  %v7122_v35 = vcombine.low %v2713_v13, %v2729_v21  ;;  %v3000_v11 = vld [vmem:[%s10989_s9 + $0xa20] sm:$0xff]  ;;  %v3001_v13 = vld [vmem:[%s10989_s9 + $0xa28] sm:$0xff] }
 0x346   :  { %6080 = vmatprep.subr.bf16.mxu0 %v7313_v38  ;;  %6121 = vmatprep.subr.bf16.mxu1 %v7315_v39  ;;  %v7089_v38 = vcombine.high %v2680_v31, %v2696_v32  ;;  %v7091_v39 = vcombine.high %v2681_v61, %v2697_v33  ;;  %v3016_v12 = vld [vmem:[%s10989_s9 + $0xaa0] sm:$0xff]  ;;  %v3017_v21 = vld [vmem:[%s10989_s9 + $0xaa8] sm:$0xff] }
 0x348   :  { %6031 = vmatmul.mubr.bf16.vlgmr.msra.gmra.mxu0 %v9507_v27  ;;  %6072 = vmatmul.mubr.bf16.vlgmr.msra.gmra.mxu1 %v9507_v27 }
 0x349   :  { %6081 = vmatpush1.bf16.msra.mxu0 %v7312_v58  ;;  %6112 = vmatprep.mubr.bf16.mxu0 %v9505_v26  ;;  %v7088_v58 = vcombine.low %v2680_v31, %v2696_v32  ;;  %v2968_v31 = vld [vmem:[%s10989_s9 + $0x920] sm:$0xff] }
 0x34a   :  { %6122 = vmatpush1.bf16.msra.mxu1 %v7314_v59  ;;  %6153 = vmatprep.mubr.bf16.mxu1 %v9505_v26  ;;  %v7090_v59 = vcombine.low %v2681_v61, %v2697_v33  ;;  %v2984_v32 = vld [vmem:[%s10989_s9 + $0x9a0] sm:$0xff]  ;;  %v2969_v61 = vld [vmem:[%s10989_s9 + $0x928] sm:$0xff] }
 0x34b   :  { %6082 = vmatprep.subr.bf16.mxu0 %v7281_v60  ;;  %6123 = vmatprep.subr.bf16.mxu1 %v7283_v15  ;;  %v7569_v60 = vcombine.high %v3160_v14, %v3176_v29  ;;  %v7571_v15 = vcombine.high %v3161_v55, %v3177_v56  ;;  %v2985_v33 = vld [vmem:[%s10989_s9 + $0x9a8] sm:$0xff] }
 0x34d   :  { %6083 = vmatpush1.bf16.msra.mxu0 %v7280_v42  ;;  %v7568_v42 = vcombine.low %v3160_v14, %v3176_v29  ;;  %v2936_v14 = vld [vmem:[%s10989_s9 + $0x820] sm:$0xff] }
 0x34e   :  { %6124 = vmatpush1.bf16.msra.mxu1 %v7282_v44  ;;  %6084 = vmatprep.subr.bf16.mxu0 %v7249_v18  ;;  %v7570_v44 = vcombine.low %v3161_v55, %v3177_v56  ;;  %v7537_v18 = vcombine.high %v3128_v40, %v3144_v3  ;;  %v2952_v29 = vld [vmem:[%s10989_s9 + $0x8a0] sm:$0xff]  ;;  %v2937_v55 = vld [vmem:[%s10989_s9 + $0x828] sm:$0xff] }
 0x34f   :  { %6125 = vmatprep.subr.bf16.mxu1 %v7251_v46  ;;  %v7539_v46 = vcombine.high %v3129_v41, %v3145_v22  ;;  %v2953_v56 = vld [vmem:[%s10989_s9 + $0x8a8] sm:$0xff] }
 0x351   :  { %6085 = vmatpush1.bf16.msra.mxu0 %v7248_v51  ;;  %v7536_v51 = vcombine.low %v3128_v40, %v3144_v3  ;;  %v2906_v40 = vld [vmem:[%s10989_s9 + $0x730] sm:$0xff] }
 0x352   :  { %6126 = vmatpush1.bf16.msra.mxu1 %v7250_v52  ;;  %6086 = vmatprep.subr.bf16.mxu0 %v7217_v53  ;;  %v7538_v52 = vcombine.low %v3129_v41, %v3145_v22  ;;  %v7505_v53 = vcombine.high %v3096_v47, %v3112_v48  ;;  %v2922_v3 = vld [vmem:[%s10989_s9 + $0x7b0] sm:$0xff]  ;;  %v2907_v41 = vld [vmem:[%s10989_s9 + $0x738] sm:$0xff] }
 0x353   :  { %6127 = vmatprep.subr.bf16.mxu1 %v7219_v54  ;;  %v7507_v54 = vcombine.high %v3097_v50, %v3113_v23  ;;  %v2923_v22 = vld [vmem:[%s10989_s9 + $0x7b8] sm:$0xff] }
 0x355   :  { %6087 = vmatpush1.bf16.msra.mxu0 %v7216_v62  ;;  %v7504_v62 = vcombine.low %v3096_v47, %v3112_v48  ;;  %v2874_v47 = vld [vmem:[%s10989_s9 + $0x630] sm:$0xff] }
 0x356   :  { %6128 = vmatpush1.bf16.msra.mxu1 %v7218_v63  ;;  %6088 = vmatprep.subr.bf16.mxu0 %v7185_v0  ;;  %v7506_v63 = vcombine.low %v3097_v50, %v3113_v23  ;;  %v7473_v0 = vcombine.high %v3064_v36, %v3080_v37  ;;  %v2890_v48 = vld [vmem:[%s10989_s9 + $0x6b0] sm:$0xff]  ;;  %v7316_v50 = vcombine.low %v2906_v40, %v2922_v3  ;;  %v2875_v23 = vld [vmem:[%s10989_s9 + $0x638] sm:$0xff] }
 0x357   :  { %6129 = vmatprep.subr.bf16.mxu1 %v7187_v1  ;;  %v7475_v1 = vcombine.high %v3065_v28, %v3081_v57 }
 0x359   :  { %6089 = vmatpush1.bf16.msra.mxu0 %v7184_v7  ;;  %v7472_v7 = vcombine.low %v3064_v36, %v3080_v37  ;;  %v2858_v36 = vld [vmem:[%s10989_s9 + $0x5b0] sm:$0xff] }
 0x35a   :  { %6130 = vmatpush1.bf16.msra.mxu1 %v7186_v8  ;;  %6090 = vmatprep.subr.bf16.mxu0 %v7153_v9  ;;  %v7474_v8 = vcombine.low %v3065_v28, %v3081_v57  ;;  %v7441_v9 = vcombine.high %v3032_v2, %v3048_v4  ;;  %v2843_v28 = vld [vmem:[%s10989_s9 + $0x538] sm:$0xff] }
 0x35b   :  { %6131 = vmatprep.subr.bf16.mxu1 %v7155_v10  ;;  %v7443_v10 = vcombine.high %v3033_v5, %v3049_v6  ;;  %v2859_v57 = vld [vmem:[%s10989_s9 + $0x5b8] sm:$0xff] }
 0x35d   :  { %6091 = vmatpush1.bf16.msra.mxu0 %v7152_v24  ;;  %v7440_v24 = vcombine.low %v3032_v2, %v3048_v4  ;;  %v2810_v2 = vld [vmem:[%s10989_s9 + $0x430] sm:$0xff] }
 0x35e   :  { %6132 = vmatpush1.bf16.msra.mxu1 %v7154_v25  ;;  %6092 = vmatprep.subr.bf16.mxu0 %v7121_v30  ;;  %v7442_v25 = vcombine.low %v3033_v5, %v3049_v6  ;;  %v7409_v30 = vcombine.high %v3000_v11, %v3016_v12  ;;  %v2826_v4 = vld [vmem:[%s10989_s9 + $0x4b0] sm:$0xff]  ;;  %v2811_v5 = vld [vmem:[%s10989_s9 + $0x438] sm:$0xff] }
 0x35f   :  { %6133 = vmatprep.subr.bf16.mxu1 %v7123_v45  ;;  %v7411_v45 = vcombine.high %v3001_v13, %v3017_v21  ;;  %v2827_v6 = vld [vmem:[%s10989_s9 + $0x4b8] sm:$0xff] }
 0x361   :  { %6093 = vmatpush1.bf16.msra.mxu0 %v7120_v34  ;;  %v7408_v34 = vcombine.low %v3000_v11, %v3016_v12  ;;  %v2778_v11 = vld [vmem:[%s10989_s9 + $0x330] sm:$0xff] }
 0x362   :  { %6134 = vmatpush1.bf16.msra.mxu1 %v7122_v35  ;;  %6094 = vmatprep.subr.bf16.mxu0 %v7089_v38  ;;  %v7410_v35 = vcombine.low %v3001_v13, %v3017_v21  ;;  %v7377_v38 = vcombine.high %v2968_v31, %v2984_v32  ;;  %v2794_v12 = vld [vmem:[%s10989_s9 + $0x3b0] sm:$0xff]  ;;  %v2779_v13 = vld [vmem:[%s10989_s9 + $0x338] sm:$0xff] }
 0x363   :  { %6135 = vmatprep.subr.bf16.mxu1 %v7091_v39  ;;  %v7379_v39 = vcombine.high %v2969_v61, %v2985_v33  ;;  %v2795_v21 = vld [vmem:[%s10989_s9 + $0x3b8] sm:$0xff] }
 0x365   :  { %6095 = vmatpush1.bf16.msra.mxu0 %v7088_v58  ;;  %v7376_v58 = vcombine.low %v2968_v31, %v2984_v32  ;;  %v2746_v31 = vld [vmem:[%s10989_s9 + $0x230] sm:$0xff] }
 0x366   :  { %6136 = vmatpush1.bf16.msra.mxu1 %v7090_v59  ;;  %6096 = vmatprep.subr.bf16.mxu0 %v7569_v60  ;;  %v7378_v59 = vcombine.low %v2969_v61, %v2985_v33  ;;  %v7345_v60 = vcombine.high %v2936_v14, %v2952_v29  ;;  %v2762_v32 = vld [vmem:[%s10989_s9 + $0x2b0] sm:$0xff]  ;;  %v2747_v61 = vld [vmem:[%s10989_s9 + $0x238] sm:$0xff] }
 0x367   :  { %6137 = vmatprep.subr.bf16.mxu1 %v7571_v15  ;;  %v7347_v15 = vcombine.high %v2937_v55, %v2953_v56  ;;  %v2763_v33 = vld [vmem:[%s10989_s9 + $0x2b8] sm:$0xff] }
 0x369   :  { %6097 = vmatpush2.bf16.msra.mxu0 %v7568_v42  ;;  %v7344_v42 = vcombine.low %v2936_v14, %v2952_v29  ;;  %v2714_v14 = vld [vmem:[%s10989_s9 + $0x130] sm:$0xff] }
 0x36a   :  { %6138 = vmatpush2.bf16.msra.mxu1 %v7570_v44  ;;  %6098 = vmatprep.subr.bf16.mxu0 %v7537_v18  ;;  %v7346_v44 = vcombine.low %v2937_v55, %v2953_v56  ;;  %v7317_v18 = vcombine.high %v2906_v40, %v2922_v3  ;;  %v2730_v29 = vld [vmem:[%s10989_s9 + $0x1b0] sm:$0xff]  ;;  %v2715_v55 = vld [vmem:[%s10989_s9 + $0x138] sm:$0xff] }
 0x36b   :  { %6139 = vmatprep.subr.bf16.mxu1 %v7539_v46  ;;  %v7319_v46 = vcombine.high %v2907_v41, %v2923_v22  ;;  %v2731_v56 = vld [vmem:[%s10989_s9 + $0x1b8] sm:$0xff]  ;;  %v2682_v40 = vld [vmem:[%s10989_s9 + $0x30] sm:$0xff] }
 0x36c   :  { %v2698_v3 = vld [vmem:[%s10989_s9 + $0xb0] sm:$0xff] }
 0x36d   :  { %6099 = vmatpush2.bf16.msra.mxu0 %v7536_v51  ;;  %v2891_v51 = vld [vmem:[%s10989_s9 + $0x6b8] sm:$0xff] }
 0x36e   :  { %6140 = vmatpush2.bf16.msra.mxu1 %v7538_v52  ;;  %6100 = vmatprep.subr.bf16.mxu0 %v7505_v53  ;;  %v7318_v52 = vcombine.low %v2907_v41, %v2923_v22  ;;  %v7285_v53 = vcombine.high %v2874_v47, %v2890_v48  ;;  %v7287_v37 = vcombine.high %v2875_v23, %v2891_v51  ;;  %v2683_v41 = vld [vmem:[%s10989_s9 + $0x38] sm:$0xff] }
 0x36f   :  { %6141 = vmatprep.subr.bf16.mxu1 %v7507_v54  ;;  %v2842_v54 = vld [vmem:[%s10989_s9 + $0x530] sm:$0xff]  ;;  %v2699_v22 = vld [vmem:[%s10989_s9 + $0xb8] sm:$0xff] }
 0x371   :  { %6101 = vmatpush2.bf16.msra.mxu0 %v7504_v62  ;;  %v7284_v62 = vcombine.low %v2874_v47, %v2890_v48  ;;  %v3162_v47 = vld [vmem:[%s10989_s9 + $0xf30] sm:$0xff] }
 0x372   :  { %6142 = vmatpush2.bf16.msra.mxu1 %v7506_v63  ;;  %6102 = vmatprep.subr.bf16.mxu0 %v7473_v0  ;;  %v7286_v63 = vcombine.low %v2875_v23, %v2891_v51  ;;  %v7253_v0 = vcombine.high %v2842_v54, %v2858_v36  ;;  %v3178_v48 = vld [vmem:[%s10989_s9 + $0xfb0] sm:$0xff]  ;;  %v3179_v23 = vld [vmem:[%s10989_s9 + $0xfb8] sm:$0xff]  ;;  %v7092_v51 = vcombine.low %v2682_v40, %v2698_v3 }
 0x373   :  { %6143 = vmatprep.subr.bf16.mxu1 %v7475_v1  ;;  %v7255_v1 = vcombine.high %v2843_v28, %v2859_v57 }
 0x375   :  { %6103 = vmatpush2.bf16.msra.mxu0 %v7472_v7  ;;  %v7252_v7 = vcombine.low %v2842_v54, %v2858_v36  ;;  %v3130_v36 = vld [vmem:[%s10989_s9 + $0xe30] sm:$0xff] }
 0x376   :  { %6144 = vmatpush2.bf16.msra.mxu1 %v7474_v8  ;;  %6104 = vmatprep.subr.bf16.mxu0 %v7441_v9  ;;  %v7254_v8 = vcombine.low %v2843_v28, %v2859_v57  ;;  %v7221_v9 = vcombine.high %v2810_v2, %v2826_v4  ;;  %v3131_v28 = vld [vmem:[%s10989_s9 + $0xe38] sm:$0xff] }
 0x377   :  { %6145 = vmatprep.subr.bf16.mxu1 %v7443_v10  ;;  %v7223_v10 = vcombine.high %v2811_v5, %v2827_v6  ;;  %v3147_v57 = vld [vmem:[%s10989_s9 + $0xeb8] sm:$0xff] }
 0x379   :  { %6105 = vmatpush2.bf16.msra.mxu0 %v7440_v24  ;;  %v7220_v24 = vcombine.low %v2810_v2, %v2826_v4  ;;  %v3098_v2 = vld [vmem:[%s10989_s9 + $0xd30] sm:$0xff] }
 0x37a   :  { %6146 = vmatpush2.bf16.msra.mxu1 %v7442_v25  ;;  %6106 = vmatprep.subr.bf16.mxu0 %v7409_v30  ;;  %v7222_v25 = vcombine.low %v2811_v5, %v2827_v6  ;;  %v7189_v30 = vcombine.high %v2778_v11, %v2794_v12  ;;  %v3114_v4 = vld [vmem:[%s10989_s9 + $0xdb0] sm:$0xff]  ;;  %v3099_v5 = vld [vmem:[%s10989_s9 + $0xd38] sm:$0xff] }
 0x37b   :  { %6147 = vmatprep.subr.bf16.mxu1 %v7411_v45  ;;  %v7191_v45 = vcombine.high %v2779_v13, %v2795_v21  ;;  %v3115_v6 = vld [vmem:[%s10989_s9 + $0xdb8] sm:$0xff] }
 0x37d   :  { %6107 = vmatpush2.bf16.msra.mxu0 %v7408_v34  ;;  %v7188_v34 = vcombine.low %v2778_v11, %v2794_v12  ;;  %v3066_v11 = vld [vmem:[%s10989_s9 + $0xc30] sm:$0xff] }
 0x37e   :  { %6148 = vmatpush2.bf16.msra.mxu1 %v7410_v35  ;;  %6108 = vmatprep.subr.bf16.mxu0 %v7377_v38  ;;  %v7190_v35 = vcombine.low %v2779_v13, %v2795_v21  ;;  %v7157_v38 = vcombine.high %v2746_v31, %v2762_v32  ;;  %v3082_v12 = vld [vmem:[%s10989_s9 + $0xcb0] sm:$0xff]  ;;  %v3067_v13 = vld [vmem:[%s10989_s9 + $0xc38] sm:$0xff] }
 0x37f   :  { %6149 = vmatprep.subr.bf16.mxu1 %v7379_v39  ;;  %v7159_v39 = vcombine.high %v2747_v61, %v2763_v33  ;;  %v3083_v21 = vld [vmem:[%s10989_s9 + $0xcb8] sm:$0xff] }
 0x381   :  { %6109 = vmatpush2.bf16.msra.mxu0 %v7376_v58  ;;  %v7156_v58 = vcombine.low %v2746_v31, %v2762_v32  ;;  %v3034_v31 = vld [vmem:[%s10989_s9 + $0xb30] sm:$0xff] }
 0x382   :  { %6150 = vmatpush2.bf16.msra.mxu1 %v7378_v59  ;;  %6110 = vmatprep.subr.bf16.mxu0 %v7345_v60  ;;  %v7158_v59 = vcombine.low %v2747_v61, %v2763_v33  ;;  %v7125_v60 = vcombine.high %v2714_v14, %v2730_v29  ;;  %v3050_v32 = vld [vmem:[%s10989_s9 + $0xbb0] sm:$0xff]  ;;  %v3035_v61 = vld [vmem:[%s10989_s9 + $0xb38] sm:$0xff] }
 0x383   :  { %6151 = vmatprep.subr.bf16.mxu1 %v7347_v15  ;;  %v7127_v15 = vcombine.high %v2715_v55, %v2731_v56  ;;  %v3051_v33 = vld [vmem:[%s10989_s9 + $0xbb8] sm:$0xff] }
 0x385   :  { %6111 = vmatpush2.bf16.msra.mxu0 %v7344_v42  ;;  %v7124_v42 = vcombine.low %v2714_v14, %v2730_v29  ;;  %v3002_v14 = vld [vmem:[%s10989_s9 + $0xa30] sm:$0xff] }
 0x386   :  { %6152 = vmatpush2.bf16.msra.mxu1 %v7346_v44  ;;  %6162 = vmatprep.subr.bf16.mxu0 %v7317_v18  ;;  %v7126_v44 = vcombine.low %v2715_v55, %v2731_v56  ;;  %v7093_v18 = vcombine.high %v2682_v40, %v2698_v3  ;;  %v3018_v29 = vld [vmem:[%s10989_s9 + $0xab0] sm:$0xff]  ;;  %v3003_v55 = vld [vmem:[%s10989_s9 + $0xa38] sm:$0xff] }
 0x387   :  { %6203 = vmatprep.subr.bf16.mxu1 %v7319_v46  ;;  %v7095_v46 = vcombine.high %v2683_v41, %v2699_v22  ;;  %v3019_v56 = vld [vmem:[%s10989_s9 + $0xab8] sm:$0xff]  ;;  %v2970_v40 = vld [vmem:[%s10989_s9 + $0x930] sm:$0xff] }
 0x388   :  { %6113 = vmatmul.mubr.bf16.vlgmr.msra.gmra.mxu0 %v9507_v27  ;;  %v2986_v3 = vld [vmem:[%s10989_s9 + $0x9b0] sm:$0xff] }
 0x389   :  { %6154 = vmatmul.mubr.bf16.vlgmr.msra.gmra.mxu1 %v9507_v27  ;;  %6163 = vmatpush1.bf16.msra.mxu0 %v7316_v50  ;;  %v3163_v50 = vld [vmem:[%s10989_s9 + $0xf38] sm:$0xff] }
 0x38a   :  { %6194 = vmatprep.mubr.bf16.mxu0 %v9505_v26  ;;  %6204 = vmatpush1.bf16.msra.mxu1 %v7318_v52  ;;  %v7094_v52 = vcombine.low %v2683_v41, %v2699_v22  ;;  %v7575_v54 = vcombine.high %v3163_v50, %v3179_v23  ;;  %v2971_v41 = vld [vmem:[%s10989_s9 + $0x938] sm:$0xff] }
 0x38b   :  { %6235 = vmatprep.mubr.bf16.mxu1 %v9505_v26  ;;  %6164 = vmatprep.subr.bf16.mxu0 %v7285_v53  ;;  %v7573_v53 = vcombine.high %v3162_v47, %v3178_v48  ;;  %v2987_v22 = vld [vmem:[%s10989_s9 + $0x9b8] sm:$0xff] }
 0x38c   :  { %6205 = vmatprep.subr.bf16.mxu1 %v7287_v37  ;;  %v3146_v37 = vld [vmem:[%s10989_s9 + $0xeb0] sm:$0xff] }
 0x38d   :  { %6165 = vmatpush1.bf16.msra.mxu0 %v7284_v62  ;;  %v7572_v62 = vcombine.low %v3162_v47, %v3178_v48  ;;  %v2938_v47 = vld [vmem:[%s10989_s9 + $0x830] sm:$0xff] }
 0x38e   :  { %6206 = vmatpush1.bf16.msra.mxu1 %v7286_v63  ;;  %6166 = vmatprep.subr.bf16.mxu0 %v7253_v0  ;;  %v7574_v63 = vcombine.low %v3163_v50, %v3179_v23  ;;  %v7541_v0 = vcombine.high %v3130_v36, %v3146_v37  ;;  %v2954_v48 = vld [vmem:[%s10989_s9 + $0x8b0] sm:$0xff]  ;;  %v2939_v50 = vld [vmem:[%s10989_s9 + $0x838] sm:$0xff] }
 0x38f   :  { %6207 = vmatprep.subr.bf16.mxu1 %v7255_v1  ;;  %v7543_v1 = vcombine.high %v3131_v28, %v3147_v57  ;;  %v2955_v23 = vld [vmem:[%s10989_s9 + $0x8b8] sm:$0xff] }
 0x391   :  { %6167 = vmatpush1.bf16.msra.mxu0 %v7252_v7  ;;  %v7540_v7 = vcombine.low %v3130_v36, %v3146_v37  ;;  %v2908_v36 = vld [vmem:[%s10989_s9 + $0x740] sm:$0xff] }
 0x392   :  { %6208 = vmatpush1.bf16.msra.mxu1 %v7254_v8  ;;  %6168 = vmatprep.subr.bf16.mxu0 %v7221_v9  ;;  %v7542_v8 = vcombine.low %v3131_v28, %v3147_v57  ;;  %v7509_v9 = vcombine.high %v3098_v2, %v3114_v4  ;;  %v2924_v37 = vld [vmem:[%s10989_s9 + $0x7c0] sm:$0xff]  ;;  %v2909_v28 = vld [vmem:[%s10989_s9 + $0x748] sm:$0xff] }
 0x393   :  { %6209 = vmatprep.subr.bf16.mxu1 %v7223_v10  ;;  %v7511_v10 = vcombine.high %v3099_v5, %v3115_v6  ;;  %v2925_v57 = vld [vmem:[%s10989_s9 + $0x7c8] sm:$0xff] }
 0x395   :  { %6169 = vmatpush1.bf16.msra.mxu0 %v7220_v24  ;;  %v7508_v24 = vcombine.low %v3098_v2, %v3114_v4  ;;  %v10096_v2 = vld [vmem:[%s10993_s10] sm:$0xff] }
 0x396   :  { %6210 = vmatpush1.bf16.msra.mxu1 %v7222_v25  ;;  %6170 = vmatprep.subr.bf16.mxu0 %v7189_v30  ;;  %v7510_v25 = vcombine.low %v3099_v5, %v3115_v6  ;;  %v7477_v30 = vcombine.high %v3066_v11, %v3082_v12  ;;  %v2876_v4 = vld [vmem:[%s10989_s9 + $0x640] sm:$0xff]  ;;  %v7320_v6 = vcombine.low %v2908_v36, %v2924_v37 }
 0x397   :  { %6211 = vmatprep.subr.bf16.mxu1 %v7191_v45  ;;  %v7479_v45 = vcombine.high %v3067_v13, %v3083_v21  ;;  %v2892_v5 = vld [vmem:[%s10989_s9 + $0x6c0] sm:$0xff] }
 0x399   :  { %6171 = vmatpush1.bf16.msra.mxu0 %v7188_v34  ;;  %v7476_v34 = vcombine.low %v3066_v11, %v3082_v12  ;;  %v2844_v11 = vld [vmem:[%s10989_s9 + $0x540] sm:$0xff]  ;;  %v3207_v12 = vrot.slane %v10096_v2, %v9227_v16 }
 0x39a   :  { %6212 = vmatpush1.bf16.msra.mxu1 %v7190_v35  ;;  %6172 = vmatprep.subr.bf16.mxu0 %v7157_v38  ;;  %v7478_v35 = vcombine.low %v3067_v13, %v3083_v21  ;;  %v7445_v38 = vcombine.high %v3034_v31, %v3050_v32  ;;  %v3203_v13 = vrot.slane %v10096_v2, %v9079_v19 }
 0x39b   :  { %6213 = vmatprep.subr.bf16.mxu1 %v7159_v39  ;;  %v7447_v39 = vcombine.high %v3035_v61, %v3051_v33  ;;  %v3211_v21 = vrot.slane %v10096_v2, %v9230_v20 }
 0x39d   :  { %6173 = vmatpush1.bf16.msra.mxu0 %v7156_v58  ;;  %v7444_v58 = vcombine.low %v3034_v31, %v3050_v32 }
 0x39e   :  { %6214 = vmatpush1.bf16.msra.mxu1 %v7158_v59  ;;  %6174 = vmatprep.subr.bf16.mxu0 %v7125_v60  ;;  %v7446_v59 = vcombine.low %v3035_v61, %v3051_v33  ;;  %v7413_v60 = vcombine.high %v3002_v14, %v3018_v29  ;;  %v7288_v33 = vcombine.low %v2876_v4, %v2892_v5 }
 0x39f   :  { %6215 = vmatprep.subr.bf16.mxu1 %v7127_v15  ;;  %v7415_v15 = vcombine.high %v3003_v55, %v3019_v56 }
 0x3a1   :  { %6175 = vmatpush1.bf16.msra.mxu0 %v7124_v42  ;;  %v7412_v42 = vcombine.low %v3002_v14, %v3018_v29 }
 0x3a2   :  { %6216 = vmatpush1.bf16.msra.mxu1 %v7126_v44  ;;  %6176 = vmatprep.subr.bf16.mxu0 %v7093_v18  ;;  %v7414_v44 = vcombine.low %v3003_v55, %v3019_v56  ;;  %v7381_v18 = vcombine.high %v2970_v40, %v2986_v3 }
 0x3a3   :  { %6217 = vmatprep.subr.bf16.mxu1 %v7095_v46  ;;  %v7383_v46 = vcombine.high %v2971_v41, %v2987_v22 }
 0x3a5   :  { %6177 = vmatpush1.bf16.msra.mxu0 %v7092_v51  ;;  %v7380_v51 = vcombine.low %v2970_v40, %v2986_v3  ;;  %v2813_v3 = vld [vmem:[%s10989_s9 + $0x448] sm:$0xff] }
 0x3a6   :  { %6218 = vmatpush1.bf16.msra.mxu1 %v7094_v52  ;;  %6178 = vmatprep.subr.bf16.mxu0 %v7573_v53  ;;  %v7382_v52 = vcombine.low %v2971_v41, %v2987_v22  ;;  %v7349_v53 = vcombine.high %v2938_v47, %v2954_v48  ;;  %v2829_v41 = vld [vmem:[%s10989_s9 + $0x4c8] sm:$0xff] }
 0x3a7   :  { %6219 = vmatprep.subr.bf16.mxu1 %v7575_v54  ;;  %v7351_v54 = vcombine.high %v2939_v50, %v2955_v23 }
 0x3a9   :  { %6179 = vmatpush2.bf16.msra.mxu0 %v7572_v62  ;;  %v7348_v62 = vcombine.low %v2938_v47, %v2954_v48 }
 0x3aa   :  { %6220 = vmatpush2.bf16.msra.mxu1 %v7574_v63  ;;  %6180 = vmatprep.subr.bf16.mxu0 %v7541_v0  ;;  %v7350_v63 = vcombine.low %v2939_v50, %v2955_v23  ;;  %v7321_v0 = vcombine.high %v2908_v36, %v2924_v37  ;;  %v2797_v36 = vld [vmem:[%s10989_s9 + $0x3c8] sm:$0xff] }
 0x3ab   :  { %6221 = vmatprep.subr.bf16.mxu1 %v7543_v1  ;;  %v7323_v1 = vcombine.high %v2909_v28, %v2925_v57 }
 0x3ad   :  { %6181 = vmatpush2.bf16.msra.mxu0 %v7540_v7  ;;  %v2877_v7 = vld [vmem:[%s10989_s9 + $0x648] sm:$0xff] }
 0x3ae   :  { %6222 = vmatpush2.bf16.msra.mxu1 %v7542_v8  ;;  %6182 = vmatprep.subr.bf16.mxu0 %v7509_v9  ;;  %v2893_v8 = vld [vmem:[%s10989_s9 + $0x6c8] sm:$0xff]  ;;  %v7322_v9 = vcombine.low %v2909_v28, %v2925_v57  ;;  %v7226_v57 = vcombine.low %v2813_v3, %v2829_v41 }
 0x3af   :  { %6223 = vmatprep.subr.bf16.mxu1 %v7511_v10  ;;  %v3199_v10 = vrot.slane %v10096_v2, %v9071_v17  ;;  %v7291_v61 = vcombine.high %v2877_v7, %v2893_v8 }
 0x3b1   :  { %6183 = vmatpush2.bf16.msra.mxu0 %v7508_v24  ;;  %v7289_v24 = vcombine.high %v2876_v4, %v2892_v5  ;;  %v2749_v4 = vld [vmem:[%s10989_s9 + $0x248] sm:$0xff] }
 0x3b2   :  { %6224 = vmatpush2.bf16.msra.mxu1 %v7510_v25  ;;  %6184 = vmatprep.subr.bf16.mxu0 %v7477_v30  ;;  %v2860_v25 = vld [vmem:[%s10989_s9 + $0x5c0] sm:$0xff]  ;;  %v2845_v30 = vld [vmem:[%s10989_s9 + $0x548] sm:$0xff] }
 0x3b3   :  { %6225 = vmatprep.subr.bf16.mxu1 %v7479_v45  ;;  %v2861_v45 = vld [vmem:[%s10989_s9 + $0x5c8] sm:$0xff]  ;;  %v7257_v14 = vcombine.high %v2844_v11, %v2860_v25 }
 0x3b4   :  { %v7259_v29 = vcombine.high %v2845_v30, %v2861_v45  ;;  %v7258_v47 = vcombine.low %v2845_v30, %v2861_v45  ;;  %v2765_v5 = vld [vmem:[%s10989_s9 + $0x2c8] sm:$0xff]  ;;  %v2684_v45 = vld [vmem:[%s10989_s9 + $0x40] sm:$0xff] }
 0x3b5   :  { %6185 = vmatpush2.bf16.msra.mxu0 %v7476_v34  ;;  %v7290_v34 = vcombine.low %v2877_v7, %v2893_v8 }
 0x3b6   :  { %6226 = vmatpush2.bf16.msra.mxu1 %v7478_v35  ;;  %6186 = vmatprep.subr.bf16.mxu0 %v7445_v38 }
 0x3b7   :  { %6227 = vmatprep.subr.bf16.mxu1 %v7447_v39 }
 0x3b9   :  { %6187 = vmatpush2.bf16.msra.mxu0 %v7444_v58 }
 0x3ba   :  { %6228 = vmatpush2.bf16.msra.mxu1 %v7446_v59  ;;  %6188 = vmatprep.subr.bf16.mxu0 %v7413_v60  ;;  %v2812_v59 = vld [vmem:[%s10989_s9 + $0x440] sm:$0xff] }
 0x3bb   :  { %6229 = vmatprep.subr.bf16.mxu1 %v7415_v15  ;;  %v2828_v60 = vld [vmem:[%s10989_s9 + $0x4c0] sm:$0xff] }
 0x3bc   :  { %v7225_v48 = vcombine.high %v2812_v59, %v2828_v60  ;;  %v7224_v28 = vcombine.low %v2812_v59, %v2828_v60 }
 0x3bd   :  { %6189 = vmatpush2.bf16.msra.mxu0 %v7412_v42 }
 0x3be   :  { %6230 = vmatpush2.bf16.msra.mxu1 %v7414_v44  ;;  %6190 = vmatprep.subr.bf16.mxu0 %v7381_v18  ;;  %v7256_v44 = vcombine.low %v2844_v11, %v2860_v25  ;;  %v2732_v11 = vld [vmem:[%s10989_s9 + $0x1c0] sm:$0xff] }
 0x3bf   :  { %6231 = vmatprep.subr.bf16.mxu1 %v7383_v46 }
 0x3c1   :  { %6191 = vmatpush2.bf16.msra.mxu0 %v7380_v51  ;;  %v7227_v51 = vcombine.high %v2813_v3, %v2829_v41  ;;  %v3133_v3 = vld [vmem:[%s10989_s9 + $0xe48] sm:$0xff] }
 0x3c2   :  { %6232 = vmatpush2.bf16.msra.mxu1 %v7382_v52  ;;  %6192 = vmatprep.subr.bf16.mxu0 %v7349_v53  ;;  %v2780_v52 = vld [vmem:[%s10989_s9 + $0x340] sm:$0xff]  ;;  %v3149_v41 = vld [vmem:[%s10989_s9 + $0xec8] sm:$0xff] }
 0x3c3   :  { %6233 = vmatprep.subr.bf16.mxu1 %v7351_v54  ;;  %v2796_v53 = vld [vmem:[%s10989_s9 + $0x3c0] sm:$0xff]  ;;  %v2781_v54 = vld [vmem:[%s10989_s9 + $0x348] sm:$0xff] }
 0x3c4   :  { %v7194_v7 = vcombine.low %v2781_v54, %v2797_v36 }
 0x3c5   :  { %6193 = vmatpush2.bf16.msra.mxu0 %v7348_v62  ;;  %v7193_v62 = vcombine.high %v2780_v52, %v2796_v53 }
 0x3c6   :  { %6234 = vmatpush2.bf16.msra.mxu1 %v7350_v63  ;;  %6244 = vmatprep.subr.bf16.mxu0 %v7321_v0  ;;  %v7195_v63 = vcombine.high %v2781_v54, %v2797_v36  ;;  %v2748_v0 = vld [vmem:[%s10989_s9 + $0x240] sm:$0xff] }
 0x3c7   :  { %6285 = vmatprep.subr.bf16.mxu1 %v7323_v1  ;;  %v2764_v1 = vld [vmem:[%s10989_s9 + $0x2c0] sm:$0xff] }
 0x3c8   :  { %6195 = vmatmul.mubr.bf16.vlgmr.msra.gmra.mxu0 %v9507_v27  ;;  %v5950_v31 = vpop.f32.mrf.mxu0  ;;  %v5991_v32 = vpop.f32.mrf.mxu1  ;;  %v7161_v8 = vcombine.high %v2748_v0, %v2764_v1  ;;  %v3068_v54 = vld [vmem:[%s10989_s9 + $0xc40] sm:$0xff] }
 0x3c9   :  { %6236 = vmatmul.mubr.bf16.vlgmr.msra.gmra.mxu1 %v9507_v27  ;;  %6245 = vmatpush1.bf16.msra.mxu0 %v7320_v6  ;;  %v5951_v35 = vadd.f32 %v5950_v31, %v3199_v10  ;;  %v5992_v55 = vadd.f32 %v5991_v32, %v3207_v12  ;;  %v7192_v6 = vcombine.low %v2780_v52, %v2796_v53  ;;  %v2716_v10 = vld [vmem:[%s10989_s9 + $0x140] sm:$0xff]  ;;  %v2717_v12 = vld [vmem:[%s10989_s9 + $0x148] sm:$0xff] }
 0x3ca   :  { %6276 = vmatprep.mubr.bf16.mxu0 %v9505_v26  ;;  %6286 = vmatpush1.bf16.msra.mxu1 %v7322_v9  ;;  %v5952_v38 = vpop.f32.mrf.mxu0  ;;  %v5993_v39 = vpop.f32.mrf.mxu1  ;;  %v7163_v9 = vcombine.high %v2749_v4, %v2765_v5  ;;  %v7129_v25 = vcombine.high %v2716_v10, %v2732_v11  ;;  %v2700_v31 = vld [vmem:[%s10989_s9 + $0xc0] sm:$0xff]  ;;  %v2685_v32 = vld [vmem:[%s10989_s9 + $0x48] sm:$0xff] }
 0x3cb   :  { %6317 = vmatprep.mubr.bf16.mxu1 %v9505_v26  ;;  %v5953_v56 = vadd.f32 %v5952_v38, %v3203_v13  ;;  %v5994_v58 = vadd.f32 %v5993_v39, %v3211_v21  ;;  %6246 = vmatprep.subr.bf16.mxu0 %v7289_v24  ;;  %v2733_v13 = vld [vmem:[%s10989_s9 + $0x1c8] sm:$0xff]  ;;  %v7160_v21 = vcombine.low %v2748_v0, %v2764_v1  ;;  %v3164_v39 = vld [vmem:[%s10989_s9 + $0xf40] sm:$0xff] }
 0x3cc   :  { %6287 = vmatprep.subr.bf16.mxu1 %v7291_v61  ;;  %v5954_v15 = vpop.f32.mrf.mxu0  ;;  %v5995_v40 = vpop.f32.mrf.mxu1  ;;  %v7162_v24 = vcombine.low %v2749_v4, %v2765_v5  ;;  %v7131_v30 = vcombine.high %v2717_v12, %v2733_v13  ;;  %v2701_v61 = vld [vmem:[%s10989_s9 + $0xc8] sm:$0xff]  ;;  %v3084_v36 = vld [vmem:[%s10989_s9 + $0xcc0] sm:$0xff] }
 0x3cd   :  { %v6604_v22 = vcombine.low %v5951_v35, %v5953_v56  ;;  %v6605_v42 = vcombine.low %v5992_v55, %v5994_v58  ;;  %6247 = vmatpush1.bf16.msra.mxu0 %v7288_v33  ;;  %v7128_v33 = vcombine.low %v2716_v10, %v2732_v11  ;;  %v7097_v35 = vcombine.high %v2684_v45, %v2700_v31  ;;  %v3181_v55 = vld [vmem:[%s10989_s9 + $0xfc8] sm:$0xff]  ;;  %v3132_v15 = vld [vmem:[%s10989_s9 + $0xe40] sm:$0xff] }
 0x3ce   :  { %6288 = vmatpush1.bf16.msra.mxu1 %v7290_v34  ;;  %v5955_v18 = vpop.f32.mrf.mxu0  ;;  %v5996_v46 = vpop.f32.mrf.mxu1  ;;  %6248 = vmatprep.subr.bf16.mxu0 %v7257_v14  ;;  %v7130_v34 = vcombine.low %v2717_v12, %v2733_v13  ;;  %v7099_v38 = vcombine.high %v2685_v32, %v2701_v61  ;;  %v3180_v14 = vld [vmem:[%s10989_s9 + $0xfc0] sm:$0xff]  ;;  %v7096_v56 = vcombine.low %v2684_v45, %v2700_v31  ;;  %v3037_v5 = vld [vmem:[%s10989_s9 + $0xb48] sm:$0xff] }
 0x3cf   :  { %v6612_v50 = vrot.slane %v6604_v22, %v8283_v49  ;;  %v6619_v23 = vrot.slane %v6605_v42, %v8283_v49  ;;  %6289 = vmatprep.subr.bf16.mxu1 %v7259_v29  ;;  %v3165_v29 = vld [vmem:[%s10989_s9 + $0xf48] sm:$0xff]  ;;  %v7098_v58 = vcombine.low %v2685_v32, %v2701_v61  ;;  %v7577_v59 = vcombine.high %v3164_v39, %v3180_v14  ;;  %v3148_v40 = vld [vmem:[%s10989_s9 + $0xec0] sm:$0xff] }
 0x3d0   :  { %v7579_v60 = vcombine.high %v3165_v29, %v3181_v55  ;;  %v7576_v22 = vcombine.low %v3164_v39, %v3180_v14  ;;  %v7578_v42 = vcombine.low %v3165_v29, %v3181_v55  ;;  %v7547_v18 = vcombine.high %v3133_v3, %v3149_v41  ;;  %v3100_v46 = vld [vmem:[%s10989_s9 + $0xd40] sm:$0xff]  ;;  %v3005_v13 = vld [vmem:[%s10989_s9 + $0xa48] sm:$0xff] }
 0x3d1   :  { %v6620_v37 = vcombine.low %v6612_v50, %v6619_v23  ;;  %6249 = vmatpush1.bf16.msra.mxu0 %v7256_v44  ;;  %v7545_v44 = vcombine.high %v3132_v15, %v3148_v40  ;;  %v3117_v50 = vld [vmem:[%s10989_s9 + $0xdc8] sm:$0xff]  ;;  %v7544_v23 = vcombine.low %v3132_v15, %v3148_v40  ;;  %v3036_v1 = vld [vmem:[%s10989_s9 + $0xb40] sm:$0xff]  ;;  %v2910_v40 = vld [vmem:[%s10989_s9 + $0x750] sm:$0xff] }
 0x3d2   :  { %6290 = vmatpush1.bf16.msra.mxu1 %v7258_v47  ;;  %6250 = vmatprep.subr.bf16.mxu0 %v7225_v48  ;;  %v3116_v47 = vld [vmem:[%s10989_s9 + $0xdc0] sm:$0xff]  ;;  %v3101_v48 = vld [vmem:[%s10989_s9 + $0xd48] sm:$0xff] }
 0x3d3   :  { %6748 = vst [vmem:[%s10994_s11] sm:$0xff] %v6620_v37  ;;  %6291 = vmatprep.subr.bf16.mxu1 %v7227_v51  ;;  %v7546_v51 = vcombine.low %v3133_v3, %v3149_v41  ;;  %v7513_v52 = vcombine.high %v3100_v46, %v3116_v47  ;;  %v7515_v53 = vcombine.high %v3101_v48, %v3117_v50  ;;  %v3069_v37 = vld [vmem:[%s10989_s9 + $0xc48] sm:$0xff]  ;;  %v3052_v4 = vld [vmem:[%s10989_s9 + $0xbc0] sm:$0xff]  ;;  %v2926_v3 = vld [vmem:[%s10989_s9 + $0x7d0] sm:$0xff] }
 0x3d4   :  { %v3004_v11 = vld [vmem:[%s10989_s9 + $0xa40] sm:$0xff]  ;;  %v2973_v61 = vld [vmem:[%s10989_s9 + $0x948] sm:$0xff]  ;;  %v2911_v41 = vld [vmem:[%s10989_s9 + $0x758] sm:$0xff] }
 0x3d5   :  { %6251 = vmatpush1.bf16.msra.mxu0 %v7224_v28  ;;  %v3085_v28 = vld [vmem:[%s10989_s9 + $0xcc8] sm:$0xff]  ;;  %v3020_v12 = vld [vmem:[%s10989_s9 + $0xac0] sm:$0xff] }
 0x3d6   :  { %6292 = vmatpush1.bf16.msra.mxu1 %v7226_v57  ;;  %6252 = vmatprep.subr.bf16.mxu0 %v7193_v62  ;;  %v7512_v57 = vcombine.low %v3100_v46, %v3116_v47  ;;  %v7514_v62 = vcombine.low %v3101_v48, %v3117_v50  ;;  %v7483_v0 = vcombine.high %v3069_v37, %v3085_v28  ;;  %v2972_v31 = vld [vmem:[%s10989_s9 + $0x940] sm:$0xff]  ;;  %v2941_v55 = vld [vmem:[%s10989_s9 + $0x848] sm:$0xff]  ;;  %v10311_v47 = vsub.s32 6, %v8265_v43 }
 0x3d7   :  { %6293 = vmatprep.subr.bf16.mxu1 %v7195_v63  ;;  %v7481_v63 = vcombine.high %v3068_v54, %v3084_v36  ;;  %v2988_v32 = vld [vmem:[%s10989_s9 + $0x9c0] sm:$0xff]  ;;  %v7325_v46 = vcombine.high %v2910_v40, %v2926_v3  ;;  %v10314_v50 = vsub.s32 5, %v8265_v43 }
 0x3d8   :  { %v2940_v14 = vld [vmem:[%s10989_s9 + $0x840] sm:$0xff] }
 0x3d9   :  { %6253 = vmatpush1.bf16.msra.mxu0 %v7192_v6  ;;  %v3053_v6 = vld [vmem:[%s10989_s9 + $0xbc8] sm:$0xff]  ;;  %v2956_v29 = vld [vmem:[%s10989_s9 + $0x8c0] sm:$0xff] }
 0x3da   :  { %6294 = vmatpush1.bf16.msra.mxu1 %v7194_v7  ;;  %6254 = vmatprep.subr.bf16.mxu0 %v7161_v8  ;;  %v7480_v7 = vcombine.low %v3068_v54, %v3084_v36  ;;  %v7482_v8 = vcombine.low %v3069_v37, %v3085_v28  ;;  %v7451_v10 = vcombine.high %v3037_v5, %v3053_v6  ;;  %v2879_v54 = vld [vmem:[%s10989_s9 + $0x658] sm:$0xff]  ;;  %v2846_v28 = vld [vmem:[%s10989_s9 + $0x550] sm:$0xff] }
 0x3db   :  { %6295 = vmatprep.subr.bf16.mxu1 %v7163_v9  ;;  %v7449_v9 = vcombine.high %v3036_v1, %v3052_v4  ;;  %v2895_v36 = vld [vmem:[%s10989_s9 + $0x6d8] sm:$0xff] }
 0x3dd   :  { %6255 = vmatpush1.bf16.msra.mxu0 %v7160_v21  ;;  %v3021_v21 = vld [vmem:[%s10989_s9 + $0xac8] sm:$0xff] }
 0x3de   :  { %6296 = vmatpush1.bf16.msra.mxu1 %v7162_v24  ;;  %6256 = vmatprep.subr.bf16.mxu0 %v7129_v25  ;;  %v7448_v24 = vcombine.low %v3036_v1, %v3052_v4  ;;  %v7450_v25 = vcombine.low %v3037_v5, %v3053_v6  ;;  %v7419_v45 = vcombine.high %v3005_v13, %v3021_v21  ;;  %v2862_v1 = vld [vmem:[%s10989_s9 + $0x5d0] sm:$0xff]  ;;  %v2847_v4 = vld [vmem:[%s10989_s9 + $0x558] sm:$0xff] }
 0x3df   :  { %6297 = vmatprep.subr.bf16.mxu1 %v7131_v30  ;;  %v7417_v30 = vcombine.high %v3004_v11, %v3020_v12  ;;  %v2863_v5 = vld [vmem:[%s10989_s9 + $0x5d8] sm:$0xff] }
 0x3e1   :  { %6257 = vmatpush1.bf16.msra.mxu0 %v7128_v33  ;;  %v2989_v33 = vld [vmem:[%s10989_s9 + $0x9c8] sm:$0xff] }
 0x3e2   :  { %6298 = vmatpush1.bf16.msra.mxu1 %v7130_v34  ;;  %6258 = vmatprep.subr.bf16.mxu0 %v7097_v35  ;;  %v7416_v34 = vcombine.low %v3004_v11, %v3020_v12  ;;  %v7418_v35 = vcombine.low %v3005_v13, %v3021_v21  ;;  %v7387_v39 = vcombine.high %v2973_v61, %v2989_v33 }
 0x3e3   :  { %6299 = vmatprep.subr.bf16.mxu1 %v7099_v38  ;;  %v7385_v38 = vcombine.high %v2972_v31, %v2988_v32  ;;  %v7261_v13 = vcombine.high %v2846_v28, %v2862_v1  ;;  %v7263_v21 = vcombine.high %v2847_v4, %v2863_v5 }
 0x3e5   :  { %6259 = vmatpush1.bf16.msra.mxu0 %v7096_v56  ;;  %v2957_v56 = vld [vmem:[%s10989_s9 + $0x8c8] sm:$0xff] }
 0x3e6   :  { %6300 = vmatpush1.bf16.msra.mxu1 %v7098_v58  ;;  %6260 = vmatprep.subr.bf16.mxu0 %v7577_v59  ;;  %v7384_v58 = vcombine.low %v2972_v31, %v2988_v32  ;;  %v7386_v59 = vcombine.low %v2973_v61, %v2989_v33  ;;  %v7355_v15 = vcombine.high %v2941_v55, %v2957_v56  ;;  %v2830_v31 = vld [vmem:[%s10989_s9 + $0x4d0] sm:$0xff]  ;;  %v2815_v33 = vld [vmem:[%s10989_s9 + $0x458] sm:$0xff] }
 0x3e7   :  { %6301 = vmatprep.subr.bf16.mxu1 %v7579_v60  ;;  %v7353_v60 = vcombine.high %v2940_v14, %v2956_v29 }
 0x3e9   :  { %6261 = vmatpush2.bf16.msra.mxu0 %v7576_v22  ;;  %v2927_v22 = vld [vmem:[%s10989_s9 + $0x7d8] sm:$0xff] }
 0x3ea   :  { %6302 = vmatpush2.bf16.msra.mxu1 %v7578_v42  ;;  %6262 = vmatprep.subr.bf16.mxu0 %v7545_v44  ;;  %v7352_v42 = vcombine.low %v2940_v14, %v2956_v29  ;;  %v7354_v44 = vcombine.low %v2941_v55, %v2957_v56  ;;  %v7327_v48 = vcombine.high %v2911_v41, %v2927_v22 }
 0x3eb   :  { %6303 = vmatprep.subr.bf16.mxu1 %v7547_v18  ;;  %v10308_v18 = vsub.s32 4, %v8265_v43  ;;  %v7326_v37 = vcombine.low %v2911_v41, %v2927_v22  ;;  %v7262_v55 = vcombine.low %v2847_v4, %v2863_v5  ;;  %v2799_v41 = vld [vmem:[%s10989_s9 + $0x3d8] sm:$0xff] }
 0x3ed   :  { %6263 = vmatpush2.bf16.msra.mxu0 %v7544_v23  ;;  %v10317_v23 = vsub.s32 7, %v8265_v43  ;;  %v3215_v43 = vrot.slane %v10096_v2, %v10308_v18 }
 0x3ee   :  { %6304 = vmatpush2.bf16.msra.mxu1 %v7546_v51  ;;  %6264 = vmatprep.subr.bf16.mxu0 %v7513_v52  ;;  %v2878_v51 = vld [vmem:[%s10989_s9 + $0x650] sm:$0xff] }
 0x3ef   :  { %6305 = vmatprep.subr.bf16.mxu1 %v7515_v53  ;;  %v2894_v52 = vld [vmem:[%s10989_s9 + $0x6d0] sm:$0xff]  ;;  %v7324_v53 = vcombine.low %v2910_v40, %v2926_v3  ;;  %v2783_v3 = vld [vmem:[%s10989_s9 + $0x358] sm:$0xff] }
 0x3f0   :  { %v2798_v40 = vld [vmem:[%s10989_s9 + $0x3d0] sm:$0xff] }
 0x3f1   :  { %6265 = vmatpush2.bf16.msra.mxu0 %v7512_v57  ;;  %v3223_v57 = vrot.slane %v10096_v2, %v10311_v47 }
 0x3f2   :  { %6306 = vmatpush2.bf16.msra.mxu1 %v7514_v62  ;;  %6266 = vmatprep.subr.bf16.mxu0 %v7481_v63  ;;  %v3219_v62 = vrot.slane %v10096_v2, %v10314_v50  ;;  %v3227_v63 = vrot.slane %v10096_v2, %v10317_v23  ;;  %v7292_v2 = vcombine.low %v2878_v51, %v2894_v52 }
 0x3f3   :  { %6307 = vmatprep.subr.bf16.mxu1 %v7483_v0  ;;  %v7293_v0 = vcombine.high %v2878_v51, %v2894_v52  ;;  %v2750_v51 = vld [vmem:[%s10989_s9 + $0x250] sm:$0xff] }
 0x3f4   :  { %v2766_v52 = vld [vmem:[%s10989_s9 + $0x2d0] sm:$0xff] }
 0x3f5   :  { %6267 = vmatpush2.bf16.msra.mxu0 %v7480_v7 }
 0x3f6   :  { %6308 = vmatpush2.bf16.msra.mxu1 %v7482_v8  ;;  %6268 = vmatprep.subr.bf16.mxu0 %v7449_v9  ;;  %v7295_v8 = vcombine.high %v2879_v54, %v2895_v36  ;;  %v7294_v9 = vcombine.low %v2879_v54, %v2895_v36  ;;  %v2767_v54 = vld [vmem:[%s10989_s9 + $0x2d8] sm:$0xff] }
 0x3f7   :  { %6309 = vmatprep.subr.bf16.mxu1 %v7451_v10 }
 0x3f9   :  { %6269 = vmatpush2.bf16.msra.mxu0 %v7448_v24 }
 0x3fa   :  { %6310 = vmatpush2.bf16.msra.mxu1 %v7450_v25  ;;  %6270 = vmatprep.subr.bf16.mxu0 %v7417_v30 }
 0x3fb   :  { %6311 = vmatprep.subr.bf16.mxu1 %v7419_v45  ;;  %v2814_v45 = vld [vmem:[%s10989_s9 + $0x450] sm:$0xff] }
 0x3fc   :  { %v7229_v56 = vcombine.high %v2814_v45, %v2830_v31 }
 0x3fd   :  { %6271 = vmatpush2.bf16.msra.mxu0 %v7416_v34  ;;  %v2831_v34 = vld [vmem:[%s10989_s9 + $0x4d8] sm:$0xff] }
 0x3fe   :  { %6312 = vmatpush2.bf16.msra.mxu1 %v7418_v35  ;;  %6272 = vmatprep.subr.bf16.mxu0 %v7385_v38 }
 0x3ff   :  { %6313 = vmatprep.subr.bf16.mxu1 %v7387_v39  ;;  %v7260_v39 = vcombine.low %v2846_v28, %v2862_v1  ;;  %v7164_v1 = vcombine.low %v2750_v51, %v2766_v52 }
 0x401   :  { %6273 = vmatpush2.bf16.msra.mxu0 %v7384_v58 }
 0x402   :  { %6314 = vmatpush2.bf16.msra.mxu1 %v7386_v59  ;;  %6274 = vmatprep.subr.bf16.mxu0 %v7353_v60  ;;  %v7231_v60 = vcombine.high %v2815_v33, %v2831_v34 }
 0x403   :  { %6315 = vmatprep.subr.bf16.mxu1 %v7355_v15  ;;  %v2782_v15 = vld [vmem:[%s10989_s9 + $0x350] sm:$0xff] }
 0x404   :  { %v7196_v36 = vcombine.low %v2782_v15, %v2798_v40 }
 0x405   :  { %6275 = vmatpush2.bf16.msra.mxu0 %v7352_v42  ;;  %v7228_v42 = vcombine.low %v2814_v45, %v2830_v31 }
 0x406   :  { %6316 = vmatpush2.bf16.msra.mxu1 %v7354_v44  ;;  %6326 = vmatprep.subr.bf16.mxu0 %v7325_v46  ;;  %v7230_v44 = vcombine.low %v2815_v33, %v2831_v34  ;;  %v7197_v46 = vcombine.high %v2782_v15, %v2798_v40  ;;  %v3134_v33 = vld [vmem:[%s10989_s9 + $0xe50] sm:$0xff] }
 0x407   :  { %6367 = vmatprep.subr.bf16.mxu1 %v7327_v48  ;;  %v7199_v48 = vcombine.high %v2783_v3, %v2799_v41  ;;  %v3150_v34 = vld [vmem:[%s10989_s9 + $0xed0] sm:$0xff] }
 0x408   :  { %v6032_v6 = vpop.f32.mrf.mxu0  ;;  %v6073_v7 = vpop.f32.mrf.mxu1  ;;  %6277 = vmatmul.mubr.bf16.vlgmr.msra.gmra.mxu0 %v9507_v27  ;;  %v7548_v15 = vcombine.low %v3134_v33, %v3150_v34 }
 0x409   :  { %6318 = vmatmul.mubr.bf16.vlgmr.msra.gmra.mxu1 %v9507_v27  ;;  %6327 = vmatpush1.bf16.msra.mxu0 %v7324_v53  ;;  %v6033_v10 = vadd.f32 %v6032_v6, %v3215_v43  ;;  %v6074_v24 = vadd.f32 %v6073_v7, %v3223_v57  ;;  %v2751_v53 = vld [vmem:[%s10989_s9 + $0x258] sm:$0xff]  ;;  %v7198_v43 = vcombine.low %v2783_v3, %v2799_v41  ;;  %v2718_v57 = vld [vmem:[%s10989_s9 + $0x150] sm:$0xff] }
 0x40a   :  { %6358 = vmatprep.mubr.bf16.mxu0 %v9505_v26  ;;  %6368 = vmatpush1.bf16.msra.mxu1 %v7326_v37  ;;  %v6034_v11 = vpop.f32.mrf.mxu0  ;;  %v6075_v12 = vpop.f32.mrf.mxu1  ;;  %v7165_v37 = vcombine.high %v2750_v51, %v2766_v52  ;;  %v7167_v28 = vcombine.high %v2751_v53, %v2767_v54  ;;  %v7166_v4 = vcombine.low %v2751_v53, %v2767_v54  ;;  %v2686_v7 = vld [vmem:[%s10989_s9 + $0x50] sm:$0xff] }
 0x40b   :  { %6399 = vmatprep.mubr.bf16.mxu1 %v9505_v26  ;;  %v6035_v25 = vadd.f32 %v6034_v11, %v3219_v62  ;;  %v6076_v30 = vadd.f32 %v6075_v12, %v3227_v63  ;;  %6328 = vmatprep.subr.bf16.mxu0 %v7293_v0  ;;  %v2734_v62 = vld [vmem:[%s10989_s9 + $0x1d0] sm:$0xff]  ;;  %v2719_v63 = vld [vmem:[%s10989_s9 + $0x158] sm:$0xff] }
 0x40c   :  { %v6036_v32 = vpop.f32.mrf.mxu0  ;;  %v6077_v61 = vpop.f32.mrf.mxu1  ;;  %6369 = vmatprep.subr.bf16.mxu1 %v7295_v8  ;;  %v2735_v0 = vld [vmem:[%s10989_s9 + $0x1d8] sm:$0xff]  ;;  %v7133_v5 = vcombine.high %v2718_v57, %v2734_v62  ;;  %v2702_v8 = vld [vmem:[%s10989_s9 + $0xd0] sm:$0xff] }
 0x40d   :  { %v6621_v35 = vcombine.low %v6033_v10, %v6035_v25  ;;  %v6622_v38 = vcombine.low %v6074_v24, %v6076_v30  ;;  %6329 = vmatpush1.bf16.msra.mxu0 %v7292_v2  ;;  %v7135_v6 = vcombine.high %v2719_v63, %v2735_v0  ;;  %v2687_v2 = vld [vmem:[%s10989_s9 + $0x58] sm:$0xff]  ;;  %v7132_v10 = vcombine.low %v2718_v57, %v2734_v62  ;;  %v3182_v24 = vld [vmem:[%s10989_s9 + $0xfd0] sm:$0xff] }
 0x40e   :  { %6370 = vmatpush1.bf16.msra.mxu1 %v7294_v9  ;;  %v6037_v14 = vpop.f32.mrf.mxu0  ;;  %v6078_v29 = vpop.f32.mrf.mxu1  ;;  %6330 = vmatprep.subr.bf16.mxu0 %v7261_v13  ;;  %v2703_v9 = vld [vmem:[%s10989_s9 + $0xd8] sm:$0xff]  ;;  %v7134_v11 = vcombine.low %v2719_v63, %v2735_v0  ;;  %v7101_v12 = vcombine.high %v2686_v7, %v2702_v8  ;;  %v7100_v45 = vcombine.low %v2686_v7, %v2702_v8  ;;  %v3038_v54 = vld [vmem:[%s10989_s9 + $0xb50] sm:$0xff] }
 0x40f   :  { %v6629_v58 = vrot.slane %v6621_v35, %v8283_v49  ;;  %v6636_v59 = vrot.slane %v6622_v38, %v8283_v49  ;;  %6371 = vmatprep.subr.bf16.mxu1 %v7263_v21  ;;  %v7103_v13 = vcombine.high %v2687_v2, %v2703_v9  ;;  %v3166_v21 = vld [vmem:[%s10989_s9 + $0xf50] sm:$0xff]  ;;  %v3167_v25 = vld [vmem:[%s10989_s9 + $0xf58] sm:$0xff]  ;;  %v7102_v31 = vcombine.low %v2687_v2, %v2703_v9 }
 0x410   :  { %v3183_v30 = vld [vmem:[%s10989_s9 + $0xfd8] sm:$0xff]  ;;  %v7581_v32 = vcombine.high %v3166_v21, %v3182_v24  ;;  %v7549_v29 = vcombine.high %v3134_v33, %v3150_v34  ;;  %v3006_v0 = vld [vmem:[%s10989_s9 + $0xa50] sm:$0xff] }
 0x411   :  { %v6637_v22 = vcombine.low %v6629_v58, %v6636_v59  ;;  %6331 = vmatpush1.bf16.msra.mxu0 %v7260_v39  ;;  %v7583_v61 = vcombine.high %v3167_v25, %v3183_v30  ;;  %v3135_v35 = vld [vmem:[%s10989_s9 + $0xe58] sm:$0xff]  ;;  %v7580_v39 = vcombine.low %v3166_v21, %v3182_v24  ;;  %v7582_v14 = vcombine.low %v3167_v25, %v3183_v30  ;;  %v3118_v58 = vld [vmem:[%s10989_s9 + $0xdd0] sm:$0xff] }
 0x412   :  { %6372 = vmatpush1.bf16.msra.mxu1 %v7262_v55  ;;  %6332 = vmatprep.subr.bf16.mxu0 %v7229_v56  ;;  %v3151_v38 = vld [vmem:[%s10989_s9 + $0xed8] sm:$0xff]  ;;  %v3102_v56 = vld [vmem:[%s10989_s9 + $0xd50] sm:$0xff] }
 0x413   :  { %6749 = vst [vmem:[%s10994_s11 + $0x8] sm:$0xff] %v6637_v22  ;;  %6373 = vmatprep.subr.bf16.mxu1 %v7231_v60  ;;  %v7551_v55 = vcombine.high %v3135_v35, %v3151_v38  ;;  %v3103_v59 = vld [vmem:[%s10989_s9 + $0xd58] sm:$0xff]  ;;  %v7550_v40 = vcombine.low %v3135_v35, %v3151_v38  ;;  %v7517_v3 = vcombine.high %v3102_v56, %v3118_v58  ;;  %v3070_v22 = vld [vmem:[%s10989_s9 + $0xc50] sm:$0xff]  ;;  %v2912_v38 = vld [vmem:[%s10989_s9 + $0x760] sm:$0xff] }
 0x414   :  { %v3119_v60 = vld [vmem:[%s10989_s9 + $0xdd8] sm:$0xff]  ;;  %v2974_v9 = vld [vmem:[%s10989_s9 + $0x950] sm:$0xff] }
 0x415   :  { %6333 = vmatpush1.bf16.msra.mxu0 %v7228_v42  ;;  %v7519_v41 = vcombine.high %v3103_v59, %v3119_v60  ;;  %v3086_v42 = vld [vmem:[%s10989_s9 + $0xcd0] sm:$0xff]  ;;  %v7518_v51 = vcombine.low %v3103_v59, %v3119_v60  ;;  %v10531_v60 = vld [vmem:[%s10993_s10 + $0x8] sm:$0xff] }
 0x416   :  { %6374 = vmatpush1.bf16.msra.mxu1 %v7230_v44  ;;  %6334 = vmatprep.subr.bf16.mxu0 %v7197_v46  ;;  %v3071_v44 = vld [vmem:[%s10989_s9 + $0xc58] sm:$0xff]  ;;  %v7485_v52 = vcombine.high %v3070_v22, %v3086_v42  ;;  %v2942_v30 = vld [vmem:[%s10989_s9 + $0x850] sm:$0xff] }
 0x417   :  { %6375 = vmatprep.subr.bf16.mxu1 %v7199_v48  ;;  %v3087_v46 = vld [vmem:[%s10989_s9 + $0xcd8] sm:$0xff]  ;;  %v7516_v48 = vcombine.low %v3102_v56, %v3118_v58 }
 0x418   :  { %v7487_v53 = vcombine.high %v3071_v44, %v3087_v46  ;;  %v7486_v57 = vcombine.low %v3071_v44, %v3087_v46  ;;  %v3231_v44 = vrot.slane %v10531_v60, %v9071_v17  ;;  %v3235_v46 = vrot.slane %v10531_v60, %v9079_v19 }
 0x419   :  { %6335 = vmatpush1.bf16.msra.mxu0 %v7196_v36  ;;  %v3054_v36 = vld [vmem:[%s10989_s9 + $0xbd0] sm:$0xff] }
 0x41a   :  { %6376 = vmatpush1.bf16.msra.mxu1 %v7198_v43  ;;  %6336 = vmatprep.subr.bf16.mxu0 %v7165_v37  ;;  %v3039_v43 = vld [vmem:[%s10989_s9 + $0xb58] sm:$0xff]  ;;  %v7453_v62 = vcombine.high %v3038_v54, %v3054_v36 }
 0x41b   :  { %6377 = vmatprep.subr.bf16.mxu1 %v7167_v28  ;;  %v3055_v37 = vld [vmem:[%s10989_s9 + $0xbd8] sm:$0xff]  ;;  %v7484_v28 = vcombine.low %v3070_v22, %v3086_v42  ;;  %v2897_v22 = vld [vmem:[%s10989_s9 + $0x6e8] sm:$0xff] }
 0x41c   :  { %v7455_v63 = vcombine.high %v3039_v43, %v3055_v37  ;;  %v7454_v7 = vcombine.low %v3039_v43, %v3055_v37  ;;  %v2849_v37 = vld [vmem:[%s10989_s9 + $0x568] sm:$0xff] }
 0x41d   :  { %6337 = vmatpush1.bf16.msra.mxu0 %v7164_v1  ;;  %v3022_v1 = vld [vmem:[%s10989_s9 + $0xad0] sm:$0xff] }
 0x41e   :  { %6378 = vmatpush1.bf16.msra.mxu1 %v7166_v4  ;;  %6338 = vmatprep.subr.bf16.mxu0 %v7133_v5  ;;  %v3007_v4 = vld [vmem:[%s10989_s9 + $0xa58] sm:$0xff]  ;;  %v7421_v8 = vcombine.high %v3006_v0, %v3022_v1 }
 0x41f   :  { %6379 = vmatprep.subr.bf16.mxu1 %v7135_v6  ;;  %v3023_v5 = vld [vmem:[%s10989_s9 + $0xad8] sm:$0xff]  ;;  %v7452_v6 = vcombine.low %v3038_v54, %v3054_v36  ;;  %v3239_v54 = vrot.slane %v10531_v60, %v9227_v16  ;;  %v3243_v36 = vrot.slane %v10531_v60, %v9230_v20 }
 0x420   :  { %v7423_v2 = vcombine.high %v3007_v4, %v3023_v5  ;;  %v7422_v21 = vcombine.low %v3007_v4, %v3023_v5 }
 0x421   :  { %6339 = vmatpush1.bf16.msra.mxu0 %v7132_v10  ;;  %v2990_v10 = vld [vmem:[%s10989_s9 + $0x9d0] sm:$0xff] }
 0x422   :  { %6380 = vmatpush1.bf16.msra.mxu1 %v7134_v11  ;;  %6340 = vmatprep.subr.bf16.mxu0 %v7101_v12  ;;  %v2975_v11 = vld [vmem:[%s10989_s9 + $0x958] sm:$0xff]  ;;  %v7389_v24 = vcombine.high %v2974_v9, %v2990_v10 }
 0x423   :  { %6381 = vmatprep.subr.bf16.mxu1 %v7103_v13  ;;  %v2991_v12 = vld [vmem:[%s10989_s9 + $0x9d8] sm:$0xff]  ;;  %v7420_v13 = vcombine.low %v3006_v0, %v3022_v1 }
 0x424   :  { %v7391_v25 = vcombine.high %v2975_v11, %v2991_v12  ;;  %v7390_v33 = vcombine.low %v2975_v11, %v2991_v12  ;;  %v2817_v12 = vld [vmem:[%s10989_s9 + $0x468] sm:$0xff] }
 0x425   :  { %6341 = vmatpush1.bf16.msra.mxu0 %v7100_v45  ;;  %v2958_v45 = vld [vmem:[%s10989_s9 + $0x8d0] sm:$0xff] }
 0x426   :  { %6382 = vmatpush1.bf16.msra.mxu1 %v7102_v31  ;;  %6342 = vmatprep.subr.bf16.mxu0 %v7581_v32  ;;  %v2943_v31 = vld [vmem:[%s10989_s9 + $0x858] sm:$0xff]  ;;  %v7357_v34 = vcombine.high %v2942_v30, %v2958_v45 }
 0x427   :  { %6383 = vmatprep.subr.bf16.mxu1 %v7583_v61  ;;  %v2959_v32 = vld [vmem:[%s10989_s9 + $0x8d8] sm:$0xff]  ;;  %v7388_v61 = vcombine.low %v2974_v9, %v2990_v10 }
 0x428   :  { %v7359_v35 = vcombine.high %v2943_v31, %v2959_v32  ;;  %v7358_v56 = vcombine.low %v2943_v31, %v2959_v32 }
 0x429   :  { %6343 = vmatpush2.bf16.msra.mxu0 %v7580_v39  ;;  %v2928_v39 = vld [vmem:[%s10989_s9 + $0x7e0] sm:$0xff] }
 0x42a   :  { %6384 = vmatpush2.bf16.msra.mxu1 %v7582_v14  ;;  %6344 = vmatprep.subr.bf16.mxu0 %v7549_v29  ;;  %v2913_v14 = vld [vmem:[%s10989_s9 + $0x768] sm:$0xff]  ;;  %v7329_v58 = vcombine.high %v2912_v38, %v2928_v39 }
 0x42b   :  { %6385 = vmatprep.subr.bf16.mxu1 %v7551_v55  ;;  %v2929_v29 = vld [vmem:[%s10989_s9 + $0x7e8] sm:$0xff]  ;;  %v7356_v55 = vcombine.low %v2942_v30, %v2958_v45 }
 0x42c   :  { %v7331_v59 = vcombine.high %v2913_v14, %v2929_v29  ;;  %v7330_v42 = vcombine.low %v2913_v14, %v2929_v29  ;;  %v2785_v14 = vld [vmem:[%s10989_s9 + $0x368] sm:$0xff] }
 0x42d   :  { %6345 = vmatpush2.bf16.msra.mxu0 %v7548_v15  ;;  %v2880_v15 = vld [vmem:[%s10989_s9 + $0x660] sm:$0xff]  ;;  %v2801_v29 = vld [vmem:[%s10989_s9 + $0x3e8] sm:$0xff] }
 0x42e   :  { %6386 = vmatpush2.bf16.msra.mxu1 %v7550_v40  ;;  %6346 = vmatprep.subr.bf16.mxu0 %v7517_v3  ;;  %v2896_v40 = vld [vmem:[%s10989_s9 + $0x6e0] sm:$0xff]  ;;  %v7328_v3 = vcombine.low %v2912_v38, %v2928_v39 }
 0x42f   :  { %6387 = vmatprep.subr.bf16.mxu1 %v7519_v41  ;;  %v2881_v41 = vld [vmem:[%s10989_s9 + $0x668] sm:$0xff]  ;;  %v2800_v38 = vld [vmem:[%s10989_s9 + $0x3e0] sm:$0xff] }
 0x430   :  { %v7299_v43 = vcombine.high %v2881_v41, %v2897_v22  ;;  %v7298_v0 = vcombine.low %v2881_v41, %v2897_v22  ;;  %v2753_v41 = vld [vmem:[%s10989_s9 + $0x268] sm:$0xff] }
 0x431   :  { %6347 = vmatpush2.bf16.msra.mxu0 %v7516_v48  ;;  %v7297_v48 = vcombine.high %v2880_v15, %v2896_v40  ;;  %v2769_v22 = vld [vmem:[%s10989_s9 + $0x2e8] sm:$0xff] }
 0x432   :  { %6388 = vmatpush2.bf16.msra.mxu1 %v7518_v51  ;;  %6348 = vmatprep.subr.bf16.mxu0 %v7485_v52  ;;  %v2848_v51 = vld [vmem:[%s10989_s9 + $0x560] sm:$0xff] }
 0x433   :  { %6389 = vmatprep.subr.bf16.mxu1 %v7487_v53  ;;  %v2864_v52 = vld [vmem:[%s10989_s9 + $0x5e0] sm:$0xff] }
 0x434   :  { %v7265_v1 = vcombine.high %v2848_v51, %v2864_v52 }
 0x435   :  { %6349 = vmatpush2.bf16.msra.mxu0 %v7484_v28  ;;  %v2865_v28 = vld [vmem:[%s10989_s9 + $0x5e8] sm:$0xff] }
 0x436   :  { %6390 = vmatpush2.bf16.msra.mxu1 %v7486_v57  ;;  %6350 = vmatprep.subr.bf16.mxu0 %v7453_v62  ;;  %v7296_v62 = vcombine.low %v2880_v15, %v2896_v40  ;;  %v7266_v31 = vcombine.low %v2849_v37, %v2865_v28  ;;  %v7203_v15 = vcombine.high %v2785_v14, %v2801_v29  ;;  %v2752_v40 = vld [vmem:[%s10989_s9 + $0x260] sm:$0xff] }
 0x437   :  { %6391 = vmatprep.subr.bf16.mxu1 %v7455_v63 }
 0x439   :  { %6351 = vmatpush2.bf16.msra.mxu0 %v7452_v6 }
 0x43a   :  { %6392 = vmatpush2.bf16.msra.mxu1 %v7454_v7  ;;  %6352 = vmatprep.subr.bf16.mxu0 %v7421_v8  ;;  %v7267_v7 = vcombine.high %v2849_v37, %v2865_v28  ;;  %v2816_v8 = vld [vmem:[%s10989_s9 + $0x460] sm:$0xff] }
 0x43b   :  { %6393 = vmatprep.subr.bf16.mxu1 %v7423_v2  ;;  %v2832_v2 = vld [vmem:[%s10989_s9 + $0x4e0] sm:$0xff] }
 0x43c   :  { %v7233_v32 = vcombine.high %v2816_v8, %v2832_v2 }
 0x43d   :  { %6353 = vmatpush2.bf16.msra.mxu0 %v7420_v13  ;;  %v2833_v13 = vld [vmem:[%s10989_s9 + $0x4e8] sm:$0xff] }
 0x43e   :  { %6394 = vmatpush2.bf16.msra.mxu1 %v7422_v21  ;;  %6354 = vmatprep.subr.bf16.mxu0 %v7389_v24 }
 0x43f   :  { %6395 = vmatprep.subr.bf16.mxu1 %v7391_v25  ;;  %v7264_v25 = vcombine.low %v2848_v51, %v2864_v52  ;;  %v2720_v51 = vld [vmem:[%s10989_s9 + $0x160] sm:$0xff] }
 0x440   :  { %v2736_v52 = vld [vmem:[%s10989_s9 + $0x1e0] sm:$0xff] }
 0x441   :  { %6355 = vmatpush2.bf16.msra.mxu0 %v7388_v61  ;;  %v7137_v37 = vcombine.high %v2720_v51, %v2736_v52 }
 0x442   :  { %6396 = vmatpush2.bf16.msra.mxu1 %v7390_v33  ;;  %6356 = vmatprep.subr.bf16.mxu0 %v7357_v34  ;;  %v7235_v34 = vcombine.high %v2817_v12, %v2833_v13 }
 0x443   :  { %6397 = vmatprep.subr.bf16.mxu1 %v7359_v35  ;;  %v2784_v35 = vld [vmem:[%s10989_s9 + $0x360] sm:$0xff] }
 0x445   :  { %6357 = vmatpush2.bf16.msra.mxu0 %v7356_v55  ;;  %v7232_v55 = vcombine.low %v2816_v8, %v2832_v2  ;;  %v3184_v8 = vld [vmem:[%s10989_s9 + $0xfe0] sm:$0xff]  ;;  %v3169_v2 = vld [vmem:[%s10989_s9 + $0xf68] sm:$0xff] }
 0x446   :  { %6398 = vmatpush2.bf16.msra.mxu1 %v7358_v56  ;;  %6408 = vmatprep.subr.bf16.mxu0 %v7329_v58  ;;  %v7234_v58 = vcombine.low %v2817_v12, %v2833_v13 }
 0x447   :  { %6449 = vmatprep.subr.bf16.mxu1 %v7331_v59  ;;  %v7201_v59 = vcombine.high %v2784_v35, %v2800_v38 }
 0x448   :  { %v6114_v53 = vpop.f32.mrf.mxu0  ;;  %6359 = vmatmul.mubr.bf16.vlgmr.msra.gmra.mxu0 %v9507_v27 }
 0x449   :  { %v6155_v57 = vpop.f32.mrf.mxu1  ;;  %6400 = vmatmul.mubr.bf16.vlgmr.msra.gmra.mxu1 %v9507_v27  ;;  %6409 = vmatpush1.bf16.msra.mxu0 %v7328_v3  ;;  %v6115_v4 = vadd.f32 %v6114_v53, %v3231_v44  ;;  %v2768_v3 = vld [vmem:[%s10989_s9 + $0x2e0] sm:$0xff]  ;;  %v7202_v44 = vcombine.low %v2785_v14, %v2801_v29  ;;  %v2721_v53 = vld [vmem:[%s10989_s9 + $0x168] sm:$0xff] }
 0x44a   :  { %6440 = vmatprep.mubr.bf16.mxu0 %v9505_v26  ;;  %6450 = vmatpush1.bf16.msra.mxu1 %v7330_v42  ;;  %v6116_v63 = vpop.f32.mrf.mxu0  ;;  %v6156_v9 = vadd.f32 %v6155_v57, %v3239_v54  ;;  %v7200_v42 = vcombine.low %v2784_v35, %v2800_v38  ;;  %v2737_v54 = vld [vmem:[%s10989_s9 + $0x1e8] sm:$0xff]  ;;  %v2688_v57 = vld [vmem:[%s10989_s9 + $0x60] sm:$0xff] }
 0x44b   :  { %6481 = vmatprep.mubr.bf16.mxu1 %v9505_v26  ;;  %v6117_v5 = vadd.f32 %v6116_v63, %v3235_v46  ;;  %v6157_v6 = vpop.f32.mrf.mxu1  ;;  %6410 = vmatprep.subr.bf16.mxu0 %v7297_v48  ;;  %v7169_v46 = vcombine.high %v2752_v40, %v2768_v3  ;;  %v7171_v48 = vcombine.high %v2753_v41, %v2769_v22  ;;  %v2689_v63 = vld [vmem:[%s10989_s9 + $0x68] sm:$0xff] }
 0x44c   :  { %v6158_v10 = vadd.f32 %v6157_v6, %v3243_v36  ;;  %v6118_v11 = vpop.f32.mrf.mxu0  ;;  %6451 = vmatprep.subr.bf16.mxu1 %v7299_v43  ;;  %v7168_v36 = vcombine.low %v2752_v40, %v2768_v3  ;;  %v7170_v43 = vcombine.low %v2753_v41, %v2769_v22  ;;  %v7139_v28 = vcombine.high %v2721_v53, %v2737_v54  ;;  %v3105_v35 = vld [vmem:[%s10989_s9 + $0xd68] sm:$0xff] }
 0x44d   :  { %v6638_v21 = vcombine.low %v6115_v4, %v6117_v5  ;;  %v6159_v24 = vpop.f32.mrf.mxu1  ;;  %6411 = vmatpush1.bf16.msra.mxu0 %v7296_v62  ;;  %v2704_v62 = vld [vmem:[%s10989_s9 + $0xe0] sm:$0xff]  ;;  %v7138_v4 = vcombine.low %v2721_v53, %v2737_v54  ;;  %v3121_v38 = vld [vmem:[%s10989_s9 + $0xde8] sm:$0xff] }
 0x44e   :  { %v6639_v30 = vcombine.low %v6156_v9, %v6158_v10  ;;  %6452 = vmatpush1.bf16.msra.mxu1 %v7298_v0  ;;  %v6119_v45 = vpop.f32.mrf.mxu0  ;;  %6412 = vmatprep.subr.bf16.mxu0 %v7265_v1  ;;  %v2705_v0 = vld [vmem:[%s10989_s9 + $0xe8] sm:$0xff]  ;;  %v7136_v1 = vcombine.low %v2720_v51, %v2736_v52  ;;  %v7105_v5 = vcombine.high %v2688_v57, %v2704_v62  ;;  %v3152_v24 = vld [vmem:[%s10989_s9 + $0xee0] sm:$0xff] }
 0x44f   :  { %v6646_v61 = vrot.slane %v6638_v21, %v8283_v49  ;;  %v6160_v33 = vpop.f32.mrf.mxu1  ;;  %6453 = vmatprep.subr.bf16.mxu1 %v7267_v7  ;;  %v7107_v6 = vcombine.high %v2689_v63, %v2705_v0  ;;  %v3168_v7 = vld [vmem:[%s10989_s9 + $0xf60] sm:$0xff]  ;;  %v3185_v9 = vld [vmem:[%s10989_s9 + $0xfe8] sm:$0xff]  ;;  %v7104_v10 = vcombine.low %v2688_v57, %v2704_v62  ;;  %v7106_v11 = vcombine.low %v2689_v63, %v2705_v0 }
 0x450   :  { %v6653_v39 = vrot.slane %v6639_v30, %v8283_v49  ;;  %v7585_v12 = vcombine.high %v3168_v7, %v3184_v8  ;;  %v7587_v13 = vcombine.high %v3169_v2, %v3185_v9  ;;  %v3136_v21 = vld [vmem:[%s10989_s9 + $0xe60] sm:$0xff]  ;;  %v3153_v30 = vld [vmem:[%s10989_s9 + $0xee8] sm:$0xff]  ;;  %v7584_v45 = vcombine.low %v3168_v7, %v3184_v8 }
 0x451   :  { %6413 = vmatpush1.bf16.msra.mxu0 %v7264_v25  ;;  %v3137_v25 = vld [vmem:[%s10989_s9 + $0xe68] sm:$0xff]  ;;  %v3104_v33 = vld [vmem:[%s10989_s9 + $0xd60] sm:$0xff]  ;;  %v7522_v3 = vcombine.low %v3105_v35, %v3121_v38 }
 0x452   :  { %v6654_v56 = vcombine.low %v6646_v61, %v6653_v39  ;;  %6454 = vmatpush1.bf16.msra.mxu1 %v7266_v31  ;;  %6414 = vmatprep.subr.bf16.mxu0 %v7233_v32  ;;  %v7586_v31 = vcombine.low %v3169_v2, %v3185_v9  ;;  %v7553_v32 = vcombine.high %v3136_v21, %v3152_v24 }
 0x453   :  { %6455 = vmatprep.subr.bf16.mxu1 %v7235_v34  ;;  %v7555_v61 = vcombine.high %v3137_v25, %v3153_v30  ;;  %v3120_v34 = vld [vmem:[%s10989_s9 + $0xde0] sm:$0xff]  ;;  %v7552_v39 = vcombine.low %v3136_v21, %v3152_v24  ;;  %v7554_v14 = vcombine.low %v3137_v25, %v3153_v30 }
 0x454   :  { %6750 = vst [vmem:[%s10994_s11 + $0x10] sm:$0xff] %v6654_v56  ;;  %v7521_v29 = vcombine.high %v3104_v33, %v3120_v34  ;;  %v3072_v56 = vld [vmem:[%s10989_s9 + $0xc60] sm:$0xff]  ;;  %v7520_v40 = vcombine.low %v3104_v33, %v3120_v34 }
 0x455   :  { %6415 = vmatpush1.bf16.msra.mxu0 %v7232_v55  ;;  %v7523_v55 = vcombine.high %v3105_v35, %v3121_v38 }
 0x456   :  { %6456 = vmatpush1.bf16.msra.mxu1 %v7234_v58  ;;  %6416 = vmatprep.subr.bf16.mxu0 %v7201_v59  ;;  %v3088_v58 = vld [vmem:[%s10989_s9 + $0xce0] sm:$0xff]  ;;  %v3073_v59 = vld [vmem:[%s10989_s9 + $0xc68] sm:$0xff] }
 0x457   :  { %6457 = vmatprep.subr.bf16.mxu1 %v7203_v15  ;;  %v3089_v15 = vld [vmem:[%s10989_s9 + $0xce8] sm:$0xff]  ;;  %v7489_v41 = vcombine.high %v3072_v56, %v3088_v58  ;;  %v7488_v51 = vcombine.low %v3072_v56, %v3088_v58  ;;  %v2899_v56 = vld [vmem:[%s10989_s9 + $0x6f8] sm:$0xff] }
 0x458   :  { %v7491_v22 = vcombine.high %v3073_v59, %v3089_v15  ;;  %v7490_v52 = vcombine.low %v3073_v59, %v3089_v15  ;;  %v3247_v59 = vrot.slane %v10531_v60, %v10308_v18  ;;  %v3251_v15 = vrot.slane %v10531_v60, %v10314_v50 }
 0x459   :  { %6417 = vmatpush1.bf16.msra.mxu0 %v7200_v42  ;;  %v3040_v42 = vld [vmem:[%s10989_s9 + $0xb60] sm:$0xff] }
 0x45a   :  { %6458 = vmatpush1.bf16.msra.mxu1 %v7202_v44  ;;  %6418 = vmatprep.subr.bf16.mxu0 %v7169_v46  ;;  %v3056_v44 = vld [vmem:[%s10989_s9 + $0xbe0] sm:$0xff]  ;;  %v3041_v46 = vld [vmem:[%s10989_s9 + $0xb68] sm:$0xff] }
 0x45b   :  { %6459 = vmatprep.subr.bf16.mxu1 %v7171_v48  ;;  %v3057_v48 = vld [vmem:[%s10989_s9 + $0xbe8] sm:$0xff]  ;;  %v7457_v53 = vcombine.high %v3040_v42, %v3056_v44  ;;  %v7456_v57 = vcombine.low %v3040_v42, %v3056_v44  ;;  %v3255_v42 = vrot.slane %v10531_v60, %v10311_v47  ;;  %v3259_v44 = vrot.slane %v10531_v60, %v10317_v23 }
 0x45c   :  { %v7459_v54 = vcombine.high %v3041_v46, %v3057_v48  ;;  %v7458_v62 = vcombine.low %v3041_v46, %v3057_v48  ;;  %v2851_v48 = vld [vmem:[%s10989_s9 + $0x578] sm:$0xff] }
 0x45d   :  { %6419 = vmatpush1.bf16.msra.mxu0 %v7168_v36  ;;  %v3008_v36 = vld [vmem:[%s10989_s9 + $0xa60] sm:$0xff] }
 0x45e   :  { %6460 = vmatpush1.bf16.msra.mxu1 %v7170_v43  ;;  %6420 = vmatprep.subr.bf16.mxu0 %v7137_v37  ;;  %v3024_v43 = vld [vmem:[%s10989_s9 + $0xae0] sm:$0xff]  ;;  %v3009_v37 = vld [vmem:[%s10989_s9 + $0xa68] sm:$0xff] }
 0x45f   :  { %6461 = vmatprep.subr.bf16.mxu1 %v7139_v28  ;;  %v3025_v28 = vld [vmem:[%s10989_s9 + $0xae8] sm:$0xff]  ;;  %v7425_v63 = vcombine.high %v3008_v36, %v3024_v43  ;;  %v7424_v7 = vcombine.low %v3008_v36, %v3024_v43 }
 0x460   :  { %v7427_v0 = vcombine.high %v3009_v37, %v3025_v28  ;;  %v7426_v8 = vcombine.low %v3009_v37, %v3025_v28 }
 0x461   :  { %6421 = vmatpush1.bf16.msra.mxu0 %v7136_v1  ;;  %v2976_v1 = vld [vmem:[%s10989_s9 + $0x960] sm:$0xff] }
 0x462   :  { %6462 = vmatpush1.bf16.msra.mxu1 %v7138_v4  ;;  %6422 = vmatprep.subr.bf16.mxu0 %v7105_v5  ;;  %v2992_v4 = vld [vmem:[%s10989_s9 + $0x9e0] sm:$0xff]  ;;  %v2977_v5 = vld [vmem:[%s10989_s9 + $0x968] sm:$0xff] }
 0x463   :  { %6463 = vmatprep.subr.bf16.mxu1 %v7107_v6  ;;  %v2993_v6 = vld [vmem:[%s10989_s9 + $0x9e8] sm:$0xff]  ;;  %v7393_v2 = vcombine.high %v2976_v1, %v2992_v4  ;;  %v7392_v21 = vcombine.low %v2976_v1, %v2992_v4 }
 0x464   :  { %v7395_v9 = vcombine.high %v2977_v5, %v2993_v6  ;;  %v7394_v24 = vcombine.low %v2977_v5, %v2993_v6  ;;  %v2835_v5 = vld [vmem:[%s10989_s9 + $0x4f8] sm:$0xff] }
 0x465   :  { %6423 = vmatpush1.bf16.msra.mxu0 %v7104_v10  ;;  %v2944_v10 = vld [vmem:[%s10989_s9 + $0x860] sm:$0xff] }
 0x466   :  { %6464 = vmatpush1.bf16.msra.mxu1 %v7106_v11  ;;  %6424 = vmatprep.subr.bf16.mxu0 %v7585_v12  ;;  %v2960_v11 = vld [vmem:[%s10989_s9 + $0x8e0] sm:$0xff]  ;;  %v2945_v12 = vld [vmem:[%s10989_s9 + $0x868] sm:$0xff] }
 0x467   :  { %6465 = vmatprep.subr.bf16.mxu1 %v7587_v13  ;;  %v2961_v13 = vld [vmem:[%s10989_s9 + $0x8e8] sm:$0xff]  ;;  %v7361_v25 = vcombine.high %v2944_v10, %v2960_v11  ;;  %v7360_v33 = vcombine.low %v2944_v10, %v2960_v11 }
 0x468   :  { %v7363_v30 = vcombine.high %v2945_v12, %v2961_v13  ;;  %v7362_v34 = vcombine.low %v2945_v12, %v2961_v13 }
 0x469   :  { %6425 = vmatpush2.bf16.msra.mxu0 %v7584_v45  ;;  %v2914_v45 = vld [vmem:[%s10989_s9 + $0x770] sm:$0xff] }
 0x46a   :  { %6466 = vmatpush2.bf16.msra.mxu1 %v7586_v31  ;;  %6426 = vmatprep.subr.bf16.mxu0 %v7553_v32  ;;  %v2930_v31 = vld [vmem:[%s10989_s9 + $0x7f0] sm:$0xff]  ;;  %v2915_v32 = vld [vmem:[%s10989_s9 + $0x778] sm:$0xff] }
 0x46b   :  { %6467 = vmatprep.subr.bf16.mxu1 %v7555_v61  ;;  %v2931_v61 = vld [vmem:[%s10989_s9 + $0x7f8] sm:$0xff]  ;;  %v7333_v35 = vcombine.high %v2914_v45, %v2930_v31 }
 0x46c   :  { %v7335_v38 = vcombine.high %v2915_v32, %v2931_v61  ;;  %v7334_v58 = vcombine.low %v2915_v32, %v2931_v61 }
 0x46d   :  { %6427 = vmatpush2.bf16.msra.mxu0 %v7552_v39  ;;  %v2882_v39 = vld [vmem:[%s10989_s9 + $0x670] sm:$0xff] }
 0x46e   :  { %6468 = vmatpush2.bf16.msra.mxu1 %v7554_v14  ;;  %6428 = vmatprep.subr.bf16.mxu0 %v7521_v29  ;;  %v2898_v14 = vld [vmem:[%s10989_s9 + $0x6f0] sm:$0xff]  ;;  %v7332_v29 = vcombine.low %v2914_v45, %v2930_v31  ;;  %v2787_v45 = vld [vmem:[%s10989_s9 + $0x378] sm:$0xff] }
 0x46f   :  { %6469 = vmatprep.subr.bf16.mxu1 %v7523_v55  ;;  %v2883_v55 = vld [vmem:[%s10989_s9 + $0x678] sm:$0xff] }
 0x470   :  { %v7303_v46 = vcombine.high %v2883_v55, %v2899_v56  ;;  %v7302_v36 = vcombine.low %v2883_v55, %v2899_v56  ;;  %v2803_v31 = vld [vmem:[%s10989_s9 + $0x3f8] sm:$0xff] }
 0x471   :  { %6429 = vmatpush2.bf16.msra.mxu0 %v7520_v40  ;;  %v7301_v40 = vcombine.high %v2882_v39, %v2898_v14  ;;  %v7206_v56 = vcombine.low %v2787_v45, %v2803_v31 }
 0x472   :  { %6470 = vmatpush2.bf16.msra.mxu1 %v7522_v3  ;;  %6430 = vmatprep.subr.bf16.mxu0 %v7489_v41  ;;  %v2850_v3 = vld [vmem:[%s10989_s9 + $0x570] sm:$0xff] }
 0x473   :  { %6471 = vmatprep.subr.bf16.mxu1 %v7491_v22  ;;  %v2866_v41 = vld [vmem:[%s10989_s9 + $0x5f0] sm:$0xff] }
 0x474   :  { %v7269_v60 = vcombine.high %v2850_v3, %v2866_v41 }
 0x475   :  { %6431 = vmatpush2.bf16.msra.mxu0 %v7488_v51  ;;  %v2867_v51 = vld [vmem:[%s10989_s9 + $0x5f8] sm:$0xff] }
 0x476   :  { %6472 = vmatpush2.bf16.msra.mxu1 %v7490_v52  ;;  %6432 = vmatprep.subr.bf16.mxu0 %v7457_v53  ;;  %v7300_v53 = vcombine.low %v2882_v39, %v2898_v14  ;;  %v7270_v10 = vcombine.low %v2851_v48, %v2867_v51  ;;  %v2770_v39 = vld [vmem:[%s10989_s9 + $0x2f0] sm:$0xff]  ;;  %v2755_v14 = vld [vmem:[%s10989_s9 + $0x278] sm:$0xff] }
 0x477   :  { %6473 = vmatprep.subr.bf16.mxu1 %v7459_v54 }
 0x479   :  { %6433 = vmatpush2.bf16.msra.mxu0 %v7456_v57  ;;  %v7271_v57 = vcombine.high %v2851_v48, %v2867_v51  ;;  %v2690_v48 = vld [vmem:[%s10989_s9 + $0x70] sm:$0xff] }
 0x47a   :  { %6474 = vmatpush2.bf16.msra.mxu1 %v7458_v62  ;;  %6434 = vmatprep.subr.bf16.mxu0 %v7425_v63  ;;  %v2818_v62 = vld [vmem:[%s10989_s9 + $0x470] sm:$0xff] }
 0x47b   :  { %6475 = vmatprep.subr.bf16.mxu1 %v7427_v0  ;;  %v2834_v63 = vld [vmem:[%s10989_s9 + $0x4f0] sm:$0xff] }
 0x47c   :  { %v7237_v11 = vcombine.high %v2818_v62, %v2834_v63  ;;  %v7236_v32 = vcombine.low %v2818_v62, %v2834_v63  ;;  %v2706_v51 = vld [vmem:[%s10989_s9 + $0xf0] sm:$0xff]  ;;  %v3187_v62 = vld [vmem:[%s10989_s9 + $0xff8] sm:$0xff] }
 0x47d   :  { %6435 = vmatpush2.bf16.msra.mxu0 %v7424_v7  ;;  %v7108_v63 = vcombine.low %v2690_v48, %v2706_v51 }
 0x47e   :  { %6476 = vmatpush2.bf16.msra.mxu1 %v7426_v8  ;;  %6436 = vmatprep.subr.bf16.mxu0 %v7393_v2  ;;  %v7268_v8 = vcombine.low %v2850_v3, %v2866_v41  ;;  %v2723_v3 = vld [vmem:[%s10989_s9 + $0x178] sm:$0xff] }
 0x47f   :  { %6477 = vmatprep.subr.bf16.mxu1 %v7395_v9  ;;  %v2739_v41 = vld [vmem:[%s10989_s9 + $0x1f8] sm:$0xff] }
 0x481   :  { %6437 = vmatpush2.bf16.msra.mxu0 %v7392_v21 }
 0x482   :  { %6478 = vmatpush2.bf16.msra.mxu1 %v7394_v24  ;;  %6438 = vmatprep.subr.bf16.mxu0 %v7361_v25  ;;  %v2786_v24 = vld [vmem:[%s10989_s9 + $0x370] sm:$0xff] }
 0x483   :  { %6479 = vmatprep.subr.bf16.mxu1 %v7363_v30  ;;  %v2802_v25 = vld [vmem:[%s10989_s9 + $0x3f0] sm:$0xff] }
 0x484   :  { %v7204_v55 = vcombine.low %v2786_v24, %v2802_v25 }
 0x485   :  { %6439 = vmatpush2.bf16.msra.mxu0 %v7360_v33 }
 0x486   :  { %6480 = vmatpush2.bf16.msra.mxu1 %v7362_v34  ;;  %6490 = vmatprep.subr.bf16.mxu0 %v7333_v35  ;;  %v7205_v34 = vcombine.high %v2786_v24, %v2802_v25  ;;  %v7207_v35 = vcombine.high %v2787_v45, %v2803_v31  ;;  %v3074_v31 = vld [vmem:[%s10989_s9 + $0xc70] sm:$0xff] }
 0x487   :  { %6531 = vmatprep.subr.bf16.mxu1 %v7335_v38  ;;  %v2754_v38 = vld [vmem:[%s10989_s9 + $0x270] sm:$0xff] }
 0x488   :  { %v6196_v22 = vpop.f32.mrf.mxu0  ;;  %6441 = vmatmul.mubr.bf16.vlgmr.msra.gmra.mxu0 %v9507_v27 }
 0x489   :  { %v6237_v52 = vpop.f32.mrf.mxu1  ;;  %6482 = vmatmul.mubr.bf16.vlgmr.msra.gmra.mxu1 %v9507_v27  ;;  %6491 = vmatpush1.bf16.msra.mxu0 %v7332_v29  ;;  %v6197_v43 = vadd.f32 %v6196_v22, %v3247_v59  ;;  %v2771_v29 = vld [vmem:[%s10989_s9 + $0x2f8] sm:$0xff]  ;;  %v7172_v22 = vcombine.low %v2754_v38, %v2770_v39 }
 0x48a   :  { %6522 = vmatprep.mubr.bf16.mxu0 %v9505_v26  ;;  %6532 = vmatpush1.bf16.msra.mxu1 %v7334_v58  ;;  %v6198_v54 = vpop.f32.mrf.mxu0  ;;  %v6238_v0 = vadd.f32 %v6237_v52, %v3255_v42  ;;  %v7173_v58 = vcombine.high %v2754_v38, %v2770_v39  ;;  %v7175_v59 = vcombine.high %v2755_v14, %v2771_v29  ;;  %v2691_v52 = vld [vmem:[%s10989_s9 + $0x78] sm:$0xff] }
 0x48b   :  { %6563 = vmatprep.mubr.bf16.mxu1 %v9505_v26  ;;  %v6199_v37 = vadd.f32 %v6198_v54, %v3251_v15  ;;  %v6239_v28 = vpop.f32.mrf.mxu1  ;;  %6492 = vmatprep.subr.bf16.mxu0 %v7301_v40  ;;  %v2819_v26 = vld [vmem:[%s10989_s9 + $0x478] sm:$0xff]  ;;  %v2722_v15 = vld [vmem:[%s10989_s9 + $0x170] sm:$0xff]  ;;  %v7174_v42 = vcombine.low %v2755_v14, %v2771_v29 }
 0x48c   :  { %v6240_v1 = vadd.f32 %v6239_v28, %v3259_v44  ;;  %v6200_v4 = vpop.f32.mrf.mxu0  ;;  %6533 = vmatprep.subr.bf16.mxu1 %v7303_v46  ;;  %v7239_v21 = vcombine.high %v2819_v26, %v2835_v5  ;;  %v7238_v33 = vcombine.low %v2819_v26, %v2835_v5  ;;  %v2738_v40 = vld [vmem:[%s10989_s9 + $0x1f0] sm:$0xff]  ;;  %v7143_v46 = vcombine.high %v2723_v3, %v2739_v41 }
 0x48d   :  { %v6655_v6 = vcombine.low %v6197_v43, %v6199_v37  ;;  %v6241_v7 = vpop.f32.mrf.mxu1  ;;  %6493 = vmatpush1.bf16.msra.mxu0 %v7300_v53  ;;  %v7141_v44 = vcombine.high %v2722_v15, %v2738_v40  ;;  %v2707_v53 = vld [vmem:[%s10989_s9 + $0xf8] sm:$0xff]  ;;  %v7140_v54 = vcombine.low %v2722_v15, %v2738_v40  ;;  %v3170_v37 = vld [vmem:[%s10989_s9 + $0xf70] sm:$0xff] }
 0x48e   :  { %v6656_v2 = vcombine.low %v6238_v0, %v6240_v1  ;;  %6534 = vmatpush1.bf16.msra.mxu1 %v7302_v36  ;;  %v6201_v9 = vpop.f32.mrf.mxu0  ;;  %6494 = vmatprep.subr.bf16.mxu0 %v7269_v60  ;;  %v7142_v36 = vcombine.low %v2723_v3, %v2739_v41  ;;  %v7109_v60 = vcombine.high %v2690_v48, %v2706_v51  ;;  %v3186_v28 = vld [vmem:[%s10989_s9 + $0xff0] sm:$0xff]  ;;  %v3155_v7 = vld [vmem:[%s10989_s9 + $0xef8] sm:$0xff] }
 0x48f   :  { %v6663_v12 = vrot.slane %v6655_v6, %v8283_v49  ;;  %v6242_v13 = vpop.f32.mrf.mxu1  ;;  %6535 = vmatprep.subr.bf16.mxu1 %v7271_v57  ;;  %v7111_v43 = vcombine.high %v2691_v52, %v2707_v53  ;;  %v3171_v57 = vld [vmem:[%s10989_s9 + $0xf78] sm:$0xff]  ;;  %v7110_v0 = vcombine.low %v2691_v52, %v2707_v53  ;;  %v7589_v1 = vcombine.high %v3170_v37, %v3186_v28  ;;  %v3138_v26 = vld [vmem:[%s10989_s9 + $0xe70] sm:$0xff] }
 0x490   :  { %v6670_v30 = vrot.slane %v6656_v2, %v8283_v49  ;;  %v7591_v4 = vcombine.high %v3171_v57, %v3187_v62  ;;  %v3154_v5 = vld [vmem:[%s10989_s9 + $0xef0] sm:$0xff]  ;;  %v3139_v6 = vld [vmem:[%s10989_s9 + $0xe78] sm:$0xff]  ;;  %v7590_v2 = vcombine.low %v3171_v57, %v3187_v62 }
 0x491   :  { %6495 = vmatpush1.bf16.msra.mxu0 %v7268_v8  ;;  %v7588_v8 = vcombine.low %v3170_v37, %v3186_v28  ;;  %v7557_v9 = vcombine.high %v3138_v26, %v3154_v5  ;;  %v3107_v13 = vld [vmem:[%s10989_s9 + $0xd78] sm:$0xff]  ;;  %v7556_v24 = vcombine.low %v3138_v26, %v3154_v5  ;;  %v7558_v25 = vcombine.low %v3139_v6, %v3155_v7  ;;  %v3042_v14 = vld [vmem:[%s10989_s9 + $0xb70] sm:$0xff] }
 0x492   :  { %v6671_v61 = vcombine.low %v6663_v12, %v6670_v30  ;;  %6536 = vmatpush1.bf16.msra.mxu1 %v7270_v10  ;;  %6496 = vmatprep.subr.bf16.mxu0 %v7237_v11  ;;  %v7559_v10 = vcombine.high %v3139_v6, %v3155_v7  ;;  %v3106_v11 = vld [vmem:[%s10989_s9 + $0xd70] sm:$0xff] }
 0x493   :  { %6537 = vmatprep.subr.bf16.mxu1 %v7239_v21  ;;  %v3122_v12 = vld [vmem:[%s10989_s9 + $0xdf0] sm:$0xff]  ;;  %v3123_v21 = vld [vmem:[%s10989_s9 + $0xdf8] sm:$0xff] }
 0x494   :  { %6751 = vst [vmem:[%s10994_s11 + $0x18] sm:$0xff] %v6671_v61  ;;  %v7525_v30 = vcombine.high %v3106_v11, %v3122_v12  ;;  %v7527_v45 = vcombine.high %v3107_v13, %v3123_v21  ;;  %v3075_v61 = vld [vmem:[%s10989_s9 + $0xc78] sm:$0xff]  ;;  %v3058_v29 = vld [vmem:[%s10989_s9 + $0xbf0] sm:$0xff] }
 0x495   :  { %6497 = vmatpush1.bf16.msra.mxu0 %v7236_v32  ;;  %v3090_v32 = vld [vmem:[%s10989_s9 + $0xcf0] sm:$0xff]  ;;  %v7461_v15 = vcombine.high %v3042_v14, %v3058_v29 }
 0x496   :  { %6538 = vmatpush1.bf16.msra.mxu1 %v7238_v33  ;;  %6498 = vmatprep.subr.bf16.mxu0 %v7205_v34  ;;  %v3091_v33 = vld [vmem:[%s10989_s9 + $0xcf8] sm:$0xff]  ;;  %v7524_v34 = vcombine.low %v3106_v11, %v3122_v12  ;;  %v7493_v38 = vcombine.high %v3074_v31, %v3090_v32  ;;  %v3010_v3 = vld [vmem:[%s10989_s9 + $0xa70] sm:$0xff] }
 0x497   :  { %6539 = vmatprep.subr.bf16.mxu1 %v7207_v35  ;;  %v7526_v35 = vcombine.low %v3107_v13, %v3123_v21  ;;  %v7495_v39 = vcombine.high %v3075_v61, %v3091_v33  ;;  %v3026_v41 = vld [vmem:[%s10989_s9 + $0xaf0] sm:$0xff] }
 0x498   :  { %v7429_v48 = vcombine.high %v3010_v3, %v3026_v41  ;;  %v2978_v52 = vld [vmem:[%s10989_s9 + $0x970] sm:$0xff] }
 0x499   :  { %6499 = vmatpush1.bf16.msra.mxu0 %v7204_v55  ;;  %v3043_v55 = vld [vmem:[%s10989_s9 + $0xb78] sm:$0xff]  ;;  %v2994_v53 = vld [vmem:[%s10989_s9 + $0x9f0] sm:$0xff] }
 0x49a   :  { %6540 = vmatpush1.bf16.msra.mxu1 %v7206_v56  ;;  %6500 = vmatprep.subr.bf16.mxu0 %v7173_v58  ;;  %v3059_v56 = vld [vmem:[%s10989_s9 + $0xbf8] sm:$0xff]  ;;  %v7492_v58 = vcombine.low %v3074_v31, %v3090_v32  ;;  %v7397_v37 = vcombine.high %v2978_v52, %v2994_v53  ;;  %v2946_v57 = vld [vmem:[%s10989_s9 + $0x870] sm:$0xff] }
 0x49b   :  { %6541 = vmatprep.subr.bf16.mxu1 %v7175_v59  ;;  %v7494_v59 = vcombine.low %v3075_v61, %v3091_v33  ;;  %v7463_v40 = vcombine.high %v3043_v55, %v3059_v56  ;;  %v2962_v62 = vld [vmem:[%s10989_s9 + $0x8f0] sm:$0xff] }
 0x49c   :  { %v7365_v26 = vcombine.high %v2946_v57, %v2962_v62  ;;  %v7364_v6 = vcombine.low %v2946_v57, %v2962_v62 }
 0x49d   :  { %6501 = vmatpush1.bf16.msra.mxu0 %v7172_v22  ;;  %v3011_v22 = vld [vmem:[%s10989_s9 + $0xa78] sm:$0xff] }
 0x49e   :  { %6542 = vmatpush1.bf16.msra.mxu1 %v7174_v42  ;;  %6502 = vmatprep.subr.bf16.mxu0 %v7141_v44  ;;  %v3027_v42 = vld [vmem:[%s10989_s9 + $0xaf8] sm:$0xff]  ;;  %v7460_v44 = vcombine.low %v3042_v14, %v3058_v29 }
 0x49f   :  { %6543 = vmatprep.subr.bf16.mxu1 %v7143_v46  ;;  %v7462_v46 = vcombine.low %v3043_v55, %v3059_v56  ;;  %v7431_v51 = vcombine.high %v3011_v22, %v3027_v42 }
 0x4a1   :  { %6503 = vmatpush1.bf16.msra.mxu0 %v7140_v54  ;;  %v2979_v54 = vld [vmem:[%s10989_s9 + $0x978] sm:$0xff] }
 0x4a2   :  { %6544 = vmatpush1.bf16.msra.mxu1 %v7142_v36  ;;  %6504 = vmatprep.subr.bf16.mxu0 %v7109_v60  ;;  %v2995_v36 = vld [vmem:[%s10989_s9 + $0x9f8] sm:$0xff]  ;;  %v7428_v60 = vcombine.low %v3010_v3, %v3026_v41 }
 0x4a3   :  { %6545 = vmatprep.subr.bf16.mxu1 %v7111_v43  ;;  %v7430_v43 = vcombine.low %v3011_v22, %v3027_v42  ;;  %v7399_v28 = vcombine.high %v2979_v54, %v2995_v36 }
 0x4a5   :  { %6505 = vmatpush1.bf16.msra.mxu0 %v7108_v63  ;;  %v2947_v63 = vld [vmem:[%s10989_s9 + $0x878] sm:$0xff] }
 0x4a6   :  { %6546 = vmatpush1.bf16.msra.mxu1 %v7110_v0  ;;  %6506 = vmatprep.subr.bf16.mxu0 %v7589_v1  ;;  %v2963_v0 = vld [vmem:[%s10989_s9 + $0x8f8] sm:$0xff]  ;;  %v7396_v1 = vcombine.low %v2978_v52, %v2994_v53 }
 0x4a7   :  { %6547 = vmatprep.subr.bf16.mxu1 %v7591_v4  ;;  %v7398_v4 = vcombine.low %v2979_v54, %v2995_v36  ;;  %v7367_v5 = vcombine.high %v2947_v63, %v2963_v0  ;;  %v7366_v7 = vcombine.low %v2947_v63, %v2963_v0 }
 0x4a9   :  { %6507 = vmatpush2.bf16.msra.mxu0 %v7588_v8  ;;  %v3190_v8 = vld [vmem:[%s10993_s10 + $0x10] sm:$0xff] }
 0x4aa   :  { %6548 = vmatpush2.bf16.msra.mxu1 %v7590_v2  ;;  %6508 = vmatprep.subr.bf16.mxu0 %v7557_v9  ;;  %v3263_v2 = vrot.slane %v3190_v8, %v9071_v17  ;;  %v3267_v9 = vrot.slane %v3190_v8, %v9079_v19  ;;  %v3271_v11 = vrot.slane %v3190_v8, %v9227_v16 }
 0x4ab   :  { %6549 = vmatprep.subr.bf16.mxu1 %v7559_v10  ;;  %v3275_v12 = vrot.slane %v3190_v8, %v9230_v20  ;;  %v3283_v55 = vrot.slane %v3190_v8, %v10314_v50 }
 0x4ad   :  { %6509 = vmatpush2.bf16.msra.mxu0 %v7556_v24 }
 0x4ae   :  { %6550 = vmatpush2.bf16.msra.mxu1 %v7558_v25  ;;  %6510 = vmatprep.subr.bf16.mxu0 %v7525_v30 }
 0x4af   :  { %6551 = vmatprep.subr.bf16.mxu1 %v7527_v45 }
 0x4b1   :  { %6511 = vmatpush2.bf16.msra.mxu0 %v7524_v34 }
 0x4b2   :  { %6552 = vmatpush2.bf16.msra.mxu1 %v7526_v35  ;;  %6512 = vmatprep.subr.bf16.mxu0 %v7493_v38 }
 0x4b3   :  { %6553 = vmatprep.subr.bf16.mxu1 %v7495_v39 }
 0x4b5   :  { %6513 = vmatpush2.bf16.msra.mxu0 %v7492_v58  ;;  %v3287_v58 = vrot.slane %v3190_v8, %v10311_v47 }
 0x4b6   :  { %6554 = vmatpush2.bf16.msra.mxu1 %v7494_v59  ;;  %6514 = vmatprep.subr.bf16.mxu0 %v7461_v15  ;;  %v3291_v59 = vrot.slane %v3190_v8, %v10317_v23 }
 0x4b7   :  { %6555 = vmatprep.subr.bf16.mxu1 %v7463_v40 }
 0x4b9   :  { %6515 = vmatpush2.bf16.msra.mxu0 %v7460_v44 }
 0x4ba   :  { %6556 = vmatpush2.bf16.msra.mxu1 %v7462_v46  ;;  %6516 = vmatprep.subr.bf16.mxu0 %v7429_v48 }
 0x4bb   :  { %6557 = vmatprep.subr.bf16.mxu1 %v7431_v51 }
 0x4bd   :  { %6517 = vmatpush2.bf16.msra.mxu0 %v7428_v60 }
 0x4be   :  { %6558 = vmatpush2.bf16.msra.mxu1 %v7430_v43  ;;  %6518 = vmatprep.subr.bf16.mxu0 %v7397_v37  ;;  %v3191_v37 = vld [vmem:[%s10993_s10 + $0x18] sm:$0xff] }
 0x4bf   :  { %6559 = vmatprep.subr.bf16.mxu1 %v7399_v28  ;;  %v3295_v28 = vrot.slane %v3191_v37, %v9071_v17  ;;  %v3299_v57 = vrot.slane %v3191_v37, %v9079_v19  ;;  %v3303_v63 = vrot.slane %v3191_v37, %v9227_v16  ;;  %v3307_v0 = vrot.slane %v3191_v37, %v9230_v20 }
 0x4c0   :  { %v3311_v20 = vrot.slane %v3191_v37, %v10308_v18 }
 0x4c1   :  { %6519 = vmatpush2.bf16.msra.mxu0 %v7396_v1 }
 0x4c2   :  { %6560 = vmatpush2.bf16.msra.mxu1 %v7398_v4  ;;  %6520 = vmatprep.subr.bf16.mxu0 %v7365_v26 }
 0x4c3   :  { %6561 = vmatprep.subr.bf16.mxu1 %v7367_v5 }
 0x4c5   :  { %6521 = vmatpush2.bf16.msra.mxu0 %v7364_v6 }
 0x4c6   :  { %6562 = vmatpush2.bf16.msra.mxu1 %v7366_v7 }
 0x4c8   :  { %v6278_v10 = vpop.f32.mrf.mxu0  ;;  %6523 = vmatmul.mubr.bf16.vlgmr.msra.gmra.mxu0 %v9507_v27 }
 0x4c9   :  { %v6319_v13 = vpop.f32.mrf.mxu1  ;;  %6564 = vmatmul.mubr.bf16.vlgmr.msra.gmra.mxu1 %v9507_v27  ;;  %v6279_v24 = vadd.f32 %v6278_v10, %v3263_v2  ;;  %v3279_v27 = vrot.slane %v3190_v8, %v10308_v18 }
 0x4ca   :  { %v6280_v21 = vpop.f32.mrf.mxu0  ;;  %v6320_v45 = vadd.f32 %v6319_v13, %v3271_v11 }
 0x4cb   :  { %v6281_v25 = vadd.f32 %v6280_v21, %v3267_v9  ;;  %v6321_v30 = vpop.f32.mrf.mxu1  ;;  %v3315_v21 = vrot.slane %v3191_v37, %v10314_v50 }
 0x4cc   :  { %v6322_v31 = vadd.f32 %v6321_v30, %v3275_v12  ;;  %v6282_v32 = vpop.f32.mrf.mxu0  ;;  %v3323_v30 = vrot.slane %v3191_v37, %v10317_v23 }
 0x4cd   :  { %v6672_v61 = vcombine.low %v6279_v24, %v6281_v25  ;;  %v6323_v33 = vpop.f32.mrf.mxu1  ;;  %v3319_v25 = vrot.slane %v3191_v37, %v10311_v47 }
 0x4ce   :  { %v6673_v34 = vcombine.low %v6320_v45, %v6322_v31  ;;  %v6283_v35 = vpop.f32.mrf.mxu0 }
 0x4cf   :  { %v6680_v38 = vrot.slane %v6672_v61, %v8283_v49  ;;  %v6324_v39 = vpop.f32.mrf.mxu1 }
 0x4d0   :  { %v6687_v14 = vrot.slane %v6673_v34, %v8283_v49 }
 0x4d2   :  { %v6688_v29 = vcombine.low %v6680_v38, %v6687_v14 }
 0x4d4   :  { %6752 = vst [vmem:[%s10994_s11 + $0x20] sm:$0xff] %v6688_v29 }
 0x508   :  { %v6360_v56 = vpop.f32.mrf.mxu0 }
 0x509   :  { %v6401_v15 = vpop.f32.mrf.mxu1  ;;  %v6361_v3 = vadd.f32 %v6360_v56, %v3279_v27 }
 0x50a   :  { %v6362_v40 = vpop.f32.mrf.mxu0  ;;  %v6402_v42 = vadd.f32 %v6401_v15, %v3287_v58 }
 0x50b   :  { %v6363_v41 = vadd.f32 %v6362_v40, %v3283_v55  ;;  %v6403_v22 = vpop.f32.mrf.mxu1 }
 0x50c   :  { %v6404_v44 = vadd.f32 %v6403_v22, %v3291_v59  ;;  %v6364_v46 = vpop.f32.mrf.mxu0 }
 0x50d   :  { %v6689_v48 = vcombine.low %v6361_v3, %v6363_v41  ;;  %v6405_v51 = vpop.f32.mrf.mxu1 }
 0x50e   :  { %v6690_v52 = vcombine.low %v6402_v42, %v6404_v44  ;;  %v6365_v53 = vpop.f32.mrf.mxu0 }
 0x50f   :  { %v6697_v54 = vrot.slane %v6689_v48, %v8283_v49  ;;  %v6406_v36 = vpop.f32.mrf.mxu1 }
 0x510   :  { %v6704_v60 = vrot.slane %v6690_v52, %v8283_v49 }
 0x512   :  { %v6705_v43 = vcombine.low %v6697_v54, %v6704_v60 }
 0x514   :  { %6753 = vst [vmem:[%s10994_s11 + $0x28] sm:$0xff] %v6705_v43 }
 0x548   :  { %v6442_v62 = vpop.f32.mrf.mxu0 }
 0x549   :  { %v6483_v1 = vpop.f32.mrf.mxu1  ;;  %v6443_v26 = vadd.f32 %v6442_v62, %v3295_v28 }
 0x54a   :  { %v6444_v4 = vpop.f32.mrf.mxu0  ;;  %v6484_v7 = vadd.f32 %v6483_v1, %v3303_v63 }
 0x54b   :  { %v6445_v5 = vadd.f32 %v6444_v4, %v3299_v57  ;;  %v6485_v6 = vpop.f32.mrf.mxu1 }
 0x54c   :  { %v6486_v8 = vadd.f32 %v6485_v6, %v3307_v0  ;;  %v6446_v2 = vpop.f32.mrf.mxu0 }
 0x54d   :  { %v6706_v9 = vcombine.low %v6443_v26, %v6445_v5  ;;  %v6487_v10 = vpop.f32.mrf.mxu1 }
 0x54e   :  { %v6707_v11 = vcombine.low %v6484_v7, %v6486_v8  ;;  %v6447_v12 = vpop.f32.mrf.mxu0 }
 0x54f   :  { %v6714_v17 = vrot.slane %v6706_v9, %v8283_v49  ;;  %v6488_v19 = vpop.f32.mrf.mxu1 }
 0x550   :  { %v6721_v13 = vrot.slane %v6707_v11, %v8283_v49 }
 0x552   :  { %v6722_v16 = vcombine.low %v6714_v17, %v6721_v13 }
 0x554   :  { %6754 = vst [vmem:[%s10994_s11 + $0x30] sm:$0xff] %v6722_v16 }
 0x588   :  { %v6524_v24 = vpop.f32.mrf.mxu0 }
 0x589   :  { %v6565_v45 = vpop.f32.mrf.mxu1  ;;  %v6525_v32 = vadd.f32 %v6524_v24, %v3311_v20 }
 0x58a   :  { %v6526_v31 = vpop.f32.mrf.mxu0  ;;  %v6566_v34 = vadd.f32 %v6565_v45, %v3319_v25 }
 0x58b   :  { %v6527_v61 = vadd.f32 %v6526_v31, %v3315_v21  ;;  %v6567_v33 = vpop.f32.mrf.mxu1 }
 0x58c   :  { %v6568_v35 = vadd.f32 %v6567_v33, %v3323_v30  ;;  %v6528_v38 = vpop.f32.mrf.mxu0 }
 0x58d   :  { %v6723_v39 = vcombine.low %v6525_v32, %v6527_v61  ;;  %v6569_v14 = vpop.f32.mrf.mxu1 }
 0x58e   :  { %v6724_v29 = vcombine.low %v6566_v34, %v6568_v35  ;;  %v6529_v27 = vpop.f32.mrf.mxu0 }
 0x58f   :  { %v6731_v18 = vrot.slane %v6723_v39, %v8283_v49  ;;  %v6570_v50 = vpop.f32.mrf.mxu1 }
 0x590   :  { %v6738_v55 = vrot.slane %v6724_v29, %v8283_v49 }
 0x592   :  { %v6739_v47 = vcombine.low %v6731_v18, %v6738_v55 }
 0x594   :  { %6755 = vst [vmem:[%s10994_s11 + $0x38] sm:$0xff] %v6739_v47 }

</bundles_post_ra>
